<compile_context>
chip_gen: v6e
topology: v6e:2x2x1
jax: 0.10.0
libtpu: 0.0.40
codegen_flags: <defaults>
</compile_context>

<pallas_src>
import jax
import jax.numpy as jnp
from jax.experimental import pallas as pl
from jax.experimental.pallas import tpu as pltpu

# Skeleton.reduced_dim is not provided in the snippet; the original project
# uses 13 joints x 2 coords = 26. Fixed deterministically here.
SKELETON_REDUCED_DIM = 26
HIDDEN = 16 * 16 * 3        # 768
OUT = 64 * 64 * 3           # 12288
TN = 3072                   # output tile along the 12288-wide feature axis
N_TILES = OUT // TN         # 4 (even -> balanced across v7x's 2 TensorCores)


def _gen_kernel(x_ref, w1_ref, b1_ref, w2_ref, b2_ref, o_ref):
    # Layer 1 + ReLU (tiny: B x 26 x 768), full f32. Recomputed per output
    # tile; this is megacore-safe and hidden under the W2 HBM stream.
    h = jnp.dot(x_ref[...], w1_ref[...], preferred_element_type=jnp.float32)
    h = jnp.maximum(h + b1_ref[...], 0.0)
    # Layer 2 on the current contiguous bf16 W2 tile, f32 accumulation,
    # f32 bias add, then sigmoid.
    y = jnp.dot(h.astype(jnp.bfloat16), w2_ref[...],
                preferred_element_type=jnp.float32) + b2_ref[...]
    o_ref[...] = jax.nn.sigmoid(y).astype(o_ref.dtype)


def tile_w2(w2):
    """One-time layout + dtype prep:
        (HIDDEN, OUT) f32 -> tile-major (N_TILES, HIDDEN, TN) bf16.

    Each grid step then DMAs one fully contiguous ~4.7 MB slab, and the
    streamed bytes (the kernel's only real cost at B=2) are halved vs f32.
    In a real model this is done once at parameter-init and amortized."""
    return jnp.transpose(
        w2.reshape(HIDDEN, N_TILES, TN), (1, 0, 2)).astype(jnp.bfloat16)


def gen_nn_ske_to_image(z, w1, b1, w2_tiled, b2):
    """z: (B, SKELETON_REDUCED_DIM) f32, w2_tiled: (N_TILES, HIDDEN, TN) bf16
    -> (B, 3, 64, 64) f32."""
    B, D = z.shape
    assert D == SKELETON_REDUCED_DIM
    assert w2_tiled.shape == (N_TILES, HIDDEN, TN)
    assert w2_tiled.dtype == jnp.bfloat16

    w2_bytes = N_TILES * HIDDEN * TN * 2
    small_bytes = (B * D + D * HIDDEN + HIDDEN + OUT + B * OUT) * 4
    cost = pl.CostEstimate(
        flops=2 * B * HIDDEN * OUT + 2 * B * D * HIDDEN,
        transcendentals=B * OUT,
        bytes_accessed=w2_bytes + small_bytes,
    )

    flat = pl.pallas_call(
        _gen_kernel,
        out_shape=jax.ShapeDtypeStruct((B, OUT), jnp.float32),
        grid_spec=pltpu.PrefetchScalarGridSpec(
            num_scalar_prefetch=0,
            grid=(N_TILES,),
            in_specs=[
                pl.BlockSpec((B, D), lambda j: (0, 0)),           # z (full)
                pl.BlockSpec((D, HIDDEN), lambda j: (0, 0)),      # W1 (full)
                pl.BlockSpec((1, HIDDEN), lambda j: (0, 0)),      # b1 (full)
                # W2 tile: leading dim squeezed -> kernel sees (HIDDEN, TN),
                # each block is one contiguous bf16 HBM slab. Default 2-deep
                # pipelining kept (HBM-bound; deeper buffers only waste VMEM).
                pl.BlockSpec((None, HIDDEN, TN), lambda j: (j, 0, 0)),
                pl.BlockSpec((1, TN), lambda j: (0, j)),          # b2 tile
            ],
            out_specs=pl.BlockSpec((B, TN), lambda j: (0, j)),
        ),
        compiler_params=pltpu.CompilerParams(
            dimension_semantics=("parallel",),
            vmem_limit_bytes=32 * 1024 * 1024,
        ),
        cost_estimate=cost,
    )(z, w1, b1, w2_tiled, b2)

    # Equivalent of torch's .unsqueeze(-1).unsqueeze(-1).view(-1, 3, 64, 64)
    return flat.reshape(B, 3, 64, 64)


def _init_linear(key, fan_in, fan_out):
    """PyTorch nn.Linear default init: U(-1/sqrt(fan_in), 1/sqrt(fan_in)).

    Weight returned transposed as (fan_in, fan_out) for the x @ W convention."""
    kw, kb = jax.random.split(key)
    bound = 1.0 / jnp.sqrt(float(fan_in))
    w = jax.random.uniform(kw, (fan_in, fan_out), jnp.float32, -bound, bound)
    b = jax.random.uniform(kb, (1, fan_out), jnp.float32, -bound, bound)
    return w, b


def _reference(z, w1, b1, w2, b2):
    h = jnp.maximum(z @ w1 + b1, 0.0)
    y = jax.nn.sigmoid(h @ w2 + b2)
    return y.reshape(z.shape[0], 3, 64, 64)


if __name__ == "__main__":
    key = jax.random.PRNGKey(0)
    k_z, k_l1, k_l2 = jax.random.split(key, 3)

    B = 2
    z = jax.random.normal(k_z, (B, SKELETON_REDUCED_DIM), jnp.float32)
    w1, b1 = _init_linear(k_l1, SKELETON_REDUCED_DIM, HIDDEN)
    w2, b2 = _init_linear(k_l2, HIDDEN, OUT)

    # One-time tile-major + bf16 weight prep (amortized across calls).
    w2_tiled = jax.block_until_ready(tile_w2(w2))

    img = gen_nn_ske_to_image(z, w1, b1, w2_tiled, b2)
    img = jax.block_until_ready(img)

    ref = _reference(z, w1, b1, w2, b2)
    assert img.shape == (B, 3, 64, 64), img.shape
    # W2 is streamed in bf16 (f32 accumulation), so allow ~1e-2 absolute
    # tolerance on the post-sigmoid output vs the full-f32 reference.
    err = float(jnp.max(jnp.abs(img - ref)))
    assert err < 1e-2, err

    print("KERNEL_OK")
</pallas_src>

<mosaic_0001>
module attributes {stable_mosaic.version = 11 : i64} {
  func.func @_gen_kernel(%arg0: i32, %arg1: memref<2x26xf32, #tpu.memory_space<vmem>>, %arg2: memref<26x768xf32, #tpu.memory_space<vmem>>, %arg3: memref<1x768xf32, #tpu.memory_space<vmem>>, %arg4: memref<1x768x3072xbf16, #tpu.memory_space<vmem>>, %arg5: memref<1x3072xf32, #tpu.memory_space<vmem>>, %arg6: memref<2x3072xf32, #tpu.memory_space<vmem>>) attributes {dimension_semantics = [#tpu.dimension_semantics<parallel>], iteration_bounds = array<i64: 4>, scalar_prefetch = 0 : i64, scratch_operands = 0 : i64, tpu.core_type = #tpu.core_type<tc>, window_params = [{pipeline_mode = #tpu.pipeline_mode<synchronous>, transform_indices = @transform_0, window_bounds = array<i64: 2, 26>}, {pipeline_mode = #tpu.pipeline_mode<synchronous>, transform_indices = @transform_1, window_bounds = array<i64: 26, 768>}, {pipeline_mode = #tpu.pipeline_mode<synchronous>, transform_indices = @transform_2, window_bounds = array<i64: 1, 768>}, {transform_indices = @transform_3, window_bounds = array<i64: 1, 768, 3072>}, {transform_indices = @transform_4, window_bounds = array<i64: 1, 3072>}, {transform_indices = @transform_5, window_bounds = array<i64: 2, 3072>}]} {
    %c0 = arith.constant 0 : index
    %c0_0 = arith.constant 0 : index
    %0 = vector.load %arg1[%c0, %c0_0] : memref<2x26xf32, #tpu.memory_space<vmem>>, vector<2x26xf32>
    %c0_1 = arith.constant 0 : index
    %c0_2 = arith.constant 0 : index
    %1 = vector.load %arg2[%c0_1, %c0_2] : memref<26x768xf32, #tpu.memory_space<vmem>>, vector<26x768xf32>
    %cst = arith.constant dense<0.000000e+00> : vector<2x768xf32>
    %2 = tpu.matmul %0, %1, %cst {dimension_numbers = #tpu.dot_dimension_numbers<[1], [0], [0], [1], [0, 0, 1, 1], [], []>} : vector<2x26xf32>, vector<26x768xf32>, vector<2x768xf32> -> vector<2x768xf32>
    %c0_3 = arith.constant 0 : index
    %c0_4 = arith.constant 0 : index
    %3 = vector.load %arg3[%c0_3, %c0_4] : memref<1x768xf32, #tpu.memory_space<vmem>>, vector<1x768xf32>
    %4 = vector.broadcast %3 : vector<1x768xf32> to vector<2x768xf32>
    %5 = arith.addf %2, %4 : vector<2x768xf32>
    %cst_5 = arith.constant 0.000000e+00 : f32
    %6 = vector.broadcast %cst_5 : f32 to vector<2x768xf32>
    %7 = arith.maximumf %5, %6 : vector<2x768xf32>
    %8 = arith.truncf %7 : vector<2x768xf32> to vector<2x768xbf16>
    %c0_6 = arith.constant 0 : index
    %c0_7 = arith.constant 0 : index
    %c0_8 = arith.constant 0 : index
    %9 = vector.load %arg4[%c0_6, %c0_7, %c0_8] : memref<1x768x3072xbf16, #tpu.memory_space<vmem>>, vector<1x768x3072xbf16>
    %10 = vector.shape_cast %9 : vector<1x768x3072xbf16> to vector<768x3072xbf16>
    %cst_9 = arith.constant dense<0.000000e+00> : vector<2x3072xf32>
    %11 = tpu.matmul %8, %10, %cst_9 {dimension_numbers = #tpu.dot_dimension_numbers<[1], [0], [0], [1], [0, 0, 1, 1], [], []>} : vector<2x768xbf16>, vector<768x3072xbf16>, vector<2x3072xf32> -> vector<2x3072xf32>
    %c0_10 = arith.constant 0 : index
    %c0_11 = arith.constant 0 : index
    %12 = vector.load %arg5[%c0_10, %c0_11] : memref<1x3072xf32, #tpu.memory_space<vmem>>, vector<1x3072xf32>
    %13 = vector.broadcast %12 : vector<1x3072xf32> to vector<2x3072xf32>
    %14 = arith.addf %11, %13 : vector<2x3072xf32>
    %15 = arith.negf %14 : vector<2x3072xf32>
    %16 = math.exp %15 : vector<2x3072xf32>
    %cst_12 = arith.constant 1.000000e+00 : f32
    %17 = vector.broadcast %cst_12 : f32 to vector<2x3072xf32>
    %18 = arith.addf %17, %16 : vector<2x3072xf32>
    %19 = arith.divf %17, %18 : vector<2x3072xf32>
    %c0_13 = arith.constant 0 : index
    %c0_14 = arith.constant 0 : index
    %20 = vector.load %arg6[%c0_13, %c0_14] : memref<2x3072xf32, #tpu.memory_space<vmem>>, vector<2x3072xf32>
    tpu.vector_store %arg6[%c0_13, %c0_14], %19 {strides = array<i32>} : memref<2x3072xf32, #tpu.memory_space<vmem>>, vector<2x3072xf32>,
    return
  }
  func.func @transform_0(%arg0: i32) -> (i32, i32) {
    %c0_i32 = arith.constant 0 : i32
    %c0_i32_0 = arith.constant 0 : i32
    %c0_i32_1 = arith.constant 0 : i32
    return %c0_i32, %c0_i32_0 : i32, i32
  }
  func.func @transform_1(%arg0: i32) -> (i32, i32) {
    %c0_i32 = arith.constant 0 : i32
    %c0_i32_0 = arith.constant 0 : i32
    %c0_i32_1 = arith.constant 0 : i32
    return %c0_i32, %c0_i32_0 : i32, i32
  }
  func.func @transform_2(%arg0: i32) -> (i32, i32) {
    %c0_i32 = arith.constant 0 : i32
    %c0_i32_0 = arith.constant 0 : i32
    %c0_i32_1 = arith.constant 0 : i32
    return %c0_i32, %c0_i32_0 : i32, i32
  }
  func.func @transform_3(%arg0: i32) -> (i32, i32, i32) {
    %c0_i32 = arith.constant 0 : i32
    %c0_i32_0 = arith.constant 0 : i32
    %c0_i32_1 = arith.constant 0 : i32
    return %arg0, %c0_i32, %c0_i32_0 : i32, i32, i32
  }
  func.func @transform_4(%arg0: i32) -> (i32, i32) {
    %c0_i32 = arith.constant 0 : i32
    %c0_i32_0 = arith.constant 0 : i32
    return %c0_i32, %arg0 : i32, i32
  }
  func.func @transform_5(%arg0: i32) -> (i32, i32) {
    %c0_i32 = arith.constant 0 : i32
    %c0_i32_0 = arith.constant 0 : i32
    return %c0_i32, %arg0 : i32, i32
  }
}

</mosaic_0001>

<bundles_post_ra>
// kernel: tpu_custom_call.1
= control target key start
LH: loop header
LB: loop body
LE: loop exit
PB: predicated region body
PF: predicated region fallthrough
CT: control target
= control target key end

     0   :  { %s12901_s0 = inlined_call_operand.hbm [shape: f32[2,26], index: 0, kind: input, shape index: {}]   ;;  %s12902_s1 = inlined_call_operand.hbm [shape: f32[26,768], index: 1, kind: input, shape index: {}]   ;;  %s12903_s2 = inlined_call_operand.hbm [shape: f32[1,768], index: 2, kind: input, shape index: {}]   ;;  %s12904_s3 = inlined_call_operand.hbm [shape: bf16[4,768,3072], index: 3, kind: input, shape index: {}]   ;;  %s12905_s4 = inlined_call_operand.hbm [shape: f32[1,12288], index: 4, kind: input, shape index: {}]   ;;  %s12906_s5 = inlined_call_operand.hbm [shape: f32[2,12288], index: 5, kind: output, shape index: {}]  }
   0x1   :  { %12913 = sst [smem:[#allocation16_spill]] %s12902_s1 }
   0x2   :  { %10 = vsyncpa [#allocation3], 0 }
   0x3   :  { %11 = vsyncpa [#allocation6], 0 }
   0x4   :  { %12 = vsyncpa [#allocation9], 0 }
   0x5   :  { %14 = vsyncpa [#allocation9 + $0x1], 0 }
   0x6   :  { %15 = vsyncpa [#allocation4], 0 }
   0x7   :  { %17 = vsyncpa [#allocation4 + $0x1], 0  ;;  %s11201_s18 = smov 0   ;;  %s11203_s19 = smov 0  }
   0x8   :  { %s11205_s20 = smov 0   ;;  %s11207_s21 = smov 0  }
   0x9 LB: > { %s11222_s22 = sadd.s32 4294967295, %s11157_s21   ;;  %s9557_s23 = sadd.s32 4294967294, %s11157_s21   ;;  %s11157_s21 = sphi %s11207_s21, %s12935_s21   ;;  %s11153_s20 = sphi %s11205_s20, %s12934_s20   ;;  %s11149_s19 = sphi %s11203_s19, %s12933_s19   ;;  %s11145_s18 = sphi %s11201_s18, %s12932_s18  }
   0xa   : > { %p106_p0 = scmp.ne.s32.totalorder %s11149_s19, %s11145_s18  ;;  %p12908_p1 = scmp.eq.s32.totalorder %s11222_s22, 0 }
   0xb   : > { %p156_p2 = scmp.eq.s32.totalorder %s11222_s22, 3  ;;  %p162_p3 = scmp.eq.s32.totalorder %s9557_s23, 3 }
   0xc   : > { %p11231_p4 = por %p12908_p1, %p106_p0  ;;  %p9558_p5 = scmp.ge.s32.totalorder %s11157_s21, 1 }
   0xd   : > { %p11236_p6 = por %p162_p3, %p106_p0  ;;  %p169_p7 = scmp.lt.s32.totalorder %s11157_s21, 5 }
   0xe   : > { %s12914_s24 = scalar_select %p11231_p4, 1, 0 }
   0xf   : > { %s12915_s25 = scalar_select %p11236_p6, 1, 0 }
  0x10   : > { %p11241_p8 = pnand %p9558_p5, %p169_p7  ;;  %s11159_s27 = smov [#allocation5]  }
  0x11   : > { %s192_s28 = sshll.u32 %s11159_s27, 4  ;;  %s11254_s30 = sadd.s32 1, %s11157_s21   ;;  %s193_s28 = int_to_ptr.vmem [resolvable:$true] %s192_s28 }
  0x12   : > { %s12916_s26 = scalar_select %p11241_p8, 1, 0 }
  0x13   : > { %p10783_p9 = pneg %p11241_p8  ;;  %s93_s6 = sadd.s32 1, %s11153_s20 }
  0x14   : > { %s90_s7 = ssub.s32 %s11157_s21, %s11254_s30  ;;  %s10962_s8 = scalar_lea.vmem %s193_s28, 3072 }
  0x15   : > { %p11249_p10 = pnand %p10783_p9, %p12908_p1  ;;  %p10963_p12 = scmp.ne.s32.totalorder %s193_s28, %s10962_s8 }
  0x16   : > { %p10970_p3 = scmp.lt.s32.totalorder %s193_s28, %s193_s28  ;;  %p10971_p5 = scmp.lt.s32.totalorder %s10962_s8, %s10962_s8 }
  0x17   : > { %p12909_p11 = pneg %p11249_p10 }
  0x18   : > { %p10972_p7 = por %p10971_p5, %p10970_p3 }
  0x19   : > { %p10965_p13 = pnand %p10963_p12, %p12909_p11 }
  0x1b   : > { %p10966_p0 = pneg %p10965_p13 }
  0x1d   : > { %p10973_p9 = pnand %p10972_p7, %p10966_p0 }
  0x1f   : > { %10976 = shalt.err (!%p10973_p9)
}
  0x20   : > { %s11160_s9 = smov 768   ;;  %s11161_s10 = smov 48  }
  0x21   : > { %s12918_s1 = sld [smem:[#allocation16_spill]]  ;;  %p91_p12 = scmp.eq.s32.totalorder %s90_s7, 0 }
  0x22   : > { %p100_p13 = scmp.ne.s32.totalorder %s11153_s20, %s11149_s19  ;;  %p101_p0 = scmp.eq.s32.totalorder %s11157_s21, 0 }
  0x23   : > { %p10807_p3 = scmp.lt.s32.totalorder %s11157_s21, 4  ;;  %s217_s15 = sand.u32 1, %s11157_s21  }
  0x24   : > { %s11274_s13 = scalar_select %p91_p12, %s11153_s20, %s93_s6  }
  0x25   : > { %p102_p5 = por %p101_p0, %p100_p13  ;;  %p11278_p7 = por %p156_p2, %p100_p13 }
  0x26   : > { %s12907_s16 = sand.u32 1, %s11153_s20   ;;  %s10760_s23 = smul.u32 147456, %s11157_s21 }
  0x27   : > { %10789 = dma.hbm_to_vmem [thread:$0]  (!%p11249_p10), %s12918_s1, 3072, %s193_s28, [#allocation6], %s11160_s9, %s11160_s9, %s11161_s10  }
  0x28   : > { %s12919_s14 = scalar_select %p11278_p7, 1, 0 }
  0x29   : > { %s10759_s17 = smul.u32 9216, %s12907_s16  ;;  %p11287_p9 = pnand %p10807_p3, %p102_p5 }
  0x2a   : > { %s11294_s6 = scalar_lea.hbm %s12904_s3, %s10760_s23  ;;  %s11298_s10 = scalar_lea.sflag [#allocation9], %s217_s15 }
  0x2b   : > { %s221_s8 = scalar_lea.vmem [#allocation8], %s10759_s17  ;;  %s10977_s11 = scalar_lea.hbm %s11294_s6, 147456 }
  0x2c   : > { %s228_s9 = sshll.u32 %s221_s8, 4  ;;  %p10978_p2 = scmp.ne.s32.totalorder %s11294_s6, %s10977_s11  ;;  %s11296_s9 = int_to_ptr.vmem [resolvable:$true] %s228_s9 }
  0x2d   : > { %p10979_p12 = pneg %p11287_p9  ;;  %s10982_s28 = scalar_lea.hbm %s12904_s3, 589824 }
  0x2e   : > { %p10983_p3 = scmp.lt.s32.totalorder %s11294_s6, %s12904_s3  ;;  %p10984_p5 = scmp.lt.s32.totalorder %s10982_s28, %s10977_s11 }
  0x2f   : > { %p10980_p13 = pnand %p10979_p12, %p10978_p2 }
  0x30   : > { %p10985_p1 = por %p10984_p5, %p10983_p3 }
  0x31   : > { %p10981_p0 = pneg %p10980_p13 }
  0x33   : > { %p10986_p11 = pnand %p10985_p1, %p10981_p0 }
  0x35   : > { %10989 = shalt.err (!%p10986_p11)
}
  0x36   : > { %s10990_s15 = scalar_lea.vmem %s11296_s9, 147456  ;;  %s11162_s17 = smov [#allocation8]  }
  0x37   : > { %p10991_p6 = scmp.ne.s32.totalorder %s11296_s9, %s10990_s15  ;;  %s10995_s8 = sshll.u32 %s11162_s17, 4  ;;  %s10996_s8 = int_to_ptr.vmem [resolvable:$false] %s10995_s8 }
  0x38   : > { %s10997_s12 = scalar_lea.vmem %s10996_s8, 294912  ;;  %p10998_p7 = scmp.lt.s32.totalorder %s11296_s9, %s10996_s8 }
  0x39   : > { %p10993_p2 = pnand %p10991_p6, %p10979_p12  ;;  %p10999_p4 = scmp.lt.s32.totalorder %s10997_s12, %s10990_s15 }
  0x3b   : > { %p10994_p13 = pneg %p10993_p2  ;;  %p11000_p8 = por %p10999_p4, %p10998_p7 }
  0x3d   : > { %p11001_p3 = pnand %p11000_p8, %p10994_p13 }
  0x3f   : > { %11004 = shalt.err (!%p11001_p3)
}
  0x40   : > { %s11163_s16 = smov 1536   ;;  %s11164_s11 = smov 96  }
  0x41   : > { %10796 = dma.hbm_to_vmem [thread:$0]  (!%p11287_p9), %s11294_s6, 147456, %s11296_s9, %s11298_s10, %s11163_s16, %s11163_s16, %s11164_s11  }
  0x42   : > { %s11165_s23 = smov [#allocation2]   ;;  %s11166_s7 = smov [#allocation7]  }
  0x43   : > { %s182_s28 = sshll.u32 %s11165_s23, 4  ;;  %s206_s17 = sshll.u32 %s11166_s7, 4  ;;  %s183_s28 = int_to_ptr.vmem [resolvable:$true] %s182_s28  ;;  %s207_s17 = int_to_ptr.vmem [resolvable:$true] %s206_s17 }
  0x44   : > { %s11016_s1 = scalar_lea.vmem %s183_s28, 32  ;;  %p12921_p4 = pneg %p11249_p10 }
  0x45   : > { %p11017_p1 = scmp.ne.s32.totalorder %s183_s28, %s11016_s1  ;;  %p11024_p11 = scmp.lt.s32.totalorder %s183_s28, %s183_s28 }
  0x46   : > { %p11025_p7 = scmp.lt.s32.totalorder %s11016_s1, %s11016_s1 }
  0x47   : > { %p11019_p6 = pnand %p11017_p1, %p12921_p4 }
  0x48   : > { %p11026_p0 = por %p11025_p7, %p11024_p11 }
  0x49   : > { %p11020_p8 = pneg %p11019_p6 }
  0x4b   : > { %p11027_p5 = pnand %p11026_p0, %p11020_p8 }
  0x4d   : > { %11030 = shalt.err (!%p11027_p5)
}
  0x4e   : > { %10786 = dma.hbm_to_vmem [thread:$0]  (!%p11249_p10), %s12901_s0, 32, %s183_s28, [#allocation3]  }
  0x4f   : > { %s12922_s9 = sand.u32 1, %s11153_s20   ;;  %s11042_s12 = scalar_lea.vmem %s207_s17, 96 }
  0x50   : > { %s10761_s8 = smul.u32 24, %s12922_s9  ;;  %p11043_p2 = scmp.ne.s32.totalorder %s207_s17, %s11042_s12 }
  0x51   : > { %p12923_p13 = pmov %p12921_p4  ;;  %p11050_p4 = scmp.lt.s32.totalorder %s207_s17, %s207_s17 }
  0x52   : > { %p11051_p6 = scmp.lt.s32.totalorder %s11042_s12, %s11042_s12 }
  0x53   : > { %p11045_p3 = pnand %p11043_p2, %p12923_p13 }
  0x54   : > { %p11052_p8 = por %p11051_p6, %p11050_p4 }
  0x55   : > { %p11046_p1 = pneg %p11045_p3 }
  0x57   : > { %p11053_p11 = pnand %p11052_p8, %p11046_p1 }
  0x59   : > { %11056 = shalt.err (!%p11053_p11)
}
  0x5a   : > { %10792 = dma.hbm_to_vmem [thread:$0]  (!%p11249_p10), %s12903_s2, 96, %s207_s17, [#allocation6]  }
  0x5b   : > { %s10757_s11 = smul.u32 384, %s11157_s21  ;;  %s242_s23 = scalar_lea.vmem [#allocation10], %s10761_s8 }
  0x5c   : > { %s250_s28 = sshll.u32 %s242_s23, 4  ;;  %s11062_s1 = scalar_lea.hbm %s12905_s4, 1536  ;;  %s251_s28 = int_to_ptr.vmem [resolvable:$true] %s250_s28 }
  0x5d   : > { %s248_s6 = scalar_lea.hbm %s12905_s4, %s10757_s11 }
  0x5e   : > { %s11057_s9 = scalar_lea.hbm %s248_s6, 384  ;;  %p11063_p10 = scmp.lt.s32.totalorder %s248_s6, %s12905_s4 }
  0x5f   : > { %p11058_p7 = scmp.ne.s32.totalorder %s248_s6, %s11057_s9  ;;  %p11064_p2 = scmp.lt.s32.totalorder %s11062_s1, %s11057_s9 }
  0x61   : > { %p11060_p0 = pnand %p11058_p7, %p10979_p12  ;;  %p11065_p13 = por %p11064_p2, %p11063_p10 }
  0x63   : > { %p11061_p5 = pneg %p11060_p0 }
  0x65   : > { %p11066_p3 = pnand %p11065_p13, %p11061_p5 }
  0x67   : > { %11069 = shalt.err (!%p11066_p3)
}
  0x68   : > { %s11070_s8 = scalar_lea.vmem %s251_s28, 384  ;;  %s11167_s11 = smov [#allocation10]  }
  0x69   : > { %p11071_p1 = scmp.ne.s32.totalorder %s251_s28, %s11070_s8  ;;  %s11075_s23 = sshll.u32 %s11167_s11, 4  ;;  %s11076_s23 = int_to_ptr.vmem [resolvable:$false] %s11075_s23 }
  0x6a   : > { %s11077_s7 = scalar_lea.vmem %s11076_s23, 768  ;;  %p11078_p8 = scmp.lt.s32.totalorder %s251_s28, %s11076_s23 }
  0x6b   : > { %p11073_p4 = pnand %p11071_p1, %p10979_p12  ;;  %p11079_p11 = scmp.lt.s32.totalorder %s11077_s7, %s11070_s8 }
  0x6d   : > { %p11074_p6 = pneg %p11073_p4  ;;  %p11080_p7 = por %p11079_p11, %p11078_p8 }
  0x6f   : > { %p11081_p0 = pnand %p11080_p7, %p11074_p6 }
  0x71   : > { %11084 = shalt.err (!%p11081_p0)
}
  0x72   : > { %10799 = dma.hbm_to_vmem [thread:$0]  (!%p11287_p9), %s248_s6, 384, %s251_s28, %s11298_s10  }
  0x73   : > { %p12924_p5 = scmp.ne.s32.totalorder %s12916_s26, 0 }
  0x74   : > { %p12925_p10 = scmp.eq.s32.totalorder (!%p12924_p5), %s11222_s22, 0 }
  0x75   : > { %259 = sbr.rel (%p12924_p5) target bundleno = 1681 (0x691), region = 40 }
  0x7a   : > { %11128 = dma.done.wait (%p12925_p10), [#allocation3], 32   ;;  %p12926_p12 = pmov %p12925_p10 }
  0x7b   : > { %p12927_p2 = pmov %p12925_p10 }
  0x7c   : > { %11130 = vsyncadd (%p12926_p12), [#allocation3], 4294967264 }
  0x7d   : > { %11132 = dma.done.wait (%p12927_p2), [#allocation6], 3168   ;;  %p12928_p13 = pmov %p12927_p2 }
  0x7e   : > { %s273_s27 = sand.u32 1, %s11222_s22   ;;  %s11374_s10 = sand.u32 1, %s11149_s19  }
  0x7f   : > { %11134 = vsyncadd (%p12928_p13), [#allocation6], 4294964128  ;;  %s10762_s26 = smul.u32 9216, %s11374_s10  ;;  %s274_s28 = scalar_lea.sflag [#allocation9], %s273_s27 }
  0x80   : > { %p12929_p9 = scmp.ne.s32.totalorder %s12914_s24, 0 }
  0x81   : > { %s11377_s15 = scalar_lea.vmem [#allocation8], %s10762_s26 }
  0x82   : > { %11136 = dma.done.wait (%p12929_p9), %s274_s28, 147840  }
  0x83   : > { %11138 = vsyncadd (%p12929_p9), %s274_s28, 4294819456  ;;  %v11168_v0 = vmov 0.0   ;;  %vm381_vm0 = vcmask 1041408   ;;  %v340_v1 = vld [vmem:[#allocation5 + $0x98] sm:$0x3]  ;;  %v334_v5 = vld [vmem:[#allocation5 + $0x68] sm:$0xff] }
  0x84   : > { %464 = vmatprep.mubr.f32.mxu0 %v11168_v0  ;;  %535 = vmatprep.mubr.f32.mxu1 %v11168_v0  ;;  %v342_v2 = vld [vmem:[#allocation5 + $0xa8] sm:$0x3]  ;;  %v339_v3 = vld [vmem:[#allocation5 + $0x90] sm:$0x3]  ;;  %v341_v4 = vld [vmem:[#allocation5 + $0xa0] sm:$0x3] }
  0x85   : > { %9569 = vmatprep.subr.msk.mxu0 %vm381_vm0, %v340_v1  ;;  %9572 = vmatprep.subr.msk.mxu1 %vm381_vm0, %v342_v2  ;;  %v336_v6 = vld [vmem:[#allocation5 + $0x78] sm:$0xff]  ;;  %v333_v7 = vld [vmem:[#allocation5 + $0x60] sm:$0xff]  ;;  %v335_v8 = vld [vmem:[#allocation5 + $0x70] sm:$0xff]  ;;  %vm377_vm1 = vcmask 211968   ;;  %s10763_s24 = smul.u32 24, %s11374_s10  ;;  %s9422_s11 = scalar_lea.sflag [#allocation4], %s11374_s10 }
  0x86   : > { %9570 = vmatpush1.msk.msra.mxu0 %vm381_vm0, %v339_v3  ;;  %9573 = vmatpush1.msk.msra.mxu1 %vm381_vm0, %v341_v4  ;;  %v328_v9 = vld [vmem:[#allocation5 + $0x38] sm:$0xff]  ;;  %v330_v10 = vld [vmem:[#allocation5 + $0x48] sm:$0xff]  ;;  %v327_v11 = vld [vmem:[#allocation5 + $0x30] sm:$0xff]  ;;  %s10764_s9 = smul.u32 48, %s11374_s10  ;;  %p12930_p1 = scmp.ne.s32.totalorder %s12919_s14, 0 }
  0x87   : > { %426 = vmatprep.subr.mxu0 %v334_v5  ;;  %497 = vmatprep.subr.mxu1 %v336_v6  ;;  %v329_v12 = vld [vmem:[#allocation5 + $0x40] sm:$0xff]  ;;  %v322_v13 = vld [vmem:[#allocation5 + $0x8] sm:$0xff]  ;;  %v324_v14 = vld [vmem:[#allocation5 + $0x18] sm:$0xff]  ;;  %s11716_s6 = scalar_lea.vmem [#allocation10], %s10763_s24  ;;  %s10758_s12 = smul.u32 768, %s11222_s22 }
  0x88   : > { %427 = vmatpush1.msra.mxu0 %v333_v7  ;;  %498 = vmatpush1.msra.mxu1 %v335_v8  ;;  %v321_v15 = vld [vmem:[#allocation5] sm:$0xff]  ;;  %v323_v16 = vld [vmem:[#allocation5 + $0x10] sm:$0xff]  ;;  %v320_v17 = vld [vmem:[#allocation2] sm:$0x3]  ;;  %s11948_s29 = scalar_lea.vmem [#allocation11], %s10764_s9  ;;  %s11170_s7 = smov [#allocation11]  }
  0x89   : > { %428 = vmatprep.subr.mxu0 %v328_v9  ;;  %499 = vmatprep.subr.mxu1 %v330_v10  ;;  %v344_v18 = vld [vmem:[#allocation5 + $0xb8] sm:$0x3]  ;;  %v343_v19 = vld [vmem:[#allocation5 + $0xb0] sm:$0x3]  ;;  %v793_v20 = vld [vmem:[%s11377_s15 + $0x540] sm:$0xff]  ;;  %s9436_s1 = sshll.u32 %s11948_s29, 4  ;;  %s9434_s8 = scalar_lea.hbm %s12906_s5, %s10758_s12  ;;  %s9437_s1 = int_to_ptr.vmem [resolvable:$true] %s9436_s1 }
  0x8a   : > { %429 = vmatpush1.msra.mxu0 %v327_v11  ;;  %500 = vmatpush1.msra.mxu1 %v329_v12  ;;  %v805_v21 = vld [vmem:[%s11377_s15 + $0x5a0] sm:$0xff]  ;;  %v332_v27 = vld [vmem:[#allocation5 + $0x58] sm:$0xff]  ;;  %v331_v34 = vld [vmem:[#allocation5 + $0x50] sm:$0xff]  ;;  %s11085_s23 = scalar_lea.vmem %s9437_s1, 768  ;;  %s11089_s22 = sshll.u32 %s11170_s7, 4  ;;  %s11090_s22 = int_to_ptr.vmem [resolvable:$false] %s11089_s22 }
  0x8b   : > { %430 = vmatprep.subr.mxu0 %v322_v13  ;;  %501 = vmatprep.subr.mxu1 %v324_v14  ;;  %v338_v22 = vld [vmem:[#allocation5 + $0x88] sm:$0xff]  ;;  %v337_v23 = vld [vmem:[#allocation5 + $0x80] sm:$0xff]  ;;  %v9746_v24 = vcombine.low %v793_v20, %v805_v21  ;;  %v9747_v25 = vcombine.high %v793_v20, %v805_v21  ;;  %p11086_p3 = scmp.ne.s32.totalorder %s9437_s1, %s11085_s23  ;;  %s11091_s27 = scalar_lea.vmem %s11090_s22, 1536 }
  0x8c   : > { %431 = vmatpush1.msra.mxu0 %v321_v15  ;;  %502 = vmatpush1.msra.mxu1 %v323_v16  ;;  %v769_v26 = vld [vmem:[%s11377_s15 + $0x480] sm:$0xff]  ;;  %p11092_p8 = scmp.lt.s32.totalorder %s9437_s1, %s11090_s22  ;;  %p11093_p11 = scmp.lt.s32.totalorder %s11091_s27, %s11085_s23 }
  0x8d   : > { %9571 = vmatmul.mubr.msk.f32.vlgmr.msra.gmra.mxu0 %vm377_vm1, %v320_v17  ;;  %9574 = vmatmul.mubr.msk.f32.vlgmr.msra.gmra.mxu1 %vm377_vm1, %v320_v17  ;;  %v1177_v28 = vld [vmem:[%s11377_s15 + $0x1140] sm:$0xff]  ;;  %p11087_p4 = pnand %p11086_p3, %p12930_p1 }
  0x8e   : > { %9575 = vmatprep.subr.msk.mxu0 %vm381_vm0, %v344_v18  ;;  %606 = vmatprep.mubr.f32.mxu0 %v11168_v0  ;;  %v781_v29 = vld [vmem:[%s11377_s15 + $0x4e0] sm:$0xff]  ;;  %p11094_p7 = por %p11093_p11, %p11092_p8 }
  0x8f   : > { %9576 = vmatpush1.msk.msra.mxu0 %vm381_vm0, %v343_v19  ;;  %7663 = vmatprep.subr.bf16.mxu1 %v9747_v25  ;;  %v1189_v30 = vld [vmem:[%s11377_s15 + $0x11a0] sm:$0xff]  ;;  %v9723_v31 = vcombine.high %v769_v26, %v781_v29  ;;  %v9722_v35 = vcombine.low %v769_v26, %v781_v29  ;;  %p11088_p6 = pneg %p11087_p4 }
  0x90   : > { %v745_v32 = vld [vmem:[%s11377_s15 + $0x3c0] sm:$0xff]  ;;  %568 = vmatprep.subr.mxu0 %v338_v22  ;;  %7664 = vmatpush1.bf16.msra.mxu1 %v9746_v24  ;;  %v10131_v41 = vcombine.high %v1177_v28, %v1189_v30  ;;  %v10130_v44 = vcombine.low %v1177_v28, %v1189_v30 }
  0x91   : > { %v757_v33 = vld [vmem:[%s11377_s15 + $0x420] sm:$0xff]  ;;  %569 = vmatpush1.msra.mxu0 %v337_v23  ;;  %7665 = vmatprep.subr.bf16.mxu1 %v9723_v31  ;;  %p11095_p0 = pnand %p11094_p7, %p11088_p6 }
  0x92   : > { %v326_v36 = vld [vmem:[#allocation5 + $0x28] sm:$0xff]  ;;  %v9699_v39 = vcombine.high %v745_v32, %v757_v33  ;;  %570 = vmatprep.subr.mxu0 %v332_v27  ;;  %v325_v40 = vld [vmem:[#allocation5 + $0x20] sm:$0xff]  ;;  %v9698_v46 = vcombine.low %v745_v32, %v757_v33 }
  0x93   : > { %v1153_v37 = vld [vmem:[%s11377_s15 + $0x1080] sm:$0xff]  ;;  %571 = vmatpush1.msra.mxu0 %v331_v34 }
  0x94   : > { %v1165_v38 = vld [vmem:[%s11377_s15 + $0x10e0] sm:$0xff]  ;;  %572 = vmatprep.subr.mxu0 %v326_v36  ;;  %7666 = vmatpush1.bf16.msra.mxu1 %v9722_v35 }
  0x95   : > { %v721_v42 = vld [vmem:[%s11377_s15 + $0x300] sm:$0xff]  ;;  %v10107_v45 = vcombine.high %v1153_v37, %v1165_v38  ;;  %573 = vmatpush1.msra.mxu0 %v325_v40  ;;  %7667 = vmatprep.subr.bf16.mxu1 %v9699_v39  ;;  %v10106_v52 = vcombine.low %v1153_v37, %v1165_v38 }
  0x96   : > { %v733_v43 = vld [vmem:[%s11377_s15 + $0x360] sm:$0xff]  ;;  %9577 = vmatmul.mubr.msk.f32.vlgmr.msra.gmra.mxu0 %vm377_vm1, %v320_v17  ;;  %7704 = vmatprep.subr.bf16.mxu0 %v10131_v41 }
  0x97   : > { %v1129_v47 = vld [vmem:[%s11377_s15 + $0xfc0] sm:$0xff]  ;;  %v9675_v49 = vcombine.high %v721_v42, %v733_v43  ;;  %7705 = vmatpush1.bf16.msra.mxu0 %v10130_v44  ;;  %v9674_v54 = vcombine.low %v721_v42, %v733_v43 }
  0x98   : > { %v1141_v48 = vld [vmem:[%s11377_s15 + $0x1020] sm:$0xff]  ;;  %7706 = vmatprep.subr.bf16.mxu0 %v10107_v45  ;;  %7668 = vmatpush1.bf16.msra.mxu1 %v9698_v46 }
  0x99   : > { %v697_v50 = vld [vmem:[%s11377_s15 + $0x240] sm:$0xff]  ;;  %v10083_v53 = vcombine.high %v1129_v47, %v1141_v48  ;;  %7669 = vmatprep.subr.bf16.mxu1 %v9675_v49  ;;  %v10082_v60 = vcombine.low %v1129_v47, %v1141_v48 }
  0x9a   : > { %v709_v51 = vld [vmem:[%s11377_s15 + $0x2a0] sm:$0xff] }
  0x9b   : > { %v1105_v55 = vld [vmem:[%s11377_s15 + $0xf00] sm:$0xff]  ;;  %v9651_v57 = vcombine.high %v697_v50, %v709_v51  ;;  %7707 = vmatpush1.bf16.msra.mxu0 %v10106_v52  ;;  %v9650_v62 = vcombine.low %v697_v50, %v709_v51 }
  0x9c   : > { %v1117_v56 = vld [vmem:[%s11377_s15 + $0xf60] sm:$0xff]  ;;  %7708 = vmatprep.subr.bf16.mxu0 %v10083_v53  ;;  %7670 = vmatpush1.bf16.msra.mxu1 %v9674_v54 }
  0x9d   : > { %v673_v58 = vld [vmem:[%s11377_s15 + $0x180] sm:$0xff]  ;;  %v10059_v61 = vcombine.high %v1105_v55, %v1117_v56  ;;  %7671 = vmatprep.subr.bf16.mxu1 %v9651_v57  ;;  %v10058_v4 = vcombine.low %v1105_v55, %v1117_v56 }
  0x9e   : > { %v685_v59 = vld [vmem:[%s11377_s15 + $0x1e0] sm:$0xff] }
  0x9f   : > { %v1081_v63 = vld [vmem:[%s11377_s15 + $0xe40] sm:$0xff]  ;;  %v9627_v1 = vcombine.high %v673_v58, %v685_v59  ;;  %7709 = vmatpush1.bf16.msra.mxu0 %v10082_v60  ;;  %v9626_v6 = vcombine.low %v673_v58, %v685_v59 }
  0xa0   : > { %v1093_v0 = vld [vmem:[%s11377_s15 + $0xea0] sm:$0xff]  ;;  %7710 = vmatprep.subr.bf16.mxu0 %v10059_v61  ;;  %7672 = vmatpush1.bf16.msra.mxu1 %v9650_v62 }
  0xa1   : > { %v649_v2 = vld [vmem:[%s11377_s15 + $0xc0] sm:$0xff]  ;;  %v10035_v5 = vcombine.high %v1081_v63, %v1093_v0  ;;  %7673 = vmatprep.subr.bf16.mxu1 %v9627_v1  ;;  %v10034_v12 = vcombine.low %v1081_v63, %v1093_v0 }
  0xa2   : > { %v661_v3 = vld [vmem:[%s11377_s15 + $0x120] sm:$0xff] }
  0xa3   : > { %v1057_v7 = vld [vmem:[%s11377_s15 + $0xd80] sm:$0xff]  ;;  %v9603_v9 = vcombine.high %v649_v2, %v661_v3  ;;  %7711 = vmatpush1.bf16.msra.mxu0 %v10058_v4  ;;  %v9602_v14 = vcombine.low %v649_v2, %v661_v3 }
  0xa4   : > { %v1069_v8 = vld [vmem:[%s11377_s15 + $0xde0] sm:$0xff]  ;;  %7712 = vmatprep.subr.bf16.mxu0 %v10035_v5  ;;  %7674 = vmatpush1.bf16.msra.mxu1 %v9626_v6 }
  0xa5   : > { %v625_v10 = vld [vmem:[%s11377_s15] sm:$0xff]  ;;  %v10011_v13 = vcombine.high %v1057_v7, %v1069_v8  ;;  %7675 = vmatprep.subr.bf16.mxu1 %v9603_v9  ;;  %v10010_v20 = vcombine.low %v1057_v7, %v1069_v8 }
  0xa6   : > { %v637_v11 = vld [vmem:[%s11377_s15 + $0x60] sm:$0xff] }
  0xa7   : > { %v1033_v15 = vld [vmem:[%s11377_s15 + $0xcc0] sm:$0xff]  ;;  %v9579_v17 = vcombine.high %v625_v10, %v637_v11  ;;  %7713 = vmatpush1.bf16.msra.mxu0 %v10034_v12  ;;  %v9578_v22 = vcombine.low %v625_v10, %v637_v11 }
  0xa8   : > { %v1045_v16 = vld [vmem:[%s11377_s15 + $0xd20] sm:$0xff]  ;;  %7714 = vmatprep.subr.bf16.mxu0 %v10011_v13  ;;  %7676 = vmatpush1.bf16.msra.mxu1 %v9602_v14 }
  0xa9   : > { %v985_v18 = vld [vmem:[%s11377_s15 + $0xb40] sm:$0xff]  ;;  %v9987_v21 = vcombine.high %v1033_v15, %v1045_v16  ;;  %7677 = vmatprep.subr.bf16.mxu1 %v9579_v17  ;;  %v9986_v28 = vcombine.low %v1033_v15, %v1045_v16 }
  0xaa   : > { %v997_v19 = vld [vmem:[%s11377_s15 + $0xba0] sm:$0xff] }
  0xab   : > { %v1009_v23 = vld [vmem:[%s11377_s15 + $0xc00] sm:$0xff]  ;;  %v9939_v25 = vcombine.high %v985_v18, %v997_v19  ;;  %7715 = vmatpush1.bf16.msra.mxu0 %v10010_v20  ;;  %v9938_v30 = vcombine.low %v985_v18, %v997_v19 }
  0xac   : > { %v1021_v24 = vld [vmem:[%s11377_s15 + $0xc60] sm:$0xff]  ;;  %7716 = vmatprep.subr.bf16.mxu0 %v9987_v21  ;;  %7678 = vmatpush1.bf16.msra.mxu1 %v9578_v22 }
  0xad   : > { %v961_v26 = vld [vmem:[%s11377_s15 + $0xa80] sm:$0xff]  ;;  %v9963_v29 = vcombine.high %v1009_v23, %v1021_v24  ;;  %7679 = vmatprep.subr.bf16.mxu1 %v9939_v25  ;;  %v9962_v36 = vcombine.low %v1009_v23, %v1021_v24 }
  0xae   : > { %v973_v27 = vld [vmem:[%s11377_s15 + $0xae0] sm:$0xff] }
  0xaf   : > { %v1369_v31 = vld [vmem:[%s11377_s15 + $0x1740] sm:$0xff]  ;;  %v9915_v33 = vcombine.high %v961_v26, %v973_v27  ;;  %7717 = vmatpush1.bf16.msra.mxu0 %v9986_v28  ;;  %v9914_v38 = vcombine.low %v961_v26, %v973_v27  ;;  %v794_v28 = vld [vmem:[%s11377_s15 + $0x548] sm:$0xff] }
  0xb0   : > { %v1381_v32 = vld [vmem:[%s11377_s15 + $0x17a0] sm:$0xff]  ;;  %7718 = vmatprep.subr.bf16.mxu0 %v9963_v29  ;;  %7680 = vmatpush2.bf16.msra.mxu1 %v9938_v30  ;;  %v806_v30 = vld [vmem:[%s11377_s15 + $0x5a8] sm:$0xff] }
  0xb1   : > { %v937_v34 = vld [vmem:[%s11377_s15 + $0x9c0] sm:$0xff]  ;;  %v10323_v37 = vcombine.high %v1369_v31, %v1381_v32  ;;  %7681 = vmatprep.subr.bf16.mxu1 %v9915_v33  ;;  %v10322_v44 = vcombine.low %v1369_v31, %v1381_v32  ;;  %v9748_v32 = vcombine.low %v794_v28, %v806_v30  ;;  %v9749_v33 = vcombine.high %v794_v28, %v806_v30  ;;  %v698_v28 = vld [vmem:[%s11377_s15 + $0x248] sm:$0xff] }
  0xb2   : > { %v949_v35 = vld [vmem:[%s11377_s15 + $0xa20] sm:$0xff] }
  0xb3   : > { %v1345_v39 = vld [vmem:[%s11377_s15 + $0x1680] sm:$0xff]  ;;  %v9891_v41 = vcombine.high %v937_v34, %v949_v35  ;;  %7719 = vmatpush1.bf16.msra.mxu0 %v9962_v36  ;;  %v9890_v46 = vcombine.low %v937_v34, %v949_v35  ;;  %v347_v34 = vlaneseq }
  0xb4   : > { %v1357_v40 = vld [vmem:[%s11377_s15 + $0x16e0] sm:$0xff]  ;;  %7720 = vmatprep.subr.bf16.mxu0 %v10323_v37  ;;  %7682 = vmatpush2.bf16.msra.mxu1 %v9914_v38  ;;  %v11468_v38 = vld [vmem:[#allocation7] sm:$0x3f] }
  0xb5   : > { %v913_v42 = vld [vmem:[%s11377_s15 + $0x900] sm:$0xff]  ;;  %v10299_v45 = vcombine.high %v1345_v39, %v1357_v40  ;;  %7683 = vmatprep.subr.bf16.mxu1 %v9891_v41  ;;  %v10298_v52 = vcombine.low %v1345_v39, %v1357_v40  ;;  %v11460_v35 = vshrl.u32 %v347_v34, 7 }
  0xb6   : > { %v925_v43 = vld [vmem:[%s11377_s15 + $0x960] sm:$0xff] }
  0xb7   : > { %v1321_v47 = vld [vmem:[%s11377_s15 + $0x15c0] sm:$0xff]  ;;  %v9867_v49 = vcombine.high %v913_v42, %v925_v43  ;;  %7721 = vmatpush2.bf16.msra.mxu0 %v10322_v44  ;;  %v9866_v54 = vcombine.low %v913_v42, %v925_v43  ;;  %v11463_v36 = vsub.s32 0, %v11460_v35  ;;  %v11466_v37 = vsub.s32 2, %v11460_v35 }
  0xb8   : > { %v1333_v48 = vld [vmem:[%s11377_s15 + $0x1620] sm:$0xff]  ;;  %7722 = vmatprep.subr.bf16.mxu0 %v10299_v45  ;;  %7684 = vmatpush2.bf16.msra.mxu1 %v9890_v46  ;;  %v11471_v39 = vsub.s32 1, %v11460_v35  ;;  %v11474_v40 = vsub.s32 3, %v11460_v35 }
  0xb9   : > { %v889_v50 = vld [vmem:[%s11377_s15 + $0x840] sm:$0xff]  ;;  %v10275_v53 = vcombine.high %v1321_v47, %v1333_v48  ;;  %7685 = vmatprep.subr.bf16.mxu1 %v9867_v49  ;;  %v10274_v60 = vcombine.low %v1321_v47, %v1333_v48  ;;  %v350_v41 = vrot.slane %v11468_v38, %v11463_v36  ;;  %v358_v42 = vrot.slane %v11468_v38, %v11466_v37 }
  0xba   : > { %v901_v51 = vld [vmem:[%s11377_s15 + $0x8a0] sm:$0xff]  ;;  %v354_v43 = vrot.slane %v11468_v38, %v11471_v39  ;;  %v362_v44 = vrot.slane %v11468_v38, %v11474_v40 }
  0xbb   : > { %v1297_v55 = vld [vmem:[%s11377_s15 + $0x1500] sm:$0xff]  ;;  %v9843_v57 = vcombine.high %v889_v50, %v901_v51  ;;  %7723 = vmatpush2.bf16.msra.mxu0 %v10298_v52  ;;  %v9842_v62 = vcombine.low %v889_v50, %v901_v51 }
  0xbc   : > { %v1309_v56 = vld [vmem:[%s11377_s15 + $0x1560] sm:$0xff]  ;;  %7724 = vmatprep.subr.bf16.mxu0 %v10275_v53  ;;  %7686 = vmatpush2.bf16.msra.mxu1 %v9866_v54 }
  0xbd   : > { %v865_v58 = vld [vmem:[%s11377_s15 + $0x780] sm:$0xff]  ;;  %v10251_v61 = vcombine.high %v1297_v55, %v1309_v56  ;;  %7687 = vmatprep.subr.bf16.mxu1 %v9843_v57  ;;  %v10250_v2 = vcombine.low %v1297_v55, %v1309_v56  ;;  %v11485_v55 = vsub.s32 5, %v11460_v35 }
  0xbe   : > { %v877_v59 = vld [vmem:[%s11377_s15 + $0x7e0] sm:$0xff] }
  0xbf   : > { %v1273_v63 = vld [vmem:[%s11377_s15 + $0x1440] sm:$0xff]  ;;  %v9819_v1 = vcombine.high %v865_v58, %v877_v59  ;;  %7725 = vmatpush2.bf16.msra.mxu0 %v10274_v60  ;;  %v9818_v4 = vcombine.low %v865_v58, %v877_v59 }
  0xc0   : > { %v1285_v0 = vld [vmem:[%s11377_s15 + $0x14a0] sm:$0xff]  ;;  %7726 = vmatprep.subr.bf16.mxu0 %v10251_v61  ;;  %7688 = vmatpush2.bf16.msra.mxu1 %v9842_v62  ;;  %v770_v61 = vld [vmem:[%s11377_s15 + $0x488] sm:$0xff] }
  0xc1   : > { %v10227_v3 = vcombine.high %v1273_v63, %v1285_v0  ;;  %7689 = vmatprep.subr.bf16.mxu1 %v9819_v1  ;;  %v1249_v5 = vld [vmem:[%s11377_s15 + $0x1380] sm:$0xff]  ;;  %v10226_v7 = vcombine.low %v1273_v63, %v1285_v0  ;;  %v782_v62 = vld [vmem:[%s11377_s15 + $0x4e8] sm:$0xff] }
  0xc2   : > { %v1261_v6 = vld [vmem:[%s11377_s15 + $0x13e0] sm:$0xff] }
  0xc3   : > { %7727 = vmatpush2.bf16.msra.mxu0 %v10250_v2  ;;  %v10203_v8 = vcombine.high %v1249_v5, %v1261_v6  ;;  %v10202_v9 = vcombine.low %v1249_v5, %v1261_v6  ;;  %v841_v10 = vld [vmem:[%s11377_s15 + $0x6c0] sm:$0xff]  ;;  %v9725_v5 = vcombine.high %v770_v61, %v782_v62 }
  0xc4   : > { %7728 = vmatprep.subr.bf16.mxu0 %v10227_v3  ;;  %7690 = vmatpush2.bf16.msra.mxu1 %v9818_v4  ;;  %v853_v11 = vld [vmem:[%s11377_s15 + $0x720] sm:$0xff]  ;;  %v370_v4 = vrot.slane %v11468_v38, %v11485_v55 }
  0xc5   : > { %v1225_v12 = vld [vmem:[%s11377_s15 + $0x12c0] sm:$0xff]  ;;  %v9795_v13 = vcombine.high %v841_v10, %v853_v11  ;;  %v9794_v15 = vcombine.low %v841_v10, %v853_v11  ;;  %v9724_v11 = vcombine.low %v770_v61, %v782_v62  ;;  %v638_v61 = vld [vmem:[%s11377_s15 + $0x68] sm:$0xff] }
  0xc6   : > { %v1237_v14 = vld [vmem:[%s11377_s15 + $0x1320] sm:$0xff] }
  0xc7   : > { %7729 = vmatpush2.bf16.msra.mxu0 %v10226_v7  ;;  %v10178_v16 = vcombine.low %v1225_v12, %v1237_v14  ;;  %v10179_v17 = vcombine.high %v1225_v12, %v1237_v14  ;;  %7691 = vmatprep.subr.bf16.mxu1 %v9795_v13  ;;  %v817_v18 = vld [vmem:[%s11377_s15 + $0x600] sm:$0xff]  ;;  %v746_v7 = vld [vmem:[%s11377_s15 + $0x3c8] sm:$0xff] }
  0xc8   : > { %7730 = vmatprep.subr.bf16.mxu0 %v10203_v8  ;;  %7692 = vmatpush2.bf16.msra.mxu1 %v9794_v15  ;;  %v829_v19 = vld [vmem:[%s11377_s15 + $0x660] sm:$0xff]  ;;  %v758_v8 = vld [vmem:[%s11377_s15 + $0x428] sm:$0xff] }
  0xc9   : > { %v1201_v20 = vld [vmem:[%s11377_s15 + $0x1200] sm:$0xff]  ;;  %v9771_v21 = vcombine.high %v817_v18, %v829_v19  ;;  %v9770_v23 = vcombine.low %v817_v18, %v829_v19  ;;  %v9701_v14 = vcombine.high %v746_v7, %v758_v8  ;;  %v722_v18 = vld [vmem:[%s11377_s15 + $0x308] sm:$0xff] }
  0xca   : > { %v1213_v22 = vld [vmem:[%s11377_s15 + $0x1260] sm:$0xff]  ;;  %v734_v19 = vld [vmem:[%s11377_s15 + $0x368] sm:$0xff] }
  0xcb   : > { %7731 = vmatpush2.bf16.msra.mxu0 %v10202_v9  ;;  %v10154_v24 = vcombine.low %v1201_v20, %v1213_v22  ;;  %v10155_v25 = vcombine.high %v1201_v20, %v1213_v22  ;;  %7693 = vmatprep.subr.bf16.mxu1 %v9771_v21  ;;  %v1561_v26 = vld [vmem:[%s11377_s15 + $0x1d40] sm:$0xff]  ;;  %v9700_v22 = vcombine.low %v746_v7, %v758_v8  ;;  %v986_v7 = vld [vmem:[%s11377_s15 + $0xb48] sm:$0xff] }
  0xcc   : > { %7732 = vmatprep.subr.bf16.mxu0 %v10179_v17  ;;  %7694 = vmatpush2.bf16.msra.mxu1 %v9770_v23  ;;  %v1573_v27 = vld [vmem:[%s11377_s15 + $0x1da0] sm:$0xff]  ;;  %v998_v8 = vld [vmem:[%s11377_s15 + $0xba8] sm:$0xff] }
  0xcd   : > { %v10515_v29 = vcombine.high %v1561_v26, %v1573_v27  ;;  %v10514_v31 = vcombine.low %v1561_v26, %v1573_v27  ;;  %v1537_v58 = vld [vmem:[%s11377_s15 + $0x1c80] sm:$0xff] }
  0xce   : > { %v1549_v59 = vld [vmem:[%s11377_s15 + $0x1ce0] sm:$0xff] }
  0xcf   : > { %7733 = vmatpush2.bf16.msra.mxu0 %v10178_v16  ;;  %7745 = vmatprep.subr.bf16.mxu1 %v10515_v29  ;;  %v10491_v2 = vcombine.high %v1537_v58, %v1549_v59  ;;  %v1513_v3 = vld [vmem:[%s11377_s15 + $0x1bc0] sm:$0xff]  ;;  %v10490_v10 = vcombine.low %v1537_v58, %v1549_v59  ;;  %v710_v29 = vld [vmem:[%s11377_s15 + $0x2a8] sm:$0xff] }
  0xd0   : > { %7734 = vmatprep.subr.bf16.mxu0 %v10155_v25  ;;  %v1525_v6 = vld [vmem:[%s11377_s15 + $0x1c20] sm:$0xff]  ;;  %v626_v59 = vld [vmem:[%s11377_s15 + $0x8] sm:$0xff] }
  0xd1   : > { %v10467_v13 = vcombine.high %v1513_v3, %v1525_v6  ;;  %v1489_v15 = vld [vmem:[%s11377_s15 + $0x1b00] sm:$0xff]  ;;  %v10466_v21 = vcombine.low %v1513_v3, %v1525_v6 }
  0xd2   : > { %v1501_v17 = vld [vmem:[%s11377_s15 + $0x1b60] sm:$0xff] }
  0xd3   : > { %7735 = vmatpush2.bf16.msra.mxu0 %v10154_v24  ;;  %v10443_v23 = vcombine.high %v1489_v15, %v1501_v17  ;;  %v9677_v24 = vcombine.high %v722_v18, %v734_v19  ;;  %v1465_v25 = vld [vmem:[%s11377_s15 + $0x1a40] sm:$0xff]  ;;  %v10442_v30 = vcombine.low %v1489_v15, %v1501_v17  ;;  %v974_v17 = vld [vmem:[%s11377_s15 + $0xae8] sm:$0xff] }
  0xd4   : > { %7786 = vmatprep.subr.bf16.mxu0 %v9749_v33  ;;  %v1477_v27 = vld [vmem:[%s11377_s15 + $0x1aa0] sm:$0xff]  ;;  %v9653_v33 = vcombine.high %v698_v28, %v710_v29 }
  0xd5   : > { %v1441_v34 = vld [vmem:[%s11377_s15 + $0x1980] sm:$0xff] }
  0xd6   : > { %v1405_v58 = vld [vmem:[%s11377_s15 + $0x1860] sm:$0xff] }
  0xd7   : > { %v1765_v6 = vld [vmem:[%s11377_s15 + $0x23a0] sm:$0xff] }
  0xd8   : > { %v1741_v15 = vld [vmem:[%s11377_s15 + $0x22e0] sm:$0xff] }
 0x14d   : > { %v466_v45 = vpop.f32.mrf.mxu0  ;;  %v537_v46 = vpop.f32.mrf.mxu1 }
 0x14e   : > { %v467_v47 = vadd.f32 %v466_v45, %v350_v41  ;;  %v538_v48 = vadd.f32 %v537_v46, %v358_v42  ;;  %v1453_v41 = vld [vmem:[%s11377_s15 + $0x19e0] sm:$0xff]  ;;  %v674_v42 = vld [vmem:[%s11377_s15 + $0x188] sm:$0xff]  ;;  %v9652_v45 = vcombine.low %v698_v28, %v710_v29 }
 0x14f   : > { %v468_v49 = vpop.f32.mrf.mxu0  ;;  %v539_v50 = vpop.f32.mrf.mxu1  ;;  %v10395_v46 = vcombine.high %v1441_v34, %v1453_v41 }
 0x150   : > { %v615_v51 = vmax.f32 %v538_v48, 0.0  ;;  %v469_v52 = vadd.f32 %v468_v49, %v354_v43  ;;  %v540_v53 = vadd.f32 %v539_v50, %v362_v44  ;;  %v613_v54 = vmax.f32 %v467_v47, 0.0  ;;  %v686_v43 = vld [vmem:[%s11377_s15 + $0x1e8] sm:$0xff]  ;;  %v1417_v48 = vld [vmem:[%s11377_s15 + $0x18c0] sm:$0xff] }
 0x151   : > { %v10418_v44 = vcombine.low %v1465_v25, %v1477_v27  ;;  %v9629_v47 = vcombine.high %v674_v42, %v686_v43  ;;  %v1429_v49 = vld [vmem:[%s11377_s15 + $0x1920] sm:$0xff]  ;;  %v650_v50 = vld [vmem:[%s11377_s15 + $0xc8] sm:$0xff] }
 0x152   : > { %v614_v56 = vmax.f32 %v469_v52, 0.0  ;;  %v616_v57 = vmax.f32 %v540_v53, 0.0  ;;  %v11489_v60 = vpack.c.bf16 %v615_v51, %v615_v51  ;;  %v11497_v1 = vpack.c.bf16 %v613_v54, %v613_v54  ;;  %v662_v51 = vld [vmem:[%s11377_s15 + $0x128] sm:$0xff] }
 0x153   : > { %v10394_v52 = vcombine.low %v1441_v34, %v1453_v41  ;;  %v9628_v53 = vcombine.low %v674_v42, %v686_v43  ;;  %v10371_v54 = vcombine.high %v1417_v48, %v1429_v49  ;;  %v10370_v62 = vcombine.low %v1417_v48, %v1429_v49  ;;  %v926_v34 = vld [vmem:[%s11377_s15 + $0x968] sm:$0xff] }
 0x154   : > { %v11493_v63 = vpack.c.bf16 %v614_v56, %v614_v56  ;;  %v11495_v0 = vpack.c.bf16 %v616_v57, %v616_v57  ;;  %v9605_v56 = vcombine.high %v650_v50, %v662_v51  ;;  %v1393_v57 = vld [vmem:[%s11377_s15 + $0x1800] sm:$0xff]  ;;  %v902_v48 = vld [vmem:[%s11377_s15 + $0x8a8] sm:$0xff] }
 0x155   : > { %v10347_v3 = vcombine.high %v1393_v57, %v1405_v58 }
 0x156   : > { %7695 = vmatprep.mubr.bf16.mxu1 %v11493_v63  ;;  %7736 = vmatprep.mubr.bf16.mxu0 %v11495_v0  ;;  %v11507_v9 = vpop.f32.mrf.mxu0 }
 0x157   : > { %7696 = vmatmul.mubr.bf16.vlgmr.msra.gmra.mxu1 %v11497_v1  ;;  %7737 = vmatmul.mubr.bf16.vlgmr.msra.gmra.mxu0 %v11489_v60 }
 0x158   : > { %7746 = vmatpush1.bf16.msra.mxu1 %v10514_v31  ;;  %7787 = vmatpush1.bf16.msra.mxu0 %v9748_v32  ;;  %v610_v12 = vpop.f32.mrf.mxu0  ;;  %v9676_v31 = vcombine.low %v722_v18, %v734_v19  ;;  %v10419_v32 = vcombine.high %v1465_v25, %v1477_v27  ;;  %v9940_v19 = vcombine.low %v986_v7, %v998_v8  ;;  %v950_v25 = vld [vmem:[%s11377_s15 + $0xa28] sm:$0xff] }
 0x159   : > { %7818 = vmatprep.mubr.bf16.mxu0 %v11493_v63  ;;  %7747 = vmatprep.subr.bf16.mxu1 %v10491_v2  ;;  %v611_v16 = vadd.f32 %v610_v12, %v370_v4  ;;  %v9604_v2 = vcombine.low %v650_v50, %v662_v51  ;;  %v9581_v4 = vcombine.high %v626_v59, %v638_v61 }
 0x15a   : > { %7788 = vmatprep.subr.bf16.mxu0 %v9725_v5  ;;  %v1753_v5 = vld [vmem:[%s11377_s15 + $0x2340] sm:$0xff] }
 0x15b   : > { %v618_v20 = vmax.f32 %v611_v16, 0.0  ;;  %v10707_v12 = vcombine.high %v1753_v5, %v1765_v6  ;;  %v962_v16 = vld [vmem:[%s11377_s15 + $0xa88] sm:$0xff]  ;;  %v10706_v18 = vcombine.low %v1753_v5, %v1765_v6 }
 0x15c   : > { %7748 = vmatpush1.bf16.msra.mxu1 %v10490_v10  ;;  %7789 = vmatpush1.bf16.msra.mxu0 %v9724_v11  ;;  %v10346_v10 = vcombine.low %v1393_v57, %v1405_v58  ;;  %v9580_v11 = vcombine.low %v626_v59, %v638_v61  ;;  %v9916_v28 = vcombine.low %v962_v16, %v974_v17  ;;  %v878_v57 = vld [vmem:[%s11377_s15 + $0x7e8] sm:$0xff] }
 0x15d   : > { %7749 = vmatprep.subr.bf16.mxu1 %v10467_v13  ;;  %7790 = vmatprep.subr.bf16.mxu0 %v9701_v14  ;;  %v11517_v26 = vpack.c.bf16 %v618_v20, %v618_v20  ;;  %v9941_v13 = vcombine.high %v986_v7, %v998_v8  ;;  %v1729_v14 = vld [vmem:[%s11377_s15 + $0x2280] sm:$0xff]  ;;  %v842_v5 = vld [vmem:[%s11377_s15 + $0x6c8] sm:$0xff] }
 0x15e   : > { %v10683_v20 = vcombine.high %v1729_v14, %v1741_v15  ;;  %v10682_v27 = vcombine.low %v1729_v14, %v1741_v15  ;;  %v854_v6 = vld [vmem:[%s11377_s15 + $0x728] sm:$0xff]  ;;  %v1597_v14 = vld [vmem:[%s11377_s15 + $0x1e60] sm:$0xff] }
 0x15f   : > { %7777 = vmatprep.mubr.bf16.mxu1 %v11517_v26  ;;  %v818_v15 = vld [vmem:[%s11377_s15 + $0x608] sm:$0xff] }
 0x160   : > { %7750 = vmatpush1.bf16.msra.mxu1 %v10466_v21  ;;  %7791 = vmatpush1.bf16.msra.mxu0 %v9700_v22  ;;  %v9917_v21 = vcombine.high %v962_v16, %v974_v17  ;;  %v1705_v22 = vld [vmem:[%s11377_s15 + $0x21c0] sm:$0xff]  ;;  %v830_v16 = vld [vmem:[%s11377_s15 + $0x668] sm:$0xff] }
 0x161   : > { %7751 = vmatprep.subr.bf16.mxu1 %v10443_v23  ;;  %7792 = vmatprep.subr.bf16.mxu0 %v9677_v24  ;;  %v1717_v23 = vld [vmem:[%s11377_s15 + $0x2220] sm:$0xff]  ;;  %v938_v24 = vld [vmem:[%s11377_s15 + $0x9c8] sm:$0xff] }
 0x162   : > { %v10659_v29 = vcombine.high %v1705_v22, %v1717_v23  ;;  %v10658_v41 = vcombine.low %v1705_v22, %v1717_v23  ;;  %v9892_v42 = vcombine.low %v938_v24, %v950_v25  ;;  %v1190_v22 = vld [vmem:[%s11377_s15 + $0x11a8] sm:$0xff] }
 0x163   : > { %v1562_v23 = vld [vmem:[%s11377_s15 + $0x1d48] sm:$0xff] }
 0x164   : > { %7752 = vmatpush1.bf16.msra.mxu1 %v10442_v30  ;;  %7793 = vmatpush1.bf16.msra.mxu0 %v9676_v31  ;;  %v9893_v30 = vcombine.high %v938_v24, %v950_v25  ;;  %v1681_v31 = vld [vmem:[%s11377_s15 + $0x2100] sm:$0xff]  ;;  %v1574_v24 = vld [vmem:[%s11377_s15 + $0x1da8] sm:$0xff] }
 0x165   : > { %7753 = vmatprep.subr.bf16.mxu1 %v10419_v32  ;;  %7794 = vmatprep.subr.bf16.mxu0 %v9653_v33  ;;  %v1693_v32 = vld [vmem:[%s11377_s15 + $0x2160] sm:$0xff]  ;;  %v914_v33 = vld [vmem:[%s11377_s15 + $0x908] sm:$0xff] }
 0x166   : > { %v10635_v43 = vcombine.high %v1681_v31, %v1693_v32  ;;  %v10634_v49 = vcombine.low %v1681_v31, %v1693_v32  ;;  %v9868_v50 = vcombine.low %v914_v33, %v926_v34  ;;  %v1166_v31 = vld [vmem:[%s11377_s15 + $0x10e8] sm:$0xff] }
 0x167   : > { %v1538_v32 = vld [vmem:[%s11377_s15 + $0x1c88] sm:$0xff] }
 0x168   : > { %7754 = vmatpush1.bf16.msra.mxu1 %v10418_v44  ;;  %7795 = vmatpush1.bf16.msra.mxu0 %v9652_v45  ;;  %v9869_v44 = vcombine.high %v914_v33, %v926_v34  ;;  %v1657_v45 = vld [vmem:[%s11377_s15 + $0x2040] sm:$0xff]  ;;  %v1550_v33 = vld [vmem:[%s11377_s15 + $0x1ce8] sm:$0xff] }
 0x169   : > { %7755 = vmatprep.subr.bf16.mxu1 %v10395_v46  ;;  %7796 = vmatprep.subr.bf16.mxu0 %v9629_v47  ;;  %v1669_v46 = vld [vmem:[%s11377_s15 + $0x20a0] sm:$0xff]  ;;  %v890_v47 = vld [vmem:[%s11377_s15 + $0x848] sm:$0xff] }
 0x16a   : > { %v10611_v51 = vcombine.high %v1657_v45, %v1669_v46  ;;  %v10610_v58 = vcombine.low %v1657_v45, %v1669_v46  ;;  %v9844_v59 = vcombine.low %v890_v47, %v902_v48  ;;  %v1130_v45 = vld [vmem:[%s11377_s15 + $0xfc8] sm:$0xff] }
 0x16b   : > { %v1142_v46 = vld [vmem:[%s11377_s15 + $0x1028] sm:$0xff] }
 0x16c   : > { %7756 = vmatpush1.bf16.msra.mxu1 %v10394_v52  ;;  %7797 = vmatpush1.bf16.msra.mxu0 %v9628_v53  ;;  %v9845_v52 = vcombine.high %v890_v47, %v902_v48  ;;  %v1633_v53 = vld [vmem:[%s11377_s15 + $0x1f80] sm:$0xff]  ;;  %v1514_v47 = vld [vmem:[%s11377_s15 + $0x1bc8] sm:$0xff] }
 0x16d   : > { %7757 = vmatprep.subr.bf16.mxu1 %v10371_v54  ;;  %7798 = vmatprep.subr.bf16.mxu0 %v9605_v56  ;;  %v1645_v54 = vld [vmem:[%s11377_s15 + $0x1fe0] sm:$0xff]  ;;  %v866_v56 = vld [vmem:[%s11377_s15 + $0x788] sm:$0xff] }
 0x16e   : > { %v10587_v61 = vcombine.high %v1633_v53, %v1645_v54  ;;  %v10586_v7 = vcombine.low %v1633_v53, %v1645_v54  ;;  %v9820_v8 = vcombine.low %v866_v56, %v878_v57  ;;  %v1526_v48 = vld [vmem:[%s11377_s15 + $0x1c28] sm:$0xff] }
 0x16f   : > { %v1106_v53 = vld [vmem:[%s11377_s15 + $0xf08] sm:$0xff] }
 0x170   : > { %7758 = vmatpush1.bf16.msra.mxu1 %v10370_v62  ;;  %7799 = vmatpush1.bf16.msra.mxu0 %v9604_v2  ;;  %v9821_v62 = vcombine.high %v866_v56, %v878_v57  ;;  %v11560_v2 = vsub.s32 4, %v11460_v35  ;;  %v1118_v54 = vld [vmem:[%s11377_s15 + $0xf68] sm:$0xff] }
 0x171   : > { %7759 = vmatprep.subr.bf16.mxu1 %v10347_v3  ;;  %7800 = vmatprep.subr.bf16.mxu0 %v9581_v4  ;;  %v1609_v3 = vld [vmem:[%s11377_s15 + $0x1ec0] sm:$0xff]  ;;  %v1490_v56 = vld [vmem:[%s11377_s15 + $0x1b08] sm:$0xff] }
 0x172   : > { %v1621_v4 = vld [vmem:[%s11377_s15 + $0x1f20] sm:$0xff]  ;;  %v1502_v57 = vld [vmem:[%s11377_s15 + $0x1b68] sm:$0xff] }
 0x173   : > { %v10562_v17 = vcombine.low %v1609_v3, %v1621_v4 }
 0x174   : > { %7760 = vmatpush1.bf16.msra.mxu1 %v10346_v10  ;;  %7801 = vmatpush1.bf16.msra.mxu0 %v9580_v11  ;;  %v366_v10 = vrot.slane %v11468_v38, %v11560_v2  ;;  %v10563_v11 = vcombine.high %v1609_v3, %v1621_v4  ;;  %v1082_v3 = vld [vmem:[%s11377_s15 + $0xe48] sm:$0xff] }
 0x175   : > { %7761 = vmatprep.subr.bf16.mxu1 %v10707_v12  ;;  %7802 = vmatprep.subr.bf16.mxu0 %v9941_v13  ;;  %v9797_v12 = vcombine.high %v842_v5, %v854_v6  ;;  %v1585_v13 = vld [vmem:[%s11377_s15 + $0x1e00] sm:$0xff]  ;;  %v1094_v4 = vld [vmem:[%s11377_s15 + $0xea8] sm:$0xff] }
 0x176   : > { %v10539_v38 = vcombine.high %v1585_v13, %v1597_v14  ;;  %v10538_v25 = vcombine.low %v1585_v13, %v1597_v14  ;;  %v1070_v13 = vld [vmem:[%s11377_s15 + $0xde8] sm:$0xff] }
 0x177   : > { %v1442_v14 = vld [vmem:[%s11377_s15 + $0x1988] sm:$0xff] }
 0x178   : > { %7762 = vmatpush2.bf16.msra.mxu1 %v10706_v18  ;;  %7803 = vmatpush2.bf16.msra.mxu0 %v9940_v19  ;;  %v9796_v18 = vcombine.low %v842_v5, %v854_v6  ;;  %v609_v19 = vadd.f32 %v11507_v9, %v366_v10  ;;  %v1466_v5 = vld [vmem:[%s11377_s15 + $0x1a48] sm:$0xff]  ;;  %v10037_v10 = vcombine.high %v1082_v3, %v1094_v4 }
 0x179   : > { %7763 = vmatprep.subr.bf16.mxu1 %v10683_v20  ;;  %7804 = vmatprep.subr.bf16.mxu0 %v9917_v21  ;;  %v9773_v20 = vcombine.high %v818_v15, %v830_v16  ;;  %v1178_v21 = vld [vmem:[%s11377_s15 + $0x1148] sm:$0xff] }
 0x17a   : > { %v10133_v9 = vcombine.high %v1178_v21, %v1190_v22  ;;  %v10132_v34 = vcombine.low %v1178_v21, %v1190_v22  ;;  %v1478_v6 = vld [vmem:[%s11377_s15 + $0x1aa8] sm:$0xff] }
 0x17b   : > { %v1418_v21 = vld [vmem:[%s11377_s15 + $0x18c8] sm:$0xff] }
 0x17c   : > { %7764 = vmatpush2.bf16.msra.mxu1 %v10682_v27  ;;  %7805 = vmatpush2.bf16.msra.mxu0 %v9916_v28  ;;  %v9772_v27 = vcombine.low %v818_v15, %v830_v16  ;;  %v617_v28 = vmax.f32 %v609_v19, 0.0  ;;  %v1454_v15 = vld [vmem:[%s11377_s15 + $0x19e8] sm:$0xff]  ;;  %v10036_v16 = vcombine.low %v1082_v3, %v1094_v4 }
 0x17d   : > { %7765 = vmatprep.subr.bf16.mxu1 %v10659_v29  ;;  %7806 = vmatprep.subr.bf16.mxu0 %v9893_v30  ;;  %v10517_v29 = vcombine.high %v1562_v23, %v1574_v24  ;;  %v1154_v30 = vld [vmem:[%s11377_s15 + $0x1088] sm:$0xff]  ;;  %v10397_v19 = vcombine.high %v1442_v14, %v1454_v15 }
 0x17e   : > { %v1430_v22 = vld [vmem:[%s11377_s15 + $0x1928] sm:$0xff] }
 0x17f   : > { %v1718_v3 = vld [vmem:[%s11377_s15 + $0x2228] sm:$0xff] }
 0x180   : > { %7766 = vmatpush2.bf16.msra.mxu1 %v10658_v41  ;;  %7807 = vmatpush2.bf16.msra.mxu0 %v9892_v42  ;;  %v11581_v41 = vpack.c.bf16 %v617_v28, %v617_v28  ;;  %v10516_v42 = vcombine.low %v1562_v23, %v1574_v24  ;;  %v10396_v24 = vcombine.low %v1442_v14, %v1454_v15  ;;  %v1010_v28 = vld [vmem:[%s11377_s15 + $0xc08] sm:$0xff] }
 0x181   : > { %7767 = vmatprep.subr.bf16.mxu1 %v10635_v43  ;;  %7808 = vmatprep.subr.bf16.mxu0 %v9869_v44  ;;  %v10109_v43 = vcombine.high %v1154_v30, %v1166_v31  ;;  %v10493_v44 = vcombine.high %v1538_v32, %v1550_v33 }
 0x184   : > { %7768 = vmatpush2.bf16.msra.mxu1 %v10634_v49  ;;  %7809 = vmatpush2.bf16.msra.mxu0 %v9868_v50  ;;  %v10108_v49 = vcombine.low %v1154_v30, %v1166_v31  ;;  %v10492_v50 = vcombine.low %v1538_v32, %v1550_v33  ;;  %v1406_v30 = vld [vmem:[%s11377_s15 + $0x1868] sm:$0xff]  ;;  %v10372_v32 = vcombine.low %v1418_v21, %v1430_v22 }
 0x185   : > { %7769 = vmatprep.subr.bf16.mxu1 %v10611_v51  ;;  %7810 = vmatprep.subr.bf16.mxu0 %v9845_v52  ;;  %v10085_v51 = vcombine.high %v1130_v45, %v1142_v46  ;;  %v10469_v52 = vcombine.high %v1514_v47, %v1526_v48 }
 0x188   : > { %7770 = vmatpush2.bf16.msra.mxu1 %v10610_v58  ;;  %7811 = vmatpush2.bf16.msra.mxu0 %v9844_v59  ;;  %v10084_v58 = vcombine.low %v1130_v45, %v1142_v46  ;;  %v10468_v59 = vcombine.low %v1514_v47, %v1526_v48  ;;  %v1766_v45 = vld [vmem:[%s11377_s15 + $0x23a8] sm:$0xff] }
 0x189   : > { %7771 = vmatprep.subr.bf16.mxu1 %v10587_v61  ;;  %7812 = vmatprep.subr.bf16.mxu0 %v9821_v62  ;;  %v10061_v61 = vcombine.high %v1106_v53, %v1118_v54  ;;  %v10445_v62 = vcombine.high %v1490_v56, %v1502_v57 }
 0x18c   : > { %7772 = vmatpush2.bf16.msra.mxu1 %v10586_v7  ;;  %7813 = vmatpush2.bf16.msra.mxu0 %v9820_v8  ;;  %v10060_v7 = vcombine.low %v1106_v53, %v1118_v54  ;;  %v10444_v8 = vcombine.low %v1490_v56, %v1502_v57  ;;  %v1742_v53 = vld [vmem:[%s11377_s15 + $0x22e8] sm:$0xff] }
 0x18d   : > { %7773 = vmatprep.subr.bf16.mxu1 %v10563_v11  ;;  %7814 = vmatprep.subr.bf16.mxu0 %v9797_v12  ;;  %v10421_v11 = vcombine.high %v1466_v5, %v1478_v6  ;;  %v1058_v12 = vld [vmem:[%s11377_s15 + $0xd88] sm:$0xff] }
 0x18e   : > { %v10012_v23 = vcombine.low %v1058_v12, %v1070_v13 }
 0x190   : > { %7774 = vmatpush2.bf16.msra.mxu1 %v10562_v17  ;;  %7815 = vmatpush2.bf16.msra.mxu0 %v9796_v18  ;;  %v10420_v17 = vcombine.low %v1466_v5, %v1478_v6  ;;  %v10013_v18 = vcombine.high %v1058_v12, %v1070_v13  ;;  %v1694_v12 = vld [vmem:[%s11377_s15 + $0x2168] sm:$0xff] }
 0x191   : > { %7775 = vmatprep.subr.bf16.mxu1 %v10539_v38  ;;  %7816 = vmatprep.subr.bf16.mxu0 %v9773_v20  ;;  %v1034_v38 = vld [vmem:[%s11377_s15 + $0xcc8] sm:$0xff] }
 0x192   : > { %v1046_v20 = vld [vmem:[%s11377_s15 + $0xd28] sm:$0xff] }
 0x193   : > { %v9988_v31 = vcombine.low %v1034_v38, %v1046_v20 }
 0x194   : > { %7776 = vmatpush2.bf16.msra.mxu1 %v10538_v25  ;;  %7817 = vmatpush2.bf16.msra.mxu0 %v9772_v27  ;;  %v9989_v25 = vcombine.high %v1034_v38, %v1046_v20  ;;  %v10373_v27 = vcombine.high %v1418_v21, %v1430_v22  ;;  %v1670_v38 = vld [vmem:[%s11377_s15 + $0x20a8] sm:$0xff] }
 0x195   : > { %7827 = vmatprep.subr.bf16.mxu1 %v10133_v9  ;;  %7868 = vmatprep.subr.bf16.mxu0 %v10517_v29  ;;  %v1022_v9 = vld [vmem:[%s11377_s15 + $0xc68] sm:$0xff] }
 0x196   : > { %v1394_v29 = vld [vmem:[%s11377_s15 + $0x1808] sm:$0xff]  ;;  %v9965_v33 = vcombine.high %v1010_v28, %v1022_v9  ;;  %v9964_v46 = vcombine.low %v1010_v28, %v1022_v9 }
 0x197   : > { %7778 = vmatmul.mubr.bf16.vlgmr.msra.gmra.mxu1 %v11581_v41  ;;  %7819 = vmatmul.mubr.bf16.vlgmr.msra.gmra.mxu0 %v11497_v1  ;;  %v10348_v47 = vcombine.low %v1394_v29, %v1406_v30  ;;  %v1646_v28 = vld [vmem:[%s11377_s15 + $0x1fe8] sm:$0xff] }
 0x198   : > { %7828 = vmatpush1.bf16.msra.mxu1 %v10132_v34  ;;  %7859 = vmatprep.mubr.bf16.mxu1 %v11495_v0  ;;  %v10349_v34 = vcombine.high %v1394_v29, %v1406_v30 }
 0x199   : > { %7869 = vmatpush1.bf16.msra.mxu0 %v10516_v42  ;;  %7900 = vmatprep.mubr.bf16.mxu0 %v11517_v26  ;;  %v1370_v42 = vld [vmem:[%s11377_s15 + $0x1748] sm:$0xff] }
 0x19a   : > { %7829 = vmatprep.subr.bf16.mxu1 %v10109_v43  ;;  %7870 = vmatprep.subr.bf16.mxu0 %v10493_v44  ;;  %v1382_v43 = vld [vmem:[%s11377_s15 + $0x17a8] sm:$0xff] }
 0x19b   : > { %v1754_v44 = vld [vmem:[%s11377_s15 + $0x2348] sm:$0xff]  ;;  %v10325_v48 = vcombine.high %v1370_v42, %v1382_v43  ;;  %v10324_v54 = vcombine.low %v1370_v42, %v1382_v43 }
 0x19c   : > { %7830 = vmatpush1.bf16.msra.mxu1 %v10108_v49  ;;  %v10709_v49 = vcombine.high %v1754_v44, %v1766_v45  ;;  %v10708_v56 = vcombine.low %v1754_v44, %v1766_v45  ;;  %v1622_v42 = vld [vmem:[%s11377_s15 + $0x1f28] sm:$0xff] }
 0x19d   : > { %7871 = vmatpush1.bf16.msra.mxu0 %v10492_v50  ;;  %7831 = vmatprep.subr.bf16.mxu1 %v10085_v51  ;;  %v1346_v50 = vld [vmem:[%s11377_s15 + $0x1688] sm:$0xff] }
 0x19e   : > { %7872 = vmatprep.subr.bf16.mxu0 %v10469_v52  ;;  %v1358_v51 = vld [vmem:[%s11377_s15 + $0x16e8] sm:$0xff] }
 0x19f   : > { %v1730_v52 = vld [vmem:[%s11377_s15 + $0x2288] sm:$0xff]  ;;  %v10301_v57 = vcombine.high %v1346_v50, %v1358_v51  ;;  %v10300_v4 = vcombine.low %v1346_v50, %v1358_v51 }
 0x1a0   : > { %7832 = vmatpush1.bf16.msra.mxu1 %v10084_v58  ;;  %v10685_v58 = vcombine.high %v1730_v52, %v1742_v53  ;;  %v10684_v5 = vcombine.low %v1730_v52, %v1742_v53  ;;  %v1598_v50 = vld [vmem:[%s11377_s15 + $0x1e68] sm:$0xff] }
 0x1a1   : > { %7873 = vmatpush1.bf16.msra.mxu0 %v10468_v59  ;;  %7833 = vmatprep.subr.bf16.mxu1 %v10061_v61  ;;  %v1322_v59 = vld [vmem:[%s11377_s15 + $0x15c8] sm:$0xff] }
 0x1a2   : > { %7874 = vmatprep.subr.bf16.mxu0 %v10445_v62  ;;  %v1334_v61 = vld [vmem:[%s11377_s15 + $0x1628] sm:$0xff] }
 0x1a3   : > { %v1706_v62 = vld [vmem:[%s11377_s15 + $0x21c8] sm:$0xff]  ;;  %v10277_v6 = vcombine.high %v1322_v59, %v1334_v61  ;;  %v10276_v13 = vcombine.low %v1322_v59, %v1334_v61  ;;  %v1191_v59 = vld [vmem:[%s11377_s15 + $0x11b0] sm:$0xff] }
 0x1a4   : > { %7834 = vmatpush1.bf16.msra.mxu1 %v10060_v7  ;;  %v10661_v7 = vcombine.high %v1706_v62, %v1718_v3  ;;  %v10660_v14 = vcombine.low %v1706_v62, %v1718_v3 }
 0x1a5   : > { %7875 = vmatpush1.bf16.msra.mxu0 %v10444_v8  ;;  %7835 = vmatprep.subr.bf16.mxu1 %v10037_v10  ;;  %v1298_v8 = vld [vmem:[%s11377_s15 + $0x1508] sm:$0xff] }
 0x1a6   : > { %7876 = vmatprep.subr.bf16.mxu0 %v10421_v11  ;;  %v1310_v10 = vld [vmem:[%s11377_s15 + $0x1568] sm:$0xff] }
 0x1a7   : > { %v1682_v11 = vld [vmem:[%s11377_s15 + $0x2108] sm:$0xff]  ;;  %v10253_v15 = vcombine.high %v1298_v8, %v1310_v10  ;;  %v10252_v20 = vcombine.low %v1298_v8, %v1310_v10  ;;  %v1155_v8 = vld [vmem:[%s11377_s15 + $0x1090] sm:$0xff] }
 0x1a8   : > { %7836 = vmatpush1.bf16.msra.mxu1 %v10036_v16  ;;  %v10637_v16 = vcombine.high %v1682_v11, %v1694_v12  ;;  %v10636_v21 = vcombine.low %v1682_v11, %v1694_v12  ;;  %v1167_v10 = vld [vmem:[%s11377_s15 + $0x10f0] sm:$0xff] }
 0x1a9   : > { %7877 = vmatpush1.bf16.msra.mxu0 %v10420_v17  ;;  %7837 = vmatprep.subr.bf16.mxu1 %v10013_v18  ;;  %v1274_v17 = vld [vmem:[%s11377_s15 + $0x1448] sm:$0xff] }
 0x1aa   : > { %7878 = vmatprep.subr.bf16.mxu0 %v10397_v19  ;;  %v1286_v18 = vld [vmem:[%s11377_s15 + $0x14a8] sm:$0xff] }
 0x1ab   : > { %v1658_v19 = vld [vmem:[%s11377_s15 + $0x2048] sm:$0xff]  ;;  %v10229_v22 = vcombine.high %v1274_v17, %v1286_v18  ;;  %v10228_v9 = vcombine.low %v1274_v17, %v1286_v18  ;;  %v1143_v17 = vld [vmem:[%s11377_s15 + $0x1030] sm:$0xff] }
 0x1ac   : > { %7838 = vmatpush1.bf16.msra.mxu1 %v10012_v23  ;;  %v10613_v23 = vcombine.high %v1658_v19, %v1670_v38  ;;  %v10612_v29 = vcombine.low %v1658_v19, %v1670_v38  ;;  %v10110_v19 = vcombine.low %v1155_v8, %v1167_v10 }
 0x1ad   : > { %7879 = vmatpush1.bf16.msra.mxu0 %v10396_v24  ;;  %7839 = vmatprep.subr.bf16.mxu1 %v9989_v25  ;;  %v1250_v24 = vld [vmem:[%s11377_s15 + $0x1388] sm:$0xff] }
 0x1ae   : > { %7880 = vmatprep.subr.bf16.mxu0 %v10373_v27  ;;  %v1262_v25 = vld [vmem:[%s11377_s15 + $0x13e8] sm:$0xff] }
 0x1af   : > { %v1634_v27 = vld [vmem:[%s11377_s15 + $0x1f88] sm:$0xff]  ;;  %v10205_v30 = vcombine.high %v1250_v24, %v1262_v25  ;;  %v10204_v43 = vcombine.low %v1250_v24, %v1262_v25  ;;  %v1119_v24 = vld [vmem:[%s11377_s15 + $0xf70] sm:$0xff] }
 0x1b0   : > { %7840 = vmatpush1.bf16.msra.mxu1 %v9988_v31  ;;  %v10589_v31 = vcombine.high %v1634_v27, %v1646_v28  ;;  %v10588_v44 = vcombine.low %v1634_v27, %v1646_v28 }
 0x1b1   : > { %7881 = vmatpush1.bf16.msra.mxu0 %v10372_v32  ;;  %7841 = vmatprep.subr.bf16.mxu1 %v9965_v33  ;;  %v1226_v32 = vld [vmem:[%s11377_s15 + $0x12c8] sm:$0xff] }
 0x1b2   : > { %7882 = vmatprep.subr.bf16.mxu0 %v10349_v34  ;;  %v1238_v33 = vld [vmem:[%s11377_s15 + $0x1328] sm:$0xff] }
 0x1b3   : > { %v1610_v34 = vld [vmem:[%s11377_s15 + $0x1ec8] sm:$0xff]  ;;  %v10181_v45 = vcombine.high %v1226_v32, %v1238_v33  ;;  %v10180_v51 = vcombine.low %v1226_v32, %v1238_v33  ;;  %v1095_v32 = vld [vmem:[%s11377_s15 + $0xeb0] sm:$0xff] }
 0x1b4   : > { %7842 = vmatpush1.bf16.msra.mxu1 %v9964_v46  ;;  %v10565_v46 = vcombine.high %v1610_v34, %v1622_v42  ;;  %v10564_v52 = vcombine.low %v1610_v34, %v1622_v42 }
 0x1b5   : > { %7883 = vmatpush1.bf16.msra.mxu0 %v10348_v47  ;;  %7843 = vmatprep.subr.bf16.mxu1 %v10325_v48  ;;  %v1202_v47 = vld [vmem:[%s11377_s15 + $0x1208] sm:$0xff] }
 0x1b6   : > { %7884 = vmatprep.subr.bf16.mxu0 %v10709_v49  ;;  %v1214_v48 = vld [vmem:[%s11377_s15 + $0x1268] sm:$0xff] }
 0x1b7   : > { %v1586_v49 = vld [vmem:[%s11377_s15 + $0x1e08] sm:$0xff]  ;;  %v10157_v53 = vcombine.high %v1202_v47, %v1214_v48  ;;  %v10156_v61 = vcombine.low %v1202_v47, %v1214_v48  ;;  %v1071_v47 = vld [vmem:[%s11377_s15 + $0xdf0] sm:$0xff] }
 0x1b8   : > { %7844 = vmatpush2.bf16.msra.mxu1 %v10324_v54  ;;  %v10541_v54 = vcombine.high %v1586_v49, %v1598_v50  ;;  %v10540_v62 = vcombine.low %v1586_v49, %v1598_v50 }
 0x1b9   : > { %7885 = vmatpush2.bf16.msra.mxu0 %v10708_v56  ;;  %7845 = vmatprep.subr.bf16.mxu1 %v10301_v57  ;;  %v795_v56 = vld [vmem:[%s11377_s15 + $0x550] sm:$0xff] }
 0x1ba   : > { %7886 = vmatprep.subr.bf16.mxu0 %v10685_v58  ;;  %v807_v57 = vld [vmem:[%s11377_s15 + $0x5b0] sm:$0xff] }
 0x1bb   : > { %v1179_v58 = vld [vmem:[%s11377_s15 + $0x1150] sm:$0xff]  ;;  %v9751_v3 = vcombine.high %v795_v56, %v807_v57 }
 0x1bc   : > { %7846 = vmatpush2.bf16.msra.mxu1 %v10300_v4  ;;  %v10135_v4 = vcombine.high %v1179_v58, %v1191_v59  ;;  %v10134_v11 = vcombine.low %v1179_v58, %v1191_v59 }
 0x1bd   : > { %7887 = vmatpush2.bf16.msra.mxu0 %v10684_v5  ;;  %7847 = vmatprep.subr.bf16.mxu1 %v10277_v6  ;;  %v771_v5 = vld [vmem:[%s11377_s15 + $0x490] sm:$0xff] }
 0x1be   : > { %7888 = vmatprep.subr.bf16.mxu0 %v10661_v7  ;;  %v783_v6 = vld [vmem:[%s11377_s15 + $0x4f0] sm:$0xff]  ;;  %v9750_v7 = vcombine.low %v795_v56, %v807_v57 }
 0x1bf   : > { %v9727_v12 = vcombine.high %v771_v5, %v783_v6  ;;  %v9726_v18 = vcombine.low %v771_v5, %v783_v6  ;;  %v1047_v56 = vld [vmem:[%s11377_s15 + $0xd30] sm:$0xff] }
 0x1c0   : > { %7848 = vmatpush2.bf16.msra.mxu1 %v10276_v13  ;;  %v747_v13 = vld [vmem:[%s11377_s15 + $0x3d0] sm:$0xff] }
 0x1c1   : > { %7889 = vmatpush2.bf16.msra.mxu0 %v10660_v14  ;;  %7849 = vmatprep.subr.bf16.mxu1 %v10253_v15  ;;  %v759_v14 = vld [vmem:[%s11377_s15 + $0x430] sm:$0xff]  ;;  %v10111_v15 = vcombine.high %v1155_v8, %v1167_v10 }
 0x1c2   : > { %7890 = vmatprep.subr.bf16.mxu0 %v10637_v16  ;;  %v1131_v16 = vld [vmem:[%s11377_s15 + $0xfd0] sm:$0xff]  ;;  %v9703_v38 = vcombine.high %v747_v13, %v759_v14  ;;  %v9702_v25 = vcombine.low %v747_v13, %v759_v14 }
 0x1c3   : > { %v10086_v27 = vcombine.low %v1131_v16, %v1143_v17  ;;  %v1023_v5 = vld [vmem:[%s11377_s15 + $0xc70] sm:$0xff] }
 0x1c4   : > { %7850 = vmatpush2.bf16.msra.mxu1 %v10252_v20  ;;  %v10087_v20 = vcombine.high %v1131_v16, %v1143_v17  ;;  %v1371_v13 = vld [vmem:[%s11377_s15 + $0x1750] sm:$0xff] }
 0x1c5   : > { %7891 = vmatpush2.bf16.msra.mxu0 %v10636_v21  ;;  %7851 = vmatprep.subr.bf16.mxu1 %v10229_v22  ;;  %v723_v21 = vld [vmem:[%s11377_s15 + $0x310] sm:$0xff] }
 0x1c6   : > { %7892 = vmatprep.subr.bf16.mxu0 %v10613_v23  ;;  %v735_v22 = vld [vmem:[%s11377_s15 + $0x370] sm:$0xff] }
 0x1c7   : > { %v1107_v23 = vld [vmem:[%s11377_s15 + $0xf10] sm:$0xff]  ;;  %v9679_v28 = vcombine.high %v723_v21, %v735_v22  ;;  %v9678_v33 = vcombine.low %v723_v21, %v735_v22 }
 0x1c8   : > { %7852 = vmatpush2.bf16.msra.mxu1 %v10228_v9  ;;  %v10063_v9 = vcombine.high %v1107_v23, %v1119_v24  ;;  %v10062_v34 = vcombine.low %v1107_v23, %v1119_v24  ;;  %v1383_v14 = vld [vmem:[%s11377_s15 + $0x17b0] sm:$0xff] }
 0x1c9   : > { %7893 = vmatpush2.bf16.msra.mxu0 %v10612_v29  ;;  %7853 = vmatprep.subr.bf16.mxu1 %v10205_v30  ;;  %v699_v29 = vld [vmem:[%s11377_s15 + $0x250] sm:$0xff]  ;;  %v10326_v23 = vcombine.low %v1371_v13, %v1383_v14 }
 0x1ca   : > { %7894 = vmatprep.subr.bf16.mxu0 %v10589_v31  ;;  %v711_v30 = vld [vmem:[%s11377_s15 + $0x2b0] sm:$0xff] }
 0x1cb   : > { %v1083_v31 = vld [vmem:[%s11377_s15 + $0xe50] sm:$0xff]  ;;  %v9655_v42 = vcombine.high %v699_v29, %v711_v30  ;;  %v9654_v48 = vcombine.low %v699_v29, %v711_v30 }
 0x1cc   : > { %7854 = vmatpush2.bf16.msra.mxu1 %v10204_v43  ;;  %v10039_v43 = vcombine.high %v1083_v31, %v1095_v32  ;;  %v10038_v49 = vcombine.low %v1083_v31, %v1095_v32  ;;  %v1359_v21 = vld [vmem:[%s11377_s15 + $0x16f0] sm:$0xff] }
 0x1cd   : > { %7895 = vmatpush2.bf16.msra.mxu0 %v10588_v44  ;;  %7855 = vmatprep.subr.bf16.mxu1 %v10181_v45  ;;  %v675_v44 = vld [vmem:[%s11377_s15 + $0x190] sm:$0xff] }
 0x1ce   : > { %7896 = vmatprep.subr.bf16.mxu0 %v10565_v46  ;;  %v687_v45 = vld [vmem:[%s11377_s15 + $0x1f0] sm:$0xff] }
 0x1cf   : > { %v1059_v46 = vld [vmem:[%s11377_s15 + $0xd90] sm:$0xff]  ;;  %v9631_v50 = vcombine.high %v675_v44, %v687_v45  ;;  %v9630_v57 = vcombine.low %v675_v44, %v687_v45 }
 0x1d0   : > { %7856 = vmatpush2.bf16.msra.mxu1 %v10180_v51  ;;  %v10015_v51 = vcombine.high %v1059_v46, %v1071_v47  ;;  %v10014_v58 = vcombine.low %v1059_v46, %v1071_v47  ;;  %v1335_v29 = vld [vmem:[%s11377_s15 + $0x1630] sm:$0xff] }
 0x1d1   : > { %7897 = vmatpush2.bf16.msra.mxu0 %v10564_v52  ;;  %7857 = vmatprep.subr.bf16.mxu1 %v10157_v53  ;;  %v651_v52 = vld [vmem:[%s11377_s15 + $0xd0] sm:$0xff] }
 0x1d2   : > { %7898 = vmatprep.subr.bf16.mxu0 %v10541_v54  ;;  %v663_v53 = vld [vmem:[%s11377_s15 + $0x130] sm:$0xff] }
 0x1d3   : > { %v1035_v54 = vld [vmem:[%s11377_s15 + $0xcd0] sm:$0xff]  ;;  %v9607_v59 = vcombine.high %v651_v52, %v663_v53  ;;  %v9606_v6 = vcombine.low %v651_v52, %v663_v53 }
 0x1d4   : > { %7858 = vmatpush2.bf16.msra.mxu1 %v10156_v61  ;;  %v9991_v61 = vcombine.high %v1035_v54, %v1047_v56  ;;  %v1311_v44 = vld [vmem:[%s11377_s15 + $0x1570] sm:$0xff] }
 0x1d5   : > { %7899 = vmatpush2.bf16.msra.mxu0 %v10540_v62  ;;  %7909 = vmatprep.subr.bf16.mxu1 %v9751_v3  ;;  %v627_v62 = vld [vmem:[%s11377_s15 + $0x10] sm:$0xff] }
 0x1d6   : > { %7950 = vmatprep.subr.bf16.mxu0 %v10135_v4  ;;  %v639_v3 = vld [vmem:[%s11377_s15 + $0x70] sm:$0xff] }
 0x1d7   : > { %7860 = vmatmul.mubr.bf16.vlgmr.msra.gmra.mxu1 %v11489_v60  ;;  %v1011_v4 = vld [vmem:[%s11377_s15 + $0xc10] sm:$0xff]  ;;  %v9583_v8 = vcombine.high %v627_v62, %v639_v3 }
 0x1d8   : > { %7901 = vmatmul.mubr.bf16.vlgmr.msra.gmra.mxu0 %v11581_v41  ;;  %7910 = vmatpush1.bf16.msra.mxu1 %v9750_v7  ;;  %v9990_v7 = vcombine.low %v1035_v54, %v1047_v56  ;;  %v9967_v10 = vcombine.high %v1011_v4, %v1023_v5  ;;  %v9966_v16 = vcombine.low %v1011_v4, %v1023_v5  ;;  %v1287_v52 = vld [vmem:[%s11377_s15 + $0x14b0] sm:$0xff] }
 0x1d9   : > { %7941 = vmatprep.mubr.bf16.mxu1 %v11493_v63  ;;  %7951 = vmatpush1.bf16.msra.mxu0 %v10134_v11  ;;  %v987_v11 = vld [vmem:[%s11377_s15 + $0xb50] sm:$0xff] }
 0x1da   : > { %7982 = vmatprep.mubr.bf16.mxu0 %v11495_v0  ;;  %7911 = vmatprep.subr.bf16.mxu1 %v9727_v12  ;;  %v999_v12 = vld [vmem:[%s11377_s15 + $0xbb0] sm:$0xff] }
 0x1db   : > { %7952 = vmatprep.subr.bf16.mxu0 %v10111_v15  ;;  %v9582_v15 = vcombine.low %v627_v62, %v639_v3  ;;  %v9943_v17 = vcombine.high %v987_v11, %v999_v12  ;;  %v9942_v22 = vcombine.low %v987_v11, %v999_v12  ;;  %v1263_v62 = vld [vmem:[%s11377_s15 + $0x13f0] sm:$0xff] }
 0x1dc   : > { %7912 = vmatpush1.bf16.msra.mxu1 %v9726_v18  ;;  %v10327_v18 = vcombine.high %v1371_v13, %v1383_v14  ;;  %v1239_v11 = vld [vmem:[%s11377_s15 + $0x1330] sm:$0xff] }
 0x1dd   : > { %7953 = vmatpush1.bf16.msra.mxu0 %v10110_v19  ;;  %7913 = vmatprep.subr.bf16.mxu1 %v9703_v38  ;;  %v963_v19 = vld [vmem:[%s11377_s15 + $0xa90] sm:$0xff] }
 0x1de   : > { %7954 = vmatprep.subr.bf16.mxu0 %v10087_v20  ;;  %v975_v38 = vld [vmem:[%s11377_s15 + $0xaf0] sm:$0xff] }
 0x1df   : > { %v1347_v20 = vld [vmem:[%s11377_s15 + $0x1690] sm:$0xff]  ;;  %v9919_v24 = vcombine.high %v963_v19, %v975_v38  ;;  %v9918_v30 = vcombine.low %v963_v19, %v975_v38 }
 0x1e0   : > { %7914 = vmatpush1.bf16.msra.mxu1 %v9702_v25  ;;  %v10303_v25 = vcombine.high %v1347_v20, %v1359_v21  ;;  %v10302_v31 = vcombine.low %v1347_v20, %v1359_v21  ;;  %v1215_v19 = vld [vmem:[%s11377_s15 + $0x1270] sm:$0xff] }
 0x1e1   : > { %7955 = vmatpush1.bf16.msra.mxu0 %v10086_v27  ;;  %7915 = vmatprep.subr.bf16.mxu1 %v9679_v28  ;;  %v939_v27 = vld [vmem:[%s11377_s15 + $0x9d0] sm:$0xff] }
 0x1e2   : > { %7956 = vmatprep.subr.bf16.mxu0 %v10063_v9  ;;  %v951_v28 = vld [vmem:[%s11377_s15 + $0xa30] sm:$0xff] }
 0x1e3   : > { %v1323_v9 = vld [vmem:[%s11377_s15 + $0x15d0] sm:$0xff]  ;;  %v9895_v32 = vcombine.high %v939_v27, %v951_v28  ;;  %v9894_v45 = vcombine.low %v939_v27, %v951_v28  ;;  %v808_v27 = vld [vmem:[%s11377_s15 + $0x5b8] sm:$0xff] }
 0x1e4   : > { %7916 = vmatpush1.bf16.msra.mxu1 %v9678_v33  ;;  %v10279_v33 = vcombine.high %v1323_v9, %v1335_v29  ;;  %v10278_v46 = vcombine.low %v1323_v9, %v1335_v29 }
 0x1e5   : > { %7957 = vmatpush1.bf16.msra.mxu0 %v10062_v34  ;;  %7917 = vmatprep.subr.bf16.mxu1 %v9655_v42  ;;  %v915_v34 = vld [vmem:[%s11377_s15 + $0x910] sm:$0xff] }
 0x1e6   : > { %7958 = vmatprep.subr.bf16.mxu0 %v10039_v43  ;;  %v927_v42 = vld [vmem:[%s11377_s15 + $0x970] sm:$0xff] }
 0x1e7   : > { %v1299_v43 = vld [vmem:[%s11377_s15 + $0x1510] sm:$0xff]  ;;  %v9871_v47 = vcombine.high %v915_v34, %v927_v42  ;;  %v9870_v53 = vcombine.low %v915_v34, %v927_v42 }
 0x1e8   : > { %7918 = vmatpush1.bf16.msra.mxu1 %v9654_v48  ;;  %v10255_v48 = vcombine.high %v1299_v43, %v1311_v44  ;;  %v10254_v54 = vcombine.low %v1299_v43, %v1311_v44  ;;  %v772_v43 = vld [vmem:[%s11377_s15 + $0x498] sm:$0xff] }
 0x1e9   : > { %7959 = vmatpush1.bf16.msra.mxu0 %v10038_v49  ;;  %7919 = vmatprep.subr.bf16.mxu1 %v9631_v50  ;;  %v891_v49 = vld [vmem:[%s11377_s15 + $0x850] sm:$0xff]  ;;  %v784_v44 = vld [vmem:[%s11377_s15 + $0x4f8] sm:$0xff] }
 0x1ea   : > { %7960 = vmatprep.subr.bf16.mxu0 %v10015_v51  ;;  %v903_v50 = vld [vmem:[%s11377_s15 + $0x8b0] sm:$0xff] }
 0x1eb   : > { %v1275_v51 = vld [vmem:[%s11377_s15 + $0x1450] sm:$0xff]  ;;  %v9847_v56 = vcombine.high %v891_v49, %v903_v50  ;;  %v9846_v3 = vcombine.low %v891_v49, %v903_v50 }
 0x1ec   : > { %7920 = vmatpush1.bf16.msra.mxu1 %v9630_v57  ;;  %v10231_v57 = vcombine.high %v1275_v51, %v1287_v52  ;;  %v10230_v4 = vcombine.low %v1275_v51, %v1287_v52  ;;  %v1527_v49 = vld [vmem:[%s11377_s15 + $0x1c30] sm:$0xff]  ;;  %v9729_v52 = vcombine.high %v772_v43, %v784_v44 }
 0x1ed   : > { %7961 = vmatpush1.bf16.msra.mxu0 %v10014_v58  ;;  %7921 = vmatprep.subr.bf16.mxu1 %v9607_v59  ;;  %v867_v58 = vld [vmem:[%s11377_s15 + $0x790] sm:$0xff] }
 0x1ee   : > { %7962 = vmatprep.subr.bf16.mxu0 %v9991_v61  ;;  %v879_v59 = vld [vmem:[%s11377_s15 + $0x7f0] sm:$0xff] }
 0x1ef   : > { %v1251_v61 = vld [vmem:[%s11377_s15 + $0x1390] sm:$0xff]  ;;  %v9823_v5 = vcombine.high %v867_v58, %v879_v59  ;;  %v9822_v12 = vcombine.low %v867_v58, %v879_v59 }
 0x1f0   : > { %7922 = vmatpush1.bf16.msra.mxu1 %v9606_v6  ;;  %v10207_v6 = vcombine.high %v1251_v61, %v1263_v62  ;;  %v10206_v13 = vcombine.low %v1251_v61, %v1263_v62  ;;  %v9728_v61 = vcombine.low %v772_v43, %v784_v44  ;;  %v1419_v43 = vld [vmem:[%s11377_s15 + $0x18d0] sm:$0xff] }
 0x1f1   : > { %7963 = vmatpush1.bf16.msra.mxu0 %v9990_v7  ;;  %7923 = vmatprep.subr.bf16.mxu1 %v9583_v8  ;;  %v843_v7 = vld [vmem:[%s11377_s15 + $0x6d0] sm:$0xff] }
 0x1f2   : > { %7964 = vmatprep.subr.bf16.mxu0 %v9967_v10  ;;  %v855_v8 = vld [vmem:[%s11377_s15 + $0x730] sm:$0xff] }
 0x1f3   : > { %v1227_v10 = vld [vmem:[%s11377_s15 + $0x12d0] sm:$0xff]  ;;  %v9799_v14 = vcombine.high %v843_v7, %v855_v8  ;;  %v9798_v38 = vcombine.low %v843_v7, %v855_v8 }
 0x1f4   : > { %7924 = vmatpush1.bf16.msra.mxu1 %v9582_v15  ;;  %v10183_v15 = vcombine.high %v1227_v10, %v1239_v11  ;;  %v10182_v20 = vcombine.low %v1227_v10, %v1239_v11  ;;  %v1503_v7 = vld [vmem:[%s11377_s15 + $0x1b70] sm:$0xff]  ;;  %v724_v11 = vld [vmem:[%s11377_s15 + $0x318] sm:$0xff] }
 0x1f5   : > { %7965 = vmatpush1.bf16.msra.mxu0 %v9966_v16  ;;  %7925 = vmatprep.subr.bf16.mxu1 %v9943_v17  ;;  %v819_v16 = vld [vmem:[%s11377_s15 + $0x610] sm:$0xff] }
 0x1f6   : > { %7966 = vmatprep.subr.bf16.mxu0 %v10327_v18  ;;  %v831_v17 = vld [vmem:[%s11377_s15 + $0x670] sm:$0xff] }
 0x1f7   : > { %v1203_v18 = vld [vmem:[%s11377_s15 + $0x1210] sm:$0xff]  ;;  %v9775_v21 = vcombine.high %v819_v16, %v831_v17  ;;  %v9774_v28 = vcombine.low %v819_v16, %v831_v17 }
 0x1f8   : > { %7926 = vmatpush2.bf16.msra.mxu1 %v9942_v22  ;;  %v10159_v22 = vcombine.high %v1203_v18, %v1215_v19  ;;  %v10158_v9 = vcombine.low %v1203_v18, %v1215_v19  ;;  %v1431_v44 = vld [vmem:[%s11377_s15 + $0x1930] sm:$0xff] }
 0x1f9   : > { %7967 = vmatpush2.bf16.msra.mxu0 %v10326_v23  ;;  %7927 = vmatprep.subr.bf16.mxu1 %v9919_v24  ;;  %v1563_v23 = vld [vmem:[%s11377_s15 + $0x1d50] sm:$0xff] }
 0x1fa   : > { %7968 = vmatprep.subr.bf16.mxu0 %v10303_v25  ;;  %v1575_v24 = vld [vmem:[%s11377_s15 + $0x1db0] sm:$0xff]  ;;  %v796_v25 = vld [vmem:[%s11377_s15 + $0x558] sm:$0xff] }
 0x1fb   : > { %v10519_v29 = vcombine.high %v1563_v23, %v1575_v24  ;;  %v10518_v34 = vcombine.low %v1563_v23, %v1575_v24 }
 0x1fc   : > { %7928 = vmatpush2.bf16.msra.mxu1 %v9918_v30  ;;  %v11719_v30 = vld [vmem:[%s11716_s6] sm:$0xff] }
 0x1fd   : > { %7969 = vmatpush2.bf16.msra.mxu0 %v10302_v31  ;;  %7929 = vmatprep.subr.bf16.mxu1 %v9895_v32  ;;  %v9753_v31 = vcombine.high %v796_v25, %v808_v27  ;;  %v1539_v32 = vld [vmem:[%s11377_s15 + $0x1c90] sm:$0xff]  ;;  %v1786_v42 = vrot.slane %v11719_v30, %v11463_v36 }
 0x1fe   : > { %7970 = vmatprep.subr.bf16.mxu0 %v10279_v33  ;;  %v1551_v33 = vld [vmem:[%s11377_s15 + $0x1cf0] sm:$0xff] }
 0x200   : > { %7930 = vmatpush2.bf16.msra.mxu1 %v9894_v45  ;;  %v9752_v45 = vcombine.low %v796_v25, %v808_v27 }
 0x201   : > { %7971 = vmatpush2.bf16.msra.mxu0 %v10278_v46  ;;  %7931 = vmatprep.subr.bf16.mxu1 %v9871_v47  ;;  %v1790_v46 = vrot.slane %v11719_v30, %v11471_v39  ;;  %v10495_v47 = vcombine.high %v1539_v32, %v1551_v33 }
 0x202   : > { %7972 = vmatprep.subr.bf16.mxu0 %v10255_v48  ;;  %v1515_v48 = vld [vmem:[%s11377_s15 + $0x1bd0] sm:$0xff] }
 0x203   : > { %v10471_v62 = vcombine.high %v1515_v48, %v1527_v49 }
 0x204   : > { %7932 = vmatpush2.bf16.msra.mxu1 %v9870_v53  ;;  %v748_v53 = vld [vmem:[%s11377_s15 + $0x3d8] sm:$0xff] }
 0x205   : > { %7973 = vmatpush2.bf16.msra.mxu0 %v10254_v54  ;;  %7933 = vmatprep.subr.bf16.mxu1 %v9847_v56  ;;  %v760_v54 = vld [vmem:[%s11377_s15 + $0x438] sm:$0xff] }
 0x206   : > { %7974 = vmatprep.subr.bf16.mxu0 %v10231_v57  ;;  %v10494_v57 = vcombine.low %v1539_v32, %v1551_v33  ;;  %v9704_v17 = vcombine.low %v748_v53, %v760_v54 }
 0x208   : > { %7934 = vmatpush2.bf16.msra.mxu1 %v9846_v3 }
 0x209   : > { %7975 = vmatpush2.bf16.msra.mxu0 %v10230_v4  ;;  %7935 = vmatprep.subr.bf16.mxu1 %v9823_v5  ;;  %v9705_v5 = vcombine.high %v748_v53, %v760_v54  ;;  %v628_v53 = vld [vmem:[%s11377_s15 + $0x18] sm:$0xff] }
 0x20a   : > { %7976 = vmatprep.subr.bf16.mxu0 %v10207_v6  ;;  %v1491_v6 = vld [vmem:[%s11377_s15 + $0x1b10] sm:$0xff]  ;;  %v640_v54 = vld [vmem:[%s11377_s15 + $0x78] sm:$0xff] }
 0x20b   : > { %v10447_v18 = vcombine.high %v1491_v6, %v1503_v7  ;;  %v10446_v23 = vcombine.low %v1491_v6, %v1503_v7  ;;  %v9584_v7 = vcombine.low %v628_v53, %v640_v54 }
 0x20c   : > { %7936 = vmatpush2.bf16.msra.mxu1 %v9822_v12  ;;  %v736_v12 = vld [vmem:[%s11377_s15 + $0x378] sm:$0xff] }
 0x20d   : > { %7977 = vmatpush2.bf16.msra.mxu0 %v10206_v13  ;;  %7937 = vmatprep.subr.bf16.mxu1 %v9799_v14  ;;  %v10470_v14 = vcombine.low %v1515_v48, %v1527_v49  ;;  %v9681_v19 = vcombine.high %v724_v11, %v736_v12  ;;  %v9680_v24 = vcombine.low %v724_v11, %v736_v12  ;;  %v1731_v11 = vld [vmem:[%s11377_s15 + $0x2290] sm:$0xff] }
 0x20e   : > { %7978 = vmatprep.subr.bf16.mxu0 %v10183_v15  ;;  %v10375_v49 = vcombine.high %v1419_v43, %v1431_v44  ;;  %v1743_v12 = vld [vmem:[%s11377_s15 + $0x22f0] sm:$0xff] }
 0x210   : > { %7938 = vmatpush2.bf16.msra.mxu1 %v9798_v38  ;;  %v1467_v38 = vld [vmem:[%s11377_s15 + $0x1a50] sm:$0xff] }
 0x211   : > { %7979 = vmatpush2.bf16.msra.mxu0 %v10182_v20  ;;  %7939 = vmatprep.subr.bf16.mxu1 %v9775_v21  ;;  %v1479_v20 = vld [vmem:[%s11377_s15 + $0x1ab0] sm:$0xff]  ;;  %v700_v21 = vld [vmem:[%s11377_s15 + $0x258] sm:$0xff] }
 0x212   : > { %7980 = vmatprep.subr.bf16.mxu0 %v10159_v22  ;;  %v712_v22 = vld [vmem:[%s11377_s15 + $0x2b8] sm:$0xff]  ;;  %v10423_v25 = vcombine.high %v1467_v38, %v1479_v20  ;;  %v10422_v32 = vcombine.low %v1467_v38, %v1479_v20  ;;  %v1707_v38 = vld [vmem:[%s11377_s15 + $0x21d0] sm:$0xff] }
 0x213   : > { %v9657_v27 = vcombine.high %v700_v21, %v712_v22  ;;  %v9656_v33 = vcombine.low %v700_v21, %v712_v22  ;;  %v1719_v20 = vld [vmem:[%s11377_s15 + $0x2230] sm:$0xff]  ;;  %v940_v21 = vld [vmem:[%s11377_s15 + $0x9d8] sm:$0xff] }
 0x214   : > { %7940 = vmatpush2.bf16.msra.mxu1 %v9774_v28  ;;  %v1443_v28 = vld [vmem:[%s11377_s15 + $0x1990] sm:$0xff]  ;;  %v952_v22 = vld [vmem:[%s11377_s15 + $0xa38] sm:$0xff] }
 0x215   : > { %7981 = vmatpush2.bf16.msra.mxu0 %v10158_v9  ;;  %7991 = vmatprep.subr.bf16.mxu1 %v10519_v29  ;;  %v1455_v9 = vld [vmem:[%s11377_s15 + $0x19f0] sm:$0xff]  ;;  %v676_v29 = vld [vmem:[%s11377_s15 + $0x198] sm:$0xff] }
 0x216   : > { %8032 = vmatprep.subr.bf16.mxu0 %v9753_v31  ;;  %v688_v31 = vld [vmem:[%s11377_s15 + $0x1f8] sm:$0xff] }
 0x217   : > { %7942 = vmatmul.mubr.bf16.vlgmr.msra.gmra.mxu1 %v11497_v1  ;;  %v7697_v50 = vpop.f32.mrf.mxu1  ;;  %v7738_v51 = vpop.f32.mrf.mxu0  ;;  %v9632_v48 = vcombine.low %v676_v29, %v688_v31 }
 0x218   : > { %7983 = vmatmul.mubr.bf16.vlgmr.msra.gmra.mxu0 %v11489_v60  ;;  %v7698_v56 = vadd.f32 %v7697_v50, %v1786_v42  ;;  %7992 = vmatpush1.bf16.msra.mxu1 %v10518_v34  ;;  %v10399_v34 = vcombine.high %v1443_v28, %v1455_v9  ;;  %v9633_v42 = vcombine.high %v676_v29, %v688_v31  ;;  %v916_v29 = vld [vmem:[%s11377_s15 + $0x918] sm:$0xff] }
 0x219   : > { %8023 = vmatprep.mubr.bf16.mxu1 %v11517_v26  ;;  %8033 = vmatpush1.bf16.msra.mxu0 %v9752_v45  ;;  %v7699_v58 = vpop.f32.mrf.mxu1  ;;  %v7740_v59 = vpop.f32.mrf.mxu0  ;;  %v652_v45 = vld [vmem:[%s11377_s15 + $0xd8] sm:$0xff] }
 0x21a   : > { %v11736_v3 = vadd.f32 %v7738_v51, %v7698_v56  ;;  %8064 = vmatprep.mubr.bf16.mxu0 %v11493_v63  ;;  %v7700_v4 = vadd.f32 %v7699_v58, %v1790_v46  ;;  %7993 = vmatprep.subr.bf16.mxu1 %v10495_v47  ;;  %v664_v46 = vld [vmem:[%s11377_s15 + $0x138] sm:$0xff]  ;;  %v10398_v47 = vcombine.low %v1443_v28, %v1455_v9  ;;  %v1395_v51 = vld [vmem:[%s11377_s15 + $0x1810] sm:$0xff] }
 0x21b   : > { %8034 = vmatprep.subr.bf16.mxu0 %v9729_v52  ;;  %v7701_v8 = vpop.f32.mrf.mxu1  ;;  %v7742_v10 = vpop.f32.mrf.mxu0  ;;  %v9609_v50 = vcombine.high %v652_v45, %v664_v46  ;;  %v1407_v52 = vld [vmem:[%s11377_s15 + $0x1870] sm:$0xff]  ;;  %v10374_v56 = vcombine.low %v1419_v43, %v1431_v44  ;;  %v928_v31 = vld [vmem:[%s11377_s15 + $0x978] sm:$0xff] }
 0x21c   : > { %v11743_v13 = vadd.f32 %v7740_v59, %v7700_v4  ;;  %7994 = vmatpush1.bf16.msra.mxu1 %v10494_v57  ;;  %v9608_v57 = vcombine.low %v652_v45, %v664_v46  ;;  %v10351_v58 = vcombine.high %v1395_v51, %v1407_v52  ;;  %v9585_v59 = vcombine.high %v628_v53, %v640_v54  ;;  %v988_v4 = vld [vmem:[%s11377_s15 + $0xb58] sm:$0xff]  ;;  %v1683_v28 = vld [vmem:[%s11377_s15 + $0x2110] sm:$0xff] }
 0x21d   : > { %8035 = vmatpush1.bf16.msra.mxu0 %v9728_v61  ;;  %v7702_v15 = vpop.f32.mrf.mxu1  ;;  %v7743_v16 = vpop.f32.mrf.mxu0  ;;  %7995 = vmatprep.subr.bf16.mxu1 %v10471_v62  ;;  %v1755_v61 = vld [vmem:[%s11377_s15 + $0x2350] sm:$0xff]  ;;  %v10350_v6 = vcombine.low %v1395_v51, %v1407_v52  ;;  %v892_v45 = vld [vmem:[%s11377_s15 + $0x858] sm:$0xff] }
 0x21e   : > { %8036 = vmatprep.subr.bf16.mxu0 %v9705_v5  ;;  %v1767_v62 = vld [vmem:[%s11377_s15 + $0x23b0] sm:$0xff]  ;;  %v1000_v5 = vld [vmem:[%s11377_s15 + $0xbb8] sm:$0xff] }
 0x21f   : > { %v10711_v8 = vcombine.high %v1755_v61, %v1767_v62  ;;  %v9945_v10 = vcombine.high %v988_v4, %v1000_v5  ;;  %v976_v15 = vld [vmem:[%s11377_s15 + $0xaf8] sm:$0xff]  ;;  %v10710_v16 = vcombine.low %v1755_v61, %v1767_v62  ;;  %v1695_v9 = vld [vmem:[%s11377_s15 + $0x2170] sm:$0xff] }
 0x220   : > { %7996 = vmatpush1.bf16.msra.mxu1 %v10470_v14  ;;  %v964_v14 = vld [vmem:[%s11377_s15 + $0xa98] sm:$0xff]  ;;  %v1659_v43 = vld [vmem:[%s11377_s15 + $0x2050] sm:$0xff] }
 0x221   : > { %8037 = vmatpush1.bf16.msra.mxu0 %v9704_v17  ;;  %7997 = vmatprep.subr.bf16.mxu1 %v10447_v18  ;;  %v9944_v17 = vcombine.low %v988_v4, %v1000_v5  ;;  %v10687_v18 = vcombine.high %v1731_v11, %v1743_v12  ;;  %v1671_v44 = vld [vmem:[%s11377_s15 + $0x20b0] sm:$0xff]  ;;  %v904_v46 = vld [vmem:[%s11377_s15 + $0x8b8] sm:$0xff] }
 0x222   : > { %8038 = vmatprep.subr.bf16.mxu0 %v9681_v19  ;;  %v9921_v19 = vcombine.high %v964_v14, %v976_v15  ;;  %v1635_v51 = vld [vmem:[%s11377_s15 + $0x1f90] sm:$0xff]  ;;  %v868_v53 = vld [vmem:[%s11377_s15 + $0x798] sm:$0xff] }
 0x223   : > { %v1647_v52 = vld [vmem:[%s11377_s15 + $0x1ff0] sm:$0xff]  ;;  %v880_v54 = vld [vmem:[%s11377_s15 + $0x7f8] sm:$0xff] }
 0x224   : > { %7998 = vmatpush1.bf16.msra.mxu1 %v10446_v23  ;;  %v10686_v23 = vcombine.low %v1731_v11, %v1743_v12  ;;  %v1611_v61 = vld [vmem:[%s11377_s15 + $0x1ed0] sm:$0xff]  ;;  %v844_v4 = vld [vmem:[%s11377_s15 + $0x6d8] sm:$0xff] }
 0x225   : > { %8039 = vmatpush1.bf16.msra.mxu0 %v9680_v24  ;;  %7999 = vmatprep.subr.bf16.mxu1 %v10423_v25  ;;  %v9920_v24 = vcombine.low %v964_v14, %v976_v15  ;;  %v10663_v25 = vcombine.high %v1707_v38, %v1719_v20  ;;  %v1623_v62 = vld [vmem:[%s11377_s15 + $0x1f30] sm:$0xff]  ;;  %v856_v5 = vld [vmem:[%s11377_s15 + $0x738] sm:$0xff] }
 0x226   : > { %8040 = vmatprep.subr.bf16.mxu0 %v9657_v27  ;;  %v9897_v27 = vcombine.high %v940_v21, %v952_v22  ;;  %v1587_v11 = vld [vmem:[%s11377_s15 + $0x1e10] sm:$0xff]  ;;  %v820_v14 = vld [vmem:[%s11377_s15 + $0x618] sm:$0xff] }
 0x227   : > { %v1599_v12 = vld [vmem:[%s11377_s15 + $0x1e70] sm:$0xff]  ;;  %v832_v15 = vld [vmem:[%s11377_s15 + $0x678] sm:$0xff] }
 0x228   : > { %8000 = vmatpush1.bf16.msra.mxu1 %v10422_v32  ;;  %v10662_v32 = vcombine.low %v1707_v38, %v1719_v20  ;;  %v1180_v38 = vld [vmem:[%s11377_s15 + $0x1158] sm:$0xff] }
 0x229   : > { %8041 = vmatpush1.bf16.msra.mxu0 %v9656_v33  ;;  %8001 = vmatprep.subr.bf16.mxu1 %v10399_v34  ;;  %v9896_v33 = vcombine.low %v940_v21, %v952_v22  ;;  %v10639_v34 = vcombine.high %v1683_v28, %v1695_v9  ;;  %v1192_v20 = vld [vmem:[%s11377_s15 + $0x11b8] sm:$0xff] }
 0x22a   : > { %8042 = vmatprep.subr.bf16.mxu0 %v9633_v42  ;;  %v9873_v42 = vcombine.high %v916_v29, %v928_v31  ;;  %v1564_v21 = vld [vmem:[%s11377_s15 + $0x1d58] sm:$0xff] }
 0x22b   : > { %v1576_v22 = vld [vmem:[%s11377_s15 + $0x1db8] sm:$0xff] }
 0x22c   : > { %8002 = vmatpush1.bf16.msra.mxu1 %v10398_v47  ;;  %v10638_v47 = vcombine.low %v1683_v28, %v1695_v9  ;;  %v1156_v28 = vld [vmem:[%s11377_s15 + $0x1098] sm:$0xff] }
 0x22d   : > { %8043 = vmatpush1.bf16.msra.mxu0 %v9632_v48  ;;  %8003 = vmatprep.subr.bf16.mxu1 %v10375_v49  ;;  %v9872_v48 = vcombine.low %v916_v29, %v928_v31  ;;  %v10615_v49 = vcombine.high %v1659_v43, %v1671_v44  ;;  %v1168_v9 = vld [vmem:[%s11377_s15 + $0x10f8] sm:$0xff]  ;;  %v10136_v29 = vcombine.low %v1180_v38, %v1192_v20 }
 0x22e   : > { %8044 = vmatprep.subr.bf16.mxu0 %v9609_v50  ;;  %v9849_v50 = vcombine.high %v892_v45, %v904_v46  ;;  %v1540_v31 = vld [vmem:[%s11377_s15 + $0x1c98] sm:$0xff] }
 0x230   : > { %8004 = vmatpush1.bf16.msra.mxu1 %v10374_v56  ;;  %v10614_v56 = vcombine.low %v1659_v43, %v1671_v44  ;;  %v1144_v43 = vld [vmem:[%s11377_s15 + $0x1038] sm:$0xff] }
 0x231   : > { %8045 = vmatpush1.bf16.msra.mxu0 %v9608_v57  ;;  %8005 = vmatprep.subr.bf16.mxu1 %v10351_v58  ;;  %v9848_v57 = vcombine.low %v892_v45, %v904_v46  ;;  %v10591_v58 = vcombine.high %v1635_v51, %v1647_v52 }
 0x232   : > { %8046 = vmatprep.subr.bf16.mxu0 %v9585_v59  ;;  %v9825_v59 = vcombine.high %v868_v53, %v880_v54 }
 0x234   : > { %8006 = vmatpush1.bf16.msra.mxu1 %v10350_v6  ;;  %v10590_v6 = vcombine.low %v1635_v51, %v1647_v52 }
 0x235   : > { %8047 = vmatpush1.bf16.msra.mxu0 %v9584_v7  ;;  %8007 = vmatprep.subr.bf16.mxu1 %v10711_v8  ;;  %v9824_v7 = vcombine.low %v868_v53, %v880_v54  ;;  %v10567_v8 = vcombine.high %v1611_v61, %v1623_v62 }
 0x236   : > { %8048 = vmatprep.subr.bf16.mxu0 %v9945_v10  ;;  %v9801_v10 = vcombine.high %v844_v4, %v856_v5 }
 0x238   : > { %8008 = vmatpush2.bf16.msra.mxu1 %v10710_v16  ;;  %v10566_v16 = vcombine.low %v1611_v61, %v1623_v62 }
 0x239   : > { %8049 = vmatpush2.bf16.msra.mxu0 %v9944_v17  ;;  %8009 = vmatprep.subr.bf16.mxu1 %v10687_v18  ;;  %v9800_v17 = vcombine.low %v844_v4, %v856_v5  ;;  %v10543_v18 = vcombine.high %v1587_v11, %v1599_v12  ;;  %v1492_v4 = vld [vmem:[%s11377_s15 + $0x1b18] sm:$0xff] }
 0x23a   : > { %8050 = vmatprep.subr.bf16.mxu0 %v9921_v19  ;;  %v9777_v19 = vcombine.high %v820_v14, %v832_v15  ;;  %v1504_v5 = vld [vmem:[%s11377_s15 + $0x1b78] sm:$0xff] }
 0x23c   : > { %8010 = vmatpush2.bf16.msra.mxu1 %v10686_v23  ;;  %v10542_v23 = vcombine.low %v1587_v11, %v1599_v12  ;;  %v10449_v12 = vcombine.high %v1492_v4, %v1504_v5 }
 0x23d   : > { %8051 = vmatpush2.bf16.msra.mxu0 %v9920_v24  ;;  %8011 = vmatprep.subr.bf16.mxu1 %v10663_v25  ;;  %v9776_v24 = vcombine.low %v820_v14, %v832_v15  ;;  %v10137_v25 = vcombine.high %v1180_v38, %v1192_v20  ;;  %v1084_v14 = vld [vmem:[%s11377_s15 + $0xe58] sm:$0xff] }
 0x23e   : > { %8052 = vmatprep.subr.bf16.mxu0 %v9897_v27  ;;  %v10521_v27 = vcombine.high %v1564_v21, %v1576_v22  ;;  %v1096_v15 = vld [vmem:[%s11377_s15 + $0xeb8] sm:$0xff] }
 0x23f   : > { %v10041_v38 = vcombine.high %v1084_v14, %v1096_v15 }
 0x240   : > { %8012 = vmatpush2.bf16.msra.mxu1 %v10662_v32  ;;  %v1552_v32 = vld [vmem:[%s11377_s15 + $0x1cf8] sm:$0xff] }
 0x241   : > { %8053 = vmatpush2.bf16.msra.mxu0 %v9896_v33  ;;  %8013 = vmatprep.subr.bf16.mxu1 %v10639_v34  ;;  %v10520_v33 = vcombine.low %v1564_v21, %v1576_v22  ;;  %v10113_v34 = vcombine.high %v1156_v28, %v1168_v9  ;;  %v10497_v46 = vcombine.high %v1540_v31, %v1552_v32  ;;  %v1060_v21 = vld [vmem:[%s11377_s15 + $0xd98] sm:$0xff] }
 0x242   : > { %8054 = vmatprep.subr.bf16.mxu0 %v9873_v42  ;;  %v1132_v42 = vld [vmem:[%s11377_s15 + $0xfd8] sm:$0xff]  ;;  %v10496_v53 = vcombine.low %v1540_v31, %v1552_v32 }
 0x243   : > { %v10089_v54 = vcombine.high %v1132_v42, %v1144_v43  ;;  %v1072_v22 = vld [vmem:[%s11377_s15 + $0xdf8] sm:$0xff] }
 0x244   : > { %8014 = vmatpush2.bf16.msra.mxu1 %v10638_v47  ;;  %v1516_v47 = vld [vmem:[%s11377_s15 + $0x1bd8] sm:$0xff] }
 0x245   : > { %8055 = vmatpush2.bf16.msra.mxu0 %v9872_v48  ;;  %8015 = vmatprep.subr.bf16.mxu1 %v10615_v49  ;;  %v1528_v48 = vld [vmem:[%s11377_s15 + $0x1c38] sm:$0xff] }
 0x246   : > { %8056 = vmatprep.subr.bf16.mxu0 %v9849_v50  ;;  %v10112_v50 = vcombine.low %v1156_v28, %v1168_v9  ;;  %v10017_v28 = vcombine.high %v1060_v21, %v1072_v22  ;;  %v1048_v31 = vld [vmem:[%s11377_s15 + $0xd38] sm:$0xff] }
 0x247   : > { %v1420_v32 = vld [vmem:[%s11377_s15 + $0x18d8] sm:$0xff] }
 0x248   : > { %8016 = vmatpush2.bf16.msra.mxu1 %v10614_v56 }
 0x249   : > { %8057 = vmatpush2.bf16.msra.mxu0 %v9848_v57  ;;  %8017 = vmatprep.subr.bf16.mxu1 %v10591_v58  ;;  %v10473_v57 = vcombine.high %v1516_v47, %v1528_v48  ;;  %v1108_v58 = vld [vmem:[%s11377_s15 + $0xf18] sm:$0xff] }
 0x24a   : > { %8058 = vmatprep.subr.bf16.mxu0 %v9825_v59  ;;  %v1120_v59 = vld [vmem:[%s11377_s15 + $0xf78] sm:$0xff] }
 0x24b   : > { %v10065_v11 = vcombine.high %v1108_v58, %v1120_v59 }
 0x24c   : > { %8018 = vmatpush2.bf16.msra.mxu1 %v10590_v6 }
 0x24d   : > { %8059 = vmatpush2.bf16.msra.mxu0 %v9824_v7  ;;  %8019 = vmatprep.subr.bf16.mxu1 %v10567_v8  ;;  %v10088_v7 = vcombine.low %v1132_v42, %v1144_v43 }
 0x24e   : > { %8060 = vmatprep.subr.bf16.mxu0 %v9801_v10  ;;  %v10472_v10 = vcombine.low %v1516_v47, %v1528_v48  ;;  %v1012_v48 = vld [vmem:[%s11377_s15 + $0xc18] sm:$0xff] }
 0x250   : > { %8020 = vmatpush2.bf16.msra.mxu1 %v10566_v16  ;;  %v1468_v16 = vld [vmem:[%s11377_s15 + $0x1a58] sm:$0xff] }
 0x251   : > { %8061 = vmatpush2.bf16.msra.mxu0 %v9800_v17  ;;  %8021 = vmatprep.subr.bf16.mxu1 %v10543_v18  ;;  %v1480_v17 = vld [vmem:[%s11377_s15 + $0x1ab8] sm:$0xff]  ;;  %v10064_v18 = vcombine.low %v1108_v58, %v1120_v59 }
 0x252   : > { %8062 = vmatprep.subr.bf16.mxu0 %v9777_v19  ;;  %v10448_v19 = vcombine.low %v1492_v4, %v1504_v5  ;;  %v10425_v20 = vcombine.high %v1468_v16, %v1480_v17  ;;  %v1372_v59 = vld [vmem:[%s11377_s15 + $0x1758] sm:$0xff] }
 0x253   : > { %v1768_v4 = vld [vmem:[%s11377_s15 + $0x23b8] sm:$0xff] }
 0x254   : > { %8022 = vmatpush2.bf16.msra.mxu1 %v10542_v23  ;;  %v1444_v23 = vld [vmem:[%s11377_s15 + $0x1998] sm:$0xff] }
 0x255   : > { %8063 = vmatpush2.bf16.msra.mxu0 %v9776_v24  ;;  %8073 = vmatprep.subr.bf16.mxu1 %v10137_v25  ;;  %v1456_v24 = vld [vmem:[%s11377_s15 + $0x19f8] sm:$0xff]  ;;  %v10040_v25 = vcombine.low %v1084_v14, %v1096_v15 }
 0x256   : > { %8114 = vmatprep.subr.bf16.mxu0 %v10521_v27  ;;  %v10424_v27 = vcombine.low %v1468_v16, %v1480_v17  ;;  %v10401_v9 = vcombine.high %v1444_v23, %v1456_v24  ;;  %v10400_v43 = vcombine.low %v1444_v23, %v1456_v24 }
 0x257   : > { %v7779_v44 = vpop.f32.mrf.mxu1  ;;  %v11803_v45 = vpop.f32.mrf.mxu0  ;;  %8024 = vmatmul.mubr.bf16.vlgmr.msra.gmra.mxu1 %v11581_v41 }
 0x258   : > { %v7780_v49 = vadd.f32 %v7779_v44, %v11736_v3  ;;  %8065 = vmatmul.mubr.bf16.vlgmr.msra.gmra.mxu0 %v11497_v1  ;;  %8074 = vmatpush1.bf16.msra.mxu1 %v10136_v29  ;;  %v1036_v29 = vld [vmem:[%s11377_s15 + $0xcd8] sm:$0xff] }
 0x259   : > { %8105 = vmatprep.mubr.bf16.mxu1 %v11495_v0  ;;  %8115 = vmatpush1.bf16.msra.mxu0 %v10520_v33  ;;  %v7781_v51 = vpop.f32.mrf.mxu1  ;;  %v11811_v52 = vpop.f32.mrf.mxu0  ;;  %v1432_v33 = vld [vmem:[%s11377_s15 + $0x1938] sm:$0xff]  ;;  %v9993_v44 = vcombine.high %v1036_v29, %v1048_v31 }
 0x25a   : > { %v10730_v56 = vmul.f32 -1.442695, %v7780_v49  ;;  %8146 = vmatprep.mubr.bf16.mxu0 %v11517_v26  ;;  %v7782_v3 = vadd.f32 %v7781_v51, %v11743_v13  ;;  %8075 = vmatprep.subr.bf16.mxu1 %v10113_v34  ;;  %v10016_v34 = vcombine.low %v1060_v21, %v1072_v22  ;;  %v10377_v47 = vcombine.high %v1420_v32, %v1432_v33  ;;  %v1024_v49 = vld [vmem:[%s11377_s15 + $0xc78] sm:$0xff] }
 0x25b   : > { %v7783_v61 = vpop.f32.mrf.mxu1  ;;  %v7824_v62 = vpop.f32.mrf.mxu0  ;;  %8116 = vmatprep.subr.bf16.mxu0 %v10497_v46  ;;  %v1396_v51 = vld [vmem:[%s11377_s15 + $0x1818] sm:$0xff]  ;;  %v9968_v5 = vcombine.low %v1012_v48, %v1024_v49 }
 0x25c   : > { %10853 = vpow2.f32 %v10730_v56  ;;  %v10731_v6 = vmul.f32 -1.442695, %v7782_v3  ;;  %8076 = vmatpush1.bf16.msra.mxu1 %v10112_v50  ;;  %v9992_v56 = vcombine.low %v1036_v29, %v1048_v31  ;;  %v10376_v3 = vcombine.low %v1420_v32, %v1432_v33  ;;  %v1384_v61 = vld [vmem:[%s11377_s15 + $0x17b8] sm:$0xff] }
 0x25d   : > { %8117 = vmatpush1.bf16.msra.mxu0 %v10496_v53  ;;  %v7784_v8 = vpop.f32.mrf.mxu1  ;;  %v7825_v13 = vpop.f32.mrf.mxu0  ;;  %8077 = vmatprep.subr.bf16.mxu1 %v10089_v54  ;;  %v1408_v53 = vld [vmem:[%s11377_s15 + $0x1878] sm:$0xff]  ;;  %v10328_v14 = vcombine.low %v1372_v59, %v1384_v61 }
 0x25e   : > { %10855 = vpow2.f32 %v10731_v6  ;;  %8118 = vmatprep.subr.bf16.mxu0 %v10473_v57  ;;  %v9969_v57 = vcombine.high %v1012_v48, %v1024_v49  ;;  %v10353_v58 = vcombine.high %v1396_v51, %v1408_v53  ;;  %v1756_v62 = vld [vmem:[%s11377_s15 + $0x2358] sm:$0xff]  ;;  %v10352_v6 = vcombine.low %v1396_v51, %v1408_v53 }
 0x25f   : > { %v10713_v8 = vcombine.high %v1756_v62, %v1768_v4  ;;  %v1348_v13 = vld [vmem:[%s11377_s15 + $0x1698] sm:$0xff]  ;;  %v10712_v15 = vcombine.low %v1756_v62, %v1768_v4 }
 0x260   : > { %8078 = vmatpush1.bf16.msra.mxu1 %v10088_v7  ;;  %v10329_v7 = vcombine.high %v1372_v59, %v1384_v61  ;;  %v1684_v29 = vld [vmem:[%s11377_s15 + $0x2118] sm:$0xff] }
 0x261   : > { %8119 = vmatpush1.bf16.msra.mxu0 %v10472_v10  ;;  %8079 = vmatprep.subr.bf16.mxu1 %v10065_v11  ;;  %v1360_v10 = vld [vmem:[%s11377_s15 + $0x16f8] sm:$0xff] }
 0x262   : > { %8120 = vmatprep.subr.bf16.mxu0 %v10449_v12  ;;  %v1732_v11 = vld [vmem:[%s11377_s15 + $0x2298] sm:$0xff]  ;;  %v10305_v16 = vcombine.high %v1348_v13, %v1360_v10  ;;  %v10304_v21 = vcombine.low %v1348_v13, %v1360_v10 }
 0x263   : > { %v1744_v12 = vld [vmem:[%s11377_s15 + $0x22f8] sm:$0xff] }
 0x264   : > { %8080 = vmatpush1.bf16.msra.mxu1 %v10064_v18  ;;  %v10689_v17 = vcombine.high %v1732_v11, %v1744_v12  ;;  %v1324_v18 = vld [vmem:[%s11377_s15 + $0x15d8] sm:$0xff]  ;;  %v10688_v22 = vcombine.low %v1732_v11, %v1744_v12 }
 0x265   : > { %8121 = vmatpush1.bf16.msra.mxu0 %v10448_v19  ;;  %8081 = vmatprep.subr.bf16.mxu1 %v10041_v38  ;;  %v1336_v19 = vld [vmem:[%s11377_s15 + $0x1638] sm:$0xff] }
 0x266   : > { %8122 = vmatprep.subr.bf16.mxu0 %v10425_v20  ;;  %v1708_v38 = vld [vmem:[%s11377_s15 + $0x21d8] sm:$0xff]  ;;  %v10281_v23 = vcombine.high %v1324_v18, %v1336_v19  ;;  %v10280_v33 = vcombine.low %v1324_v18, %v1336_v19 }
 0x267   : > { %v1720_v20 = vld [vmem:[%s11377_s15 + $0x2238] sm:$0xff] }
 0x268   : > { %8082 = vmatpush1.bf16.msra.mxu1 %v10040_v25  ;;  %v10665_v25 = vcombine.high %v1708_v38, %v1720_v20  ;;  %v1696_v31 = vld [vmem:[%s11377_s15 + $0x2178] sm:$0xff] }
 0x269   : > { %v10854_v42 = vpop.eup %10853  ;;  %8123 = vmatpush1.bf16.msra.mxu0 %v10424_v27  ;;  %8083 = vmatprep.subr.bf16.mxu1 %v10017_v28  ;;  %v1300_v27 = vld [vmem:[%s11377_s15 + $0x1518] sm:$0xff] }
 0x26a   : > { %v9211_v46 = vadd.f32 1.0, %v10854_v42  ;;  %8124 = vmatprep.subr.bf16.mxu0 %v10401_v9  ;;  %v1312_v28 = vld [vmem:[%s11377_s15 + $0x1578] sm:$0xff] }
 0x26b   : > { %v10856_v50 = vpop.eup %10855  ;;  %v10257_v42 = vcombine.high %v1300_v27, %v1312_v28  ;;  %v1672_v48 = vld [vmem:[%s11377_s15 + $0x20b8] sm:$0xff]  ;;  %v10256_v49 = vcombine.low %v1300_v27, %v1312_v28 }
 0x26c   : > { %v9212_v54 = vadd.f32 1.0, %v10856_v50  ;;  %8084 = vmatpush1.bf16.msra.mxu1 %v10016_v34  ;;  %10857 = vrcp.f32 %v9211_v46  ;;  %v10664_v34 = vcombine.low %v1708_v38, %v1720_v20  ;;  %v1288_v46 = vld [vmem:[%s11377_s15 + $0x14b8] sm:$0xff]  ;;  %v10640_v50 = vcombine.low %v1684_v29, %v1696_v31  ;;  %v797_v20 = vld [vmem:[%s11377_s15 + $0x560] sm:$0xff] }
 0x26d   : > { %8125 = vmatpush1.bf16.msra.mxu0 %v10400_v43  ;;  %8085 = vmatprep.subr.bf16.mxu1 %v9993_v44  ;;  %v10641_v43 = vcombine.high %v1684_v29, %v1696_v31  ;;  %v1276_v44 = vld [vmem:[%s11377_s15 + $0x1458] sm:$0xff]  ;;  %v1794_v29 = vrot.slane %v11719_v30, %v11466_v37 }
 0x26e   : > { %10859 = vrcp.f32 %v9212_v54  ;;  %8126 = vmatprep.subr.bf16.mxu0 %v10377_v47  ;;  %v1660_v47 = vld [vmem:[%s11377_s15 + $0x2058] sm:$0xff]  ;;  %v10233_v51 = vcombine.high %v1276_v44, %v1288_v46 }
 0x26f   : > { %v10617_v53 = vcombine.high %v1660_v47, %v1672_v48  ;;  %v1252_v54 = vld [vmem:[%s11377_s15 + $0x1398] sm:$0xff]  ;;  %v10616_v59 = vcombine.low %v1660_v47, %v1672_v48  ;;  %v7821_v48 = vadd.f32 %v11803_v45, %v1794_v29 }
 0x270   : > { %8086 = vmatpush1.bf16.msra.mxu1 %v9992_v56  ;;  %v1264_v56 = vld [vmem:[%s11377_s15 + $0x13f8] sm:$0xff] }
 0x271   : > { %8127 = vmatpush1.bf16.msra.mxu0 %v10376_v3  ;;  %8087 = vmatprep.subr.bf16.mxu1 %v9969_v57  ;;  %v1636_v3 = vld [vmem:[%s11377_s15 + $0x1f98] sm:$0xff]  ;;  %v10209_v61 = vcombine.high %v1252_v54, %v1264_v56 }
 0x272   : > { %8128 = vmatprep.subr.bf16.mxu0 %v10353_v58  ;;  %v1648_v57 = vld [vmem:[%s11377_s15 + $0x1ff8] sm:$0xff]  ;;  %v10232_v58 = vcombine.low %v1276_v44, %v1288_v46  ;;  %v1157_v44 = vld [vmem:[%s11377_s15 + $0x10a0] sm:$0xff] }
 0x273   : > { %v10593_v62 = vcombine.high %v1636_v3, %v1648_v57  ;;  %v1228_v4 = vld [vmem:[%s11377_s15 + $0x12d8] sm:$0xff]  ;;  %v10592_v13 = vcombine.low %v1636_v3, %v1648_v57  ;;  %v1169_v46 = vld [vmem:[%s11377_s15 + $0x1100] sm:$0xff] }
 0x274   : > { %8088 = vmatpush1.bf16.msra.mxu1 %v9968_v5  ;;  %v1240_v5 = vld [vmem:[%s11377_s15 + $0x1338] sm:$0xff] }
 0x275   : > { %8129 = vmatpush1.bf16.msra.mxu0 %v10352_v6  ;;  %8089 = vmatprep.subr.bf16.mxu1 %v10329_v7  ;;  %v1612_v6 = vld [vmem:[%s11377_s15 + $0x1ed8] sm:$0xff]  ;;  %v10185_v10 = vcombine.high %v1228_v4, %v1240_v5 }
 0x276   : > { %8130 = vmatprep.subr.bf16.mxu0 %v10713_v8  ;;  %v1624_v7 = vld [vmem:[%s11377_s15 + $0x1f38] sm:$0xff]  ;;  %v10208_v8 = vcombine.low %v1252_v54, %v1264_v56  ;;  %v10115_v54 = vcombine.high %v1157_v44, %v1169_v46  ;;  %v1145_v56 = vld [vmem:[%s11377_s15 + $0x1040] sm:$0xff] }
 0x277   : > { %v10569_v11 = vcombine.high %v1612_v6, %v1624_v7  ;;  %v1204_v12 = vld [vmem:[%s11377_s15 + $0x1218] sm:$0xff]  ;;  %v10568_v18 = vcombine.low %v1612_v6, %v1624_v7  ;;  %v725_v7 = vld [vmem:[%s11377_s15 + $0x320] sm:$0xff] }
 0x278   : > { %8090 = vmatpush2.bf16.msra.mxu1 %v10328_v14  ;;  %v1216_v14 = vld [vmem:[%s11377_s15 + $0x1278] sm:$0xff] }
 0x279   : > { %8131 = vmatpush2.bf16.msra.mxu0 %v10712_v15  ;;  %8091 = vmatprep.subr.bf16.mxu1 %v10305_v16  ;;  %v11847_v24 = vpop.eup %10857  ;;  %v1588_v15 = vld [vmem:[%s11377_s15 + $0x1e18] sm:$0xff]  ;;  %v10161_v19 = vcombine.high %v1204_v12, %v1216_v14 }
 0x27a   : > { %8132 = vmatprep.subr.bf16.mxu0 %v10689_v17  ;;  %v1600_v16 = vld [vmem:[%s11377_s15 + $0x1e78] sm:$0xff]  ;;  %v10184_v17 = vcombine.low %v1228_v4, %v1240_v5 }
 0x27b   : > { %v11851_v9 = vpop.eup %10859  ;;  %v10545_v38 = vcombine.high %v1588_v15, %v1600_v16  ;;  %v10544_v27 = vcombine.low %v1588_v15, %v1600_v16 }
 0x27c   : > { %v9307_v32 = vcombine.low %v11847_v24, %v11851_v9  ;;  %8092 = vmatpush2.bf16.msra.mxu1 %v10304_v21  ;;  %v809_v21 = vld [vmem:[%s11377_s15 + $0x5c0] sm:$0xff] }
 0x27d   : > { %8133 = vmatpush2.bf16.msra.mxu0 %v10688_v22  ;;  %8093 = vmatprep.subr.bf16.mxu1 %v10281_v23  ;;  %v1181_v22 = vld [vmem:[%s11377_s15 + $0x1160] sm:$0xff]  ;;  %v9755_v28 = vcombine.high %v797_v20, %v809_v21 }
 0x27e   : > { %8134 = vmatprep.subr.bf16.mxu0 %v10665_v25  ;;  %v1193_v23 = vld [vmem:[%s11377_s15 + $0x11c0] sm:$0xff]  ;;  %v10160_v25 = vcombine.low %v1204_v12, %v1216_v14 }
 0x27f   : > { %v10139_v31 = vcombine.high %v1181_v22, %v1193_v23  ;;  %v10138_v47 = vcombine.low %v1181_v22, %v1193_v23  ;;  %v701_v22 = vld [vmem:[%s11377_s15 + $0x260] sm:$0xff] }
 0x280   : > { %8094 = vmatpush2.bf16.msra.mxu1 %v10280_v33  ;;  %v773_v33 = vld [vmem:[%s11377_s15 + $0x4a0] sm:$0xff] }
 0x281   : > { %8135 = vmatpush2.bf16.msra.mxu0 %v10664_v34  ;;  %8095 = vmatprep.subr.bf16.mxu1 %v10257_v42  ;;  %v785_v34 = vld [vmem:[%s11377_s15 + $0x500] sm:$0xff]  ;;  %v1798_v42 = vrot.slane %v11719_v30, %v11474_v40 }
 0x282   : > { %8136 = vmatprep.subr.bf16.mxu0 %v10641_v43  ;;  %v9754_v43 = vcombine.low %v797_v20, %v809_v21  ;;  %v1133_v30 = vld [vmem:[%s11377_s15 + $0xfe0] sm:$0xff]  ;;  %v9730_v45 = vcombine.low %v773_v33, %v785_v34 }
 0x283   : > { %v7823_v3 = vadd.f32 %v11811_v52, %v1798_v42  ;;  %v10091_v6 = vcombine.high %v1133_v30, %v1145_v56  ;;  %v713_v23 = vld [vmem:[%s11377_s15 + $0x2c0] sm:$0xff] }
 0x284   : > { %8096 = vmatpush2.bf16.msra.mxu1 %v10256_v49  ;;  %v9731_v49 = vcombine.high %v773_v33, %v785_v34  ;;  %v677_v34 = vld [vmem:[%s11377_s15 + $0x1a0] sm:$0xff] }
 0x285   : > { %8137 = vmatpush2.bf16.msra.mxu0 %v10640_v50  ;;  %8097 = vmatprep.subr.bf16.mxu1 %v10233_v51  ;;  %v749_v50 = vld [vmem:[%s11377_s15 + $0x3e0] sm:$0xff] }
 0x286   : > { %8138 = vmatprep.subr.bf16.mxu0 %v10617_v53  ;;  %v761_v51 = vld [vmem:[%s11377_s15 + $0x440] sm:$0xff] }
 0x287   : > { %v9706_v16 = vcombine.low %v749_v50, %v761_v51  ;;  %v689_v42 = vld [vmem:[%s11377_s15 + $0x200] sm:$0xff] }
 0x288   : > { %8098 = vmatpush2.bf16.msra.mxu1 %v10232_v58  ;;  %v1265_v24 = vld [vmem:[%s11377_s15 + $0x1400] sm:$0xff] }
 0x289   : > { %8139 = vmatpush2.bf16.msra.mxu0 %v10616_v59  ;;  %8099 = vmatprep.subr.bf16.mxu1 %v10209_v61  ;;  %v10114_v61 = vcombine.low %v1157_v44, %v1169_v46  ;;  %v1073_v44 = vld [vmem:[%s11377_s15 + $0xe00] sm:$0xff]  ;;  %v9658_v46 = vcombine.low %v701_v22, %v713_v23 }
 0x28a   : > { %8140 = vmatprep.subr.bf16.mxu0 %v10593_v62  ;;  %v9707_v62 = vcombine.high %v749_v50, %v761_v51  ;;  %v653_v50 = vld [vmem:[%s11377_s15 + $0xe0] sm:$0xff] }
 0x28b   : > { %v665_v51 = vld [vmem:[%s11377_s15 + $0x140] sm:$0xff] }
 0x28c   : > { %8100 = vmatpush2.bf16.msra.mxu1 %v10208_v8  ;;  %v737_v8 = vld [vmem:[%s11377_s15 + $0x380] sm:$0xff] }
 0x28d   : > { %8141 = vmatpush2.bf16.msra.mxu0 %v10592_v13  ;;  %8101 = vmatprep.subr.bf16.mxu1 %v10185_v10  ;;  %v1109_v10 = vld [vmem:[%s11377_s15 + $0xf20] sm:$0xff] }
 0x28e   : > { %8142 = vmatprep.subr.bf16.mxu0 %v10569_v11  ;;  %v1121_v11 = vld [vmem:[%s11377_s15 + $0xf80] sm:$0xff] }
 0x28f   : > { %v10067_v21 = vcombine.high %v1109_v10, %v1121_v11  ;;  %v10066_v29 = vcombine.low %v1109_v10, %v1121_v11  ;;  %v989_v10 = vld [vmem:[%s11377_s15 + $0xb60] sm:$0xff] }
 0x290   : > { %8102 = vmatpush2.bf16.msra.mxu1 %v10184_v17  ;;  %v1001_v11 = vld [vmem:[%s11377_s15 + $0xbc0] sm:$0xff] }
 0x291   : > { %8143 = vmatpush2.bf16.msra.mxu0 %v10568_v18  ;;  %8103 = vmatprep.subr.bf16.mxu1 %v10161_v19  ;;  %v10090_v18 = vcombine.low %v1133_v30, %v1145_v56  ;;  %v9683_v19 = vcombine.high %v725_v7, %v737_v8  ;;  %v9634_v30 = vcombine.low %v677_v34, %v689_v42 }
 0x292   : > { %8144 = vmatprep.subr.bf16.mxu0 %v10545_v38 }
 0x294   : > { %8104 = vmatpush2.bf16.msra.mxu1 %v10160_v25  ;;  %v1085_v25 = vld [vmem:[%s11377_s15 + $0xe60] sm:$0xff] }
 0x295   : > { %8145 = vmatpush2.bf16.msra.mxu0 %v10544_v27  ;;  %8155 = vmatprep.subr.bf16.mxu1 %v9755_v28  ;;  %v1097_v27 = vld [vmem:[%s11377_s15 + $0xec0] sm:$0xff]  ;;  %v9682_v28 = vcombine.low %v725_v7, %v737_v8 }
 0x296   : > { %8196 = vmatprep.subr.bf16.mxu0 %v10139_v31  ;;  %v9659_v31 = vcombine.high %v701_v22, %v713_v23  ;;  %v10043_v33 = vcombine.high %v1085_v25, %v1097_v27  ;;  %v11169_v22 = vmov 1983009808  }
 0x297   : > { %v7861_v53 = vpop.f32.mrf.mxu1  ;;  %8106 = vmatmul.mubr.bf16.vlgmr.msra.gmra.mxu1 %v11489_v60  ;;  %v9310_v23 = vunpack.c.l.s4 %v11169_v22 }
 0x298   : > { %v7862_v57 = vadd.f32 %v7861_v53, %v7821_v48  ;;  %v7902_v58 = vpop.f32.mrf.mxu0  ;;  %8147 = vmatmul.mubr.bf16.vlgmr.msra.gmra.mxu0 %v11581_v41  ;;  %8156 = vmatpush1.bf16.msra.mxu1 %v9754_v43  ;;  %v1061_v43 = vld [vmem:[%s11377_s15 + $0xda0] sm:$0xff]  ;;  %v9635_v48 = vcombine.high %v677_v34, %v689_v42 }
 0x299   : > { %8187 = vmatprep.mubr.bf16.mxu1 %v11493_v63  ;;  %8197 = vmatpush1.bf16.msra.mxu0 %v10138_v47  ;;  %v7863_v59 = vpop.f32.mrf.mxu1  ;;  %v10042_v47 = vcombine.low %v1085_v25, %v1097_v27  ;;  %v1037_v53 = vld [vmem:[%s11377_s15 + $0xce0] sm:$0xff]  ;;  %v10018_v56 = vcombine.low %v1061_v43, %v1073_v44  ;;  %v9946_v25 = vcombine.low %v989_v10, %v1001_v11 }
 0x29a   : > { %v7903_v4 = vadd.f32 %v7902_v58, %v7862_v57  ;;  %8228 = vmatprep.mubr.bf16.mxu0 %v11495_v0  ;;  %v7864_v52 = vadd.f32 %v7863_v59, %v7823_v3  ;;  %v7904_v5 = vpop.f32.mrf.mxu0  ;;  %8157 = vmatprep.subr.bf16.mxu1 %v9731_v49  ;;  %v10019_v49 = vcombine.high %v1061_v43, %v1073_v44  ;;  %v629_v58 = vld [vmem:[%s11377_s15 + $0x20] sm:$0xff]  ;;  %v9311_v43 = vunpack.c.0.s8 %v9310_v23 }
 0x29b   : > { %v7865_v13 = vpop.f32.mrf.mxu1  ;;  %8198 = vmatprep.subr.bf16.mxu0 %v10115_v54  ;;  %v1049_v54 = vld [vmem:[%s11377_s15 + $0xd40] sm:$0xff]  ;;  %v9611_v3 = vcombine.high %v653_v50, %v665_v51 }
 0x29c   : > { %v10732_v12 = vmul.f32 -1.442695, %v7903_v4  ;;  %v7905_v14 = vadd.f32 %v7904_v5, %v7864_v52  ;;  %v7906_v15 = vpop.f32.mrf.mxu0  ;;  %8158 = vmatpush1.bf16.msra.mxu1 %v9730_v45  ;;  %v9995_v57 = vcombine.high %v1037_v53, %v1049_v54  ;;  %v641_v45 = vld [vmem:[%s11377_s15 + $0x80] sm:$0xff]  ;;  %v9610_v52 = vcombine.low %v653_v50, %v665_v51 }
 0x29d   : > { %8199 = vmatpush1.bf16.msra.mxu0 %v10114_v61  ;;  %v7866_v17 = vpop.f32.mrf.mxu1  ;;  %8159 = vmatprep.subr.bf16.mxu1 %v9707_v62  ;;  %v1013_v61 = vld [vmem:[%s11377_s15 + $0xc20] sm:$0xff]  ;;  %v9587_v7 = vcombine.high %v629_v58, %v641_v45  ;;  %v9586_v15 = vcombine.low %v629_v58, %v641_v45 }
 0x29e   : > { %10861 = vpow2.f32 %v10732_v12  ;;  %v10733_v38 = vmul.f32 -1.442695, %v7905_v14  ;;  %v7907_v20 = vpop.f32.mrf.mxu0  ;;  %8200 = vmatprep.subr.bf16.mxu0 %v10091_v6  ;;  %v1025_v62 = vld [vmem:[%s11377_s15 + $0xc80] sm:$0xff]  ;;  %v9994_v6 = vcombine.low %v1037_v53, %v1049_v54  ;;  %v9947_v17 = vcombine.high %v989_v10, %v1001_v11 }
 0x29f   : > { %v9971_v13 = vcombine.high %v1013_v61, %v1025_v62  ;;  %v1373_v12 = vld [vmem:[%s11377_s15 + $0x1760] sm:$0xff] }
 0x2a0   : > { %10863 = vpow2.f32 %v10733_v38  ;;  %8160 = vmatpush1.bf16.msra.mxu1 %v9706_v16  ;;  %v1385_v14 = vld [vmem:[%s11377_s15 + $0x17c0] sm:$0xff]  ;;  %v9970_v16 = vcombine.low %v1013_v61, %v1025_v62 }
 0x2a1   : > { %8201 = vmatpush1.bf16.msra.mxu0 %v10090_v18  ;;  %8161 = vmatprep.subr.bf16.mxu1 %v9683_v19  ;;  %v10331_v18 = vcombine.high %v1373_v12, %v1385_v14  ;;  %v965_v19 = vld [vmem:[%s11377_s15 + $0xaa0] sm:$0xff]  ;;  %v10330_v27 = vcombine.low %v1373_v12, %v1385_v14 }
 0x2a2   : > { %8202 = vmatprep.subr.bf16.mxu0 %v10067_v21  ;;  %v977_v38 = vld [vmem:[%s11377_s15 + $0xb00] sm:$0xff] }
 0x2a3   : > { %v1349_v20 = vld [vmem:[%s11377_s15 + $0x16a0] sm:$0xff]  ;;  %v9922_v44 = vcombine.low %v965_v19, %v977_v38 }
 0x2a4   : > { %8162 = vmatpush1.bf16.msra.mxu1 %v9682_v28  ;;  %v1361_v21 = vld [vmem:[%s11377_s15 + $0x1700] sm:$0xff]  ;;  %v9923_v28 = vcombine.high %v965_v19, %v977_v38 }
 0x2a5   : > { %8203 = vmatpush1.bf16.msra.mxu0 %v10066_v29  ;;  %8163 = vmatprep.subr.bf16.mxu1 %v9659_v31  ;;  %v10307_v29 = vcombine.high %v1349_v20, %v1361_v21  ;;  %v941_v31 = vld [vmem:[%s11377_s15 + $0x9e0] sm:$0xff] }
 0x2a6   : > { %8204 = vmatprep.subr.bf16.mxu0 %v10043_v33  ;;  %v953_v33 = vld [vmem:[%s11377_s15 + $0xa40] sm:$0xff] }
 0x2a7   : > { %v1325_v34 = vld [vmem:[%s11377_s15 + $0x15e0] sm:$0xff] }
 0x2a8   : > { %8164 = vmatpush1.bf16.msra.mxu1 %v9658_v46  ;;  %v1337_v42 = vld [vmem:[%s11377_s15 + $0x1640] sm:$0xff]  ;;  %v10306_v46 = vcombine.low %v1349_v20, %v1361_v21 }
 0x2a9   : > { %8205 = vmatpush1.bf16.msra.mxu0 %v10042_v47  ;;  %8165 = vmatprep.subr.bf16.mxu1 %v9635_v48  ;;  %v9899_v47 = vcombine.high %v941_v31, %v953_v33  ;;  %v10283_v48 = vcombine.high %v1325_v34, %v1337_v42  ;;  %v929_v50 = vld [vmem:[%s11377_s15 + $0x980] sm:$0xff] }
 0x2aa   : > { %8206 = vmatprep.subr.bf16.mxu0 %v10019_v49  ;;  %v917_v49 = vld [vmem:[%s11377_s15 + $0x920] sm:$0xff] }
 0x2ab   : > { %v10862_v59 = vpop.eup %10861  ;;  %v1301_v51 = vld [vmem:[%s11377_s15 + $0x1520] sm:$0xff]  ;;  %v9875_v58 = vcombine.high %v917_v49, %v929_v50 }
 0x2ac   : > { %v9213_v4 = vadd.f32 1.0, %v10862_v59  ;;  %8166 = vmatpush1.bf16.msra.mxu1 %v9634_v30  ;;  %v1313_v53 = vld [vmem:[%s11377_s15 + $0x1580] sm:$0xff]  ;;  %v11932_v30 = vsub.s32 %v9311_v43, %v11460_v35 }
 0x2ad   : > { %v10864_v5 = vpop.eup %10863  ;;  %8207 = vmatpush1.bf16.msra.mxu0 %v10018_v56  ;;  %8167 = vmatprep.subr.bf16.mxu1 %v9611_v3  ;;  %v9898_v56 = vcombine.low %v941_v31, %v953_v33  ;;  %v10259_v59 = vcombine.high %v1301_v51, %v1313_v53  ;;  %v893_v61 = vld [vmem:[%s11377_s15 + $0x860] sm:$0xff] }
 0x2ae   : > { %v9214_v8 = vadd.f32 1.0, %v10864_v5  ;;  %8208 = vmatprep.subr.bf16.mxu0 %v9995_v57  ;;  %10865 = vrcp.f32 %v9213_v4  ;;  %v10282_v57 = vcombine.low %v1325_v34, %v1337_v42  ;;  %v905_v62 = vld [vmem:[%s11377_s15 + $0x8c0] sm:$0xff]  ;;  %v9315_v5 = vrot.slane %v9307_v32, %v11932_v30 }
 0x2af   : > { %v1277_v4 = vld [vmem:[%s11377_s15 + $0x1460] sm:$0xff]  ;;  %v9850_v9 = vcombine.low %v893_v61, %v905_v62 }
 0x2b0   : > { %10867 = vrcp.f32 %v9214_v8  ;;  %8168 = vmatpush1.bf16.msra.mxu1 %v9610_v52  ;;  %v1289_v52 = vld [vmem:[%s11377_s15 + $0x14c0] sm:$0xff]  ;;  %v10258_v8 = vcombine.low %v1301_v51, %v1313_v53 }
 0x2b1   : > { %8209 = vmatpush1.bf16.msra.mxu0 %v9994_v6  ;;  %8169 = vmatprep.subr.bf16.mxu1 %v9587_v7  ;;  %v9874_v7 = vcombine.low %v917_v49, %v929_v50  ;;  %v10235_v11 = vcombine.high %v1277_v4, %v1289_v52  ;;  %v869_v12 = vld [vmem:[%s11377_s15 + $0x7a0] sm:$0xff]  ;;  %v10234_v32 = vcombine.low %v1277_v4, %v1289_v52 }
 0x2b2   : > { %8210 = vmatprep.subr.bf16.mxu0 %v9971_v13  ;;  %v9851_v13 = vcombine.high %v893_v61, %v905_v62  ;;  %v881_v14 = vld [vmem:[%s11377_s15 + $0x800] sm:$0xff] }
 0x2b3   : > { %v857_v19 = vld [vmem:[%s11377_s15 + $0x740] sm:$0xff]  ;;  %v9826_v21 = vcombine.low %v869_v12, %v881_v14 }
 0x2b4   : > { %8170 = vmatpush1.bf16.msra.mxu1 %v9586_v15  ;;  %v1253_v15 = vld [vmem:[%s11377_s15 + $0x13a0] sm:$0xff] }
 0x2b5   : > { %8211 = vmatpush1.bf16.msra.mxu0 %v9970_v16  ;;  %8171 = vmatprep.subr.bf16.mxu1 %v9947_v17  ;;  %v9827_v16 = vcombine.high %v869_v12, %v881_v14  ;;  %v10211_v17 = vcombine.high %v1253_v15, %v1265_v24  ;;  %v1229_v38 = vld [vmem:[%s11377_s15 + $0x12e0] sm:$0xff]  ;;  %v10210_v22 = vcombine.low %v1253_v15, %v1265_v24 }
 0x2b6   : > { %8212 = vmatprep.subr.bf16.mxu0 %v10331_v18  ;;  %v845_v18 = vld [vmem:[%s11377_s15 + $0x6e0] sm:$0xff] }
 0x2b7   : > { %v1241_v20 = vld [vmem:[%s11377_s15 + $0x1340] sm:$0xff]  ;;  %v9803_v23 = vcombine.high %v845_v18, %v857_v19  ;;  %v9802_v33 = vcombine.low %v845_v18, %v857_v19 }
 0x2b8   : > { %8172 = vmatpush2.bf16.msra.mxu1 %v9946_v25  ;;  %v10187_v25 = vcombine.high %v1229_v38, %v1241_v20  ;;  %v1217_v31 = vld [vmem:[%s11377_s15 + $0x1280] sm:$0xff]  ;;  %v10186_v34 = vcombine.low %v1229_v38, %v1241_v20  ;;  %v726_v20 = vld [vmem:[%s11377_s15 + $0x328] sm:$0xff] }
 0x2b9   : > { %8213 = vmatpush2.bf16.msra.mxu0 %v10330_v27  ;;  %8173 = vmatprep.subr.bf16.mxu1 %v9923_v28  ;;  %v821_v27 = vld [vmem:[%s11377_s15 + $0x620] sm:$0xff] }
 0x2ba   : > { %8214 = vmatprep.subr.bf16.mxu0 %v10307_v29  ;;  %v833_v28 = vld [vmem:[%s11377_s15 + $0x680] sm:$0xff] }
 0x2bb   : > { %v10866_v54 = vpop.eup %10865  ;;  %v1205_v29 = vld [vmem:[%s11377_s15 + $0x1220] sm:$0xff]  ;;  %v9779_v42 = vcombine.high %v821_v27, %v833_v28  ;;  %v9778_v49 = vcombine.low %v821_v27, %v833_v28 }
 0x2bc   : > { %8174 = vmatpush2.bf16.msra.mxu1 %v9922_v44  ;;  %v10163_v43 = vcombine.high %v1205_v29, %v1217_v31  ;;  %v1565_v44 = vld [vmem:[%s11377_s15 + $0x1d60] sm:$0xff]  ;;  %v10162_v50 = vcombine.low %v1205_v29, %v1217_v31 }
 0x2bd   : > { %v10868_v3 = vpop.eup %10867  ;;  %8215 = vmatpush2.bf16.msra.mxu0 %v10306_v46  ;;  %8175 = vmatprep.subr.bf16.mxu1 %v9899_v47  ;;  %v1577_v46 = vld [vmem:[%s11377_s15 + $0x1dc0] sm:$0xff]  ;;  %v798_v47 = vld [vmem:[%s11377_s15 + $0x568] sm:$0xff] }
 0x2be   : > { %v9308_v45 = vcombine.low %v10866_v54, %v10868_v3  ;;  %8216 = vmatprep.subr.bf16.mxu0 %v10283_v48  ;;  %v810_v48 = vld [vmem:[%s11377_s15 + $0x5c8] sm:$0xff]  ;;  %v10523_v51 = vcombine.high %v1565_v44, %v1577_v46  ;;  %v1541_v54 = vld [vmem:[%s11377_s15 + $0x1ca0] sm:$0xff] }
 0x2bf   : > { %v9757_v53 = vcombine.high %v798_v47, %v810_v48  ;;  %v11966_v3 = vld [vmem:[%s11716_s6] sm:$0xff]  ;;  %v9756_v61 = vcombine.low %v798_v47, %v810_v48 }
 0x2c0   : > { %v9322_v6 = vrot.slane %v9308_v45, %v11932_v30  ;;  %8176 = vmatpush2.bf16.msra.mxu1 %v9898_v56  ;;  %v1553_v56 = vld [vmem:[%s11377_s15 + $0x1d00] sm:$0xff]  ;;  %v774_v45 = vld [vmem:[%s11377_s15 + $0x4a8] sm:$0xff]  ;;  %v1806_v62 = vrot.slane %v11966_v3, %v11485_v55 }
 0x2c1   : > { %8217 = vmatpush2.bf16.msra.mxu0 %v10282_v57  ;;  %8177 = vmatprep.subr.bf16.mxu1 %v9875_v58  ;;  %v1802_v57 = vrot.slane %v11966_v3, %v11560_v2  ;;  %v10522_v58 = vcombine.low %v1565_v44, %v1577_v46  ;;  %v10499_v4 = vcombine.high %v1541_v54, %v1553_v56  ;;  %v1517_v52 = vld [vmem:[%s11377_s15 + $0x1be0] sm:$0xff]  ;;  %v714_v44 = vld [vmem:[%s11377_s15 + $0x2c8] sm:$0xff] }
 0x2c2   : > { %v9323_v10 = vcombine.low %v9315_v5, %v9322_v6  ;;  %8218 = vmatprep.subr.bf16.mxu0 %v10259_v59  ;;  %v786_v59 = vld [vmem:[%s11377_s15 + $0x508] sm:$0xff]  ;;  %v1529_v5 = vld [vmem:[%s11377_s15 + $0x1c40] sm:$0xff]  ;;  %v10498_v12 = vcombine.low %v1541_v54, %v1553_v56 }
 0x2c3   : > { %v9732_v15 = vcombine.low %v774_v45, %v786_v59  ;;  %v10475_v24 = vcombine.high %v1517_v52, %v1529_v5  ;;  %v1493_v18 = vld [vmem:[%s11377_s15 + $0x1b20] sm:$0xff]  ;;  %v690_v54 = vld [vmem:[%s11377_s15 + $0x208] sm:$0xff] }
 0x2c4   : > { %8178 = vmatpush2.bf16.msra.mxu1 %v9874_v7  ;;  %9415 = vst [vmem:[%s11948_s29] sm:$0xff] %v9323_v10  ;;  %v9733_v7 = vcombine.high %v774_v45, %v786_v59  ;;  %v1505_v19 = vld [vmem:[%s11377_s15 + $0x1b80] sm:$0xff] }
 0x2c5   : > { %8219 = vmatpush2.bf16.msra.mxu0 %v10258_v8  ;;  %8179 = vmatprep.subr.bf16.mxu1 %v9851_v13  ;;  %v750_v8 = vld [vmem:[%s11377_s15 + $0x3e8] sm:$0xff]  ;;  %v10451_v29 = vcombine.high %v1493_v18, %v1505_v19  ;;  %v10450_v46 = vcombine.low %v1493_v18, %v1505_v19  ;;  %v1421_v59 = vld [vmem:[%s11377_s15 + $0x18e0] sm:$0xff] }
 0x2c6   : > { %8220 = vmatprep.subr.bf16.mxu0 %v10235_v11  ;;  %v762_v13 = vld [vmem:[%s11377_s15 + $0x448] sm:$0xff] }
 0x2c7   : > { %v9708_v28 = vcombine.low %v750_v8, %v762_v13  ;;  %v1002_v18 = vld [vmem:[%s11377_s15 + $0xbc8] sm:$0xff] }
 0x2c8   : > { %8180 = vmatpush2.bf16.msra.mxu1 %v9850_v9 }
 0x2c9   : > { %8221 = vmatpush2.bf16.msra.mxu0 %v10234_v32  ;;  %8181 = vmatprep.subr.bf16.mxu1 %v9827_v16 }
 0x2ca   : > { %8222 = vmatprep.subr.bf16.mxu0 %v10211_v17  ;;  %v9709_v17 = vcombine.high %v750_v8, %v762_v13  ;;  %v1397_v8 = vld [vmem:[%s11377_s15 + $0x1820] sm:$0xff] }
 0x2cb   : > { %v1409_v13 = vld [vmem:[%s11377_s15 + $0x1880] sm:$0xff] }
 0x2cc   : > { %8182 = vmatpush2.bf16.msra.mxu1 %v9826_v21  ;;  %v738_v21 = vld [vmem:[%s11377_s15 + $0x388] sm:$0xff]  ;;  %v10354_v19 = vcombine.low %v1397_v8, %v1409_v13 }
 0x2cd   : > { %8223 = vmatpush2.bf16.msra.mxu0 %v10210_v22  ;;  %8183 = vmatprep.subr.bf16.mxu1 %v9803_v23  ;;  %v9684_v47 = vcombine.low %v726_v20, %v738_v21 }
 0x2ce   : > { %8224 = vmatprep.subr.bf16.mxu0 %v10187_v25  ;;  %v10474_v25 = vcombine.low %v1517_v52, %v1529_v5 }
 0x2d0   : > { %8184 = vmatpush2.bf16.msra.mxu1 %v9802_v33  ;;  %v9685_v33 = vcombine.high %v726_v20, %v738_v21 }
 0x2d1   : > { %8225 = vmatpush2.bf16.msra.mxu0 %v10186_v34  ;;  %8185 = vmatprep.subr.bf16.mxu1 %v9779_v42  ;;  %v1469_v34 = vld [vmem:[%s11377_s15 + $0x1a60] sm:$0xff] }
 0x2d2   : > { %8226 = vmatprep.subr.bf16.mxu0 %v10163_v43  ;;  %v1481_v42 = vld [vmem:[%s11377_s15 + $0x1ac0] sm:$0xff]  ;;  %v702_v43 = vld [vmem:[%s11377_s15 + $0x268] sm:$0xff] }
 0x2d3   : > { %v10427_v48 = vcombine.high %v1469_v34, %v1481_v42  ;;  %v10426_v56 = vcombine.low %v1469_v34, %v1481_v42  ;;  %v1709_v42 = vld [vmem:[%s11377_s15 + $0x21e0] sm:$0xff] }
 0x2d4   : > { %8186 = vmatpush2.bf16.msra.mxu1 %v9778_v49  ;;  %v9661_v49 = vcombine.high %v702_v43, %v714_v44 }
 0x2d5   : > { %8227 = vmatpush2.bf16.msra.mxu0 %v10162_v50  ;;  %8237 = vmatprep.subr.bf16.mxu1 %v10523_v51  ;;  %v1445_v50 = vld [vmem:[%s11377_s15 + $0x19a0] sm:$0xff] }
 0x2d6   : > { %8278 = vmatprep.subr.bf16.mxu0 %v9757_v53  ;;  %v1457_v51 = vld [vmem:[%s11377_s15 + $0x1a00] sm:$0xff]  ;;  %v678_v53 = vld [vmem:[%s11377_s15 + $0x1a8] sm:$0xff] }
 0x2d7   : > { %v7943_v6 = vpop.f32.mrf.mxu1  ;;  %8188 = vmatmul.mubr.bf16.vlgmr.msra.gmra.mxu1 %v11497_v1  ;;  %v9637_v45 = vcombine.high %v678_v53, %v690_v54  ;;  %v10402_v52 = vcombine.low %v1445_v50, %v1457_v51  ;;  %v9636_v5 = vcombine.low %v678_v53, %v690_v54  ;;  %v1697_v53 = vld [vmem:[%s11377_s15 + $0x2180] sm:$0xff]  ;;  %v918_v54 = vld [vmem:[%s11377_s15 + $0x928] sm:$0xff] }
 0x2d8   : > { %v7944_v10 = vadd.f32 %v7943_v6, %v1802_v57  ;;  %v7984_v11 = vpop.f32.mrf.mxu0  ;;  %8229 = vmatmul.mubr.bf16.vlgmr.msra.gmra.mxu0 %v11489_v60  ;;  %8238 = vmatpush1.bf16.msra.mxu1 %v10522_v58  ;;  %v9660_v57 = vcombine.low %v702_v43, %v714_v44  ;;  %v10403_v58 = vcombine.high %v1445_v50, %v1457_v51  ;;  %v1721_v43 = vld [vmem:[%s11377_s15 + $0x2240] sm:$0xff]  ;;  %v942_v44 = vld [vmem:[%s11377_s15 + $0x9e8] sm:$0xff] }
 0x2d9   : > { %8269 = vmatprep.mubr.bf16.mxu1 %v11517_v26  ;;  %8279 = vmatpush1.bf16.msra.mxu0 %v9756_v61  ;;  %v7945_v14 = vpop.f32.mrf.mxu1  ;;  %v1433_v61 = vld [vmem:[%s11377_s15 + $0x1940] sm:$0xff] }
 0x2da   : > { %v11981_v9 = vadd.f32 %v7984_v11, %v7944_v10  ;;  %8310 = vmatprep.mubr.bf16.mxu0 %v11493_v63  ;;  %v7946_v32 = vadd.f32 %v7945_v14, %v1806_v62  ;;  %v7986_v16 = vpop.f32.mrf.mxu0  ;;  %8239 = vmatprep.subr.bf16.mxu1 %v10499_v4  ;;  %v654_v62 = vld [vmem:[%s11377_s15 + $0xe8] sm:$0xff]  ;;  %v10379_v6 = vcombine.high %v1421_v59, %v1433_v61  ;;  %v1685_v51 = vld [vmem:[%s11377_s15 + $0x2120] sm:$0xff] }
 0x2db   : > { %v7947_v38 = vpop.f32.mrf.mxu1  ;;  %8280 = vmatprep.subr.bf16.mxu0 %v9733_v7  ;;  %v666_v4 = vld [vmem:[%s11377_s15 + $0x148] sm:$0xff] }
 0x2dc   : > { %v11988_v22 = vadd.f32 %v7986_v16, %v7946_v32  ;;  %v7988_v23 = vpop.f32.mrf.mxu0  ;;  %8240 = vmatpush1.bf16.msra.mxu1 %v10498_v12  ;;  %v9613_v7 = vcombine.high %v654_v62, %v666_v4  ;;  %v630_v10 = vld [vmem:[%s11377_s15 + $0x28] sm:$0xff]  ;;  %v10378_v12 = vcombine.low %v1421_v59, %v1433_v61  ;;  %v9612_v14 = vcombine.low %v654_v62, %v666_v4  ;;  %v1757_v32 = vld [vmem:[%s11377_s15 + $0x2360] sm:$0xff] }
 0x2dd   : > { %8281 = vmatpush1.bf16.msra.mxu0 %v9732_v15  ;;  %v7948_v27 = vpop.f32.mrf.mxu1  ;;  %8241 = vmatprep.subr.bf16.mxu1 %v10475_v24  ;;  %v642_v11 = vld [vmem:[%s11377_s15 + $0x88] sm:$0xff]  ;;  %v10355_v15 = vcombine.high %v1397_v8, %v1409_v13  ;;  %v1769_v16 = vld [vmem:[%s11377_s15 + $0x23c0] sm:$0xff] }
 0x2de   : > { %v7989_v31 = vpop.f32.mrf.mxu0  ;;  %8282 = vmatprep.subr.bf16.mxu0 %v9709_v17  ;;  %v9589_v24 = vcombine.high %v630_v10, %v642_v11  ;;  %v990_v17 = vld [vmem:[%s11377_s15 + $0xb68] sm:$0xff]  ;;  %v9588_v38 = vcombine.low %v630_v10, %v642_v11  ;;  %v10715_v20 = vcombine.high %v1757_v32, %v1769_v16  ;;  %v1733_v23 = vld [vmem:[%s11377_s15 + $0x22a0] sm:$0xff] }
 0x2df   : > { %v9949_v21 = vcombine.high %v990_v17, %v1002_v18  ;;  %v966_v27 = vld [vmem:[%s11377_s15 + $0xaa8] sm:$0xff]  ;;  %v9948_v31 = vcombine.low %v990_v17, %v1002_v18  ;;  %v1661_v61 = vld [vmem:[%s11377_s15 + $0x2060] sm:$0xff] }
 0x2e0   : > { %8242 = vmatpush1.bf16.msra.mxu1 %v10474_v25  ;;  %v1745_v25 = vld [vmem:[%s11377_s15 + $0x2300] sm:$0xff]  ;;  %v894_v4 = vld [vmem:[%s11377_s15 + $0x868] sm:$0xff] }
 0x2e1   : > { %8283 = vmatpush1.bf16.msra.mxu0 %v9708_v28  ;;  %8243 = vmatprep.subr.bf16.mxu1 %v10451_v29  ;;  %v978_v28 = vld [vmem:[%s11377_s15 + $0xb08] sm:$0xff]  ;;  %v10714_v29 = vcombine.low %v1757_v32, %v1769_v16  ;;  %v1673_v62 = vld [vmem:[%s11377_s15 + $0x20c0] sm:$0xff] }
 0x2e2   : > { %8284 = vmatprep.subr.bf16.mxu0 %v9685_v33  ;;  %v10691_v33 = vcombine.high %v1733_v23, %v1745_v25  ;;  %v9925_v34 = vcombine.high %v966_v27, %v978_v28  ;;  %v1637_v13 = vld [vmem:[%s11377_s15 + $0x1fa0] sm:$0xff]  ;;  %v870_v11 = vld [vmem:[%s11377_s15 + $0x7a8] sm:$0xff] }
 0x2e3   : > { %v1649_v10 = vld [vmem:[%s11377_s15 + $0x2000] sm:$0xff]  ;;  %v846_v18 = vld [vmem:[%s11377_s15 + $0x6e8] sm:$0xff] }
 0x2e4   : > { %8244 = vmatpush1.bf16.msra.mxu1 %v10450_v46  ;;  %v954_v46 = vld [vmem:[%s11377_s15 + $0xa48] sm:$0xff]  ;;  %v1613_v16 = vld [vmem:[%s11377_s15 + $0x1ee0] sm:$0xff] }
 0x2e5   : > { %8285 = vmatpush1.bf16.msra.mxu0 %v9684_v47  ;;  %8245 = vmatprep.subr.bf16.mxu1 %v10427_v48  ;;  %v10690_v47 = vcombine.low %v1733_v23, %v1745_v25  ;;  %v9924_v48 = vcombine.low %v966_v27, %v978_v28  ;;  %v9901_v50 = vcombine.high %v942_v44, %v954_v46  ;;  %v1625_v17 = vld [vmem:[%s11377_s15 + $0x1f40] sm:$0xff]  ;;  %v822_v28 = vld [vmem:[%s11377_s15 + $0x628] sm:$0xff] }
 0x2e6   : > { %8286 = vmatprep.subr.bf16.mxu0 %v9661_v49  ;;  %v10667_v49 = vcombine.high %v1709_v42, %v1721_v43  ;;  %v1589_v25 = vld [vmem:[%s11377_s15 + $0x1e20] sm:$0xff] }
 0x2e7   : > { %v1601_v27 = vld [vmem:[%s11377_s15 + $0x1e80] sm:$0xff] }
 0x2e8   : > { %8246 = vmatpush1.bf16.msra.mxu1 %v10426_v56  ;;  %v930_v56 = vld [vmem:[%s11377_s15 + $0x988] sm:$0xff] }
 0x2e9   : > { %8287 = vmatpush1.bf16.msra.mxu0 %v9660_v57  ;;  %8247 = vmatprep.subr.bf16.mxu1 %v10403_v58  ;;  %v10666_v57 = vcombine.low %v1709_v42, %v1721_v43  ;;  %v9900_v58 = vcombine.low %v942_v44, %v954_v46  ;;  %v9877_v59 = vcombine.high %v918_v54, %v930_v56  ;;  %v1182_v43 = vld [vmem:[%s11377_s15 + $0x1168] sm:$0xff] }
 0x2ea   : > { %8288 = vmatprep.subr.bf16.mxu0 %v9637_v45  ;;  %v10643_v45 = vcombine.high %v1685_v51, %v1697_v53  ;;  %v1194_v44 = vld [vmem:[%s11377_s15 + $0x11c8] sm:$0xff] }
 0x2eb   : > { %v1566_v46 = vld [vmem:[%s11377_s15 + $0x1d68] sm:$0xff] }
 0x2ec   : > { %8248 = vmatpush1.bf16.msra.mxu1 %v10402_v52  ;;  %v906_v52 = vld [vmem:[%s11377_s15 + $0x8c8] sm:$0xff] }
 0x2ed   : > { %8289 = vmatpush1.bf16.msra.mxu0 %v9636_v5  ;;  %8249 = vmatprep.subr.bf16.mxu1 %v10379_v6  ;;  %v10642_v5 = vcombine.low %v1685_v51, %v1697_v53  ;;  %v9876_v6 = vcombine.low %v918_v54, %v930_v56  ;;  %v9853_v8 = vcombine.high %v894_v4, %v906_v52  ;;  %v1158_v53 = vld [vmem:[%s11377_s15 + $0x10a8] sm:$0xff] }
 0x2ee   : > { %8290 = vmatprep.subr.bf16.mxu0 %v9613_v7  ;;  %v10619_v7 = vcombine.high %v1661_v61, %v1673_v62  ;;  %v1170_v54 = vld [vmem:[%s11377_s15 + $0x1108] sm:$0xff]  ;;  %v10140_v56 = vcombine.low %v1182_v43, %v1194_v44 }
 0x2f0   : > { %8250 = vmatpush1.bf16.msra.mxu1 %v10378_v12  ;;  %v882_v12 = vld [vmem:[%s11377_s15 + $0x808] sm:$0xff] }
 0x2f1   : > { %8291 = vmatpush1.bf16.msra.mxu0 %v9612_v14  ;;  %8251 = vmatprep.subr.bf16.mxu1 %v10355_v15  ;;  %v10618_v14 = vcombine.low %v1661_v61, %v1673_v62  ;;  %v9852_v15 = vcombine.low %v894_v4, %v906_v52  ;;  %v9829_v32 = vcombine.high %v870_v11, %v882_v12  ;;  %v1134_v61 = vld [vmem:[%s11377_s15 + $0xfe8] sm:$0xff] }
 0x2f2   : > { %8292 = vmatprep.subr.bf16.mxu0 %v9589_v24  ;;  %v10595_v24 = vcombine.high %v1637_v13, %v1649_v10  ;;  %v1146_v62 = vld [vmem:[%s11377_s15 + $0x1048] sm:$0xff] }
 0x2f4   : > { %8252 = vmatpush1.bf16.msra.mxu1 %v10354_v19  ;;  %v858_v19 = vld [vmem:[%s11377_s15 + $0x748] sm:$0xff] }
 0x2f5   : > { %8293 = vmatpush1.bf16.msra.mxu0 %v9588_v38  ;;  %8253 = vmatprep.subr.bf16.mxu1 %v10715_v20  ;;  %v10594_v38 = vcombine.low %v1637_v13, %v1649_v10  ;;  %v9828_v20 = vcombine.low %v870_v11, %v882_v12  ;;  %v9805_v23 = vcombine.high %v846_v18, %v858_v19 }
 0x2f6   : > { %8294 = vmatprep.subr.bf16.mxu0 %v9949_v21  ;;  %v10571_v21 = vcombine.high %v1613_v16, %v1625_v17  ;;  %v10116_v13 = vcombine.low %v1158_v53, %v1170_v54  ;;  %v10093_v12 = vcombine.high %v1134_v61, %v1146_v62 }
 0x2f8   : > { %8254 = vmatpush2.bf16.msra.mxu1 %v10714_v29  ;;  %v834_v29 = vld [vmem:[%s11377_s15 + $0x688] sm:$0xff] }
 0x2f9   : > { %8295 = vmatpush2.bf16.msra.mxu0 %v9948_v31  ;;  %8255 = vmatprep.subr.bf16.mxu1 %v10691_v33  ;;  %v10570_v31 = vcombine.low %v1613_v16, %v1625_v17  ;;  %v9804_v33 = vcombine.low %v846_v18, %v858_v19  ;;  %v9781_v42 = vcombine.high %v822_v28, %v834_v29  ;;  %v1122_v16 = vld [vmem:[%s11377_s15 + $0xf88] sm:$0xff] }
 0x2fa   : > { %8296 = vmatprep.subr.bf16.mxu0 %v9925_v34  ;;  %v10547_v34 = vcombine.high %v1589_v25, %v1601_v27  ;;  %v1494_v18 = vld [vmem:[%s11377_s15 + $0x1b28] sm:$0xff] }
 0x2fb   : > { %v1506_v19 = vld [vmem:[%s11377_s15 + $0x1b88] sm:$0xff] }
 0x2fc   : > { %8256 = vmatpush2.bf16.msra.mxu1 %v10690_v47  ;;  %v1578_v47 = vld [vmem:[%s11377_s15 + $0x1dc8] sm:$0xff] }
 0x2fd   : > { %8297 = vmatpush2.bf16.msra.mxu0 %v9924_v48  ;;  %8257 = vmatprep.subr.bf16.mxu1 %v10667_v49  ;;  %v10546_v48 = vcombine.low %v1589_v25, %v1601_v27  ;;  %v9780_v49 = vcombine.low %v822_v28, %v834_v29  ;;  %v10525_v51 = vcombine.high %v1566_v46, %v1578_v47  ;;  %v1086_v29 = vld [vmem:[%s11377_s15 + $0xe68] sm:$0xff] }
 0x2fe   : > { %8298 = vmatprep.subr.bf16.mxu0 %v9901_v50  ;;  %v10141_v50 = vcombine.high %v1182_v43, %v1194_v44  ;;  %v10453_v28 = vcombine.high %v1494_v18, %v1506_v19  ;;  %v10452_v43 = vcombine.low %v1494_v18, %v1506_v19  ;;  %v1386_v18 = vld [vmem:[%s11377_s15 + $0x17c8] sm:$0xff] }
 0x2ff   : > { %v1758_v19 = vld [vmem:[%s11377_s15 + $0x2368] sm:$0xff] }
 0x300   : > { %8258 = vmatpush2.bf16.msra.mxu1 %v10666_v57  ;;  %v1542_v57 = vld [vmem:[%s11377_s15 + $0x1ca8] sm:$0xff] }
 0x301   : > { %8299 = vmatpush2.bf16.msra.mxu0 %v9900_v58  ;;  %8259 = vmatprep.subr.bf16.mxu1 %v10643_v45  ;;  %v1554_v58 = vld [vmem:[%s11377_s15 + $0x1d08] sm:$0xff]  ;;  %v10524_v45 = vcombine.low %v1566_v46, %v1578_v47 }
 0x302   : > { %8300 = vmatprep.subr.bf16.mxu0 %v9877_v59  ;;  %v10117_v59 = vcombine.high %v1158_v53, %v1170_v54  ;;  %v10501_v52 = vcombine.high %v1542_v57, %v1554_v58  ;;  %v10500_v11 = vcombine.low %v1542_v57, %v1554_v58  ;;  %v1062_v47 = vld [vmem:[%s11377_s15 + $0xda8] sm:$0xff] }
 0x303   : > { %v1038_v57 = vld [vmem:[%s11377_s15 + $0xce8] sm:$0xff] }
 0x304   : > { %8260 = vmatpush2.bf16.msra.mxu1 %v10642_v5  ;;  %v1518_v5 = vld [vmem:[%s11377_s15 + $0x1be8] sm:$0xff] }
 0x305   : > { %8301 = vmatpush2.bf16.msra.mxu0 %v9876_v6  ;;  %8261 = vmatprep.subr.bf16.mxu1 %v10619_v7  ;;  %v1530_v6 = vld [vmem:[%s11377_s15 + $0x1c48] sm:$0xff] }
 0x306   : > { %8302 = vmatprep.subr.bf16.mxu0 %v9853_v8  ;;  %v1050_v58 = vld [vmem:[%s11377_s15 + $0xd48] sm:$0xff] }
 0x308   : > { %8262 = vmatpush2.bf16.msra.mxu1 %v10618_v14 }
 0x309   : > { %8303 = vmatpush2.bf16.msra.mxu0 %v9852_v15  ;;  %8263 = vmatprep.subr.bf16.mxu1 %v10595_v24  ;;  %v10477_v24 = vcombine.high %v1518_v5, %v1530_v6 }
 0x30a   : > { %8304 = vmatprep.subr.bf16.mxu0 %v9829_v32  ;;  %v1110_v32 = vld [vmem:[%s11377_s15 + $0xf28] sm:$0xff] }
 0x30b   : > { %v10069_v25 = vcombine.high %v1110_v32, %v1122_v16 }
 0x30c   : > { %8264 = vmatpush2.bf16.msra.mxu1 %v10594_v38 }
 0x30d   : > { %8305 = vmatpush2.bf16.msra.mxu0 %v9828_v20  ;;  %8265 = vmatprep.subr.bf16.mxu1 %v10571_v21  ;;  %v10092_v21 = vcombine.low %v1134_v61, %v1146_v62 }
 0x30e   : > { %8306 = vmatprep.subr.bf16.mxu0 %v9805_v23  ;;  %v10476_v23 = vcombine.low %v1518_v5, %v1530_v6 }
 0x310   : > { %8266 = vmatpush2.bf16.msra.mxu1 %v10570_v31  ;;  %v1098_v31 = vld [vmem:[%s11377_s15 + $0xec8] sm:$0xff] }
 0x311   : > { %8307 = vmatpush2.bf16.msra.mxu0 %v9804_v33  ;;  %8267 = vmatprep.subr.bf16.mxu1 %v10547_v34  ;;  %v1470_v33 = vld [vmem:[%s11377_s15 + $0x1a68] sm:$0xff]  ;;  %v10045_v44 = vcombine.high %v1086_v29, %v1098_v31 }
 0x312   : > { %8308 = vmatprep.subr.bf16.mxu0 %v9781_v42  ;;  %v1482_v34 = vld [vmem:[%s11377_s15 + $0x1ac8] sm:$0xff]  ;;  %v10068_v42 = vcombine.low %v1110_v32, %v1122_v16 }
 0x313   : > { %v10429_v46 = vcombine.high %v1470_v33, %v1482_v34  ;;  %v10428_v53 = vcombine.low %v1470_v33, %v1482_v34 }
 0x314   : > { %8268 = vmatpush2.bf16.msra.mxu1 %v10546_v48  ;;  %v1074_v48 = vld [vmem:[%s11377_s15 + $0xe08] sm:$0xff] }
 0x315   : > { %8309 = vmatpush2.bf16.msra.mxu0 %v9780_v49  ;;  %8319 = vmatprep.subr.bf16.mxu1 %v10141_v50  ;;  %v1446_v49 = vld [vmem:[%s11377_s15 + $0x19a8] sm:$0xff]  ;;  %v10021_v54 = vcombine.high %v1062_v47, %v1074_v48  ;;  %v10020_v61 = vcombine.low %v1062_v47, %v1074_v48 }
 0x316   : > { %8360 = vmatprep.subr.bf16.mxu0 %v10525_v51  ;;  %v1458_v50 = vld [vmem:[%s11377_s15 + $0x1a08] sm:$0xff]  ;;  %v10044_v51 = vcombine.low %v1086_v29, %v1098_v31 }
 0x317   : > { %v8025_v4 = vpop.f32.mrf.mxu1  ;;  %8270 = vmatmul.mubr.bf16.vlgmr.msra.gmra.mxu1 %v11581_v41  ;;  %v1746_v29 = vld [vmem:[%s11377_s15 + $0x2308] sm:$0xff] }
 0x318   : > { %v8026_v7 = vadd.f32 %v8025_v4, %v11981_v9  ;;  %v12052_v8 = vpop.f32.mrf.mxu0  ;;  %8311 = vmatmul.mubr.bf16.vlgmr.msra.gmra.mxu0 %v11497_v1  ;;  %8320 = vmatpush1.bf16.msra.mxu1 %v10140_v56  ;;  %v10405_v56 = vcombine.high %v1446_v49, %v1458_v50  ;;  %v10404_v4 = vcombine.low %v1446_v49, %v1458_v50  ;;  %v1722_v47 = vld [vmem:[%s11377_s15 + $0x2248] sm:$0xff] }
 0x319   : > { %8351 = vmatprep.mubr.bf16.mxu1 %v11495_v0  ;;  %8361 = vmatpush1.bf16.msra.mxu0 %v10524_v45  ;;  %v8027_v10 = vpop.f32.mrf.mxu1  ;;  %v1422_v45 = vld [vmem:[%s11377_s15 + $0x18e8] sm:$0xff] }
 0x31a   : > { %v10734_v14 = vmul.f32 -1.442695, %v8026_v7  ;;  %8392 = vmatprep.mubr.bf16.mxu0 %v11517_v26  ;;  %v8028_v9 = vadd.f32 %v8027_v10, %v11988_v22  ;;  %v12058_v15 = vpop.f32.mrf.mxu0  ;;  %8321 = vmatprep.subr.bf16.mxu1 %v10117_v59  ;;  %v1434_v59 = vld [vmem:[%s11377_s15 + $0x1948] sm:$0xff] }
 0x31b   : > { %v8029_v17 = vpop.f32.mrf.mxu1  ;;  %8362 = vmatprep.subr.bf16.mxu0 %v10501_v52  ;;  %v9997_v52 = vcombine.high %v1038_v57, %v1050_v58  ;;  %v10381_v6 = vcombine.high %v1422_v45, %v1434_v59  ;;  %v1014_v7 = vld [vmem:[%s11377_s15 + $0xc28] sm:$0xff] }
 0x31c   : > { %10869 = vpow2.f32 %v10734_v14  ;;  %v10735_v38 = vmul.f32 -1.442695, %v8028_v9  ;;  %v8070_v20 = vpop.f32.mrf.mxu0  ;;  %8322 = vmatpush1.bf16.msra.mxu1 %v10116_v13  ;;  %v1026_v13 = vld [vmem:[%s11377_s15 + $0xc88] sm:$0xff]  ;;  %v9996_v9 = vcombine.low %v1038_v57, %v1050_v58 }
 0x31d   : > { %8363 = vmatpush1.bf16.msra.mxu0 %v10500_v11  ;;  %v8030_v22 = vpop.f32.mrf.mxu1  ;;  %8323 = vmatprep.subr.bf16.mxu1 %v10093_v12  ;;  %v1398_v11 = vld [vmem:[%s11377_s15 + $0x1828] sm:$0xff]  ;;  %v9973_v32 = vcombine.high %v1014_v7, %v1026_v13  ;;  %v9972_v20 = vcombine.low %v1014_v7, %v1026_v13 }
 0x31e   : > { %10871 = vpow2.f32 %v10735_v38  ;;  %v8071_v27 = vpop.f32.mrf.mxu0  ;;  %8364 = vmatprep.subr.bf16.mxu0 %v10477_v24  ;;  %v1410_v12 = vld [vmem:[%s11377_s15 + $0x1888] sm:$0xff]  ;;  %v10380_v24 = vcombine.low %v1422_v45, %v1434_v59 }
 0x31f   : > { %v10357_v16 = vcombine.high %v1398_v11, %v1410_v12  ;;  %v1374_v17 = vld [vmem:[%s11377_s15 + $0x1768] sm:$0xff] }
 0x320   : > { %8324 = vmatpush1.bf16.msra.mxu1 %v10092_v21  ;;  %v1770_v38 = vld [vmem:[%s11377_s15 + $0x23c8] sm:$0xff]  ;;  %v10356_v21 = vcombine.low %v1398_v11, %v1410_v12  ;;  %v10333_v22 = vcombine.high %v1374_v17, %v1386_v18  ;;  %v10332_v31 = vcombine.low %v1374_v17, %v1386_v18 }
 0x321   : > { %8365 = vmatpush1.bf16.msra.mxu0 %v10476_v23  ;;  %8325 = vmatprep.subr.bf16.mxu1 %v10069_v25  ;;  %v10717_v23 = vcombine.high %v1758_v19, %v1770_v38  ;;  %v1350_v25 = vld [vmem:[%s11377_s15 + $0x16a8] sm:$0xff]  ;;  %v10716_v33 = vcombine.low %v1758_v19, %v1770_v38 }
 0x322   : > { %8366 = vmatprep.subr.bf16.mxu0 %v10453_v28  ;;  %v1362_v27 = vld [vmem:[%s11377_s15 + $0x1708] sm:$0xff] }
 0x323   : > { %v1734_v28 = vld [vmem:[%s11377_s15 + $0x22a8] sm:$0xff]  ;;  %v10309_v34 = vcombine.high %v1350_v25, %v1362_v27  ;;  %v10308_v48 = vcombine.low %v1350_v25, %v1362_v27 }
 0x324   : > { %8326 = vmatpush1.bf16.msra.mxu1 %v10068_v42  ;;  %v10693_v42 = vcombine.high %v1734_v28, %v1746_v29  ;;  %v10692_v49 = vcombine.low %v1734_v28, %v1746_v29  ;;  %v1686_v58 = vld [vmem:[%s11377_s15 + $0x2128] sm:$0xff] }
 0x325   : > { %8367 = vmatpush1.bf16.msra.mxu0 %v10452_v43  ;;  %8327 = vmatprep.subr.bf16.mxu1 %v10045_v44  ;;  %v1326_v43 = vld [vmem:[%s11377_s15 + $0x15e8] sm:$0xff] }
 0x326   : > { %8368 = vmatprep.subr.bf16.mxu0 %v10429_v46  ;;  %v1338_v44 = vld [vmem:[%s11377_s15 + $0x1648] sm:$0xff] }
 0x327   : > { %v1710_v46 = vld [vmem:[%s11377_s15 + $0x21e8] sm:$0xff]  ;;  %v10285_v50 = vcombine.high %v1326_v43, %v1338_v44 }
 0x328   : > { %8328 = vmatpush1.bf16.msra.mxu1 %v10044_v51  ;;  %v1698_v45 = vld [vmem:[%s11377_s15 + $0x2188] sm:$0xff] }
 0x329   : > { %v10870_v62 = vpop.eup %10869  ;;  %8369 = vmatpush1.bf16.msra.mxu0 %v10428_v53  ;;  %8329 = vmatprep.subr.bf16.mxu1 %v10021_v54  ;;  %v10669_v53 = vcombine.high %v1710_v46, %v1722_v47  ;;  %v1302_v54 = vld [vmem:[%s11377_s15 + $0x1528] sm:$0xff]  ;;  %v10644_v11 = vcombine.low %v1686_v58, %v1698_v45 }
 0x32a   : > { %v9215_v5 = vadd.f32 1.0, %v10870_v62  ;;  %8370 = vmatprep.subr.bf16.mxu0 %v10405_v56  ;;  %v1314_v56 = vld [vmem:[%s11377_s15 + $0x1588] sm:$0xff]  ;;  %v10668_v62 = vcombine.low %v1710_v46, %v1722_v47  ;;  %v12119_v47 = vsub.s32 6, %v11460_v35 }
 0x32b   : > { %v10872_v10 = vpop.eup %10871  ;;  %v1662_v7 = vld [vmem:[%s11377_s15 + $0x2068] sm:$0xff] }
 0x32c   : > { %v9216_v14 = vadd.f32 1.0, %v10872_v10  ;;  %8330 = vmatpush1.bf16.msra.mxu1 %v10020_v61  ;;  %10873 = vrcp.f32 %v9215_v5  ;;  %v10284_v61 = vcombine.low %v1326_v43, %v1338_v44  ;;  %v1278_v5 = vld [vmem:[%s11377_s15 + $0x1468] sm:$0xff]  ;;  %v10260_v10 = vcombine.low %v1302_v54, %v1314_v56 }
 0x32d   : > { %8371 = vmatpush1.bf16.msra.mxu0 %v10404_v4  ;;  %8331 = vmatprep.subr.bf16.mxu1 %v9997_v52  ;;  %v10261_v4 = vcombine.high %v1302_v54, %v1314_v56  ;;  %v10645_v52 = vcombine.high %v1686_v58, %v1698_v45  ;;  %v1674_v13 = vld [vmem:[%s11377_s15 + $0x20c8] sm:$0xff]  ;;  %v1195_v54 = vld [vmem:[%s11377_s15 + $0x11d0] sm:$0xff]  ;;  %v12126_v56 = vsub.s32 7, %v11460_v35 }
 0x32e   : > { %10875 = vrcp.f32 %v9216_v14  ;;  %8372 = vmatprep.subr.bf16.mxu0 %v10381_v6  ;;  %v1290_v6 = vld [vmem:[%s11377_s15 + $0x14c8] sm:$0xff]  ;;  %v10621_v14 = vcombine.high %v1662_v7, %v1674_v13  ;;  %v10620_v18 = vcombine.low %v1662_v7, %v1674_v13  ;;  %v1159_v7 = vld [vmem:[%s11377_s15 + $0x10b0] sm:$0xff] }
 0x32f   : > { %v10237_v12 = vcombine.high %v1278_v5, %v1290_v6  ;;  %v10236_v17 = vcombine.low %v1278_v5, %v1290_v6  ;;  %v787_v5 = vld [vmem:[%s11377_s15 + $0x510] sm:$0xff]  ;;  %v1814_v35 = vrot.slane %v11966_v3, %v12126_v56 }
 0x330   : > { %8332 = vmatpush1.bf16.msra.mxu1 %v9996_v9  ;;  %v1254_v9 = vld [vmem:[%s11377_s15 + $0x13a8] sm:$0xff]  ;;  %v1171_v13 = vld [vmem:[%s11377_s15 + $0x1110] sm:$0xff] }
 0x331   : > { %8373 = vmatpush1.bf16.msra.mxu0 %v10380_v24  ;;  %8333 = vmatprep.subr.bf16.mxu1 %v9973_v32  ;;  %v1266_v24 = vld [vmem:[%s11377_s15 + $0x1408] sm:$0xff] }
 0x332   : > { %8374 = vmatprep.subr.bf16.mxu0 %v10357_v16  ;;  %v1638_v32 = vld [vmem:[%s11377_s15 + $0x1fa8] sm:$0xff]  ;;  %v10213_v19 = vcombine.high %v1254_v9, %v1266_v24  ;;  %v10212_v25 = vcombine.low %v1254_v9, %v1266_v24  ;;  %v763_v9 = vld [vmem:[%s11377_s15 + $0x450] sm:$0xff] }
 0x333   : > { %v1650_v16 = vld [vmem:[%s11377_s15 + $0x2008] sm:$0xff] }
 0x334   : > { %8334 = vmatpush1.bf16.msra.mxu1 %v9972_v20  ;;  %v10597_v38 = vcombine.high %v1638_v32, %v1650_v16  ;;  %v1230_v20 = vld [vmem:[%s11377_s15 + $0x12e8] sm:$0xff]  ;;  %v10596_v27 = vcombine.low %v1638_v32, %v1650_v16  ;;  %v10119_v32 = vcombine.high %v1159_v7, %v1171_v13  ;;  %v1147_v16 = vld [vmem:[%s11377_s15 + $0x1050] sm:$0xff] }
 0x335   : > { %8375 = vmatpush1.bf16.msra.mxu0 %v10356_v21  ;;  %8335 = vmatprep.subr.bf16.mxu1 %v10333_v22  ;;  %v1242_v21 = vld [vmem:[%s11377_s15 + $0x1348] sm:$0xff] }
 0x336   : > { %8376 = vmatprep.subr.bf16.mxu0 %v10717_v23  ;;  %v1614_v22 = vld [vmem:[%s11377_s15 + $0x1ee8] sm:$0xff]  ;;  %v10189_v28 = vcombine.high %v1230_v20, %v1242_v21  ;;  %v10188_v43 = vcombine.low %v1230_v20, %v1242_v21  ;;  %v10118_v20 = vcombine.low %v1159_v7, %v1171_v13  ;;  %v691_v7 = vld [vmem:[%s11377_s15 + $0x210] sm:$0xff] }
 0x337   : > { %v1626_v23 = vld [vmem:[%s11377_s15 + $0x1f48] sm:$0xff]  ;;  %v1063_v13 = vld [vmem:[%s11377_s15 + $0xdb0] sm:$0xff] }
 0x338   : > { %8336 = vmatpush2.bf16.msra.mxu1 %v10332_v31  ;;  %v10573_v29 = vcombine.high %v1614_v22, %v1626_v23  ;;  %v1206_v31 = vld [vmem:[%s11377_s15 + $0x1228] sm:$0xff]  ;;  %v10572_v44 = vcombine.low %v1614_v22, %v1626_v23 }
 0x339   : > { %8377 = vmatpush2.bf16.msra.mxu0 %v10716_v33  ;;  %8337 = vmatprep.subr.bf16.mxu1 %v10309_v34  ;;  %v12092_v51 = vpop.eup %10873  ;;  %v1218_v33 = vld [vmem:[%s11377_s15 + $0x1288] sm:$0xff] }
 0x33a   : > { %8378 = vmatprep.subr.bf16.mxu0 %v10693_v42  ;;  %v1590_v34 = vld [vmem:[%s11377_s15 + $0x1e28] sm:$0xff]  ;;  %v10165_v46 = vcombine.high %v1206_v31, %v1218_v33  ;;  %v10164_v58 = vcombine.low %v1206_v31, %v1218_v33  ;;  %v1111_v31 = vld [vmem:[%s11377_s15 + $0xf30] sm:$0xff] }
 0x33b   : > { %v12096_v57 = vpop.eup %10875  ;;  %v1602_v42 = vld [vmem:[%s11377_s15 + $0x1e88] sm:$0xff]  ;;  %v1123_v33 = vld [vmem:[%s11377_s15 + $0xf90] sm:$0xff] }
 0x33c   : > { %v9324_v59 = vcombine.low %v12092_v51, %v12096_v57  ;;  %8338 = vmatpush2.bf16.msra.mxu1 %v10308_v48  ;;  %v10549_v48 = vcombine.high %v1590_v34, %v1602_v42  ;;  %v10548_v45 = vcombine.low %v1590_v34, %v1602_v42  ;;  %v1255_v51 = vld [vmem:[%s11377_s15 + $0x13b0] sm:$0xff] }
 0x33d   : > { %8379 = vmatpush2.bf16.msra.mxu0 %v10692_v49  ;;  %8339 = vmatprep.subr.bf16.mxu1 %v10285_v50  ;;  %v799_v49 = vld [vmem:[%s11377_s15 + $0x570] sm:$0xff] }
 0x33e   : > { %8380 = vmatprep.subr.bf16.mxu0 %v10669_v53  ;;  %v811_v50 = vld [vmem:[%s11377_s15 + $0x5d0] sm:$0xff] }
 0x33f   : > { %v1183_v53 = vld [vmem:[%s11377_s15 + $0x1170] sm:$0xff]  ;;  %v9758_v6 = vcombine.low %v799_v49, %v811_v50 }
 0x340   : > { %8340 = vmatpush2.bf16.msra.mxu1 %v10284_v61  ;;  %v9759_v61 = vcombine.high %v799_v49, %v811_v50  ;;  %v1267_v57 = vld [vmem:[%s11377_s15 + $0x1410] sm:$0xff] }
 0x341   : > { %8381 = vmatpush2.bf16.msra.mxu0 %v10668_v62  ;;  %8341 = vmatprep.subr.bf16.mxu1 %v10261_v4  ;;  %v1810_v62 = vrot.slane %v11966_v3, %v12119_v47  ;;  %v10143_v4 = vcombine.high %v1183_v53, %v1195_v54  ;;  %v1135_v3 = vld [vmem:[%s11377_s15 + $0xff0] sm:$0xff] }
 0x342   : > { %8382 = vmatprep.subr.bf16.mxu0 %v10645_v52  ;;  %v775_v52 = vld [vmem:[%s11377_s15 + $0x4b0] sm:$0xff] }
 0x344   : > { %8342 = vmatpush2.bf16.msra.mxu1 %v10260_v10  ;;  %v10142_v10 = vcombine.low %v1183_v53, %v1195_v54  ;;  %v10071_v54 = vcombine.high %v1111_v31, %v1123_v33 }
 0x345   : > { %8383 = vmatpush2.bf16.msra.mxu0 %v10644_v11  ;;  %8343 = vmatprep.subr.bf16.mxu1 %v10237_v12  ;;  %v8067_v11 = vadd.f32 %v12052_v8, %v1810_v62  ;;  %v9735_v12 = vcombine.high %v775_v52, %v787_v5  ;;  %v9734_v8 = vcombine.low %v775_v52, %v787_v5  ;;  %v1099_v62 = vld [vmem:[%s11377_s15 + $0xed0] sm:$0xff] }
 0x346   : > { %8384 = vmatprep.subr.bf16.mxu0 %v10621_v14  ;;  %v751_v14 = vld [vmem:[%s11377_s15 + $0x3f0] sm:$0xff]  ;;  %v10070_v52 = vcombine.low %v1111_v31, %v1123_v33 }
 0x347   : > { %v9711_v21 = vcombine.high %v751_v14, %v763_v9 }
 0x348   : > { %8344 = vmatpush2.bf16.msra.mxu1 %v10236_v17  ;;  %v8069_v17 = vadd.f32 %v12058_v15, %v1814_v35 }
 0x349   : > { %8385 = vmatpush2.bf16.msra.mxu0 %v10620_v18  ;;  %8345 = vmatprep.subr.bf16.mxu1 %v10213_v19 }
 0x34a   : > { %8386 = vmatprep.subr.bf16.mxu0 %v10597_v38 }
 0x34c   : > { %8346 = vmatpush2.bf16.msra.mxu1 %v10212_v25  ;;  %v10095_v25 = vcombine.high %v1135_v3, %v1147_v16 }
 0x34d   : > { %8387 = vmatpush2.bf16.msra.mxu0 %v10596_v27  ;;  %8347 = vmatprep.subr.bf16.mxu1 %v10189_v28  ;;  %v727_v27 = vld [vmem:[%s11377_s15 + $0x330] sm:$0xff] }
 0x34e   : > { %8388 = vmatprep.subr.bf16.mxu0 %v10573_v29  ;;  %v739_v28 = vld [vmem:[%s11377_s15 + $0x390] sm:$0xff] }
 0x34f   : > { %v9687_v49 = vcombine.high %v727_v27, %v739_v28 }
 0x350   : > { %8348 = vmatpush2.bf16.msra.mxu1 %v10188_v43 }
 0x351   : > { %8389 = vmatpush2.bf16.msra.mxu0 %v10572_v44  ;;  %8349 = vmatprep.subr.bf16.mxu1 %v10165_v46  ;;  %v9710_v44 = vcombine.low %v751_v14, %v763_v9 }
 0x352   : > { %8390 = vmatprep.subr.bf16.mxu0 %v10549_v48  ;;  %v10094_v48 = vcombine.low %v1135_v3, %v1147_v16  ;;  %v1039_v3 = vld [vmem:[%s11377_s15 + $0xcf0] sm:$0xff] }
 0x353   : > { %v1051_v16 = vld [vmem:[%s11377_s15 + $0xd50] sm:$0xff] }
 0x354   : > { %8350 = vmatpush2.bf16.msra.mxu1 %v10164_v58  ;;  %v703_v58 = vld [vmem:[%s11377_s15 + $0x270] sm:$0xff] }
 0x355   : > { %8391 = vmatpush2.bf16.msra.mxu0 %v10548_v45  ;;  %8401 = vmatprep.subr.bf16.mxu1 %v9759_v61  ;;  %v715_v45 = vld [vmem:[%s11377_s15 + $0x2d0] sm:$0xff] }
 0x356   : > { %8442 = vmatprep.subr.bf16.mxu0 %v10143_v4  ;;  %v1087_v61 = vld [vmem:[%s11377_s15 + $0xe70] sm:$0xff]  ;;  %v9686_v4 = vcombine.low %v727_v27, %v739_v28  ;;  %v9663_v5 = vcombine.high %v703_v58, %v715_v45  ;;  %v9998_v28 = vcombine.low %v1039_v3, %v1051_v16 }
 0x357   : > { %v8107_v24 = vpop.f32.mrf.mxu1  ;;  %8352 = vmatmul.mubr.bf16.vlgmr.msra.gmra.mxu1 %v11489_v60  ;;  %v10047_v35 = vcombine.high %v1087_v61, %v1099_v62 }
 0x358   : > { %v8108_v18 = vadd.f32 %v8107_v24, %v8067_v11  ;;  %v8148_v19 = vpop.f32.mrf.mxu0  ;;  %8393 = vmatmul.mubr.bf16.vlgmr.msra.gmra.mxu0 %v11581_v41  ;;  %8402 = vmatpush1.bf16.msra.mxu1 %v9758_v6  ;;  %v679_v6 = vld [vmem:[%s11377_s15 + $0x1b0] sm:$0xff]  ;;  %v9662_v11 = vcombine.low %v703_v58, %v715_v45 }
 0x359   : > { %8433 = vmatprep.mubr.bf16.mxu1 %v11493_v63  ;;  %8443 = vmatpush1.bf16.msra.mxu0 %v10142_v10  ;;  %v8109_v38 = vpop.f32.mrf.mxu1  ;;  %v1075_v10 = vld [vmem:[%s11377_s15 + $0xe10] sm:$0xff]  ;;  %v9639_v14 = vcombine.high %v679_v6, %v691_v7 }
 0x35a   : > { %v8149_v22 = vadd.f32 %v8148_v19, %v8108_v18  ;;  %8474 = vmatprep.mubr.bf16.mxu0 %v11495_v0  ;;  %v8110_v15 = vadd.f32 %v8109_v38, %v8069_v17  ;;  %v8150_v23 = vpop.f32.mrf.mxu0  ;;  %8403 = vmatprep.subr.bf16.mxu1 %v9735_v12  ;;  %v10046_v12 = vcombine.low %v1087_v61, %v1099_v62  ;;  %v655_v24 = vld [vmem:[%s11377_s15 + $0xf0] sm:$0xff] }
 0x35b   : > { %v8111_v29 = vpop.f32.mrf.mxu1  ;;  %8444 = vmatprep.subr.bf16.mxu0 %v10119_v32  ;;  %v10023_v9 = vcombine.high %v1063_v13, %v1075_v10  ;;  %v667_v32 = vld [vmem:[%s11377_s15 + $0x150] sm:$0xff]  ;;  %v9638_v17 = vcombine.low %v679_v6, %v691_v7  ;;  %v10022_v18 = vcombine.low %v1063_v13, %v1075_v10 }
 0x35c   : > { %v10736_v34 = vmul.f32 -1.442695, %v8149_v22  ;;  %v8151_v42 = vadd.f32 %v8150_v23, %v8110_v15  ;;  %v8152_v43 = vpop.f32.mrf.mxu0  ;;  %8404 = vmatpush1.bf16.msra.mxu1 %v9734_v8  ;;  %v9615_v19 = vcombine.high %v655_v24, %v667_v32  ;;  %v9999_v8 = vcombine.high %v1039_v3, %v1051_v16  ;;  %v631_v38 = vld [vmem:[%s11377_s15 + $0x30] sm:$0xff] }
 0x35d   : > { %8445 = vmatpush1.bf16.msra.mxu0 %v10118_v20  ;;  %v8112_v46 = vpop.f32.mrf.mxu1  ;;  %8405 = vmatprep.subr.bf16.mxu1 %v9711_v21  ;;  %v643_v20 = vld [vmem:[%s11377_s15 + $0x90] sm:$0xff] }
 0x35e   : > { %10877 = vpow2.f32 %v10736_v34  ;;  %v10737_v50 = vmul.f32 -1.442695, %v8151_v42  ;;  %v8153_v53 = vpop.f32.mrf.mxu0  ;;  %8446 = vmatprep.subr.bf16.mxu0 %v10095_v25  ;;  %v1015_v22 = vld [vmem:[%s11377_s15 + $0xc30] sm:$0xff]  ;;  %v9614_v25 = vcombine.low %v655_v24, %v667_v32  ;;  %v9591_v29 = vcombine.high %v631_v38, %v643_v20 }
 0x35f   : > { %v1027_v15 = vld [vmem:[%s11377_s15 + $0xc90] sm:$0xff]  ;;  %v9590_v46 = vcombine.low %v631_v38, %v643_v20 }
 0x360   : > { %10879 = vpow2.f32 %v10737_v50  ;;  %8406 = vmatpush1.bf16.msra.mxu1 %v9710_v44  ;;  %v9975_v33 = vcombine.high %v1015_v22, %v1027_v15  ;;  %v991_v34 = vld [vmem:[%s11377_s15 + $0xb70] sm:$0xff] }
 0x361   : > { %8447 = vmatpush1.bf16.msra.mxu0 %v10094_v48  ;;  %8407 = vmatprep.subr.bf16.mxu1 %v9687_v49  ;;  %v1003_v42 = vld [vmem:[%s11377_s15 + $0xbd0] sm:$0xff]  ;;  %v9974_v48 = vcombine.low %v1015_v22, %v1027_v15 }
 0x362   : > { %8448 = vmatprep.subr.bf16.mxu0 %v10071_v54  ;;  %v1375_v43 = vld [vmem:[%s11377_s15 + $0x1770] sm:$0xff]  ;;  %v9951_v49 = vcombine.high %v991_v34, %v1003_v42  ;;  %v9950_v61 = vcombine.low %v991_v34, %v1003_v42 }
 0x363   : > { %v1387_v44 = vld [vmem:[%s11377_s15 + $0x17d0] sm:$0xff] }
 0x364   : > { %8408 = vmatpush1.bf16.msra.mxu1 %v9686_v4  ;;  %v10335_v50 = vcombine.high %v1375_v43, %v1387_v44  ;;  %v967_v53 = vld [vmem:[%s11377_s15 + $0xab0] sm:$0xff]  ;;  %v10334_v62 = vcombine.low %v1375_v43, %v1387_v44 }
 0x365   : > { %8449 = vmatpush1.bf16.msra.mxu0 %v10070_v52  ;;  %8409 = vmatprep.subr.bf16.mxu1 %v9663_v5  ;;  %v979_v54 = vld [vmem:[%s11377_s15 + $0xb10] sm:$0xff] }
 0x366   : > { %8450 = vmatprep.subr.bf16.mxu0 %v10047_v35  ;;  %v1351_v58 = vld [vmem:[%s11377_s15 + $0x16b0] sm:$0xff]  ;;  %v9927_v4 = vcombine.high %v967_v53, %v979_v54  ;;  %v9926_v13 = vcombine.low %v967_v53, %v979_v54 }
 0x367   : > { %v1363_v45 = vld [vmem:[%s11377_s15 + $0x1710] sm:$0xff] }
 0x368   : > { %8410 = vmatpush1.bf16.msra.mxu1 %v9662_v11  ;;  %v10311_v52 = vcombine.high %v1351_v58, %v1363_v45  ;;  %v943_v5 = vld [vmem:[%s11377_s15 + $0x9f0] sm:$0xff]  ;;  %v10310_v10 = vcombine.low %v1351_v58, %v1363_v45  ;;  %v10214_v58 = vcombine.low %v1255_v51, %v1267_v57 }
 0x369   : > { %8451 = vmatpush1.bf16.msra.mxu0 %v10046_v12  ;;  %8411 = vmatprep.subr.bf16.mxu1 %v9639_v14  ;;  %v955_v35 = vld [vmem:[%s11377_s15 + $0xa50] sm:$0xff] }
 0x36a   : > { %8452 = vmatprep.subr.bf16.mxu0 %v10023_v9  ;;  %v1327_v6 = vld [vmem:[%s11377_s15 + $0x15f0] sm:$0xff]  ;;  %v9903_v11 = vcombine.high %v943_v5, %v955_v35  ;;  %v9902_v16 = vcombine.low %v943_v5, %v955_v35 }
 0x36b   : > { %v10878_v21 = vpop.eup %10877  ;;  %v1339_v7 = vld [vmem:[%s11377_s15 + $0x1650] sm:$0xff] }
 0x36c   : > { %v9217_v23 = vadd.f32 1.0, %v10878_v21  ;;  %8412 = vmatpush1.bf16.msra.mxu1 %v9638_v17  ;;  %v10287_v12 = vcombine.high %v1327_v6, %v1339_v7  ;;  %v919_v14 = vld [vmem:[%s11377_s15 + $0x930] sm:$0xff] }
 0x36d   : > { %v10880_v27 = vpop.eup %10879  ;;  %8453 = vmatpush1.bf16.msra.mxu0 %v10022_v18  ;;  %8413 = vmatprep.subr.bf16.mxu1 %v9615_v19  ;;  %v931_v9 = vld [vmem:[%s11377_s15 + $0x990] sm:$0xff]  ;;  %v10286_v18 = vcombine.low %v1327_v6, %v1339_v7 }
 0x36e   : > { %v9218_v31 = vadd.f32 1.0, %v10880_v27  ;;  %8454 = vmatprep.subr.bf16.mxu0 %v9999_v8  ;;  %10881 = vrcp.f32 %v9217_v23  ;;  %v1303_v24 = vld [vmem:[%s11377_s15 + $0x1530] sm:$0xff]  ;;  %v9879_v19 = vcombine.high %v919_v14, %v931_v9  ;;  %v9332_v23 = vrot.slane %v9324_v59, %v11932_v30 }
 0x36f   : > { %v1315_v32 = vld [vmem:[%s11377_s15 + $0x1590] sm:$0xff]  ;;  %v9878_v27 = vcombine.low %v919_v14, %v931_v9  ;;  %v812_v14 = vld [vmem:[%s11377_s15 + $0x5d8] sm:$0xff] }
 0x370   : > { %10883 = vrcp.f32 %v9218_v31  ;;  %8414 = vmatpush1.bf16.msra.mxu1 %v9614_v25  ;;  %v10263_v38 = vcombine.high %v1303_v24, %v1315_v32  ;;  %v895_v20 = vld [vmem:[%s11377_s15 + $0x870] sm:$0xff] }
 0x371   : > { %8455 = vmatpush1.bf16.msra.mxu0 %v9998_v28  ;;  %8415 = vmatprep.subr.bf16.mxu1 %v9591_v29  ;;  %v907_v21 = vld [vmem:[%s11377_s15 + $0x8d0] sm:$0xff]  ;;  %v10262_v28 = vcombine.low %v1303_v24, %v1315_v32  ;;  %v12209_v32 = vld [vmem:[%s11716_s6 + $0x8] sm:$0xff] }
 0x372   : > { %8456 = vmatprep.subr.bf16.mxu0 %v9975_v33  ;;  %v1279_v22 = vld [vmem:[%s11377_s15 + $0x1470] sm:$0xff]  ;;  %v9855_v29 = vcombine.high %v895_v20, %v907_v21  ;;  %v9854_v59 = vcombine.low %v895_v20, %v907_v21  ;;  %v788_v20 = vld [vmem:[%s11377_s15 + $0x518] sm:$0xff] }
 0x373   : > { %v1291_v15 = vld [vmem:[%s11377_s15 + $0x14d0] sm:$0xff] }
 0x374   : > { %8416 = vmatpush1.bf16.msra.mxu1 %v9590_v46  ;;  %v10239_v33 = vcombine.high %v1279_v22, %v1291_v15  ;;  %v871_v34 = vld [vmem:[%s11377_s15 + $0x7b0] sm:$0xff]  ;;  %v10238_v43 = vcombine.low %v1279_v22, %v1291_v15  ;;  %v10215_v46 = vcombine.high %v1255_v51, %v1267_v57  ;;  %v1822_v22 = vrot.slane %v12209_v32, %v11471_v39 }
 0x375   : > { %8457 = vmatpush1.bf16.msra.mxu0 %v9974_v48  ;;  %8417 = vmatprep.subr.bf16.mxu1 %v9951_v49  ;;  %v883_v42 = vld [vmem:[%s11377_s15 + $0x810] sm:$0xff] }
 0x376   : > { %8458 = vmatprep.subr.bf16.mxu0 %v10335_v50  ;;  %v9831_v44 = vcombine.high %v871_v34, %v883_v42  ;;  %v847_v48 = vld [vmem:[%s11377_s15 + $0x6f0] sm:$0xff]  ;;  %v9830_v54 = vcombine.low %v871_v34, %v883_v42 }
 0x377   : > { %v859_v49 = vld [vmem:[%s11377_s15 + $0x750] sm:$0xff] }
 0x378   : > { %8418 = vmatpush2.bf16.msra.mxu1 %v9950_v61  ;;  %v1231_v50 = vld [vmem:[%s11377_s15 + $0x12f0] sm:$0xff]  ;;  %v9807_v45 = vcombine.high %v847_v48, %v859_v49  ;;  %v9806_v35 = vcombine.low %v847_v48, %v859_v49 }
 0x379   : > { %8459 = vmatpush2.bf16.msra.mxu0 %v10334_v62  ;;  %8419 = vmatprep.subr.bf16.mxu1 %v9927_v4  ;;  %v1243_v53 = vld [vmem:[%s11377_s15 + $0x1350] sm:$0xff] }
 0x37a   : > { %8460 = vmatprep.subr.bf16.mxu0 %v10311_v52  ;;  %v10191_v61 = vcombine.high %v1231_v50, %v1243_v53  ;;  %v823_v62 = vld [vmem:[%s11377_s15 + $0x630] sm:$0xff]  ;;  %v10190_v6 = vcombine.low %v1231_v50, %v1243_v53 }
 0x37b   : > { %v10882_v3 = vpop.eup %10881  ;;  %v835_v4 = vld [vmem:[%s11377_s15 + $0x690] sm:$0xff] }
 0x37c   : > { %8420 = vmatpush2.bf16.msra.mxu1 %v9926_v13  ;;  %v1207_v52 = vld [vmem:[%s11377_s15 + $0x1230] sm:$0xff]  ;;  %v9783_v7 = vcombine.high %v823_v62, %v835_v4  ;;  %v9782_v9 = vcombine.low %v823_v62, %v835_v4 }
 0x37d   : > { %v10884_v17 = vpop.eup %10883  ;;  %8461 = vmatpush2.bf16.msra.mxu0 %v10310_v10  ;;  %8421 = vmatprep.subr.bf16.mxu1 %v9903_v11  ;;  %v1219_v5 = vld [vmem:[%s11377_s15 + $0x1290] sm:$0xff] }
 0x37e   : > { %v9325_v8 = vcombine.low %v10882_v3, %v10884_v17  ;;  %8462 = vmatprep.subr.bf16.mxu0 %v10287_v12  ;;  %v10167_v13 = vcombine.high %v1207_v52, %v1219_v5  ;;  %v1567_v10 = vld [vmem:[%s11377_s15 + $0x1d70] sm:$0xff]  ;;  %v800_v12 = vld [vmem:[%s11377_s15 + $0x578] sm:$0xff]  ;;  %v10166_v24 = vcombine.low %v1207_v52, %v1219_v5 }
 0x37f   : > { %v1579_v11 = vld [vmem:[%s11377_s15 + $0x1dd0] sm:$0xff]  ;;  %v9760_v21 = vcombine.low %v800_v12, %v812_v14 }
 0x380   : > { %v9339_v25 = vrot.slane %v9325_v8, %v11932_v30  ;;  %8422 = vmatpush2.bf16.msra.mxu1 %v9902_v16  ;;  %v10527_v3 = vcombine.high %v1567_v10, %v1579_v11  ;;  %v9761_v16 = vcombine.high %v800_v12, %v812_v14  ;;  %v1543_v17 = vld [vmem:[%s11377_s15 + $0x1cb0] sm:$0xff]  ;;  %v10526_v8 = vcombine.low %v1567_v10, %v1579_v11  ;;  %v704_v10 = vld [vmem:[%s11377_s15 + $0x278] sm:$0xff] }
 0x381   : > { %8463 = vmatpush2.bf16.msra.mxu0 %v10286_v18  ;;  %8423 = vmatprep.subr.bf16.mxu1 %v9879_v19  ;;  %v1555_v18 = vld [vmem:[%s11377_s15 + $0x1d10] sm:$0xff]  ;;  %v1818_v19 = vrot.slane %v12209_v32, %v11463_v36  ;;  %v716_v11 = vld [vmem:[%s11377_s15 + $0x2d8] sm:$0xff] }
 0x382   : > { %v9340_v31 = vcombine.low %v9332_v23, %v9339_v25  ;;  %8464 = vmatprep.subr.bf16.mxu0 %v10263_v38  ;;  %v776_v38 = vld [vmem:[%s11377_s15 + $0x4b8] sm:$0xff]  ;;  %v10503_v15 = vcombine.high %v1543_v17, %v1555_v18  ;;  %v1519_v23 = vld [vmem:[%s11377_s15 + $0x1bf0] sm:$0xff]  ;;  %v10502_v42 = vcombine.low %v1543_v17, %v1555_v18 }
 0x383   : > { %v1531_v25 = vld [vmem:[%s11377_s15 + $0x1c50] sm:$0xff]  ;;  %v9736_v57 = vcombine.low %v776_v38, %v788_v20  ;;  %v680_v17 = vld [vmem:[%s11377_s15 + $0x1b8] sm:$0xff] }
 0x384   : > { %8424 = vmatpush2.bf16.msra.mxu1 %v9878_v27  ;;  %9416 = vst [vmem:[%s11948_s29 + $0x8] sm:$0xff] %v9340_v31  ;;  %v764_v31 = vld [vmem:[%s11377_s15 + $0x458] sm:$0xff]  ;;  %v1495_v49 = vld [vmem:[%s11377_s15 + $0x1b30] sm:$0xff]  ;;  %v10478_v62 = vcombine.low %v1519_v23, %v1531_v25 }
 0x385   : > { %8465 = vmatpush2.bf16.msra.mxu0 %v10262_v28  ;;  %8425 = vmatprep.subr.bf16.mxu1 %v9855_v29  ;;  %v9737_v28 = vcombine.high %v776_v38, %v788_v20  ;;  %v752_v29 = vld [vmem:[%s11377_s15 + $0x3f8] sm:$0xff]  ;;  %v1507_v50 = vld [vmem:[%s11377_s15 + $0x1b90] sm:$0xff] }
 0x386   : > { %8466 = vmatprep.subr.bf16.mxu0 %v10239_v33  ;;  %v9713_v48 = vcombine.high %v752_v29, %v764_v31  ;;  %v9712_v52 = vcombine.low %v752_v29, %v764_v31  ;;  %v10455_v5 = vcombine.high %v1495_v49, %v1507_v50  ;;  %v10454_v12 = vcombine.low %v1495_v49, %v1507_v50  ;;  %v692_v18 = vld [vmem:[%s11377_s15 + $0x218] sm:$0xff]  ;;  %v1399_v31 = vld [vmem:[%s11377_s15 + $0x1830] sm:$0xff] }
 0x387   : > { %v9641_v20 = vcombine.high %v680_v17, %v692_v18  ;;  %v992_v49 = vld [vmem:[%s11377_s15 + $0xb78] sm:$0xff] }
 0x388   : > { %8426 = vmatpush2.bf16.msra.mxu1 %v9854_v59  ;;  %v10479_v59 = vcombine.high %v1519_v23, %v1531_v25  ;;  %v668_v23 = vld [vmem:[%s11377_s15 + $0x158] sm:$0xff] }
 0x389   : > { %8467 = vmatpush2.bf16.msra.mxu0 %v10238_v43  ;;  %8427 = vmatprep.subr.bf16.mxu1 %v9831_v44  ;;  %v1004_v50 = vld [vmem:[%s11377_s15 + $0xbd8] sm:$0xff] }
 0x38a   : > { %8468 = vmatprep.subr.bf16.mxu0 %v10215_v46 }
 0x38c   : > { %8428 = vmatpush2.bf16.msra.mxu1 %v9830_v54  ;;  %v728_v54 = vld [vmem:[%s11377_s15 + $0x338] sm:$0xff] }
 0x38d   : > { %8469 = vmatpush2.bf16.msra.mxu0 %v10214_v58  ;;  %8429 = vmatprep.subr.bf16.mxu1 %v9807_v45  ;;  %v740_v58 = vld [vmem:[%s11377_s15 + $0x398] sm:$0xff] }
 0x38e   : > { %8470 = vmatprep.subr.bf16.mxu0 %v10191_v61  ;;  %v9688_v14 = vcombine.low %v728_v54, %v740_v58 }
 0x390   : > { %8430 = vmatpush2.bf16.msra.mxu1 %v9806_v35 }
 0x391   : > { %8471 = vmatpush2.bf16.msra.mxu0 %v10190_v6  ;;  %8431 = vmatprep.subr.bf16.mxu1 %v9783_v7  ;;  %v9689_v6 = vcombine.high %v728_v54, %v740_v58  ;;  %v1471_v7 = vld [vmem:[%s11377_s15 + $0x1a70] sm:$0xff] }
 0x392   : > { %8472 = vmatprep.subr.bf16.mxu0 %v10167_v13  ;;  %v1483_v13 = vld [vmem:[%s11377_s15 + $0x1ad0] sm:$0xff] }
 0x394   : > { %8432 = vmatpush2.bf16.msra.mxu1 %v9782_v9  ;;  %v10431_v9 = vcombine.high %v1471_v7, %v1483_v13 }
 0x395   : > { %8473 = vmatpush2.bf16.msra.mxu0 %v10166_v24  ;;  %8483 = vmatprep.subr.bf16.mxu1 %v10527_v3  ;;  %v9665_v24 = vcombine.high %v704_v10, %v716_v11  ;;  %v1447_v3 = vld [vmem:[%s11377_s15 + $0x19b0] sm:$0xff] }
 0x396   : > { %8524 = vmatprep.subr.bf16.mxu0 %v9761_v16  ;;  %v1459_v16 = vld [vmem:[%s11377_s15 + $0x1a10] sm:$0xff] }
 0x397   : > { %v8189_v27 = vpop.f32.mrf.mxu1  ;;  %8434 = vmatmul.mubr.bf16.vlgmr.msra.gmra.mxu1 %v11497_v1  ;;  %v10407_v38 = vcombine.high %v1447_v3, %v1459_v16  ;;  %v10406_v25 = vcombine.low %v1447_v3, %v1459_v16 }
 0x398   : > { %v8190_v33 = vadd.f32 %v8189_v27, %v1818_v19  ;;  %v8230_v34 = vpop.f32.mrf.mxu0  ;;  %8475 = vmatmul.mubr.bf16.vlgmr.msra.gmra.mxu0 %v11489_v60  ;;  %8484 = vmatpush1.bf16.msra.mxu1 %v10526_v8  ;;  %v10430_v19 = vcombine.low %v1471_v7, %v1483_v13  ;;  %v9664_v8 = vcombine.low %v704_v10, %v716_v11  ;;  %v1711_v10 = vld [vmem:[%s11377_s15 + $0x21f0] sm:$0xff] }
 0x399   : > { %8515 = vmatprep.mubr.bf16.mxu1 %v11517_v26  ;;  %8525 = vmatpush1.bf16.msra.mxu0 %v9760_v21  ;;  %v8191_v51 = vpop.f32.mrf.mxu1  ;;  %v1423_v21 = vld [vmem:[%s11377_s15 + $0x18f0] sm:$0xff]  ;;  %v9640_v27 = vcombine.low %v680_v17, %v692_v18 }
 0x39a   : > { %v12226_v43 = vadd.f32 %v8230_v34, %v8190_v33  ;;  %8556 = vmatprep.mubr.bf16.mxu0 %v11493_v63  ;;  %v8192_v44 = vadd.f32 %v8191_v51, %v1822_v22  ;;  %v8232_v46 = vpop.f32.mrf.mxu0  ;;  %8485 = vmatprep.subr.bf16.mxu1 %v10503_v15  ;;  %v1435_v22 = vld [vmem:[%s11377_s15 + $0x1950] sm:$0xff]  ;;  %v656_v15 = vld [vmem:[%s11377_s15 + $0xf8] sm:$0xff] }
 0x39b   : > { %v8193_v53 = vpop.f32.mrf.mxu1  ;;  %8526 = vmatprep.subr.bf16.mxu0 %v9737_v28  ;;  %v10383_v28 = vcombine.high %v1423_v21, %v1435_v22  ;;  %v9617_v29 = vcombine.high %v656_v15, %v668_v23  ;;  %v1411_v33 = vld [vmem:[%s11377_s15 + $0x1890] sm:$0xff]  ;;  %v632_v34 = vld [vmem:[%s11377_s15 + $0x38] sm:$0xff]  ;;  %v10382_v51 = vcombine.low %v1423_v21, %v1435_v22 }
 0x39c   : > { %v12233_v45 = vadd.f32 %v8232_v46, %v8192_v44  ;;  %v8234_v61 = vpop.f32.mrf.mxu0  ;;  %8486 = vmatpush1.bf16.msra.mxu1 %v10502_v42  ;;  %v644_v42 = vld [vmem:[%s11377_s15 + $0x98] sm:$0xff]  ;;  %v1759_v46 = vld [vmem:[%s11377_s15 + $0x2370] sm:$0xff]  ;;  %v10358_v53 = vcombine.low %v1399_v31, %v1411_v33 }
 0x39d   : > { %8527 = vmatpush1.bf16.msra.mxu0 %v9736_v57  ;;  %v8194_v4 = vpop.f32.mrf.mxu1  ;;  %8487 = vmatprep.subr.bf16.mxu1 %v10479_v59  ;;  %v9616_v57 = vcombine.low %v656_v15, %v668_v23  ;;  %v10359_v59 = vcombine.high %v1399_v31, %v1411_v33  ;;  %v9593_v44 = vcombine.high %v632_v34, %v644_v42  ;;  %v1723_v11 = vld [vmem:[%s11377_s15 + $0x2250] sm:$0xff] }
 0x39e   : > { %v8235_v35 = vpop.f32.mrf.mxu0  ;;  %8528 = vmatprep.subr.bf16.mxu0 %v9713_v48  ;;  %v1771_v48 = vld [vmem:[%s11377_s15 + $0x23d0] sm:$0xff]  ;;  %v9592_v54 = vcombine.low %v632_v34, %v644_v42  ;;  %v9953_v61 = vcombine.high %v992_v49, %v1004_v50  ;;  %v10671_v3 = vcombine.high %v1711_v10, %v1723_v11 }
 0x39f   : > { %v10719_v58 = vcombine.high %v1759_v46, %v1771_v48  ;;  %v1747_v4 = vld [vmem:[%s11377_s15 + $0x2310] sm:$0xff]  ;;  %v10718_v35 = vcombine.low %v1759_v46, %v1771_v48 }
 0x3a0   : > { %8488 = vmatpush1.bf16.msra.mxu1 %v10478_v62  ;;  %v1735_v62 = vld [vmem:[%s11377_s15 + $0x22b0] sm:$0xff] }
 0x3a1   : > { %8529 = vmatpush1.bf16.msra.mxu0 %v9712_v52  ;;  %8489 = vmatprep.subr.bf16.mxu1 %v10455_v5  ;;  %v968_v52 = vld [vmem:[%s11377_s15 + $0xab8] sm:$0xff]  ;;  %v10695_v7 = vcombine.high %v1735_v62, %v1747_v4  ;;  %v1687_v17 = vld [vmem:[%s11377_s15 + $0x2130] sm:$0xff] }
 0x3a2   : > { %8530 = vmatprep.subr.bf16.mxu0 %v9689_v6  ;;  %v980_v5 = vld [vmem:[%s11377_s15 + $0xb18] sm:$0xff]  ;;  %v9952_v6 = vcombine.low %v992_v49, %v1004_v50  ;;  %v1699_v18 = vld [vmem:[%s11377_s15 + $0x2190] sm:$0xff] }
 0x3a3   : > { %v9929_v13 = vcombine.high %v968_v52, %v980_v5  ;;  %v10647_v21 = vcombine.high %v1687_v17, %v1699_v18  ;;  %v1663_v15 = vld [vmem:[%s11377_s15 + $0x2070] sm:$0xff] }
 0x3a4   : > { %8490 = vmatpush1.bf16.msra.mxu1 %v10454_v12  ;;  %v944_v12 = vld [vmem:[%s11377_s15 + $0x9f8] sm:$0xff]  ;;  %v1675_v23 = vld [vmem:[%s11377_s15 + $0x20d0] sm:$0xff] }
 0x3a5   : > { %8531 = vmatpush1.bf16.msra.mxu0 %v9688_v14  ;;  %8491 = vmatprep.subr.bf16.mxu1 %v10431_v9  ;;  %v956_v14 = vld [vmem:[%s11377_s15 + $0xa58] sm:$0xff]  ;;  %v10694_v9 = vcombine.low %v1735_v62, %v1747_v4  ;;  %v10623_v31 = vcombine.high %v1663_v15, %v1675_v23  ;;  %v1639_v34 = vld [vmem:[%s11377_s15 + $0x1fb0] sm:$0xff] }
 0x3a6   : > { %8532 = vmatprep.subr.bf16.mxu0 %v9665_v24  ;;  %v9928_v24 = vcombine.low %v968_v52, %v980_v5  ;;  %v9905_v16 = vcombine.high %v944_v12, %v956_v14  ;;  %v1651_v42 = vld [vmem:[%s11377_s15 + $0x2010] sm:$0xff] }
 0x3a7   : > { %v10599_v46 = vcombine.high %v1639_v34, %v1651_v42  ;;  %v1615_v49 = vld [vmem:[%s11377_s15 + $0x1ef0] sm:$0xff] }
 0x3a8   : > { %8492 = vmatpush1.bf16.msra.mxu1 %v10430_v19  ;;  %v920_v19 = vld [vmem:[%s11377_s15 + $0x938] sm:$0xff]  ;;  %v1627_v50 = vld [vmem:[%s11377_s15 + $0x1f50] sm:$0xff] }
 0x3a9   : > { %8533 = vmatpush1.bf16.msra.mxu0 %v9664_v8  ;;  %8493 = vmatprep.subr.bf16.mxu1 %v10407_v38  ;;  %v932_v8 = vld [vmem:[%s11377_s15 + $0x998] sm:$0xff]  ;;  %v10670_v38 = vcombine.low %v1711_v10, %v1723_v11  ;;  %v10575_v62 = vcombine.high %v1615_v49, %v1627_v50  ;;  %v1591_v52 = vld [vmem:[%s11377_s15 + $0x1e30] sm:$0xff] }
 0x3aa   : > { %8534 = vmatprep.subr.bf16.mxu0 %v9641_v20  ;;  %v9904_v20 = vcombine.low %v944_v12, %v956_v14  ;;  %v9881_v22 = vcombine.high %v920_v19, %v932_v8  ;;  %v1603_v5 = vld [vmem:[%s11377_s15 + $0x1e90] sm:$0xff]  ;;  %v1184_v12 = vld [vmem:[%s11377_s15 + $0x1178] sm:$0xff] }
 0x3ab   : > { %v10551_v10 = vcombine.high %v1591_v52, %v1603_v5  ;;  %v1196_v14 = vld [vmem:[%s11377_s15 + $0x11d8] sm:$0xff] }
 0x3ac   : > { %8494 = vmatpush1.bf16.msra.mxu1 %v10406_v25  ;;  %v896_v25 = vld [vmem:[%s11377_s15 + $0x878] sm:$0xff] }
 0x3ad   : > { %8535 = vmatpush1.bf16.msra.mxu0 %v9640_v27  ;;  %8495 = vmatprep.subr.bf16.mxu1 %v10383_v28  ;;  %v908_v27 = vld [vmem:[%s11377_s15 + $0x8d8] sm:$0xff]  ;;  %v10646_v28 = vcombine.low %v1687_v17, %v1699_v18  ;;  %v10145_v17 = vcombine.high %v1184_v12, %v1196_v14 }
 0x3ae   : > { %8536 = vmatprep.subr.bf16.mxu0 %v9617_v29  ;;  %v9880_v29 = vcombine.low %v920_v19, %v932_v8  ;;  %v9857_v33 = vcombine.high %v896_v25, %v908_v27  ;;  %v1160_v19 = vld [vmem:[%s11377_s15 + $0x10b8] sm:$0xff] }
 0x3af   : > { %v1172_v8 = vld [vmem:[%s11377_s15 + $0x1118] sm:$0xff] }
 0x3b0   : > { %8496 = vmatpush1.bf16.msra.mxu1 %v10382_v51  ;;  %v872_v51 = vld [vmem:[%s11377_s15 + $0x7b8] sm:$0xff] }
 0x3b1   : > { %8537 = vmatpush1.bf16.msra.mxu0 %v9616_v57  ;;  %8497 = vmatprep.subr.bf16.mxu1 %v10359_v59  ;;  %v884_v57 = vld [vmem:[%s11377_s15 + $0x818] sm:$0xff]  ;;  %v10622_v59 = vcombine.low %v1663_v15, %v1675_v23  ;;  %v10121_v15 = vcombine.high %v1160_v19, %v1172_v8 }
 0x3b2   : > { %8538 = vmatprep.subr.bf16.mxu0 %v9593_v44  ;;  %v9856_v44 = vcombine.low %v896_v25, %v908_v27  ;;  %v9833_v48 = vcombine.high %v872_v51, %v884_v57  ;;  %v1136_v23 = vld [vmem:[%s11377_s15 + $0xff8] sm:$0xff] }
 0x3b3   : > { %v1148_v25 = vld [vmem:[%s11377_s15 + $0x1058] sm:$0xff] }
 0x3b4   : > { %8498 = vmatpush1.bf16.msra.mxu1 %v10358_v53  ;;  %v848_v53 = vld [vmem:[%s11377_s15 + $0x6f8] sm:$0xff] }
 0x3b5   : > { %8539 = vmatpush1.bf16.msra.mxu0 %v9592_v54  ;;  %8499 = vmatprep.subr.bf16.mxu1 %v10719_v58  ;;  %v860_v54 = vld [vmem:[%s11377_s15 + $0x758] sm:$0xff]  ;;  %v10598_v58 = vcombine.low %v1639_v34, %v1651_v42  ;;  %v10120_v42 = vcombine.low %v1160_v19, %v1172_v8 }
 0x3b6   : > { %8540 = vmatprep.subr.bf16.mxu0 %v9953_v61  ;;  %v9832_v61 = vcombine.low %v872_v51, %v884_v57  ;;  %v9809_v4 = vcombine.high %v848_v53, %v860_v54 }
 0x3b8   : > { %8500 = vmatpush2.bf16.msra.mxu1 %v10718_v35  ;;  %v824_v35 = vld [vmem:[%s11377_s15 + $0x638] sm:$0xff] }
 0x3b9   : > { %8541 = vmatpush2.bf16.msra.mxu0 %v9952_v6  ;;  %8501 = vmatprep.subr.bf16.mxu1 %v10695_v7  ;;  %v836_v6 = vld [vmem:[%s11377_s15 + $0x698] sm:$0xff]  ;;  %v10574_v7 = vcombine.low %v1615_v49, %v1627_v50 }
 0x3ba   : > { %8542 = vmatprep.subr.bf16.mxu0 %v9929_v13  ;;  %v9808_v13 = vcombine.low %v848_v53, %v860_v54  ;;  %v9785_v11 = vcombine.high %v824_v35, %v836_v6  ;;  %v1112_v49 = vld [vmem:[%s11377_s15 + $0xf38] sm:$0xff] }
 0x3bb   : > { %v1124_v50 = vld [vmem:[%s11377_s15 + $0xf98] sm:$0xff] }
 0x3bc   : > { %8502 = vmatpush2.bf16.msra.mxu1 %v10694_v9  ;;  %v1568_v9 = vld [vmem:[%s11377_s15 + $0x1d78] sm:$0xff] }
 0x3bd   : > { %8543 = vmatpush2.bf16.msra.mxu0 %v9928_v24  ;;  %8503 = vmatprep.subr.bf16.mxu1 %v10671_v3  ;;  %v1580_v24 = vld [vmem:[%s11377_s15 + $0x1dd8] sm:$0xff]  ;;  %v10550_v3 = vcombine.low %v1591_v52, %v1603_v5  ;;  %v10073_v5 = vcombine.high %v1112_v49, %v1124_v50 }
 0x3be   : > { %8544 = vmatprep.subr.bf16.mxu0 %v9905_v16  ;;  %v9784_v16 = vcombine.low %v824_v35, %v836_v6  ;;  %v10529_v18 = vcombine.high %v1568_v9, %v1580_v24  ;;  %v1496_v54 = vld [vmem:[%s11377_s15 + $0x1b38] sm:$0xff] }
 0x3c0   : > { %8504 = vmatpush2.bf16.msra.mxu1 %v10670_v38  ;;  %v10144_v38 = vcombine.low %v1184_v12, %v1196_v14  ;;  %v10072_v12 = vcombine.low %v1112_v49, %v1124_v50 }
 0x3c1   : > { %8545 = vmatpush2.bf16.msra.mxu0 %v9904_v20  ;;  %8505 = vmatprep.subr.bf16.mxu1 %v10647_v21  ;;  %v1544_v20 = vld [vmem:[%s11377_s15 + $0x1cb8] sm:$0xff] }
 0x3c2   : > { %8546 = vmatprep.subr.bf16.mxu0 %v9881_v22  ;;  %v1556_v21 = vld [vmem:[%s11377_s15 + $0x1d18] sm:$0xff]  ;;  %v10528_v22 = vcombine.low %v1568_v9, %v1580_v24 }
 0x3c3   : > { %v10504_v57 = vcombine.low %v1544_v20, %v1556_v21 }
 0x3c4   : > { %8506 = vmatpush2.bf16.msra.mxu1 %v10646_v28  ;;  %v10505_v28 = vcombine.high %v1544_v20, %v1556_v21  ;;  %v1040_v21 = vld [vmem:[%s11377_s15 + $0xcf8] sm:$0xff] }
 0x3c5   : > { %8547 = vmatpush2.bf16.msra.mxu0 %v9880_v29  ;;  %8507 = vmatprep.subr.bf16.mxu1 %v10623_v31  ;;  %v1520_v29 = vld [vmem:[%s11377_s15 + $0x1bf8] sm:$0xff] }
 0x3c6   : > { %8548 = vmatprep.subr.bf16.mxu0 %v9857_v33  ;;  %v1532_v31 = vld [vmem:[%s11377_s15 + $0x1c58] sm:$0xff] }
 0x3c7   : > { %v10480_v52 = vcombine.low %v1520_v29, %v1532_v31 }
 0x3c8   : > { %8508 = vmatpush2.bf16.msra.mxu1 %v10622_v59  ;;  %v10097_v59 = vcombine.high %v1136_v23, %v1148_v25 }
 0x3c9   : > { %8549 = vmatpush2.bf16.msra.mxu0 %v9856_v44  ;;  %8509 = vmatprep.subr.bf16.mxu1 %v10599_v46 }
 0x3ca   : > { %8550 = vmatprep.subr.bf16.mxu0 %v9833_v48  ;;  %v10481_v48 = vcombine.high %v1520_v29, %v1532_v31 }
 0x3cc   : > { %8510 = vmatpush2.bf16.msra.mxu1 %v10598_v58  ;;  %v1508_v58 = vld [vmem:[%s11377_s15 + $0x1b98] sm:$0xff] }
 0x3cd   : > { %8551 = vmatpush2.bf16.msra.mxu0 %v9832_v61  ;;  %8511 = vmatprep.subr.bf16.mxu1 %v10575_v62  ;;  %v10457_v6 = vcombine.high %v1496_v54, %v1508_v58  ;;  %v10456_v14 = vcombine.low %v1496_v54, %v1508_v58  ;;  %v1376_v54 = vld [vmem:[%s11377_s15 + $0x1778] sm:$0xff] }
 0x3ce   : > { %8552 = vmatprep.subr.bf16.mxu0 %v9809_v4  ;;  %v10096_v4 = vcombine.low %v1136_v23, %v1148_v25  ;;  %v1436_v23 = vld [vmem:[%s11377_s15 + $0x1958] sm:$0xff] }
 0x3cf   : > { %v1388_v58 = vld [vmem:[%s11377_s15 + $0x17d8] sm:$0xff] }
 0x3d0   : > { %8512 = vmatpush2.bf16.msra.mxu1 %v10574_v7  ;;  %v1088_v7 = vld [vmem:[%s11377_s15 + $0xe78] sm:$0xff] }
 0x3d1   : > { %8553 = vmatpush2.bf16.msra.mxu0 %v9808_v13  ;;  %8513 = vmatprep.subr.bf16.mxu1 %v10551_v10  ;;  %v1100_v13 = vld [vmem:[%s11377_s15 + $0xed8] sm:$0xff] }
 0x3d2   : > { %8554 = vmatprep.subr.bf16.mxu0 %v9785_v11  ;;  %v1472_v10 = vld [vmem:[%s11377_s15 + $0x1a78] sm:$0xff]  ;;  %v10049_v9 = vcombine.high %v1088_v7, %v1100_v13  ;;  %v10048_v19 = vcombine.low %v1088_v7, %v1100_v13 }
 0x3d3   : > { %v1484_v11 = vld [vmem:[%s11377_s15 + $0x1ad8] sm:$0xff] }
 0x3d4   : > { %8514 = vmatpush2.bf16.msra.mxu1 %v10550_v3  ;;  %v10433_v24 = vcombine.high %v1472_v10, %v1484_v11  ;;  %v1064_v3 = vld [vmem:[%s11377_s15 + $0xdb8] sm:$0xff]  ;;  %v10432_v8 = vcombine.low %v1472_v10, %v1484_v11  ;;  %v10336_v10 = vcombine.low %v1376_v54, %v1388_v58 }
 0x3d5   : > { %8555 = vmatpush2.bf16.msra.mxu0 %v9784_v16  ;;  %8565 = vmatprep.subr.bf16.mxu1 %v10145_v17  ;;  %v1076_v16 = vld [vmem:[%s11377_s15 + $0xe18] sm:$0xff] }
 0x3d6   : > { %8606 = vmatprep.subr.bf16.mxu0 %v10529_v18  ;;  %v1448_v17 = vld [vmem:[%s11377_s15 + $0x19b8] sm:$0xff]  ;;  %v10024_v25 = vcombine.low %v1064_v3, %v1076_v16 }
 0x3d7   : > { %v8271_v27 = vpop.f32.mrf.mxu1  ;;  %8516 = vmatmul.mubr.bf16.vlgmr.msra.gmra.mxu1 %v11581_v41  ;;  %v1460_v18 = vld [vmem:[%s11377_s15 + $0x1a18] sm:$0xff] }
 0x3d8   : > { %v8272_v33 = vadd.f32 %v8271_v27, %v12226_v43  ;;  %v12297_v34 = vpop.f32.mrf.mxu0  ;;  %8557 = vmatmul.mubr.bf16.vlgmr.msra.gmra.mxu0 %v11497_v1  ;;  %8566 = vmatpush1.bf16.msra.mxu1 %v10144_v38  ;;  %v10025_v38 = vcombine.high %v1064_v3, %v1076_v16  ;;  %v10409_v20 = vcombine.high %v1448_v17, %v1460_v18  ;;  %v1736_v7 = vld [vmem:[%s11377_s15 + $0x22b8] sm:$0xff] }
 0x3d9   : > { %8597 = vmatprep.mubr.bf16.mxu1 %v11495_v0  ;;  %8607 = vmatpush1.bf16.msra.mxu0 %v10528_v22  ;;  %v8273_v51 = vpop.f32.mrf.mxu1  ;;  %v1052_v22 = vld [vmem:[%s11377_s15 + $0xd58] sm:$0xff] }
 0x3da   : > { %v10738_v44 = vmul.f32 -1.442695, %v8272_v33  ;;  %8638 = vmatprep.mubr.bf16.mxu0 %v11517_v26  ;;  %v8274_v43 = vadd.f32 %v8273_v51, %v12233_v45  ;;  %v12303_v46 = vpop.f32.mrf.mxu0  ;;  %8567 = vmatprep.subr.bf16.mxu1 %v10121_v15  ;;  %v1424_v15 = vld [vmem:[%s11377_s15 + $0x18f8] sm:$0xff]  ;;  %v10001_v29 = vcombine.high %v1040_v21, %v1052_v22 }
 0x3db   : > { %v8275_v53 = vpop.f32.mrf.mxu1  ;;  %8608 = vmatprep.subr.bf16.mxu0 %v10505_v28  ;;  %v10408_v28 = vcombine.low %v1448_v17, %v1460_v18  ;;  %v10385_v33 = vcombine.high %v1424_v15, %v1436_v23  ;;  %v1028_v51 = vld [vmem:[%s11377_s15 + $0xc98] sm:$0xff]  ;;  %v10384_v49 = vcombine.low %v1424_v15, %v1436_v23 }
 0x3dc   : > { %10885 = vpow2.f32 %v10738_v44  ;;  %v10739_v61 = vmul.f32 -1.442695, %v8274_v43  ;;  %v8316_v62 = vpop.f32.mrf.mxu0  ;;  %8568 = vmatpush1.bf16.msra.mxu1 %v10120_v42  ;;  %v1016_v42 = vld [vmem:[%s11377_s15 + $0xc38] sm:$0xff] }
 0x3dd   : > { %8609 = vmatpush1.bf16.msra.mxu0 %v10504_v57  ;;  %v8276_v45 = vpop.f32.mrf.mxu1  ;;  %8569 = vmatprep.subr.bf16.mxu1 %v10097_v59  ;;  %v1400_v59 = vld [vmem:[%s11377_s15 + $0x1838] sm:$0xff]  ;;  %v9977_v50 = vcombine.high %v1016_v42, %v1028_v51 }
 0x3de   : > { %10887 = vpow2.f32 %v10739_v61  ;;  %v8317_v35 = vpop.f32.mrf.mxu0  ;;  %8610 = vmatprep.subr.bf16.mxu0 %v10481_v48  ;;  %v1412_v44 = vld [vmem:[%s11377_s15 + $0x1898] sm:$0xff]  ;;  %v10000_v48 = vcombine.low %v1040_v21, %v1052_v22 }
 0x3df   : > { %v10361_v53 = vcombine.high %v1400_v59, %v1412_v44  ;;  %v1760_v61 = vld [vmem:[%s11377_s15 + $0x2378] sm:$0xff]  ;;  %v10360_v45 = vcombine.low %v1400_v59, %v1412_v44 }
 0x3e0   : > { %8570 = vmatpush1.bf16.msra.mxu1 %v10096_v4  ;;  %v1772_v62 = vld [vmem:[%s11377_s15 + $0x23d8] sm:$0xff]  ;;  %v9976_v4 = vcombine.low %v1016_v42, %v1028_v51 }
 0x3e1   : > { %8611 = vmatpush1.bf16.msra.mxu0 %v10480_v52  ;;  %8571 = vmatprep.subr.bf16.mxu1 %v10073_v5  ;;  %v10337_v52 = vcombine.high %v1376_v54, %v1388_v58  ;;  %v10721_v5 = vcombine.high %v1760_v61, %v1772_v62  ;;  %v1352_v35 = vld [vmem:[%s11377_s15 + $0x16b8] sm:$0xff]  ;;  %v10720_v11 = vcombine.low %v1760_v61, %v1772_v62 }
 0x3e2   : > { %8612 = vmatprep.subr.bf16.mxu0 %v10457_v6  ;;  %v1364_v6 = vld [vmem:[%s11377_s15 + $0x1718] sm:$0xff] }
 0x3e3   : > { %v1748_v13 = vld [vmem:[%s11377_s15 + $0x2318] sm:$0xff]  ;;  %v10312_v17 = vcombine.low %v1352_v35, %v1364_v6 }
 0x3e4   : > { %8572 = vmatpush1.bf16.msra.mxu1 %v10072_v12  ;;  %v10313_v12 = vcombine.high %v1352_v35, %v1364_v6  ;;  %v1712_v3 = vld [vmem:[%s11377_s15 + $0x21f8] sm:$0xff]  ;;  %v10696_v18 = vcombine.low %v1736_v7, %v1748_v13 }
 0x3e5   : > { %8613 = vmatpush1.bf16.msra.mxu0 %v10456_v14  ;;  %8573 = vmatprep.subr.bf16.mxu1 %v10049_v9  ;;  %v10697_v14 = vcombine.high %v1736_v7, %v1748_v13  ;;  %v1328_v9 = vld [vmem:[%s11377_s15 + $0x15f8] sm:$0xff] }
 0x3e6   : > { %8614 = vmatprep.subr.bf16.mxu0 %v10433_v24  ;;  %v1340_v24 = vld [vmem:[%s11377_s15 + $0x1658] sm:$0xff] }
 0x3e7   : > { %v1724_v16 = vld [vmem:[%s11377_s15 + $0x2258] sm:$0xff] }
 0x3e8   : > { %8574 = vmatpush1.bf16.msra.mxu1 %v10048_v19  ;;  %v10289_v19 = vcombine.high %v1328_v9, %v1340_v24  ;;  %v1316_v21 = vld [vmem:[%s11377_s15 + $0x1598] sm:$0xff] }
 0x3e9   : > { %v10886_v27 = vpop.eup %10885  ;;  %8615 = vmatpush1.bf16.msra.mxu0 %v10432_v8  ;;  %8575 = vmatprep.subr.bf16.mxu1 %v10025_v38  ;;  %v10673_v38 = vcombine.high %v1712_v3, %v1724_v16  ;;  %v1688_v15 = vld [vmem:[%s11377_s15 + $0x2138] sm:$0xff] }
 0x3ea   : > { %v9219_v31 = vadd.f32 1.0, %v10886_v27  ;;  %8616 = vmatprep.subr.bf16.mxu0 %v10409_v20  ;;  %v1304_v20 = vld [vmem:[%s11377_s15 + $0x1538] sm:$0xff]  ;;  %v10288_v27 = vcombine.low %v1328_v9, %v1340_v24 }
 0x3eb   : > { %v10888_v57 = vpop.eup %10887  ;;  %v1700_v23 = vld [vmem:[%s11377_s15 + $0x2198] sm:$0xff]  ;;  %v10264_v59 = vcombine.low %v1304_v20, %v1316_v21 }
 0x3ec   : > { %v9220_v43 = vadd.f32 1.0, %v10888_v57  ;;  %8576 = vmatpush1.bf16.msra.mxu1 %v10024_v25  ;;  %10889 = vrcp.f32 %v9219_v31  ;;  %v10649_v31 = vcombine.high %v1688_v15, %v1700_v23  ;;  %v1292_v42 = vld [vmem:[%s11377_s15 + $0x14d8] sm:$0xff]  ;;  %v10648_v44 = vcombine.low %v1688_v15, %v1700_v23 }
 0x3ed   : > { %8617 = vmatpush1.bf16.msra.mxu0 %v10408_v28  ;;  %8577 = vmatprep.subr.bf16.mxu1 %v10001_v29  ;;  %v10672_v28 = vcombine.low %v1712_v3, %v1724_v16  ;;  %v10265_v29 = vcombine.high %v1304_v20, %v1316_v21  ;;  %v1664_v51 = vld [vmem:[%s11377_s15 + $0x2078] sm:$0xff]  ;;  %v1197_v20 = vld [vmem:[%s11377_s15 + $0x11e0] sm:$0xff] }
 0x3ee   : > { %10891 = vrcp.f32 %v9220_v43  ;;  %8618 = vmatprep.subr.bf16.mxu0 %v10385_v33  ;;  %v1280_v33 = vld [vmem:[%s11377_s15 + $0x1478] sm:$0xff] }
 0x3ef   : > { %v1676_v57 = vld [vmem:[%s11377_s15 + $0x20d8] sm:$0xff]  ;;  %v10241_v43 = vcombine.high %v1280_v33, %v1292_v42  ;;  %v10240_v58 = vcombine.low %v1280_v33, %v1292_v42  ;;  %v1830_v33 = vrot.slane %v12209_v32, %v11474_v40 }
 0x3f0   : > { %8578 = vmatpush1.bf16.msra.mxu1 %v10000_v48  ;;  %v10625_v48 = vcombine.high %v1664_v51, %v1676_v57  ;;  %v1652_v54 = vld [vmem:[%s11377_s15 + $0x2018] sm:$0xff]  ;;  %v10624_v61 = vcombine.low %v1664_v51, %v1676_v57  ;;  %v1161_v51 = vld [vmem:[%s11377_s15 + $0x10c0] sm:$0xff] }
 0x3f1   : > { %8619 = vmatpush1.bf16.msra.mxu0 %v10384_v49  ;;  %8579 = vmatprep.subr.bf16.mxu1 %v9977_v50  ;;  %v1256_v49 = vld [vmem:[%s11377_s15 + $0x13b8] sm:$0xff]  ;;  %v1173_v57 = vld [vmem:[%s11377_s15 + $0x1120] sm:$0xff] }
 0x3f2   : > { %8620 = vmatprep.subr.bf16.mxu0 %v10361_v53  ;;  %v1268_v50 = vld [vmem:[%s11377_s15 + $0x1418] sm:$0xff] }
 0x3f3   : > { %v1640_v53 = vld [vmem:[%s11377_s15 + $0x1fb8] sm:$0xff]  ;;  %v10217_v62 = vcombine.high %v1256_v49, %v1268_v50  ;;  %v10216_v6 = vcombine.low %v1256_v49, %v1268_v50  ;;  %v765_v49 = vld [vmem:[%s11377_s15 + $0x460] sm:$0xff] }
 0x3f4   : > { %8580 = vmatpush1.bf16.msra.mxu1 %v9976_v4  ;;  %v10601_v4 = vcombine.high %v1640_v53, %v1652_v54  ;;  %v1628_v35 = vld [vmem:[%s11377_s15 + $0x1f58] sm:$0xff]  ;;  %v10600_v7 = vcombine.low %v1640_v53, %v1652_v54  ;;  %v10123_v53 = vcombine.high %v1161_v51, %v1173_v57  ;;  %v1149_v54 = vld [vmem:[%s11377_s15 + $0x1060] sm:$0xff] }
 0x3f5   : > { %8621 = vmatpush1.bf16.msra.mxu0 %v10360_v45  ;;  %8581 = vmatprep.subr.bf16.mxu1 %v10337_v52  ;;  %v1232_v45 = vld [vmem:[%s11377_s15 + $0x12f8] sm:$0xff] }
 0x3f6   : > { %8622 = vmatprep.subr.bf16.mxu0 %v10721_v5  ;;  %v1244_v52 = vld [vmem:[%s11377_s15 + $0x1358] sm:$0xff] }
 0x3f7   : > { %v1616_v5 = vld [vmem:[%s11377_s15 + $0x1ef8] sm:$0xff]  ;;  %v10193_v13 = vcombine.high %v1232_v45, %v1244_v52  ;;  %v10192_v24 = vcombine.low %v1232_v45, %v1244_v52  ;;  %v10122_v45 = vcombine.low %v1161_v51, %v1173_v57  ;;  %v693_v51 = vld [vmem:[%s11377_s15 + $0x220] sm:$0xff] }
 0x3f8   : > { %8582 = vmatpush2.bf16.msra.mxu1 %v10336_v10  ;;  %v10577_v10 = vcombine.high %v1616_v5, %v1628_v35  ;;  %v1604_v9 = vld [vmem:[%s11377_s15 + $0x1e98] sm:$0xff]  ;;  %v10576_v3 = vcombine.low %v1616_v5, %v1628_v35  ;;  %v1065_v57 = vld [vmem:[%s11377_s15 + $0xdc0] sm:$0xff] }
 0x3f9   : > { %8623 = vmatpush2.bf16.msra.mxu0 %v10720_v11  ;;  %8583 = vmatprep.subr.bf16.mxu1 %v10313_v12  ;;  %v12337_v8 = vpop.eup %10889  ;;  %v1208_v11 = vld [vmem:[%s11377_s15 + $0x1238] sm:$0xff] }
 0x3fa   : > { %8624 = vmatprep.subr.bf16.mxu0 %v10697_v14  ;;  %v1220_v12 = vld [vmem:[%s11377_s15 + $0x1298] sm:$0xff] }
 0x3fb   : > { %v12341_v22 = vpop.eup %10891  ;;  %v1592_v14 = vld [vmem:[%s11377_s15 + $0x1e38] sm:$0xff]  ;;  %v10169_v16 = vcombine.high %v1208_v11, %v1220_v12  ;;  %v10168_v21 = vcombine.low %v1208_v11, %v1220_v12  ;;  %v1113_v11 = vld [vmem:[%s11377_s15 + $0xf40] sm:$0xff] }
 0x3fc   : > { %v9341_v25 = vcombine.low %v12337_v8, %v12341_v22  ;;  %8584 = vmatpush2.bf16.msra.mxu1 %v10312_v17  ;;  %v10553_v17 = vcombine.high %v1592_v14, %v1604_v9  ;;  %v10552_v15 = vcombine.low %v1592_v14, %v1604_v9  ;;  %v1125_v12 = vld [vmem:[%s11377_s15 + $0xfa0] sm:$0xff] }
 0x3fd   : > { %8625 = vmatpush2.bf16.msra.mxu0 %v10696_v18  ;;  %8585 = vmatprep.subr.bf16.mxu1 %v10289_v19  ;;  %v801_v18 = vld [vmem:[%s11377_s15 + $0x580] sm:$0xff] }
 0x3fe   : > { %8626 = vmatprep.subr.bf16.mxu0 %v10673_v38  ;;  %v813_v19 = vld [vmem:[%s11377_s15 + $0x5e0] sm:$0xff] }
 0x3ff   : > { %v1185_v38 = vld [vmem:[%s11377_s15 + $0x1180] sm:$0xff]  ;;  %v9763_v23 = vcombine.high %v801_v18, %v813_v19  ;;  %v9762_v42 = vcombine.low %v801_v18, %v813_v19 }
 0x400   : > { %8586 = vmatpush2.bf16.msra.mxu1 %v10288_v27  ;;  %v1826_v27 = vrot.slane %v12209_v32, %v11466_v37  ;;  %v1137_v32 = vld [vmem:[%s11377_s15 + $0x1000] sm:$0xff] }
 0x401   : > { %8627 = vmatpush2.bf16.msra.mxu0 %v10672_v28  ;;  %8587 = vmatprep.subr.bf16.mxu1 %v10265_v29  ;;  %v10147_v28 = vcombine.high %v1185_v38, %v1197_v20  ;;  %v777_v29 = vld [vmem:[%s11377_s15 + $0x4c0] sm:$0xff] }
 0x402   : > { %8628 = vmatprep.subr.bf16.mxu0 %v10649_v31  ;;  %v789_v31 = vld [vmem:[%s11377_s15 + $0x520] sm:$0xff] }
 0x403   : > { %v1257_v8 = vld [vmem:[%s11377_s15 + $0x13c0] sm:$0xff] }
 0x404   : > { %8588 = vmatpush2.bf16.msra.mxu1 %v10264_v59  ;;  %v10146_v59 = vcombine.low %v1185_v38, %v1197_v20  ;;  %v10075_v20 = vcombine.high %v1113_v11, %v1125_v12  ;;  %v1269_v22 = vld [vmem:[%s11377_s15 + $0x1420] sm:$0xff] }
 0x405   : > { %8629 = vmatpush2.bf16.msra.mxu0 %v10648_v44  ;;  %8589 = vmatprep.subr.bf16.mxu1 %v10241_v43  ;;  %v8313_v44 = vadd.f32 %v12297_v34, %v1826_v27  ;;  %v9739_v43 = vcombine.high %v777_v29, %v789_v31  ;;  %v9738_v34 = vcombine.low %v777_v29, %v789_v31  ;;  %v1101_v27 = vld [vmem:[%s11377_s15 + $0xee0] sm:$0xff] }
 0x406   : > { %8630 = vmatprep.subr.bf16.mxu0 %v10625_v48  ;;  %v753_v48 = vld [vmem:[%s11377_s15 + $0x400] sm:$0xff]  ;;  %v10074_v29 = vcombine.low %v1113_v11, %v1125_v12 }
 0x407   : > { %v9715_v52 = vcombine.high %v753_v48, %v765_v49 }
 0x408   : > { %8590 = vmatpush2.bf16.msra.mxu1 %v10240_v58  ;;  %v8315_v58 = vadd.f32 %v12303_v46, %v1830_v33 }
 0x409   : > { %8631 = vmatpush2.bf16.msra.mxu0 %v10624_v61  ;;  %8591 = vmatprep.subr.bf16.mxu1 %v10217_v62 }
 0x40a   : > { %8632 = vmatprep.subr.bf16.mxu0 %v10601_v4 }
 0x40c   : > { %8592 = vmatpush2.bf16.msra.mxu1 %v10216_v6  ;;  %v10099_v6 = vcombine.high %v1137_v32, %v1149_v54 }
 0x40d   : > { %8633 = vmatpush2.bf16.msra.mxu0 %v10600_v7  ;;  %8593 = vmatprep.subr.bf16.mxu1 %v10193_v13  ;;  %v729_v7 = vld [vmem:[%s11377_s15 + $0x340] sm:$0xff] }
 0x40e   : > { %8634 = vmatprep.subr.bf16.mxu0 %v10577_v10  ;;  %v741_v13 = vld [vmem:[%s11377_s15 + $0x3a0] sm:$0xff] }
 0x40f   : > { %v9691_v18 = vcombine.high %v729_v7, %v741_v13 }
 0x410   : > { %8594 = vmatpush2.bf16.msra.mxu1 %v10192_v24 }
 0x411   : > { %8635 = vmatpush2.bf16.msra.mxu0 %v10576_v3  ;;  %8595 = vmatprep.subr.bf16.mxu1 %v10169_v16  ;;  %v9714_v3 = vcombine.low %v753_v48, %v765_v49 }
 0x412   : > { %8636 = vmatprep.subr.bf16.mxu0 %v10553_v17  ;;  %v10098_v17 = vcombine.low %v1137_v32, %v1149_v54  ;;  %v1041_v32 = vld [vmem:[%s11377_s15 + $0xd00] sm:$0xff] }
 0x413   : > { %v1053_v54 = vld [vmem:[%s11377_s15 + $0xd60] sm:$0xff] }
 0x414   : > { %8596 = vmatpush2.bf16.msra.mxu1 %v10168_v21  ;;  %v705_v21 = vld [vmem:[%s11377_s15 + $0x280] sm:$0xff] }
 0x415   : > { %8637 = vmatpush2.bf16.msra.mxu0 %v10552_v15  ;;  %8647 = vmatprep.subr.bf16.mxu1 %v9763_v23  ;;  %v717_v15 = vld [vmem:[%s11377_s15 + $0x2e0] sm:$0xff] }
 0x416   : > { %8688 = vmatprep.subr.bf16.mxu0 %v10147_v28  ;;  %v1089_v23 = vld [vmem:[%s11377_s15 + $0xe80] sm:$0xff]  ;;  %v9690_v28 = vcombine.low %v729_v7, %v741_v13  ;;  %v9667_v31 = vcombine.high %v705_v21, %v717_v15  ;;  %v10002_v13 = vcombine.low %v1041_v32, %v1053_v54 }
 0x417   : > { %v8353_v50 = vpop.f32.mrf.mxu1  ;;  %8598 = vmatmul.mubr.bf16.vlgmr.msra.gmra.mxu1 %v11489_v60  ;;  %v10051_v33 = vcombine.high %v1089_v23, %v1101_v27 }
 0x418   : > { %v8354_v61 = vadd.f32 %v8353_v50, %v8313_v44  ;;  %v8394_v62 = vpop.f32.mrf.mxu0  ;;  %8639 = vmatmul.mubr.bf16.vlgmr.msra.gmra.mxu0 %v11581_v41  ;;  %8648 = vmatpush1.bf16.msra.mxu1 %v9762_v42  ;;  %v681_v42 = vld [vmem:[%s11377_s15 + $0x1c0] sm:$0xff]  ;;  %v9666_v44 = vcombine.low %v705_v21, %v717_v15 }
 0x419   : > { %8679 = vmatprep.mubr.bf16.mxu1 %v11493_v63  ;;  %8689 = vmatpush1.bf16.msra.mxu0 %v10146_v59  ;;  %v8355_v4 = vpop.f32.mrf.mxu1  ;;  %v1077_v59 = vld [vmem:[%s11377_s15 + $0xe20] sm:$0xff]  ;;  %v9643_v48 = vcombine.high %v681_v42, %v693_v51 }
 0x41a   : > { %v8395_v5 = vadd.f32 %v8394_v62, %v8354_v61  ;;  %8720 = vmatprep.mubr.bf16.mxu0 %v11495_v0  ;;  %v8356_v46 = vadd.f32 %v8355_v4, %v8315_v58  ;;  %v8396_v35 = vpop.f32.mrf.mxu0  ;;  %8649 = vmatprep.subr.bf16.mxu1 %v9739_v43  ;;  %v10050_v43 = vcombine.low %v1089_v23, %v1101_v27  ;;  %v657_v50 = vld [vmem:[%s11377_s15 + $0x100] sm:$0xff] }
 0x41b   : > { %v8357_v10 = vpop.f32.mrf.mxu1  ;;  %8690 = vmatprep.subr.bf16.mxu0 %v10123_v53  ;;  %v10027_v49 = vcombine.high %v1065_v57, %v1077_v59  ;;  %v669_v53 = vld [vmem:[%s11377_s15 + $0x160] sm:$0xff]  ;;  %v9642_v58 = vcombine.low %v681_v42, %v693_v51  ;;  %v10026_v61 = vcombine.low %v1065_v57, %v1077_v59 }
 0x41c   : > { %v10740_v14 = vmul.f32 -1.442695, %v8395_v5  ;;  %v8397_v9 = vadd.f32 %v8396_v35, %v8356_v46  ;;  %v8398_v24 = vpop.f32.mrf.mxu0  ;;  %8650 = vmatpush1.bf16.msra.mxu1 %v9738_v34  ;;  %v9619_v62 = vcombine.high %v657_v50, %v669_v53  ;;  %v10003_v34 = vcombine.high %v1041_v32, %v1053_v54  ;;  %v633_v4 = vld [vmem:[%s11377_s15 + $0x40] sm:$0xff] }
 0x41d   : > { %8691 = vmatpush1.bf16.msra.mxu0 %v10122_v45  ;;  %v8358_v16 = vpop.f32.mrf.mxu1  ;;  %8651 = vmatprep.subr.bf16.mxu1 %v9715_v52  ;;  %v645_v45 = vld [vmem:[%s11377_s15 + $0xa0] sm:$0xff] }
 0x41e   : > { %10893 = vpow2.f32 %v10740_v14  ;;  %v10741_v19 = vmul.f32 -1.442695, %v8397_v9  ;;  %v8399_v38 = vpop.f32.mrf.mxu0  ;;  %8692 = vmatprep.subr.bf16.mxu0 %v10099_v6  ;;  %v1017_v5 = vld [vmem:[%s11377_s15 + $0xc40] sm:$0xff]  ;;  %v9618_v6 = vcombine.low %v657_v50, %v669_v53  ;;  %v9595_v10 = vcombine.high %v633_v4, %v645_v45 }
 0x41f   : > { %v1029_v46 = vld [vmem:[%s11377_s15 + $0xca0] sm:$0xff]  ;;  %v9594_v16 = vcombine.low %v633_v4, %v645_v45 }
 0x420   : > { %10895 = vpow2.f32 %v10741_v19  ;;  %8652 = vmatpush1.bf16.msra.mxu1 %v9714_v3  ;;  %v9979_v12 = vcombine.high %v1017_v5, %v1029_v46  ;;  %v993_v14 = vld [vmem:[%s11377_s15 + $0xb80] sm:$0xff] }
 0x421   : > { %8693 = vmatpush1.bf16.msra.mxu0 %v10098_v17  ;;  %8653 = vmatprep.subr.bf16.mxu1 %v9691_v18  ;;  %v1005_v9 = vld [vmem:[%s11377_s15 + $0xbe0] sm:$0xff]  ;;  %v9978_v17 = vcombine.low %v1017_v5, %v1029_v46 }
 0x422   : > { %8694 = vmatprep.subr.bf16.mxu0 %v10075_v20  ;;  %v1377_v24 = vld [vmem:[%s11377_s15 + $0x1780] sm:$0xff]  ;;  %v9955_v18 = vcombine.high %v993_v14, %v1005_v9  ;;  %v9954_v23 = vcombine.low %v993_v14, %v1005_v9 }
 0x423   : > { %v1389_v3 = vld [vmem:[%s11377_s15 + $0x17e0] sm:$0xff] }
 0x424   : > { %8654 = vmatpush1.bf16.msra.mxu1 %v9690_v28  ;;  %v10339_v19 = vcombine.high %v1377_v24, %v1389_v3  ;;  %v969_v38 = vld [vmem:[%s11377_s15 + $0xac0] sm:$0xff]  ;;  %v10338_v27 = vcombine.low %v1377_v24, %v1389_v3 }
 0x425   : > { %8695 = vmatpush1.bf16.msra.mxu0 %v10074_v29  ;;  %8655 = vmatprep.subr.bf16.mxu1 %v9667_v31  ;;  %v981_v20 = vld [vmem:[%s11377_s15 + $0xb20] sm:$0xff] }
 0x426   : > { %8696 = vmatprep.subr.bf16.mxu0 %v10051_v33  ;;  %v1353_v21 = vld [vmem:[%s11377_s15 + $0x16c0] sm:$0xff]  ;;  %v9931_v28 = vcombine.high %v969_v38, %v981_v20  ;;  %v9930_v57 = vcombine.low %v969_v38, %v981_v20 }
 0x427   : > { %v1365_v15 = vld [vmem:[%s11377_s15 + $0x1720] sm:$0xff] }
 0x428   : > { %8656 = vmatpush1.bf16.msra.mxu1 %v9666_v44  ;;  %v10315_v29 = vcombine.high %v1353_v21, %v1365_v15  ;;  %v945_v31 = vld [vmem:[%s11377_s15 + $0xa00] sm:$0xff]  ;;  %v10314_v59 = vcombine.low %v1353_v21, %v1365_v15  ;;  %v10218_v21 = vcombine.low %v1257_v8, %v1269_v22 }
 0x429   : > { %8697 = vmatpush1.bf16.msra.mxu0 %v10050_v43  ;;  %8657 = vmatprep.subr.bf16.mxu1 %v9643_v48  ;;  %v957_v33 = vld [vmem:[%s11377_s15 + $0xa60] sm:$0xff] }
 0x42a   : > { %8698 = vmatprep.subr.bf16.mxu0 %v10027_v49  ;;  %v1329_v42 = vld [vmem:[%s11377_s15 + $0x1600] sm:$0xff]  ;;  %v9907_v44 = vcombine.high %v945_v31, %v957_v33  ;;  %v9906_v54 = vcombine.low %v945_v31, %v957_v33 }
 0x42b   : > { %v10894_v52 = vpop.eup %10893  ;;  %v1341_v51 = vld [vmem:[%s11377_s15 + $0x1660] sm:$0xff] }
 0x42c   : > { %v9221_v35 = vadd.f32 1.0, %v10894_v52  ;;  %8658 = vmatpush1.bf16.msra.mxu1 %v9642_v58  ;;  %v10291_v43 = vcombine.high %v1329_v42, %v1341_v51  ;;  %v921_v48 = vld [vmem:[%s11377_s15 + $0x940] sm:$0xff] }
 0x42d   : > { %v10896_v7 = vpop.eup %10895  ;;  %8699 = vmatpush1.bf16.msra.mxu0 %v10026_v61  ;;  %8659 = vmatprep.subr.bf16.mxu1 %v9619_v62  ;;  %v933_v49 = vld [vmem:[%s11377_s15 + $0x9a0] sm:$0xff]  ;;  %v10290_v61 = vcombine.low %v1329_v42, %v1341_v51 }
 0x42e   : > { %v9222_v11 = vadd.f32 1.0, %v10896_v7  ;;  %8700 = vmatprep.subr.bf16.mxu0 %v10003_v34  ;;  %10897 = vrcp.f32 %v9221_v35  ;;  %v1305_v50 = vld [vmem:[%s11377_s15 + $0x1540] sm:$0xff]  ;;  %v9883_v62 = vcombine.high %v921_v48, %v933_v49  ;;  %v9349_v35 = vrot.slane %v9341_v25, %v11932_v30 }
 0x42f   : > { %v1317_v53 = vld [vmem:[%s11377_s15 + $0x15a0] sm:$0xff]  ;;  %v9882_v7 = vcombine.low %v921_v48, %v933_v49  ;;  %v814_v48 = vld [vmem:[%s11377_s15 + $0x5e8] sm:$0xff] }
 0x430   : > { %10899 = vrcp.f32 %v9222_v11  ;;  %8660 = vmatpush1.bf16.msra.mxu1 %v9618_v6  ;;  %v10267_v4 = vcombine.high %v1305_v50, %v1317_v53  ;;  %v897_v45 = vld [vmem:[%s11377_s15 + $0x880] sm:$0xff] }
 0x431   : > { %8701 = vmatpush1.bf16.msra.mxu0 %v10002_v13  ;;  %8661 = vmatprep.subr.bf16.mxu1 %v9595_v10  ;;  %v909_v52 = vld [vmem:[%s11377_s15 + $0x8e0] sm:$0xff]  ;;  %v10266_v13 = vcombine.low %v1305_v50, %v1317_v53 }
 0x432   : > { %8702 = vmatprep.subr.bf16.mxu0 %v9979_v12  ;;  %v1281_v5 = vld [vmem:[%s11377_s15 + $0x1480] sm:$0xff]  ;;  %v9859_v10 = vcombine.high %v897_v45, %v909_v52  ;;  %v9858_v25 = vcombine.low %v897_v45, %v909_v52  ;;  %v790_v45 = vld [vmem:[%s11377_s15 + $0x528] sm:$0xff] }
 0x433   : > { %v1293_v46 = vld [vmem:[%s11377_s15 + $0x14e0] sm:$0xff] }
 0x434   : > { %8662 = vmatpush1.bf16.msra.mxu1 %v9594_v16  ;;  %v10243_v12 = vcombine.high %v1281_v5, %v1293_v46  ;;  %v873_v14 = vld [vmem:[%s11377_s15 + $0x7c0] sm:$0xff]  ;;  %v10242_v24 = vcombine.low %v1281_v5, %v1293_v46  ;;  %v10219_v16 = vcombine.high %v1257_v8, %v1269_v22 }
 0x435   : > { %8703 = vmatpush1.bf16.msra.mxu0 %v9978_v17  ;;  %8663 = vmatprep.subr.bf16.mxu1 %v9955_v18  ;;  %v885_v9 = vld [vmem:[%s11377_s15 + $0x820] sm:$0xff] }
 0x436   : > { %8704 = vmatprep.subr.bf16.mxu0 %v10339_v19  ;;  %v9835_v3 = vcombine.high %v873_v14, %v885_v9  ;;  %v849_v17 = vld [vmem:[%s11377_s15 + $0x700] sm:$0xff]  ;;  %v9834_v20 = vcombine.low %v873_v14, %v885_v9 }
 0x437   : > { %v861_v18 = vld [vmem:[%s11377_s15 + $0x760] sm:$0xff] }
 0x438   : > { %8664 = vmatpush2.bf16.msra.mxu1 %v9954_v23  ;;  %v1233_v19 = vld [vmem:[%s11377_s15 + $0x1300] sm:$0xff]  ;;  %v9811_v15 = vcombine.high %v849_v17, %v861_v18  ;;  %v9810_v33 = vcombine.low %v849_v17, %v861_v18 }
 0x439   : > { %8705 = vmatpush2.bf16.msra.mxu0 %v10338_v27  ;;  %8665 = vmatprep.subr.bf16.mxu1 %v9931_v28  ;;  %v1245_v38 = vld [vmem:[%s11377_s15 + $0x1360] sm:$0xff] }
 0x43a   : > { %8706 = vmatprep.subr.bf16.mxu0 %v10315_v29  ;;  %v10195_v23 = vcombine.high %v1233_v19, %v1245_v38  ;;  %v825_v27 = vld [vmem:[%s11377_s15 + $0x640] sm:$0xff]  ;;  %v10194_v42 = vcombine.low %v1233_v19, %v1245_v38 }
 0x43b   : > { %v10898_v32 = vpop.eup %10897  ;;  %v837_v28 = vld [vmem:[%s11377_s15 + $0x6a0] sm:$0xff] }
 0x43c   : > { %8666 = vmatpush2.bf16.msra.mxu1 %v9930_v57  ;;  %v1209_v29 = vld [vmem:[%s11377_s15 + $0x1240] sm:$0xff]  ;;  %v9787_v51 = vcombine.high %v825_v27, %v837_v28  ;;  %v9786_v49 = vcombine.low %v825_v27, %v837_v28 }
 0x43d   : > { %v10900_v58 = vpop.eup %10899  ;;  %8707 = vmatpush2.bf16.msra.mxu0 %v10314_v59  ;;  %8667 = vmatprep.subr.bf16.mxu1 %v9907_v44  ;;  %v1221_v31 = vld [vmem:[%s11377_s15 + $0x12a0] sm:$0xff] }
 0x43e   : > { %v9342_v34 = vcombine.low %v10898_v32, %v10900_v58  ;;  %8708 = vmatprep.subr.bf16.mxu0 %v10291_v43  ;;  %v10171_v57 = vcombine.high %v1209_v29, %v1221_v31  ;;  %v1569_v59 = vld [vmem:[%s11377_s15 + $0x1d80] sm:$0xff]  ;;  %v802_v43 = vld [vmem:[%s11377_s15 + $0x588] sm:$0xff]  ;;  %v10170_v50 = vcombine.low %v1209_v29, %v1221_v31 }
 0x43f   : > { %v1581_v44 = vld [vmem:[%s11377_s15 + $0x1de0] sm:$0xff]  ;;  %v9765_v32 = vcombine.high %v802_v43, %v814_v48  ;;  %v9764_v52 = vcombine.low %v802_v43, %v814_v48 }
 0x440   : > { %v9356_v6 = vrot.slane %v9342_v34, %v11932_v30  ;;  %8668 = vmatpush2.bf16.msra.mxu1 %v9906_v54  ;;  %v10531_v53 = vcombine.high %v1569_v59, %v1581_v44  ;;  %v1545_v54 = vld [vmem:[%s11377_s15 + $0x1cc0] sm:$0xff]  ;;  %v10530_v34 = vcombine.low %v1569_v59, %v1581_v44  ;;  %v706_v59 = vld [vmem:[%s11377_s15 + $0x288] sm:$0xff] }
 0x441   : > { %8709 = vmatpush2.bf16.msra.mxu0 %v10290_v61  ;;  %8669 = vmatprep.subr.bf16.mxu1 %v9883_v62  ;;  %v1557_v58 = vld [vmem:[%s11377_s15 + $0x1d20] sm:$0xff]  ;;  %v718_v44 = vld [vmem:[%s11377_s15 + $0x2e8] sm:$0xff] }
 0x442   : > { %v9357_v11 = vcombine.low %v9349_v35, %v9356_v6  ;;  %8710 = vmatprep.subr.bf16.mxu0 %v10267_v4  ;;  %v12450_v61 = vld [vmem:[%s11716_s6 + $0x8] sm:$0xff]  ;;  %v10507_v46 = vcombine.high %v1545_v54, %v1557_v58  ;;  %v10506_v9 = vcombine.low %v1545_v54, %v1557_v58 }
 0x443   : > { %v1834_v62 = vrot.slane %v12450_v61, %v11560_v2  ;;  %v778_v4 = vld [vmem:[%s11377_s15 + $0x4c8] sm:$0xff]  ;;  %v1838_v5 = vrot.slane %v12450_v61, %v11485_v55  ;;  %v1521_v35 = vld [vmem:[%s11377_s15 + $0x1c00] sm:$0xff] }
 0x444   : > { %8670 = vmatpush2.bf16.msra.mxu1 %v9882_v7  ;;  %9417 = vst [vmem:[%s11948_s29 + $0x10] sm:$0xff] %v9357_v11  ;;  %v1533_v6 = vld [vmem:[%s11377_s15 + $0x1c60] sm:$0xff]  ;;  %v766_v11 = vld [vmem:[%s11377_s15 + $0x468] sm:$0xff]  ;;  %v9740_v22 = vcombine.low %v778_v4, %v790_v45 }
 0x445   : > { %8711 = vmatpush2.bf16.msra.mxu0 %v10266_v13  ;;  %8671 = vmatprep.subr.bf16.mxu1 %v9859_v10  ;;  %v9741_v13 = vcombine.high %v778_v4, %v790_v45  ;;  %v754_v10 = vld [vmem:[%s11377_s15 + $0x408] sm:$0xff]  ;;  %v1497_v18 = vld [vmem:[%s11377_s15 + $0x1b40] sm:$0xff]  ;;  %v10482_v27 = vcombine.low %v1521_v35, %v1533_v6 }
 0x446   : > { %8712 = vmatprep.subr.bf16.mxu0 %v10243_v12  ;;  %v9717_v17 = vcombine.high %v754_v10, %v766_v11  ;;  %v1509_v19 = vld [vmem:[%s11377_s15 + $0x1ba0] sm:$0xff]  ;;  %v9716_v29 = vcombine.low %v754_v10, %v766_v11  ;;  %v682_v54 = vld [vmem:[%s11377_s15 + $0x1c8] sm:$0xff] }
 0x447   : > { %v10459_v31 = vcombine.high %v1497_v18, %v1509_v19  ;;  %v10458_v43 = vcombine.low %v1497_v18, %v1509_v19  ;;  %v694_v58 = vld [vmem:[%s11377_s15 + $0x228] sm:$0xff]  ;;  %v1401_v11 = vld [vmem:[%s11377_s15 + $0x1840] sm:$0xff] }
 0x448   : > { %8672 = vmatpush2.bf16.msra.mxu1 %v9858_v25  ;;  %v10483_v25 = vcombine.high %v1521_v35, %v1533_v6  ;;  %v9645_v45 = vcombine.high %v682_v54, %v694_v58  ;;  %v670_v35 = vld [vmem:[%s11377_s15 + $0x168] sm:$0xff] }
 0x449   : > { %8713 = vmatpush2.bf16.msra.mxu0 %v10242_v24  ;;  %8673 = vmatprep.subr.bf16.mxu1 %v9835_v3  ;;  %v994_v18 = vld [vmem:[%s11377_s15 + $0xb88] sm:$0xff] }
 0x44a   : > { %8714 = vmatprep.subr.bf16.mxu0 %v10219_v16  ;;  %v1006_v19 = vld [vmem:[%s11377_s15 + $0xbe8] sm:$0xff] }
 0x44c   : > { %8674 = vmatpush2.bf16.msra.mxu1 %v9834_v20  ;;  %v730_v20 = vld [vmem:[%s11377_s15 + $0x348] sm:$0xff] }
 0x44d   : > { %8715 = vmatpush2.bf16.msra.mxu0 %v10218_v21  ;;  %8675 = vmatprep.subr.bf16.mxu1 %v9811_v15  ;;  %v742_v21 = vld [vmem:[%s11377_s15 + $0x3a8] sm:$0xff] }
 0x44e   : > { %8716 = vmatprep.subr.bf16.mxu0 %v10195_v23  ;;  %v9692_v48 = vcombine.low %v730_v20, %v742_v21 }
 0x450   : > { %8676 = vmatpush2.bf16.msra.mxu1 %v9810_v33 }
 0x451   : > { %8717 = vmatpush2.bf16.msra.mxu0 %v10194_v42  ;;  %8677 = vmatprep.subr.bf16.mxu1 %v9787_v51  ;;  %v9693_v42 = vcombine.high %v730_v20, %v742_v21  ;;  %v1473_v51 = vld [vmem:[%s11377_s15 + $0x1a80] sm:$0xff] }
 0x452   : > { %8718 = vmatprep.subr.bf16.mxu0 %v10171_v57  ;;  %v1485_v57 = vld [vmem:[%s11377_s15 + $0x1ae0] sm:$0xff] }
 0x454   : > { %8678 = vmatpush2.bf16.msra.mxu1 %v9786_v49  ;;  %v10435_v49 = vcombine.high %v1473_v51, %v1485_v57 }
 0x455   : > { %8719 = vmatpush2.bf16.msra.mxu0 %v10170_v50  ;;  %8729 = vmatprep.subr.bf16.mxu1 %v10531_v53  ;;  %v9669_v50 = vcombine.high %v706_v59, %v718_v44  ;;  %v1449_v53 = vld [vmem:[%s11377_s15 + $0x19c0] sm:$0xff] }
 0x456   : > { %8770 = vmatprep.subr.bf16.mxu0 %v9765_v32  ;;  %v1461_v32 = vld [vmem:[%s11377_s15 + $0x1a20] sm:$0xff] }
 0x457   : > { %v8435_v7 = vpop.f32.mrf.mxu1  ;;  %8680 = vmatmul.mubr.bf16.vlgmr.msra.gmra.mxu1 %v11497_v1  ;;  %v10411_v4 = vcombine.high %v1449_v53, %v1461_v32  ;;  %v10410_v6 = vcombine.low %v1449_v53, %v1461_v32 }
 0x458   : > { %v8436_v12 = vadd.f32 %v8435_v7, %v1834_v62  ;;  %v8476_v14 = vpop.f32.mrf.mxu0  ;;  %8721 = vmatmul.mubr.bf16.vlgmr.msra.gmra.mxu0 %v11489_v60  ;;  %8730 = vmatpush1.bf16.msra.mxu1 %v10530_v34  ;;  %v10434_v62 = vcombine.low %v1473_v51, %v1485_v57  ;;  %v9668_v34 = vcombine.low %v706_v59, %v718_v44  ;;  %v1713_v59 = vld [vmem:[%s11377_s15 + $0x2200] sm:$0xff] }
 0x459   : > { %8761 = vmatprep.mubr.bf16.mxu1 %v11517_v26  ;;  %8771 = vmatpush1.bf16.msra.mxu0 %v9764_v52  ;;  %v8437_v8 = vpop.f32.mrf.mxu1  ;;  %v1425_v52 = vld [vmem:[%s11377_s15 + $0x1900] sm:$0xff]  ;;  %v9644_v7 = vcombine.low %v682_v54, %v694_v58 }
 0x45a   : > { %v12465_v24 = vadd.f32 %v8476_v14, %v8436_v12  ;;  %8802 = vmatprep.mubr.bf16.mxu0 %v11493_v63  ;;  %v8438_v3 = vadd.f32 %v8437_v8, %v1838_v5  ;;  %v8478_v16 = vpop.f32.mrf.mxu0  ;;  %8731 = vmatprep.subr.bf16.mxu1 %v10507_v46  ;;  %v1437_v5 = vld [vmem:[%s11377_s15 + $0x1960] sm:$0xff]  ;;  %v658_v46 = vld [vmem:[%s11377_s15 + $0x108] sm:$0xff] }
 0x45b   : > { %v8439_v38 = vpop.f32.mrf.mxu1  ;;  %8772 = vmatprep.subr.bf16.mxu0 %v9741_v13  ;;  %v10387_v13 = vcombine.high %v1425_v52, %v1437_v5  ;;  %v9621_v10 = vcombine.high %v658_v46, %v670_v35  ;;  %v1413_v12 = vld [vmem:[%s11377_s15 + $0x18a0] sm:$0xff]  ;;  %v634_v14 = vld [vmem:[%s11377_s15 + $0x48] sm:$0xff]  ;;  %v10386_v8 = vcombine.low %v1425_v52, %v1437_v5 }
 0x45c   : > { %v12472_v15 = vadd.f32 %v8478_v16, %v8438_v3  ;;  %v8480_v23 = vpop.f32.mrf.mxu0  ;;  %8732 = vmatpush1.bf16.msra.mxu1 %v10506_v9  ;;  %v646_v9 = vld [vmem:[%s11377_s15 + $0xa8] sm:$0xff]  ;;  %v1761_v16 = vld [vmem:[%s11377_s15 + $0x2380] sm:$0xff]  ;;  %v10362_v38 = vcombine.low %v1401_v11, %v1413_v12 }
 0x45d   : > { %8773 = vmatpush1.bf16.msra.mxu0 %v9740_v22  ;;  %v8440_v28 = vpop.f32.mrf.mxu1  ;;  %8733 = vmatprep.subr.bf16.mxu1 %v10483_v25  ;;  %v9620_v22 = vcombine.low %v658_v46, %v670_v35  ;;  %v10363_v25 = vcombine.high %v1401_v11, %v1413_v12  ;;  %v9597_v3 = vcombine.high %v634_v14, %v646_v9  ;;  %v1725_v44 = vld [vmem:[%s11377_s15 + $0x2260] sm:$0xff] }
 0x45e   : > { %v8481_v33 = vpop.f32.mrf.mxu0  ;;  %8774 = vmatprep.subr.bf16.mxu0 %v9717_v17  ;;  %v1773_v17 = vld [vmem:[%s11377_s15 + $0x23e0] sm:$0xff]  ;;  %v9596_v20 = vcombine.low %v634_v14, %v646_v9  ;;  %v9957_v23 = vcombine.high %v994_v18, %v1006_v19  ;;  %v10675_v53 = vcombine.high %v1713_v59, %v1725_v44 }
 0x45f   : > { %v10723_v21 = vcombine.high %v1761_v16, %v1773_v17  ;;  %v1749_v28 = vld [vmem:[%s11377_s15 + $0x2320] sm:$0xff]  ;;  %v10722_v33 = vcombine.low %v1761_v16, %v1773_v17 }
 0x460   : > { %8734 = vmatpush1.bf16.msra.mxu1 %v10482_v27  ;;  %v1737_v27 = vld [vmem:[%s11377_s15 + $0x22c0] sm:$0xff] }
 0x461   : > { %8775 = vmatpush1.bf16.msra.mxu0 %v9716_v29  ;;  %8735 = vmatprep.subr.bf16.mxu1 %v10459_v31  ;;  %v970_v29 = vld [vmem:[%s11377_s15 + $0xac8] sm:$0xff]  ;;  %v10699_v51 = vcombine.high %v1737_v27, %v1749_v28  ;;  %v1689_v54 = vld [vmem:[%s11377_s15 + $0x2140] sm:$0xff] }
 0x462   : > { %8776 = vmatprep.subr.bf16.mxu0 %v9693_v42  ;;  %v982_v31 = vld [vmem:[%s11377_s15 + $0xb28] sm:$0xff]  ;;  %v9956_v42 = vcombine.low %v994_v18, %v1006_v19  ;;  %v1701_v58 = vld [vmem:[%s11377_s15 + $0x21a0] sm:$0xff] }
 0x463   : > { %v9933_v57 = vcombine.high %v970_v29, %v982_v31  ;;  %v10651_v52 = vcombine.high %v1689_v54, %v1701_v58  ;;  %v1665_v46 = vld [vmem:[%s11377_s15 + $0x2080] sm:$0xff] }
 0x464   : > { %8736 = vmatpush1.bf16.msra.mxu1 %v10458_v43  ;;  %v946_v43 = vld [vmem:[%s11377_s15 + $0xa08] sm:$0xff]  ;;  %v1677_v35 = vld [vmem:[%s11377_s15 + $0x20e0] sm:$0xff] }
 0x465   : > { %8777 = vmatpush1.bf16.msra.mxu0 %v9692_v48  ;;  %8737 = vmatprep.subr.bf16.mxu1 %v10435_v49  ;;  %v958_v48 = vld [vmem:[%s11377_s15 + $0xa68] sm:$0xff]  ;;  %v10698_v49 = vcombine.low %v1737_v27, %v1749_v28  ;;  %v10627_v11 = vcombine.high %v1665_v46, %v1677_v35  ;;  %v1641_v14 = vld [vmem:[%s11377_s15 + $0x1fc0] sm:$0xff] }
 0x466   : > { %8778 = vmatprep.subr.bf16.mxu0 %v9669_v50  ;;  %v9932_v50 = vcombine.low %v970_v29, %v982_v31  ;;  %v9909_v32 = vcombine.high %v946_v43, %v958_v48  ;;  %v1653_v9 = vld [vmem:[%s11377_s15 + $0x2020] sm:$0xff] }
 0x467   : > { %v10603_v16 = vcombine.high %v1641_v14, %v1653_v9  ;;  %v1617_v18 = vld [vmem:[%s11377_s15 + $0x1f00] sm:$0xff] }
 0x468   : > { %8738 = vmatpush1.bf16.msra.mxu1 %v10434_v62  ;;  %v922_v62 = vld [vmem:[%s11377_s15 + $0x948] sm:$0xff]  ;;  %v1629_v19 = vld [vmem:[%s11377_s15 + $0x1f60] sm:$0xff] }
 0x469   : > { %8779 = vmatpush1.bf16.msra.mxu0 %v9668_v34  ;;  %8739 = vmatprep.subr.bf16.mxu1 %v10411_v4  ;;  %v934_v34 = vld [vmem:[%s11377_s15 + $0x9a8] sm:$0xff]  ;;  %v10674_v4 = vcombine.low %v1713_v59, %v1725_v44  ;;  %v10579_v27 = vcombine.high %v1617_v18, %v1629_v19  ;;  %v1593_v29 = vld [vmem:[%s11377_s15 + $0x1e40] sm:$0xff] }
 0x46a   : > { %8780 = vmatprep.subr.bf16.mxu0 %v9645_v45  ;;  %v9908_v45 = vcombine.low %v946_v43, %v958_v48  ;;  %v9885_v5 = vcombine.high %v922_v62, %v934_v34  ;;  %v1605_v31 = vld [vmem:[%s11377_s15 + $0x1ea0] sm:$0xff]  ;;  %v1186_v43 = vld [vmem:[%s11377_s15 + $0x1188] sm:$0xff] }
 0x46b   : > { %v10555_v59 = vcombine.high %v1593_v29, %v1605_v31  ;;  %v1198_v48 = vld [vmem:[%s11377_s15 + $0x11e8] sm:$0xff] }
 0x46c   : > { %8740 = vmatpush1.bf16.msra.mxu1 %v10410_v6  ;;  %v898_v6 = vld [vmem:[%s11377_s15 + $0x888] sm:$0xff] }
 0x46d   : > { %8781 = vmatpush1.bf16.msra.mxu0 %v9644_v7  ;;  %8741 = vmatprep.subr.bf16.mxu1 %v10387_v13  ;;  %v910_v7 = vld [vmem:[%s11377_s15 + $0x8e8] sm:$0xff]  ;;  %v10650_v13 = vcombine.low %v1689_v54, %v1701_v58  ;;  %v10149_v54 = vcombine.high %v1186_v43, %v1198_v48 }
 0x46e   : > { %8782 = vmatprep.subr.bf16.mxu0 %v9621_v10  ;;  %v9884_v10 = vcombine.low %v922_v62, %v934_v34  ;;  %v9861_v12 = vcombine.high %v898_v6, %v910_v7  ;;  %v1162_v62 = vld [vmem:[%s11377_s15 + $0x10c8] sm:$0xff] }
 0x46f   : > { %v1174_v34 = vld [vmem:[%s11377_s15 + $0x1128] sm:$0xff] }
 0x470   : > { %8742 = vmatpush1.bf16.msra.mxu1 %v10386_v8  ;;  %v874_v8 = vld [vmem:[%s11377_s15 + $0x7c8] sm:$0xff] }
 0x471   : > { %8783 = vmatpush1.bf16.msra.mxu0 %v9620_v22  ;;  %8743 = vmatprep.subr.bf16.mxu1 %v10363_v25  ;;  %v886_v22 = vld [vmem:[%s11377_s15 + $0x828] sm:$0xff]  ;;  %v10626_v25 = vcombine.low %v1665_v46, %v1677_v35  ;;  %v10125_v46 = vcombine.high %v1162_v62, %v1174_v34 }
 0x472   : > { %8784 = vmatprep.subr.bf16.mxu0 %v9597_v3  ;;  %v9860_v3 = vcombine.low %v898_v6, %v910_v7  ;;  %v9837_v17 = vcombine.high %v874_v8, %v886_v22  ;;  %v1138_v35 = vld [vmem:[%s11377_s15 + $0x1008] sm:$0xff] }
 0x473   : > { %v1150_v6 = vld [vmem:[%s11377_s15 + $0x1068] sm:$0xff] }
 0x474   : > { %8744 = vmatpush1.bf16.msra.mxu1 %v10362_v38  ;;  %v850_v38 = vld [vmem:[%s11377_s15 + $0x708] sm:$0xff] }
 0x475   : > { %8785 = vmatpush1.bf16.msra.mxu0 %v9596_v20  ;;  %8745 = vmatprep.subr.bf16.mxu1 %v10723_v21  ;;  %v862_v20 = vld [vmem:[%s11377_s15 + $0x768] sm:$0xff]  ;;  %v10602_v21 = vcombine.low %v1641_v14, %v1653_v9  ;;  %v10124_v9 = vcombine.low %v1162_v62, %v1174_v34 }
 0x476   : > { %8786 = vmatprep.subr.bf16.mxu0 %v9957_v23  ;;  %v9836_v23 = vcombine.low %v874_v8, %v886_v22  ;;  %v9813_v28 = vcombine.high %v850_v38, %v862_v20 }
 0x478   : > { %8746 = vmatpush2.bf16.msra.mxu1 %v10722_v33  ;;  %v826_v33 = vld [vmem:[%s11377_s15 + $0x648] sm:$0xff] }
 0x479   : > { %8787 = vmatpush2.bf16.msra.mxu0 %v9956_v42  ;;  %8747 = vmatprep.subr.bf16.mxu1 %v10699_v51  ;;  %v838_v42 = vld [vmem:[%s11377_s15 + $0x6a8] sm:$0xff]  ;;  %v10578_v51 = vcombine.low %v1617_v18, %v1629_v19 }
 0x47a   : > { %8788 = vmatprep.subr.bf16.mxu0 %v9933_v57  ;;  %v9812_v57 = vcombine.low %v850_v38, %v862_v20  ;;  %v9789_v44 = vcombine.high %v826_v33, %v838_v42  ;;  %v1114_v18 = vld [vmem:[%s11377_s15 + $0xf48] sm:$0xff] }
 0x47b   : > { %v1126_v19 = vld [vmem:[%s11377_s15 + $0xfa8] sm:$0xff] }
 0x47c   : > { %8748 = vmatpush2.bf16.msra.mxu1 %v10698_v49  ;;  %v1570_v49 = vld [vmem:[%s11377_s15 + $0x1d88] sm:$0xff] }
 0x47d   : > { %8789 = vmatpush2.bf16.msra.mxu0 %v9932_v50  ;;  %8749 = vmatprep.subr.bf16.mxu1 %v10675_v53  ;;  %v1582_v50 = vld [vmem:[%s11377_s15 + $0x1de8] sm:$0xff]  ;;  %v10554_v53 = vcombine.low %v1593_v29, %v1605_v31  ;;  %v10077_v31 = vcombine.high %v1114_v18, %v1126_v19 }
 0x47e   : > { %8790 = vmatprep.subr.bf16.mxu0 %v9909_v32  ;;  %v9788_v32 = vcombine.low %v826_v33, %v838_v42  ;;  %v10533_v58 = vcombine.high %v1570_v49, %v1582_v50  ;;  %v1498_v20 = vld [vmem:[%s11377_s15 + $0x1b48] sm:$0xff] }
 0x480   : > { %8750 = vmatpush2.bf16.msra.mxu1 %v10674_v4  ;;  %v10148_v4 = vcombine.low %v1186_v43, %v1198_v48  ;;  %v10076_v43 = vcombine.low %v1114_v18, %v1126_v19 }
 0x481   : > { %8791 = vmatpush2.bf16.msra.mxu0 %v9908_v45  ;;  %8751 = vmatprep.subr.bf16.mxu1 %v10651_v52  ;;  %v1546_v45 = vld [vmem:[%s11377_s15 + $0x1cc8] sm:$0xff] }
 0x482   : > { %8792 = vmatprep.subr.bf16.mxu0 %v9885_v5  ;;  %v1558_v52 = vld [vmem:[%s11377_s15 + $0x1d28] sm:$0xff]  ;;  %v10532_v5 = vcombine.low %v1570_v49, %v1582_v50 }
 0x483   : > { %v10508_v22 = vcombine.low %v1546_v45, %v1558_v52 }
 0x484   : > { %8752 = vmatpush2.bf16.msra.mxu1 %v10650_v13  ;;  %v10509_v13 = vcombine.high %v1546_v45, %v1558_v52  ;;  %v1042_v52 = vld [vmem:[%s11377_s15 + $0xd08] sm:$0xff] }
 0x485   : > { %8793 = vmatpush2.bf16.msra.mxu0 %v9884_v10  ;;  %8753 = vmatprep.subr.bf16.mxu1 %v10627_v11  ;;  %v1522_v10 = vld [vmem:[%s11377_s15 + $0x1c08] sm:$0xff] }
 0x486   : > { %8794 = vmatprep.subr.bf16.mxu0 %v9861_v12  ;;  %v1534_v11 = vld [vmem:[%s11377_s15 + $0x1c68] sm:$0xff] }
 0x487   : > { %v10484_v29 = vcombine.low %v1522_v10, %v1534_v11 }
 0x488   : > { %8754 = vmatpush2.bf16.msra.mxu1 %v10626_v25  ;;  %v10101_v25 = vcombine.high %v1138_v35, %v1150_v6 }
 0x489   : > { %8795 = vmatpush2.bf16.msra.mxu0 %v9860_v3  ;;  %8755 = vmatprep.subr.bf16.mxu1 %v10603_v16 }
 0x48a   : > { %8796 = vmatprep.subr.bf16.mxu0 %v9837_v17  ;;  %v10485_v17 = vcombine.high %v1522_v10, %v1534_v11 }
 0x48c   : > { %8756 = vmatpush2.bf16.msra.mxu1 %v10602_v21  ;;  %v1510_v21 = vld [vmem:[%s11377_s15 + $0x1ba8] sm:$0xff] }
 0x48d   : > { %8797 = vmatpush2.bf16.msra.mxu0 %v9836_v23  ;;  %8757 = vmatprep.subr.bf16.mxu1 %v10579_v27  ;;  %v10461_v42 = vcombine.high %v1498_v20, %v1510_v21  ;;  %v10460_v48 = vcombine.low %v1498_v20, %v1510_v21  ;;  %v1378_v20 = vld [vmem:[%s11377_s15 + $0x1788] sm:$0xff] }
 0x48e   : > { %8798 = vmatprep.subr.bf16.mxu0 %v9813_v28  ;;  %v10100_v28 = vcombine.low %v1138_v35, %v1150_v6  ;;  %v1438_v35 = vld [vmem:[%s11377_s15 + $0x1968] sm:$0xff] }
 0x48f   : > { %v1390_v21 = vld [vmem:[%s11377_s15 + $0x17e8] sm:$0xff] }
 0x490   : > { %8758 = vmatpush2.bf16.msra.mxu1 %v10578_v51  ;;  %v1090_v51 = vld [vmem:[%s11377_s15 + $0xe88] sm:$0xff] }
 0x491   : > { %8799 = vmatpush2.bf16.msra.mxu0 %v9812_v57  ;;  %8759 = vmatprep.subr.bf16.mxu1 %v10555_v59  ;;  %v1102_v57 = vld [vmem:[%s11377_s15 + $0xee8] sm:$0xff] }
 0x492   : > { %8800 = vmatprep.subr.bf16.mxu0 %v9789_v44  ;;  %v1474_v59 = vld [vmem:[%s11377_s15 + $0x1a88] sm:$0xff]  ;;  %v10053_v49 = vcombine.high %v1090_v51, %v1102_v57  ;;  %v10052_v62 = vcombine.low %v1090_v51, %v1102_v57 }
 0x493   : > { %v1486_v44 = vld [vmem:[%s11377_s15 + $0x1ae8] sm:$0xff] }
 0x494   : > { %8760 = vmatpush2.bf16.msra.mxu1 %v10554_v53  ;;  %v10437_v50 = vcombine.high %v1474_v59, %v1486_v44  ;;  %v1066_v53 = vld [vmem:[%s11377_s15 + $0xdc8] sm:$0xff]  ;;  %v10436_v34 = vcombine.low %v1474_v59, %v1486_v44  ;;  %v10340_v59 = vcombine.low %v1378_v20, %v1390_v21 }
 0x495   : > { %8801 = vmatpush2.bf16.msra.mxu0 %v9788_v32  ;;  %8811 = vmatprep.subr.bf16.mxu1 %v10149_v54  ;;  %v1078_v32 = vld [vmem:[%s11377_s15 + $0xe28] sm:$0xff] }
 0x496   : > { %8852 = vmatprep.subr.bf16.mxu0 %v10533_v58  ;;  %v1450_v54 = vld [vmem:[%s11377_s15 + $0x19c8] sm:$0xff]  ;;  %v10028_v6 = vcombine.low %v1066_v53, %v1078_v32 }
 0x497   : > { %v8517_v7 = vpop.f32.mrf.mxu1  ;;  %8762 = vmatmul.mubr.bf16.vlgmr.msra.gmra.mxu1 %v11581_v41  ;;  %v1462_v58 = vld [vmem:[%s11377_s15 + $0x1a28] sm:$0xff] }
 0x498   : > { %v8518_v12 = vadd.f32 %v8517_v7, %v12465_v24  ;;  %v12536_v14 = vpop.f32.mrf.mxu0  ;;  %8803 = vmatmul.mubr.bf16.vlgmr.msra.gmra.mxu0 %v11497_v1  ;;  %8812 = vmatpush1.bf16.msra.mxu1 %v10148_v4  ;;  %v10029_v4 = vcombine.high %v1066_v53, %v1078_v32  ;;  %v10413_v45 = vcombine.high %v1450_v54, %v1462_v58  ;;  %v1738_v51 = vld [vmem:[%s11377_s15 + $0x22c8] sm:$0xff] }
 0x499   : > { %8843 = vmatprep.mubr.bf16.mxu1 %v11495_v0  ;;  %8853 = vmatpush1.bf16.msra.mxu0 %v10532_v5  ;;  %v8519_v8 = vpop.f32.mrf.mxu1  ;;  %v1054_v5 = vld [vmem:[%s11377_s15 + $0xd68] sm:$0xff] }
 0x49a   : > { %v10742_v3 = vmul.f32 -1.442695, %v8518_v12  ;;  %8884 = vmatprep.mubr.bf16.mxu0 %v11517_v26  ;;  %v8520_v24 = vadd.f32 %v8519_v8, %v12472_v15  ;;  %v12542_v16 = vpop.f32.mrf.mxu0  ;;  %8813 = vmatprep.subr.bf16.mxu1 %v10125_v46  ;;  %v1426_v46 = vld [vmem:[%s11377_s15 + $0x1908] sm:$0xff]  ;;  %v10005_v10 = vcombine.high %v1042_v52, %v1054_v5 }
 0x49b   : > { %v8521_v38 = vpop.f32.mrf.mxu1  ;;  %8854 = vmatprep.subr.bf16.mxu0 %v10509_v13  ;;  %v10412_v13 = vcombine.low %v1450_v54, %v1462_v58  ;;  %v10389_v12 = vcombine.high %v1426_v46, %v1438_v35  ;;  %v1030_v8 = vld [vmem:[%s11377_s15 + $0xca8] sm:$0xff]  ;;  %v10388_v18 = vcombine.low %v1426_v46, %v1438_v35 }
 0x49c   : > { %10901 = vpow2.f32 %v10742_v3  ;;  %v10743_v23 = vmul.f32 -1.442695, %v8520_v24  ;;  %v8562_v27 = vpop.f32.mrf.mxu0  ;;  %8814 = vmatpush1.bf16.msra.mxu1 %v10124_v9  ;;  %v1018_v9 = vld [vmem:[%s11377_s15 + $0xc48] sm:$0xff] }
 0x49d   : > { %8855 = vmatpush1.bf16.msra.mxu0 %v10508_v22  ;;  %v8522_v15 = vpop.f32.mrf.mxu1  ;;  %8815 = vmatprep.subr.bf16.mxu1 %v10101_v25  ;;  %v1402_v25 = vld [vmem:[%s11377_s15 + $0x1848] sm:$0xff]  ;;  %v9981_v19 = vcombine.high %v1018_v9, %v1030_v8 }
 0x49e   : > { %10903 = vpow2.f32 %v10743_v23  ;;  %v8563_v33 = vpop.f32.mrf.mxu0  ;;  %8856 = vmatprep.subr.bf16.mxu0 %v10485_v17  ;;  %v1414_v3 = vld [vmem:[%s11377_s15 + $0x18a8] sm:$0xff]  ;;  %v10004_v17 = vcombine.low %v1042_v52, %v1054_v5 }
 0x49f   : > { %v10365_v38 = vcombine.high %v1402_v25, %v1414_v3  ;;  %v1762_v23 = vld [vmem:[%s11377_s15 + $0x2388] sm:$0xff]  ;;  %v10364_v15 = vcombine.low %v1402_v25, %v1414_v3 }
 0x4a0   : > { %8816 = vmatpush1.bf16.msra.mxu1 %v10100_v28  ;;  %v1774_v27 = vld [vmem:[%s11377_s15 + $0x23e8] sm:$0xff]  ;;  %v9980_v28 = vcombine.low %v1018_v9, %v1030_v8 }
 0x4a1   : > { %8857 = vmatpush1.bf16.msra.mxu0 %v10484_v29  ;;  %8817 = vmatprep.subr.bf16.mxu1 %v10077_v31  ;;  %v10341_v29 = vcombine.high %v1378_v20, %v1390_v21  ;;  %v10725_v31 = vcombine.high %v1762_v23, %v1774_v27  ;;  %v1354_v33 = vld [vmem:[%s11377_s15 + $0x16c8] sm:$0xff]  ;;  %v10724_v44 = vcombine.low %v1762_v23, %v1774_v27 }
 0x4a2   : > { %8858 = vmatprep.subr.bf16.mxu0 %v10461_v42  ;;  %v1366_v42 = vld [vmem:[%s11377_s15 + $0x1728] sm:$0xff] }
 0x4a3   : > { %v1750_v57 = vld [vmem:[%s11377_s15 + $0x2328] sm:$0xff]  ;;  %v10316_v54 = vcombine.low %v1354_v33, %v1366_v42 }
 0x4a4   : > { %8818 = vmatpush1.bf16.msra.mxu1 %v10076_v43  ;;  %v10317_v43 = vcombine.high %v1354_v33, %v1366_v42  ;;  %v1714_v53 = vld [vmem:[%s11377_s15 + $0x2208] sm:$0xff]  ;;  %v10700_v58 = vcombine.low %v1738_v51, %v1750_v57 }
 0x4a5   : > { %8859 = vmatpush1.bf16.msra.mxu0 %v10460_v48  ;;  %8819 = vmatprep.subr.bf16.mxu1 %v10053_v49  ;;  %v10701_v48 = vcombine.high %v1738_v51, %v1750_v57  ;;  %v1330_v49 = vld [vmem:[%s11377_s15 + $0x1608] sm:$0xff] }
 0x4a6   : > { %8860 = vmatprep.subr.bf16.mxu0 %v10437_v50  ;;  %v1342_v50 = vld [vmem:[%s11377_s15 + $0x1668] sm:$0xff] }
 0x4a7   : > { %v1726_v32 = vld [vmem:[%s11377_s15 + $0x2268] sm:$0xff] }
 0x4a8   : > { %8820 = vmatpush1.bf16.msra.mxu1 %v10052_v62  ;;  %v10293_v62 = vcombine.high %v1330_v49, %v1342_v50  ;;  %v1318_v52 = vld [vmem:[%s11377_s15 + $0x15a8] sm:$0xff] }
 0x4a9   : > { %v10902_v7 = vpop.eup %10901  ;;  %8861 = vmatpush1.bf16.msra.mxu0 %v10436_v34  ;;  %8821 = vmatprep.subr.bf16.mxu1 %v10029_v4  ;;  %v10677_v4 = vcombine.high %v1714_v53, %v1726_v32  ;;  %v1690_v46 = vld [vmem:[%s11377_s15 + $0x2148] sm:$0xff] }
 0x4aa   : > { %v9223_v11 = vadd.f32 1.0, %v10902_v7  ;;  %8862 = vmatprep.subr.bf16.mxu0 %v10413_v45  ;;  %v1306_v45 = vld [vmem:[%s11377_s15 + $0x1548] sm:$0xff]  ;;  %v10292_v7 = vcombine.low %v1330_v49, %v1342_v50 }
 0x4ab   : > { %v10904_v22 = vpop.eup %10903  ;;  %v1702_v35 = vld [vmem:[%s11377_s15 + $0x21a8] sm:$0xff]  ;;  %v10268_v25 = vcombine.low %v1306_v45, %v1318_v52 }
 0x4ac   : > { %v9224_v24 = vadd.f32 1.0, %v10904_v22  ;;  %8822 = vmatpush1.bf16.msra.mxu1 %v10028_v6  ;;  %10905 = vrcp.f32 %v9223_v11  ;;  %v10653_v11 = vcombine.high %v1690_v46, %v1702_v35  ;;  %v1294_v9 = vld [vmem:[%s11377_s15 + $0x14e8] sm:$0xff]  ;;  %v10652_v3 = vcombine.low %v1690_v46, %v1702_v35 }
 0x4ad   : > { %8863 = vmatpush1.bf16.msra.mxu0 %v10412_v13  ;;  %8823 = vmatprep.subr.bf16.mxu1 %v10005_v10  ;;  %v10676_v13 = vcombine.low %v1714_v53, %v1726_v32  ;;  %v10269_v10 = vcombine.high %v1306_v45, %v1318_v52  ;;  %v1666_v8 = vld [vmem:[%s11377_s15 + $0x2088] sm:$0xff]  ;;  %v1199_v45 = vld [vmem:[%s11377_s15 + $0x11f0] sm:$0xff] }
 0x4ae   : > { %10907 = vrcp.f32 %v9224_v24  ;;  %8864 = vmatprep.subr.bf16.mxu0 %v10389_v12  ;;  %v1282_v12 = vld [vmem:[%s11377_s15 + $0x1488] sm:$0xff] }
 0x4af   : > { %v1678_v22 = vld [vmem:[%s11377_s15 + $0x20e8] sm:$0xff]  ;;  %v10245_v24 = vcombine.high %v1282_v12, %v1294_v9  ;;  %v10244_v21 = vcombine.low %v1282_v12, %v1294_v9  ;;  %v1846_v12 = vrot.slane %v12450_v61, %v12126_v56 }
 0x4b0   : > { %8824 = vmatpush1.bf16.msra.mxu1 %v10004_v17  ;;  %v10629_v17 = vcombine.high %v1666_v8, %v1678_v22  ;;  %v1654_v20 = vld [vmem:[%s11377_s15 + $0x2028] sm:$0xff]  ;;  %v10628_v23 = vcombine.low %v1666_v8, %v1678_v22  ;;  %v1163_v8 = vld [vmem:[%s11377_s15 + $0x10d0] sm:$0xff] }
 0x4b1   : > { %8865 = vmatpush1.bf16.msra.mxu0 %v10388_v18  ;;  %8825 = vmatprep.subr.bf16.mxu1 %v9981_v19  ;;  %v1258_v18 = vld [vmem:[%s11377_s15 + $0x13c8] sm:$0xff]  ;;  %v1175_v22 = vld [vmem:[%s11377_s15 + $0x1130] sm:$0xff] }
 0x4b2   : > { %8866 = vmatprep.subr.bf16.mxu0 %v10365_v38  ;;  %v1270_v19 = vld [vmem:[%s11377_s15 + $0x1428] sm:$0xff] }
 0x4b3   : > { %v1642_v38 = vld [vmem:[%s11377_s15 + $0x1fc8] sm:$0xff]  ;;  %v10221_v27 = vcombine.high %v1258_v18, %v1270_v19  ;;  %v10220_v42 = vcombine.low %v1258_v18, %v1270_v19  ;;  %v767_v18 = vld [vmem:[%s11377_s15 + $0x470] sm:$0xff] }
 0x4b4   : > { %8826 = vmatpush1.bf16.msra.mxu1 %v9980_v28  ;;  %v10605_v28 = vcombine.high %v1642_v38, %v1654_v20  ;;  %v1630_v33 = vld [vmem:[%s11377_s15 + $0x1f68] sm:$0xff]  ;;  %v10604_v51 = vcombine.low %v1642_v38, %v1654_v20  ;;  %v10127_v38 = vcombine.high %v1163_v8, %v1175_v22  ;;  %v1151_v20 = vld [vmem:[%s11377_s15 + $0x1070] sm:$0xff] }
 0x4b5   : > { %8867 = vmatpush1.bf16.msra.mxu0 %v10364_v15  ;;  %8827 = vmatprep.subr.bf16.mxu1 %v10341_v29  ;;  %v1234_v15 = vld [vmem:[%s11377_s15 + $0x1308] sm:$0xff] }
 0x4b6   : > { %8868 = vmatprep.subr.bf16.mxu0 %v10725_v31  ;;  %v1246_v29 = vld [vmem:[%s11377_s15 + $0x1368] sm:$0xff] }
 0x4b7   : > { %v1618_v31 = vld [vmem:[%s11377_s15 + $0x1f08] sm:$0xff]  ;;  %v10197_v57 = vcombine.high %v1234_v15, %v1246_v29  ;;  %v10196_v50 = vcombine.low %v1234_v15, %v1246_v29  ;;  %v10126_v15 = vcombine.low %v1163_v8, %v1175_v22  ;;  %v695_v8 = vld [vmem:[%s11377_s15 + $0x230] sm:$0xff] }
 0x4b8   : > { %8828 = vmatpush2.bf16.msra.mxu1 %v10340_v59  ;;  %v10581_v59 = vcombine.high %v1618_v31, %v1630_v33  ;;  %v1606_v49 = vld [vmem:[%s11377_s15 + $0x1ea8] sm:$0xff]  ;;  %v10580_v53 = vcombine.low %v1618_v31, %v1630_v33  ;;  %v1067_v22 = vld [vmem:[%s11377_s15 + $0xdd0] sm:$0xff] }
 0x4b9   : > { %8869 = vmatpush2.bf16.msra.mxu0 %v10724_v44  ;;  %8829 = vmatprep.subr.bf16.mxu1 %v10317_v43  ;;  %v12576_v34 = vpop.eup %10905  ;;  %v1210_v44 = vld [vmem:[%s11377_s15 + $0x1248] sm:$0xff] }
 0x4ba   : > { %8870 = vmatprep.subr.bf16.mxu0 %v10701_v48  ;;  %v1222_v43 = vld [vmem:[%s11377_s15 + $0x12a8] sm:$0xff] }
 0x4bb   : > { %v12580_v5 = vpop.eup %10907  ;;  %v1594_v48 = vld [vmem:[%s11377_s15 + $0x1e48] sm:$0xff]  ;;  %v10173_v32 = vcombine.high %v1210_v44, %v1222_v43  ;;  %v10172_v52 = vcombine.low %v1210_v44, %v1222_v43  ;;  %v1115_v44 = vld [vmem:[%s11377_s15 + $0xf50] sm:$0xff] }
 0x4bc   : > { %v9358_v6 = vcombine.low %v12576_v34, %v12580_v5  ;;  %8830 = vmatpush2.bf16.msra.mxu1 %v10316_v54  ;;  %v10557_v54 = vcombine.high %v1594_v48, %v1606_v49  ;;  %v10556_v46 = vcombine.low %v1594_v48, %v1606_v49  ;;  %v1127_v43 = vld [vmem:[%s11377_s15 + $0xfb0] sm:$0xff] }
 0x4bd   : > { %8871 = vmatpush2.bf16.msra.mxu0 %v10700_v58  ;;  %8831 = vmatprep.subr.bf16.mxu1 %v10293_v62  ;;  %v803_v58 = vld [vmem:[%s11377_s15 + $0x590] sm:$0xff] }
 0x4be   : > { %8872 = vmatprep.subr.bf16.mxu0 %v10677_v4  ;;  %v815_v62 = vld [vmem:[%s11377_s15 + $0x5f0] sm:$0xff] }
 0x4bf   : > { %v1187_v4 = vld [vmem:[%s11377_s15 + $0x1190] sm:$0xff]  ;;  %v9767_v35 = vcombine.high %v803_v58, %v815_v62  ;;  %v9766_v9 = vcombine.low %v803_v58, %v815_v62 }
 0x4c0   : > { %8832 = vmatpush2.bf16.msra.mxu1 %v10292_v7  ;;  %v1842_v7 = vrot.slane %v12450_v61, %v12119_v47  ;;  %v1139_v61 = vld [vmem:[%s11377_s15 + $0x1010] sm:$0xff] }
 0x4c1   : > { %8873 = vmatpush2.bf16.msra.mxu0 %v10676_v13  ;;  %8833 = vmatprep.subr.bf16.mxu1 %v10269_v10  ;;  %v10151_v13 = vcombine.high %v1187_v4, %v1199_v45  ;;  %v779_v10 = vld [vmem:[%s11377_s15 + $0x4d0] sm:$0xff] }
 0x4c2   : > { %8874 = vmatprep.subr.bf16.mxu0 %v10653_v11  ;;  %v791_v11 = vld [vmem:[%s11377_s15 + $0x530] sm:$0xff] }
 0x4c3   : > { %v1259_v34 = vld [vmem:[%s11377_s15 + $0x13d0] sm:$0xff] }
 0x4c4   : > { %8834 = vmatpush2.bf16.msra.mxu1 %v10268_v25  ;;  %v10150_v25 = vcombine.low %v1187_v4, %v1199_v45  ;;  %v10079_v45 = vcombine.high %v1115_v44, %v1127_v43  ;;  %v1271_v5 = vld [vmem:[%s11377_s15 + $0x1430] sm:$0xff] }
 0x4c5   : > { %8875 = vmatpush2.bf16.msra.mxu0 %v10652_v3  ;;  %8835 = vmatprep.subr.bf16.mxu1 %v10245_v24  ;;  %v8559_v3 = vadd.f32 %v12536_v14, %v1842_v7  ;;  %v9743_v24 = vcombine.high %v779_v10, %v791_v11  ;;  %v9742_v14 = vcombine.low %v779_v10, %v791_v11  ;;  %v1103_v7 = vld [vmem:[%s11377_s15 + $0xef0] sm:$0xff] }
 0x4c6   : > { %8876 = vmatprep.subr.bf16.mxu0 %v10629_v17  ;;  %v755_v17 = vld [vmem:[%s11377_s15 + $0x410] sm:$0xff]  ;;  %v10078_v10 = vcombine.low %v1115_v44, %v1127_v43 }
 0x4c7   : > { %v9719_v29 = vcombine.high %v755_v17, %v767_v18 }
 0x4c8   : > { %8836 = vmatpush2.bf16.msra.mxu1 %v10244_v21  ;;  %v8561_v21 = vadd.f32 %v12542_v16, %v1846_v12 }
 0x4c9   : > { %8877 = vmatpush2.bf16.msra.mxu0 %v10628_v23  ;;  %8837 = vmatprep.subr.bf16.mxu1 %v10221_v27 }
 0x4ca   : > { %8878 = vmatprep.subr.bf16.mxu0 %v10605_v28 }
 0x4cc   : > { %8838 = vmatpush2.bf16.msra.mxu1 %v10220_v42  ;;  %v10103_v42 = vcombine.high %v1139_v61, %v1151_v20 }
 0x4cd   : > { %8879 = vmatpush2.bf16.msra.mxu0 %v10604_v51  ;;  %8839 = vmatprep.subr.bf16.mxu1 %v10197_v57  ;;  %v731_v51 = vld [vmem:[%s11377_s15 + $0x350] sm:$0xff] }
 0x4ce   : > { %8880 = vmatprep.subr.bf16.mxu0 %v10581_v59  ;;  %v743_v57 = vld [vmem:[%s11377_s15 + $0x3b0] sm:$0xff] }
 0x4cf   : > { %v9695_v58 = vcombine.high %v731_v51, %v743_v57 }
 0x4d0   : > { %8840 = vmatpush2.bf16.msra.mxu1 %v10196_v50 }
 0x4d1   : > { %8881 = vmatpush2.bf16.msra.mxu0 %v10580_v53  ;;  %8841 = vmatprep.subr.bf16.mxu1 %v10173_v32  ;;  %v9718_v53 = vcombine.low %v755_v17, %v767_v18 }
 0x4d2   : > { %8882 = vmatprep.subr.bf16.mxu0 %v10557_v54  ;;  %v10102_v54 = vcombine.low %v1139_v61, %v1151_v20  ;;  %v1043_v61 = vld [vmem:[%s11377_s15 + $0xd10] sm:$0xff] }
 0x4d3   : > { %v1055_v20 = vld [vmem:[%s11377_s15 + $0xd70] sm:$0xff] }
 0x4d4   : > { %8842 = vmatpush2.bf16.msra.mxu1 %v10172_v52  ;;  %v707_v52 = vld [vmem:[%s11377_s15 + $0x290] sm:$0xff] }
 0x4d5   : > { %8883 = vmatpush2.bf16.msra.mxu0 %v10556_v46  ;;  %8893 = vmatprep.subr.bf16.mxu1 %v9767_v35  ;;  %v719_v46 = vld [vmem:[%s11377_s15 + $0x2f0] sm:$0xff] }
 0x4d6   : > { %8934 = vmatprep.subr.bf16.mxu0 %v10151_v13  ;;  %v1091_v35 = vld [vmem:[%s11377_s15 + $0xe90] sm:$0xff]  ;;  %v9694_v13 = vcombine.low %v731_v51, %v743_v57  ;;  %v9671_v11 = vcombine.high %v707_v52, %v719_v46  ;;  %v10006_v57 = vcombine.low %v1043_v61, %v1055_v20 }
 0x4d7   : > { %v8599_v19 = vpop.f32.mrf.mxu1  ;;  %8844 = vmatmul.mubr.bf16.vlgmr.msra.gmra.mxu1 %v11489_v60  ;;  %v10055_v12 = vcombine.high %v1091_v35, %v1103_v7 }
 0x4d8   : > { %v8600_v23 = vadd.f32 %v8599_v19, %v8559_v3  ;;  %v8640_v27 = vpop.f32.mrf.mxu0  ;;  %8885 = vmatmul.mubr.bf16.vlgmr.msra.gmra.mxu0 %v11581_v41  ;;  %8894 = vmatpush1.bf16.msra.mxu1 %v9766_v9  ;;  %v683_v9 = vld [vmem:[%s11377_s15 + $0x1d0] sm:$0xff]  ;;  %v9670_v3 = vcombine.low %v707_v52, %v719_v46 }
 0x4d9   : > { %8925 = vmatprep.mubr.bf16.mxu1 %v11493_v63  ;;  %8935 = vmatpush1.bf16.msra.mxu0 %v10150_v25  ;;  %v8601_v28 = vpop.f32.mrf.mxu1  ;;  %v1079_v25 = vld [vmem:[%s11377_s15 + $0xe30] sm:$0xff]  ;;  %v9647_v17 = vcombine.high %v683_v9, %v695_v8 }
 0x4da   : > { %v8641_v31 = vadd.f32 %v8640_v27, %v8600_v23  ;;  %8966 = vmatprep.mubr.bf16.mxu0 %v11495_v0  ;;  %v8602_v16 = vadd.f32 %v8601_v28, %v8561_v21  ;;  %v8642_v33 = vpop.f32.mrf.mxu0  ;;  %8895 = vmatprep.subr.bf16.mxu1 %v9743_v24  ;;  %v10054_v24 = vcombine.low %v1091_v35, %v1103_v7  ;;  %v659_v19 = vld [vmem:[%s11377_s15 + $0x110] sm:$0xff] }
 0x4db   : > { %v8603_v59 = vpop.f32.mrf.mxu1  ;;  %8936 = vmatprep.subr.bf16.mxu0 %v10127_v38  ;;  %v10031_v18 = vcombine.high %v1067_v22, %v1079_v25  ;;  %v671_v38 = vld [vmem:[%s11377_s15 + $0x170] sm:$0xff]  ;;  %v9646_v21 = vcombine.low %v683_v9, %v695_v8  ;;  %v10030_v23 = vcombine.low %v1067_v22, %v1079_v25 }
 0x4dc   : > { %v10744_v48 = vmul.f32 -1.442695, %v8641_v31  ;;  %v8643_v49 = vadd.f32 %v8642_v33, %v8602_v16  ;;  %v8644_v50 = vpop.f32.mrf.mxu0  ;;  %8896 = vmatpush1.bf16.msra.mxu1 %v9742_v14  ;;  %v9623_v27 = vcombine.high %v659_v19, %v671_v38  ;;  %v10007_v14 = vcombine.high %v1043_v61, %v1055_v20  ;;  %v635_v28 = vld [vmem:[%s11377_s15 + $0x50] sm:$0xff] }
 0x4dd   : > { %8937 = vmatpush1.bf16.msra.mxu0 %v10126_v15  ;;  %v8604_v32 = vpop.f32.mrf.mxu1  ;;  %8897 = vmatprep.subr.bf16.mxu1 %v9719_v29  ;;  %v647_v15 = vld [vmem:[%s11377_s15 + $0xb0] sm:$0xff] }
 0x4de   : > { %10909 = vpow2.f32 %v10744_v48  ;;  %v10745_v62 = vmul.f32 -1.442695, %v8643_v49  ;;  %v8645_v4 = vpop.f32.mrf.mxu0  ;;  %8938 = vmatprep.subr.bf16.mxu0 %v10103_v42  ;;  %v1019_v31 = vld [vmem:[%s11377_s15 + $0xc50] sm:$0xff]  ;;  %v9622_v42 = vcombine.low %v659_v19, %v671_v38  ;;  %v9599_v59 = vcombine.high %v635_v28, %v647_v15 }
 0x4df   : > { %v1031_v16 = vld [vmem:[%s11377_s15 + $0xcb0] sm:$0xff]  ;;  %v9598_v32 = vcombine.low %v635_v28, %v647_v15 }
 0x4e0   : > { %10911 = vpow2.f32 %v10745_v62  ;;  %8898 = vmatpush1.bf16.msra.mxu1 %v9718_v53  ;;  %v9983_v43 = vcombine.high %v1019_v31, %v1031_v16  ;;  %v995_v48 = vld [vmem:[%s11377_s15 + $0xb90] sm:$0xff] }
 0x4e1   : > { %8939 = vmatpush1.bf16.msra.mxu0 %v10102_v54  ;;  %8899 = vmatprep.subr.bf16.mxu1 %v9695_v58  ;;  %v1007_v49 = vld [vmem:[%s11377_s15 + $0xbf0] sm:$0xff]  ;;  %v9982_v54 = vcombine.low %v1019_v31, %v1031_v16 }
 0x4e2   : > { %8940 = vmatprep.subr.bf16.mxu0 %v10079_v45  ;;  %v1379_v50 = vld [vmem:[%s11377_s15 + $0x1790] sm:$0xff]  ;;  %v9959_v58 = vcombine.high %v995_v48, %v1007_v49  ;;  %v9958_v35 = vcombine.low %v995_v48, %v1007_v49 }
 0x4e3   : > { %v1391_v53 = vld [vmem:[%s11377_s15 + $0x17f0] sm:$0xff] }
 0x4e4   : > { %8900 = vmatpush1.bf16.msra.mxu1 %v9694_v13  ;;  %v10343_v62 = vcombine.high %v1379_v50, %v1391_v53  ;;  %v971_v4 = vld [vmem:[%s11377_s15 + $0xad0] sm:$0xff]  ;;  %v10342_v7 = vcombine.low %v1379_v50, %v1391_v53 }
 0x4e5   : > { %8941 = vmatpush1.bf16.msra.mxu0 %v10078_v10  ;;  %8901 = vmatprep.subr.bf16.mxu1 %v9671_v11  ;;  %v983_v45 = vld [vmem:[%s11377_s15 + $0xb30] sm:$0xff] }
 0x4e6   : > { %8942 = vmatprep.subr.bf16.mxu0 %v10055_v12  ;;  %v1355_v52 = vld [vmem:[%s11377_s15 + $0x16d0] sm:$0xff]  ;;  %v9935_v13 = vcombine.high %v971_v4, %v983_v45  ;;  %v9934_v22 = vcombine.low %v971_v4, %v983_v45 }
 0x4e7   : > { %v1367_v46 = vld [vmem:[%s11377_s15 + $0x1730] sm:$0xff] }
 0x4e8   : > { %8902 = vmatpush1.bf16.msra.mxu1 %v9670_v3  ;;  %v10319_v10 = vcombine.high %v1355_v52, %v1367_v46  ;;  %v947_v11 = vld [vmem:[%s11377_s15 + $0xa10] sm:$0xff]  ;;  %v10318_v25 = vcombine.low %v1355_v52, %v1367_v46  ;;  %v10222_v52 = vcombine.low %v1259_v34, %v1271_v5 }
 0x4e9   : > { %8943 = vmatpush1.bf16.msra.mxu0 %v10054_v24  ;;  %8903 = vmatprep.subr.bf16.mxu1 %v9647_v17  ;;  %v959_v12 = vld [vmem:[%s11377_s15 + $0xa70] sm:$0xff] }
 0x4ea   : > { %8944 = vmatprep.subr.bf16.mxu0 %v10031_v18  ;;  %v1331_v9 = vld [vmem:[%s11377_s15 + $0x1610] sm:$0xff]  ;;  %v9911_v3 = vcombine.high %v947_v11, %v959_v12  ;;  %v9910_v20 = vcombine.low %v947_v11, %v959_v12 }
 0x4eb   : > { %v10910_v29 = vpop.eup %10909  ;;  %v1343_v8 = vld [vmem:[%s11377_s15 + $0x1670] sm:$0xff] }
 0x4ec   : > { %v9225_v33 = vadd.f32 1.0, %v10910_v29  ;;  %8904 = vmatpush1.bf16.msra.mxu1 %v9646_v21  ;;  %v10295_v24 = vcombine.high %v1331_v9, %v1343_v8  ;;  %v923_v17 = vld [vmem:[%s11377_s15 + $0x950] sm:$0xff] }
 0x4ed   : > { %v10912_v51 = vpop.eup %10911  ;;  %8945 = vmatpush1.bf16.msra.mxu0 %v10030_v23  ;;  %8905 = vmatprep.subr.bf16.mxu1 %v9623_v27  ;;  %v935_v18 = vld [vmem:[%s11377_s15 + $0x9b0] sm:$0xff]  ;;  %v10294_v23 = vcombine.low %v1331_v9, %v1343_v8 }
 0x4ee   : > { %v9226_v44 = vadd.f32 1.0, %v10912_v51  ;;  %8946 = vmatprep.subr.bf16.mxu0 %v10007_v14  ;;  %10913 = vrcp.f32 %v9225_v33  ;;  %v1307_v19 = vld [vmem:[%s11377_s15 + $0x1550] sm:$0xff]  ;;  %v9887_v27 = vcombine.high %v923_v17, %v935_v18  ;;  %v9366_v33 = vrot.slane %v9358_v6, %v11932_v30 }
 0x4ef   : > { %v1319_v38 = vld [vmem:[%s11377_s15 + $0x15b0] sm:$0xff]  ;;  %v9886_v51 = vcombine.low %v923_v17, %v935_v18  ;;  %v816_v17 = vld [vmem:[%s11377_s15 + $0x5f8] sm:$0xff] }
 0x4f0   : > { %10915 = vrcp.f32 %v9226_v44  ;;  %8906 = vmatpush1.bf16.msra.mxu1 %v9622_v42  ;;  %v10271_v28 = vcombine.high %v1307_v19, %v1319_v38  ;;  %v899_v15 = vld [vmem:[%s11377_s15 + $0x890] sm:$0xff] }
 0x4f1   : > { %8947 = vmatpush1.bf16.msra.mxu0 %v10006_v57  ;;  %8907 = vmatprep.subr.bf16.mxu1 %v9599_v59  ;;  %v911_v29 = vld [vmem:[%s11377_s15 + $0x8f0] sm:$0xff]  ;;  %v10270_v57 = vcombine.low %v1307_v19, %v1319_v38 }
 0x4f2   : > { %8948 = vmatprep.subr.bf16.mxu0 %v9983_v43  ;;  %v1283_v31 = vld [vmem:[%s11377_s15 + $0x1490] sm:$0xff]  ;;  %v9863_v59 = vcombine.high %v899_v15, %v911_v29  ;;  %v9862_v6 = vcombine.low %v899_v15, %v911_v29  ;;  %v792_v15 = vld [vmem:[%s11377_s15 + $0x538] sm:$0xff] }
 0x4f3   : > { %v1295_v16 = vld [vmem:[%s11377_s15 + $0x14f0] sm:$0xff] }
 0x4f4   : > { %8908 = vmatpush1.bf16.msra.mxu1 %v9598_v32  ;;  %v10247_v43 = vcombine.high %v1283_v31, %v1295_v16  ;;  %v875_v48 = vld [vmem:[%s11377_s15 + $0x7d0] sm:$0xff]  ;;  %v10246_v50 = vcombine.low %v1283_v31, %v1295_v16  ;;  %v10223_v32 = vcombine.high %v1259_v34, %v1271_v5 }
 0x4f5   : > { %8949 = vmatpush1.bf16.msra.mxu0 %v9982_v54  ;;  %8909 = vmatprep.subr.bf16.mxu1 %v9959_v58  ;;  %v887_v49 = vld [vmem:[%s11377_s15 + $0x830] sm:$0xff] }
 0x4f6   : > { %8950 = vmatprep.subr.bf16.mxu0 %v10343_v62  ;;  %v9839_v53 = vcombine.high %v875_v48, %v887_v49  ;;  %v851_v54 = vld [vmem:[%s11377_s15 + $0x710] sm:$0xff]  ;;  %v9838_v45 = vcombine.low %v875_v48, %v887_v49 }
 0x4f7   : > { %v863_v58 = vld [vmem:[%s11377_s15 + $0x770] sm:$0xff] }
 0x4f8   : > { %8910 = vmatpush2.bf16.msra.mxu1 %v9958_v35  ;;  %v1235_v62 = vld [vmem:[%s11377_s15 + $0x1310] sm:$0xff]  ;;  %v9815_v46 = vcombine.high %v851_v54, %v863_v58  ;;  %v9814_v12 = vcombine.low %v851_v54, %v863_v58 }
 0x4f9   : > { %8951 = vmatpush2.bf16.msra.mxu0 %v10342_v7  ;;  %8911 = vmatprep.subr.bf16.mxu1 %v9935_v13  ;;  %v1247_v4 = vld [vmem:[%s11377_s15 + $0x1370] sm:$0xff] }
 0x4fa   : > { %8952 = vmatprep.subr.bf16.mxu0 %v10319_v10  ;;  %v10199_v35 = vcombine.high %v1235_v62, %v1247_v4  ;;  %v827_v7 = vld [vmem:[%s11377_s15 + $0x650] sm:$0xff]  ;;  %v10198_v9 = vcombine.low %v1235_v62, %v1247_v4  ;;  %v732_v62 = vld [vmem:[%s11377_s15 + $0x358] sm:$0xff] }
 0x4fb   : > { %v10914_v61 = vpop.eup %10913  ;;  %v839_v13 = vld [vmem:[%s11377_s15 + $0x6b0] sm:$0xff]  ;;  %v744_v4 = vld [vmem:[%s11377_s15 + $0x3b8] sm:$0xff] }
 0x4fc   : > { %8912 = vmatpush2.bf16.msra.mxu1 %v9934_v22  ;;  %v1211_v10 = vld [vmem:[%s11377_s15 + $0x1250] sm:$0xff]  ;;  %v9791_v8 = vcombine.high %v827_v7, %v839_v13  ;;  %v9790_v18 = vcombine.low %v827_v7, %v839_v13 }
 0x4fd   : > { %v10916_v21 = vpop.eup %10915  ;;  %8953 = vmatpush2.bf16.msra.mxu0 %v10318_v25  ;;  %8913 = vmatprep.subr.bf16.mxu1 %v9911_v3  ;;  %v1223_v11 = vld [vmem:[%s11377_s15 + $0x12b0] sm:$0xff] }
 0x4fe   : > { %v9359_v14 = vcombine.low %v10914_v61, %v10916_v21  ;;  %8954 = vmatprep.subr.bf16.mxu0 %v10295_v24  ;;  %v10175_v22 = vcombine.high %v1211_v10, %v1223_v11  ;;  %v1571_v25 = vld [vmem:[%s11377_s15 + $0x1d90] sm:$0xff]  ;;  %v804_v24 = vld [vmem:[%s11377_s15 + $0x598] sm:$0xff]  ;;  %v10174_v19 = vcombine.low %v1211_v10, %v1223_v11  ;;  %v9697_v10 = vcombine.high %v732_v62, %v744_v4 }
 0x4ff   : > { %v1583_v3 = vld [vmem:[%s11377_s15 + $0x1df0] sm:$0xff]  ;;  %v9768_v29 = vcombine.low %v804_v24, %v816_v17 }
 0x500   : > { %v9373_v42 = vrot.slane %v9359_v14, %v11932_v30  ;;  %8914 = vmatpush2.bf16.msra.mxu1 %v9910_v20  ;;  %v12687_v38 = vld [vmem:[%s11716_s6 + $0x10] sm:$0xff]  ;;  %v10535_v61 = vcombine.high %v1571_v25, %v1583_v3  ;;  %v9769_v20 = vcombine.high %v804_v24, %v816_v17  ;;  %v10534_v14 = vcombine.low %v1571_v25, %v1583_v3 }
 0x501   : > { %8955 = vmatpush2.bf16.msra.mxu0 %v10294_v23  ;;  %8915 = vmatprep.subr.bf16.mxu1 %v9887_v27  ;;  %v1547_v21 = vld [vmem:[%s11377_s15 + $0x1cd0] sm:$0xff]  ;;  %v1850_v27 = vrot.slane %v12687_v38, %v11463_v36  ;;  %v1854_v31 = vrot.slane %v12687_v38, %v11471_v39  ;;  %v768_v36 = vld [vmem:[%s11377_s15 + $0x478] sm:$0xff]  ;;  %v9696_v25 = vcombine.low %v732_v62, %v744_v4 }
 0x502   : > { %v9374_v44 = vcombine.low %v9366_v33, %v9373_v42  ;;  %8956 = vmatprep.subr.bf16.mxu0 %v10271_v28  ;;  %v1559_v23 = vld [vmem:[%s11377_s15 + $0x1d30] sm:$0xff]  ;;  %v780_v28 = vld [vmem:[%s11377_s15 + $0x4d8] sm:$0xff] }
 0x503   : > { %v10511_v16 = vcombine.high %v1547_v21, %v1559_v23  ;;  %v1523_v33 = vld [vmem:[%s11377_s15 + $0x1c10] sm:$0xff]  ;;  %v10510_v48 = vcombine.low %v1547_v21, %v1559_v23  ;;  %v9744_v49 = vcombine.low %v780_v28, %v792_v15 }
 0x504   : > { %8916 = vmatpush2.bf16.msra.mxu1 %v9886_v51  ;;  %9418 = vst [vmem:[%s11948_s29 + $0x18] sm:$0xff] %v9374_v44  ;;  %v1535_v42 = vld [vmem:[%s11377_s15 + $0x1c70] sm:$0xff] }
 0x505   : > { %8957 = vmatpush2.bf16.msra.mxu0 %v10270_v57  ;;  %8917 = vmatprep.subr.bf16.mxu1 %v9863_v59  ;;  %v9745_v57 = vcombine.high %v780_v28, %v792_v15  ;;  %v756_v59 = vld [vmem:[%s11377_s15 + $0x418] sm:$0xff]  ;;  %v10487_v34 = vcombine.high %v1523_v33, %v1535_v42  ;;  %v1511_v54 = vld [vmem:[%s11377_s15 + $0x1bb0] sm:$0xff] }
 0x506   : > { %8958 = vmatprep.subr.bf16.mxu0 %v10247_v43  ;;  %v1475_v11 = vld [vmem:[%s11377_s15 + $0x1a90] sm:$0xff]  ;;  %v660_v15 = vld [vmem:[%s11377_s15 + $0x118] sm:$0xff] }
 0x507   : > { %v1451_v17 = vld [vmem:[%s11377_s15 + $0x19d0] sm:$0xff] }
 0x508   : > { %8918 = vmatpush2.bf16.msra.mxu1 %v9862_v6  ;;  %v1439_v28 = vld [vmem:[%s11377_s15 + $0x1970] sm:$0xff] }
 0x509   : > { %8959 = vmatpush2.bf16.msra.mxu0 %v10246_v50  ;;  %8919 = vmatprep.subr.bf16.mxu1 %v9839_v53  ;;  %v9721_v53 = vcombine.high %v756_v59, %v768_v36  ;;  %v1739_v62 = vld [vmem:[%s11377_s15 + $0x22d0] sm:$0xff] }
 0x50a   : > { %8960 = vmatprep.subr.bf16.mxu0 %v10223_v32  ;;  %v1499_v32 = vld [vmem:[%s11377_s15 + $0x1b50] sm:$0xff] }
 0x50b   : > { %v10463_v7 = vcombine.high %v1499_v32, %v1511_v54  ;;  %v1751_v4 = vld [vmem:[%s11377_s15 + $0x2330] sm:$0xff] }
 0x50c   : > { %8920 = vmatpush2.bf16.msra.mxu1 %v9838_v45 }
 0x50d   : > { %8961 = vmatpush2.bf16.msra.mxu0 %v10222_v52  ;;  %8921 = vmatprep.subr.bf16.mxu1 %v9815_v46  ;;  %v10486_v46 = vcombine.low %v1523_v33, %v1535_v42 }
 0x50e   : > { %8962 = vmatprep.subr.bf16.mxu0 %v10199_v35  ;;  %v9720_v35 = vcombine.low %v756_v59, %v768_v36  ;;  %v636_v59 = vld [vmem:[%s11377_s15 + $0x58] sm:$0xff] }
 0x50f   : > { %v648_v36 = vld [vmem:[%s11377_s15 + $0xb8] sm:$0xff] }
 0x510   : > { %8922 = vmatpush2.bf16.msra.mxu1 %v9814_v12  ;;  %v1487_v12 = vld [vmem:[%s11377_s15 + $0x1af0] sm:$0xff] }
 0x511   : > { %8963 = vmatpush2.bf16.msra.mxu0 %v10198_v9  ;;  %8923 = vmatprep.subr.bf16.mxu1 %v9791_v8  ;;  %v708_v9 = vld [vmem:[%s11377_s15 + $0x298] sm:$0xff]  ;;  %v10439_v3 = vcombine.high %v1475_v11, %v1487_v12 }
 0x512   : > { %8964 = vmatprep.subr.bf16.mxu0 %v10175_v22  ;;  %v720_v8 = vld [vmem:[%s11377_s15 + $0x2f8] sm:$0xff]  ;;  %v10462_v22 = vcombine.low %v1499_v32, %v1511_v54  ;;  %v9600_v32 = vcombine.low %v636_v59, %v648_v36 }
 0x513   : > { %v9673_v24 = vcombine.high %v708_v9, %v720_v8  ;;  %v9672_v21 = vcombine.low %v708_v9, %v720_v8  ;;  %v960_v9 = vld [vmem:[%s11377_s15 + $0xa78] sm:$0xff]  ;;  %v10702_v8 = vcombine.low %v1739_v62, %v1751_v4 }
 0x514   : > { %8924 = vmatpush2.bf16.msra.mxu1 %v9790_v18  ;;  %v1463_v18 = vld [vmem:[%s11377_s15 + $0x1a30] sm:$0xff] }
 0x515   : > { %8965 = vmatpush2.bf16.msra.mxu0 %v10174_v19  ;;  %8975 = vmatprep.subr.bf16.mxu1 %v10535_v61  ;;  %v684_v19 = vld [vmem:[%s11377_s15 + $0x1d8] sm:$0xff]  ;;  %v10415_v23 = vcombine.high %v1451_v17, %v1463_v18 }
 0x516   : > { %9016 = vmatprep.subr.bf16.mxu0 %v9769_v20  ;;  %v696_v61 = vld [vmem:[%s11377_s15 + $0x238] sm:$0xff]  ;;  %v10438_v20 = vcombine.low %v1475_v11, %v1487_v12  ;;  %v1727_v11 = vld [vmem:[%s11377_s15 + $0x2270] sm:$0xff] }
 0x517   : > { %v8681_v51 = vpop.f32.mrf.mxu1  ;;  %8926 = vmatmul.mubr.bf16.vlgmr.msra.gmra.mxu1 %v11497_v1  ;;  %v948_v12 = vld [vmem:[%s11377_s15 + $0xa18] sm:$0xff] }
 0x518   : > { %v8682_v44 = vadd.f32 %v8681_v51, %v1850_v27  ;;  %v8722_v43 = vpop.f32.mrf.mxu0  ;;  %8967 = vmatmul.mubr.bf16.vlgmr.msra.gmra.mxu0 %v11489_v60  ;;  %8976 = vmatpush1.bf16.msra.mxu1 %v10534_v14  ;;  %v9649_v27 = vcombine.high %v684_v19, %v696_v61  ;;  %v1427_v14 = vld [vmem:[%s11377_s15 + $0x1910] sm:$0xff] }
 0x519   : > { %9007 = vmatprep.mubr.bf16.mxu1 %v11517_v26  ;;  %9017 = vmatpush1.bf16.msra.mxu0 %v9768_v29  ;;  %v8683_v39 = vpop.f32.mrf.mxu1  ;;  %v672_v29 = vld [vmem:[%s11377_s15 + $0x178] sm:$0xff]  ;;  %v10391_v33 = vcombine.high %v1427_v14, %v1439_v28  ;;  %v1403_v51 = vld [vmem:[%s11377_s15 + $0x1850] sm:$0xff] }
 0x51a   : > { %v12704_v5 = vadd.f32 %v8722_v43, %v8682_v44  ;;  %9048 = vmatprep.mubr.bf16.mxu0 %v11493_v63  ;;  %v8684_v6 = vadd.f32 %v8683_v39, %v1854_v31  ;;  %v8724_v50 = vpop.f32.mrf.mxu0  ;;  %8977 = vmatprep.subr.bf16.mxu1 %v10511_v16  ;;  %v10414_v31 = vcombine.low %v1451_v17, %v1463_v18  ;;  %v1703_v17 = vld [vmem:[%s11377_s15 + $0x21b0] sm:$0xff]  ;;  %v924_v18 = vld [vmem:[%s11377_s15 + $0x958] sm:$0xff] }
 0x51b   : > { %v8685_v58 = vpop.f32.mrf.mxu1  ;;  %9018 = vmatprep.subr.bf16.mxu0 %v9745_v57  ;;  %v9648_v16 = vcombine.low %v684_v19, %v696_v61  ;;  %v9625_v42 = vcombine.high %v660_v15, %v672_v29  ;;  %v1415_v57 = vld [vmem:[%s11377_s15 + $0x18b0] sm:$0xff]  ;;  %v10390_v44 = vcombine.low %v1427_v14, %v1439_v28  ;;  %v9624_v43 = vcombine.low %v660_v15, %v672_v29  ;;  %v936_v19 = vld [vmem:[%s11377_s15 + $0x9b8] sm:$0xff] }
 0x51c   : > { %v12711_v45 = vadd.f32 %v8724_v50, %v8684_v6  ;;  %v8726_v52 = vpop.f32.mrf.mxu0  ;;  %8978 = vmatpush1.bf16.msra.mxu1 %v10510_v48  ;;  %v10367_v48 = vcombine.high %v1403_v51, %v1415_v57  ;;  %v9601_v39 = vcombine.high %v636_v59, %v648_v36  ;;  %v996_v6 = vld [vmem:[%s11377_s15 + $0xb98] sm:$0xff]  ;;  %v1679_v14 = vld [vmem:[%s11377_s15 + $0x20f0] sm:$0xff] }
 0x51d   : > { %9019 = vmatpush1.bf16.msra.mxu0 %v9744_v49  ;;  %v8686_v63 = vpop.f32.mrf.mxu1  ;;  %8979 = vmatprep.subr.bf16.mxu1 %v10487_v34  ;;  %v1763_v49 = vld [vmem:[%s11377_s15 + $0x2390] sm:$0xff]  ;;  %v1008_v50 = vld [vmem:[%s11377_s15 + $0xbf8] sm:$0xff] }
 0x51e   : > { %v8727_v13 = vpop.f32.mrf.mxu0  ;;  %9020 = vmatprep.subr.bf16.mxu0 %v9721_v53  ;;  %v1775_v34 = vld [vmem:[%s11377_s15 + $0x23f0] sm:$0xff]  ;;  %v10366_v53 = vcombine.low %v1403_v51, %v1415_v57  ;;  %v9961_v58 = vcombine.high %v996_v6, %v1008_v50  ;;  %v972_v52 = vld [vmem:[%s11377_s15 + $0xad8] sm:$0xff] }
 0x51f   : > { %v10727_v54 = vcombine.high %v1763_v49, %v1775_v34  ;;  %v10726_v63 = vcombine.low %v1763_v49, %v1775_v34  ;;  %v900_v28 = vld [vmem:[%s11377_s15 + $0x898] sm:$0xff]  ;;  %v1655_v51 = vld [vmem:[%s11377_s15 + $0x2030] sm:$0xff] }
 0x520   : > { %8980 = vmatpush1.bf16.msra.mxu1 %v10486_v46  ;;  %v984_v46 = vld [vmem:[%s11377_s15 + $0xb38] sm:$0xff]  ;;  %v1631_v49 = vld [vmem:[%s11377_s15 + $0x1f70] sm:$0xff] }
 0x521   : > { %9021 = vmatpush1.bf16.msra.mxu0 %v9720_v35  ;;  %8981 = vmatprep.subr.bf16.mxu1 %v10463_v7  ;;  %v9960_v35 = vcombine.low %v996_v6, %v1008_v50  ;;  %v10703_v7 = vcombine.high %v1739_v62, %v1751_v4  ;;  %v9937_v13 = vcombine.high %v972_v52, %v984_v46  ;;  %v912_v15 = vld [vmem:[%s11377_s15 + $0x8f8] sm:$0xff]  ;;  %v1607_v62 = vld [vmem:[%s11377_s15 + $0x1eb0] sm:$0xff] }
 0x522   : > { %9022 = vmatprep.subr.bf16.mxu0 %v9697_v10  ;;  %v1715_v10 = vld [vmem:[%s11377_s15 + $0x2210] sm:$0xff]  ;;  %v876_v57 = vld [vmem:[%s11377_s15 + $0x7d8] sm:$0xff] }
 0x523   : > { %v10678_v61 = vcombine.low %v1715_v10, %v1727_v11  ;;  %v888_v59 = vld [vmem:[%s11377_s15 + $0x838] sm:$0xff] }
 0x524   : > { %8982 = vmatpush1.bf16.msra.mxu1 %v10462_v22  ;;  %v9936_v22 = vcombine.low %v972_v52, %v984_v46  ;;  %v852_v34 = vld [vmem:[%s11377_s15 + $0x718] sm:$0xff] }
 0x525   : > { %9023 = vmatpush1.bf16.msra.mxu0 %v9696_v25  ;;  %8983 = vmatprep.subr.bf16.mxu1 %v10439_v3  ;;  %v10679_v25 = vcombine.high %v1715_v10, %v1727_v11  ;;  %v9913_v3 = vcombine.high %v948_v12, %v960_v9  ;;  %v864_v6 = vld [vmem:[%s11377_s15 + $0x778] sm:$0xff] }
 0x526   : > { %9024 = vmatprep.subr.bf16.mxu0 %v9673_v24  ;;  %v1691_v24 = vld [vmem:[%s11377_s15 + $0x2150] sm:$0xff]  ;;  %v828_v4 = vld [vmem:[%s11377_s15 + $0x658] sm:$0xff] }
 0x527   : > { %v10654_v29 = vcombine.low %v1691_v24, %v1703_v17  ;;  %v840_v52 = vld [vmem:[%s11377_s15 + $0x6b8] sm:$0xff] }
 0x528   : > { %8984 = vmatpush1.bf16.msra.mxu1 %v10438_v20  ;;  %v9912_v20 = vcombine.low %v948_v12, %v960_v9  ;;  %v1200_v10 = vld [vmem:[%s11377_s15 + $0x11f8] sm:$0xff] }
 0x529   : > { %9025 = vmatpush1.bf16.msra.mxu0 %v9672_v21  ;;  %8985 = vmatprep.subr.bf16.mxu1 %v10415_v23  ;;  %v10655_v21 = vcombine.high %v1691_v24, %v1703_v17  ;;  %v9889_v23 = vcombine.high %v924_v18, %v936_v19  ;;  %v1572_v11 = vld [vmem:[%s11377_s15 + $0x1d98] sm:$0xff] }
 0x52a   : > { %9026 = vmatprep.subr.bf16.mxu0 %v9649_v27  ;;  %v1667_v27 = vld [vmem:[%s11377_s15 + $0x2090] sm:$0xff]  ;;  %v1584_v12 = vld [vmem:[%s11377_s15 + $0x1df8] sm:$0xff] }
 0x52b   : > { %v10630_v36 = vcombine.low %v1667_v27, %v1679_v14  ;;  %v1176_v24 = vld [vmem:[%s11377_s15 + $0x1138] sm:$0xff] }
 0x52c   : > { %8986 = vmatpush1.bf16.msra.mxu1 %v10414_v31  ;;  %v9888_v31 = vcombine.low %v924_v18, %v936_v19  ;;  %v1548_v18 = vld [vmem:[%s11377_s15 + $0x1cd8] sm:$0xff] }
 0x52d   : > { %9027 = vmatpush1.bf16.msra.mxu0 %v9648_v16  ;;  %8987 = vmatprep.subr.bf16.mxu1 %v10391_v33  ;;  %v10631_v16 = vcombine.high %v1667_v27, %v1679_v14  ;;  %v9865_v33 = vcombine.high %v900_v28, %v912_v15  ;;  %v1560_v19 = vld [vmem:[%s11377_s15 + $0x1d38] sm:$0xff] }
 0x52e   : > { %9028 = vmatprep.subr.bf16.mxu0 %v9625_v42  ;;  %v1643_v42 = vld [vmem:[%s11377_s15 + $0x1fd0] sm:$0xff]  ;;  %v10513_v14 = vcombine.high %v1548_v18, %v1560_v19 }
 0x52f   : > { %v10606_v50 = vcombine.low %v1643_v42, %v1655_v51 }
 0x530   : > { %8988 = vmatpush1.bf16.msra.mxu1 %v10390_v44  ;;  %v9864_v44 = vcombine.low %v900_v28, %v912_v15  ;;  %v1524_v28 = vld [vmem:[%s11377_s15 + $0x1c18] sm:$0xff] }
 0x531   : > { %9029 = vmatpush1.bf16.msra.mxu0 %v9624_v43  ;;  %8989 = vmatprep.subr.bf16.mxu1 %v10367_v48  ;;  %v10607_v43 = vcombine.high %v1643_v42, %v1655_v51  ;;  %v9841_v48 = vcombine.high %v876_v57, %v888_v59  ;;  %v1536_v15 = vld [vmem:[%s11377_s15 + $0x1c78] sm:$0xff]  ;;  %v10512_v42 = vcombine.low %v1548_v18, %v1560_v19 }
 0x532   : > { %9030 = vmatprep.subr.bf16.mxu0 %v9601_v39  ;;  %v1619_v39 = vld [vmem:[%s11377_s15 + $0x1f10] sm:$0xff] }
 0x533   : > { %v10582_v46 = vcombine.low %v1619_v39, %v1631_v49 }
 0x534   : > { %8990 = vmatpush1.bf16.msra.mxu1 %v10366_v53  ;;  %v9840_v53 = vcombine.low %v876_v57, %v888_v59 }
 0x535   : > { %9031 = vmatpush1.bf16.msra.mxu0 %v9600_v32  ;;  %8991 = vmatprep.subr.bf16.mxu1 %v10727_v54  ;;  %v10583_v32 = vcombine.high %v1619_v39, %v1631_v49  ;;  %v9817_v54 = vcombine.high %v852_v34, %v864_v6 }
 0x536   : > { %9032 = vmatprep.subr.bf16.mxu0 %v9961_v58  ;;  %v1595_v58 = vld [vmem:[%s11377_s15 + $0x1e50] sm:$0xff] }
 0x537   : > { %v10558_v9 = vcombine.low %v1595_v58, %v1607_v62 }
 0x538   : > { %8992 = vmatpush2.bf16.msra.mxu1 %v10726_v63  ;;  %v9816_v63 = vcombine.low %v852_v34, %v864_v6  ;;  %v10488_v34 = vcombine.low %v1524_v28, %v1536_v15 }
 0x539   : > { %9033 = vmatpush2.bf16.msra.mxu0 %v9960_v35  ;;  %8993 = vmatprep.subr.bf16.mxu1 %v10703_v7  ;;  %v10559_v35 = vcombine.high %v1595_v58, %v1607_v62  ;;  %v9793_v7 = vcombine.high %v828_v4, %v840_v52  ;;  %v1476_v58 = vld [vmem:[%s11377_s15 + $0x1a98] sm:$0xff] }
 0x53a   : > { %9034 = vmatprep.subr.bf16.mxu0 %v9937_v13  ;;  %v1188_v13 = vld [vmem:[%s11377_s15 + $0x1198] sm:$0xff] }
 0x53b   : > { %v10152_v17 = vcombine.low %v1188_v13, %v1200_v10  ;;  %v1488_v62 = vld [vmem:[%s11377_s15 + $0x1af8] sm:$0xff] }
 0x53c   : > { %8994 = vmatpush2.bf16.msra.mxu1 %v10702_v8  ;;  %v9792_v8 = vcombine.low %v828_v4, %v840_v52 }
 0x53d   : > { %9035 = vmatpush2.bf16.msra.mxu0 %v9936_v22  ;;  %8995 = vmatprep.subr.bf16.mxu1 %v10679_v25  ;;  %v10153_v22 = vcombine.high %v1188_v13, %v1200_v10  ;;  %v10537_v25 = vcombine.high %v1572_v11, %v1584_v12  ;;  %v1452_v13 = vld [vmem:[%s11377_s15 + $0x19d8] sm:$0xff] }
 0x53e   : > { %9036 = vmatprep.subr.bf16.mxu0 %v9913_v3  ;;  %v1164_v3 = vld [vmem:[%s11377_s15 + $0x10d8] sm:$0xff] }
 0x53f   : > { %v1464_v10 = vld [vmem:[%s11377_s15 + $0x1a38] sm:$0xff] }
 0x540   : > { %8996 = vmatpush2.bf16.msra.mxu1 %v10678_v61  ;;  %v10536_v61 = vcombine.low %v1572_v11, %v1584_v12  ;;  %v10440_v12 = vcombine.low %v1476_v58, %v1488_v62  ;;  %v10416_v19 = vcombine.low %v1452_v13, %v1464_v10 }
 0x541   : > { %9037 = vmatpush2.bf16.msra.mxu0 %v9912_v20  ;;  %8997 = vmatprep.subr.bf16.mxu1 %v10655_v21  ;;  %v10129_v20 = vcombine.high %v1164_v3, %v1176_v24  ;;  %v1140_v21 = vld [vmem:[%s11377_s15 + $0x1018] sm:$0xff] }
 0x542   : > { %9038 = vmatprep.subr.bf16.mxu0 %v9889_v23  ;;  %v1152_v23 = vld [vmem:[%s11377_s15 + $0x1078] sm:$0xff] }
 0x543   : > { %v10105_v51 = vcombine.high %v1140_v21, %v1152_v23 }
 0x544   : > { %8998 = vmatpush2.bf16.msra.mxu1 %v10654_v29 }
 0x545   : > { %9039 = vmatpush2.bf16.msra.mxu0 %v9888_v31  ;;  %8999 = vmatprep.subr.bf16.mxu1 %v10631_v16  ;;  %v10128_v16 = vcombine.low %v1164_v3, %v1176_v24  ;;  %v1428_v3 = vld [vmem:[%s11377_s15 + $0x1918] sm:$0xff] }
 0x546   : > { %9040 = vmatprep.subr.bf16.mxu0 %v9865_v33  ;;  %v1440_v24 = vld [vmem:[%s11377_s15 + $0x1978] sm:$0xff] }
 0x548   : > { %9000 = vmatpush2.bf16.msra.mxu1 %v10630_v36  ;;  %v10489_v36 = vcombine.high %v1524_v28, %v1536_v15  ;;  %v1404_v28 = vld [vmem:[%s11377_s15 + $0x1858] sm:$0xff] }
 0x549   : > { %9041 = vmatpush2.bf16.msra.mxu0 %v9864_v44  ;;  %9001 = vmatprep.subr.bf16.mxu1 %v10607_v43  ;;  %v1128_v44 = vld [vmem:[%s11377_s15 + $0xfb8] sm:$0xff] }
 0x54a   : > { %9042 = vmatprep.subr.bf16.mxu0 %v9841_v48  ;;  %v1500_v48 = vld [vmem:[%s11377_s15 + $0x1b58] sm:$0xff] }
 0x54b   : > { %v1416_v15 = vld [vmem:[%s11377_s15 + $0x18b8] sm:$0xff] }
 0x54c   : > { %9002 = vmatpush2.bf16.msra.mxu1 %v10606_v50 }
 0x54d   : > { %9043 = vmatpush2.bf16.msra.mxu0 %v9840_v53  ;;  %9003 = vmatprep.subr.bf16.mxu1 %v10583_v32  ;;  %v1092_v32 = vld [vmem:[%s11377_s15 + $0xe98] sm:$0xff] }
 0x54e   : > { %9044 = vmatprep.subr.bf16.mxu0 %v9817_v54  ;;  %v1104_v54 = vld [vmem:[%s11377_s15 + $0xef8] sm:$0xff] }
 0x54f   : > { %v10056_v11 = vcombine.low %v1092_v32, %v1104_v54 }
 0x550   : > { %9004 = vmatpush2.bf16.msra.mxu1 %v10582_v46  ;;  %v10057_v46 = vcombine.high %v1092_v32, %v1104_v54  ;;  %v1332_v32 = vld [vmem:[%s11377_s15 + $0x1618] sm:$0xff] }
 0x551   : > { %9045 = vmatpush2.bf16.msra.mxu0 %v9816_v63  ;;  %9005 = vmatprep.subr.bf16.mxu1 %v10559_v35  ;;  %v10441_v63 = vcombine.high %v1476_v58, %v1488_v62  ;;  %v1068_v35 = vld [vmem:[%s11377_s15 + $0xdd8] sm:$0xff] }
 0x552   : > { %9046 = vmatprep.subr.bf16.mxu0 %v9793_v7  ;;  %v1080_v7 = vld [vmem:[%s11377_s15 + $0xe38] sm:$0xff] }
 0x553   : > { %v1344_v54 = vld [vmem:[%s11377_s15 + $0x1678] sm:$0xff] }
 0x554   : > { %9006 = vmatpush2.bf16.msra.mxu1 %v10558_v9  ;;  %v10033_v9 = vcombine.high %v1068_v35, %v1080_v7  ;;  %v1716_v58 = vld [vmem:[%s11377_s15 + $0x2218] sm:$0xff] }
 0x555   : > { %9047 = vmatpush2.bf16.msra.mxu0 %v9792_v8  ;;  %9057 = vmatprep.subr.bf16.mxu1 %v10153_v22  ;;  %v10417_v8 = vcombine.high %v1452_v13, %v1464_v10  ;;  %v1044_v22 = vld [vmem:[%s11377_s15 + $0xd18] sm:$0xff] }
 0x556   : > { %9098 = vmatprep.subr.bf16.mxu0 %v10537_v25  ;;  %v1056_v25 = vld [vmem:[%s11377_s15 + $0xd78] sm:$0xff] }
 0x557   : > { %v8763_v27 = vpop.f32.mrf.mxu1  ;;  %9008 = vmatmul.mubr.bf16.vlgmr.msra.gmra.mxu1 %v11581_v41  ;;  %v1728_v62 = vld [vmem:[%s11377_s15 + $0x2278] sm:$0xff] }
 0x558   : > { %v8764_v29 = vadd.f32 %v8763_v27, %v12704_v5  ;;  %v12775_v31 = vpop.f32.mrf.mxu0  ;;  %9049 = vmatmul.mubr.bf16.vlgmr.msra.gmra.mxu0 %v11497_v1  ;;  %9058 = vmatpush1.bf16.msra.mxu1 %v10152_v17  ;;  %v1116_v1 = vld [vmem:[%s11377_s15 + $0xf58] sm:$0xff]  ;;  %v10032_v17 = vcombine.low %v1068_v35, %v1080_v7  ;;  %v10681_v35 = vcombine.high %v1716_v58, %v1728_v62 }
 0x559   : > { %9089 = vmatprep.mubr.bf16.mxu1 %v11495_v0  ;;  %9099 = vmatpush1.bf16.msra.mxu0 %v10536_v61  ;;  %v8765_v33 = vpop.f32.mrf.mxu1  ;;  %v1512_v0 = vld [vmem:[%s11377_s15 + $0x1bb8] sm:$0xff]  ;;  %v10081_v6 = vcombine.high %v1116_v1, %v1128_v44  ;;  %v10080_v4 = vcombine.low %v1116_v1, %v1128_v44  ;;  %v10009_v61 = vcombine.high %v1044_v22, %v1056_v25 }
 0x55a   : > { %v10746_v57 = vmul.f32 -1.442695, %v8764_v29  ;;  %9130 = vmatprep.mubr.bf16.mxu0 %v11517_v26  ;;  %v8766_v5 = vadd.f32 %v8765_v33, %v12711_v45  ;;  %v12781_v59 = vpop.f32.mrf.mxu0  ;;  %9059 = vmatprep.subr.bf16.mxu1 %v10129_v20  ;;  %v10104_v26 = vcombine.low %v1140_v21, %v1152_v23  ;;  %v10465_v53 = vcombine.high %v1500_v48, %v1512_v0  ;;  %v1020_v23 = vld [vmem:[%s11377_s15 + $0xc58] sm:$0xff] }
 0x55b   : > { %v8767_v43 = vpop.f32.mrf.mxu1  ;;  %9100 = vmatprep.subr.bf16.mxu0 %v10513_v14  ;;  %v10464_v52 = vcombine.low %v1500_v48, %v1512_v0  ;;  %v10393_v21 = vcombine.high %v1428_v3, %v1440_v24  ;;  %v1032_v27 = vld [vmem:[%s11377_s15 + $0xcb8] sm:$0xff]  ;;  %v10392_v33 = vcombine.low %v1428_v3, %v1440_v24 }
 0x55c   : > { %10917 = vpow2.f32 %v10746_v57  ;;  %v10747_v39 = vmul.f32 -1.442695, %v8766_v5  ;;  %v8808_v49 = vpop.f32.mrf.mxu0  ;;  %9060 = vmatpush1.bf16.msra.mxu1 %v10128_v16  ;;  %v10008_v16 = vcombine.low %v1044_v22, %v1056_v25  ;;  %v1380_v57 = vld [vmem:[%s11377_s15 + $0x1798] sm:$0xff]  ;;  %v9984_v44 = vcombine.low %v1020_v23, %v1032_v27 }
 0x55d   : > { %9101 = vmatpush1.bf16.msra.mxu0 %v10512_v42  ;;  %v8768_v45 = vpop.f32.mrf.mxu1  ;;  %9061 = vmatprep.subr.bf16.mxu1 %v10105_v51  ;;  %v9985_v42 = vcombine.high %v1020_v23, %v1032_v27  ;;  %v10369_v51 = vcombine.high %v1404_v28, %v1416_v15  ;;  %v1392_v5 = vld [vmem:[%s11377_s15 + $0x17f8] sm:$0xff]  ;;  %v10368_v43 = vcombine.low %v1404_v28, %v1416_v15 }
 0x55e   : > { %10919 = vpow2.f32 %v10747_v39  ;;  %v8809_v50 = vpop.f32.mrf.mxu0  ;;  %9102 = vmatprep.subr.bf16.mxu0 %v10489_v36  ;;  %v1764_v36 = vld [vmem:[%s11377_s15 + $0x2398] sm:$0xff]  ;;  %v10345_v48 = vcombine.high %v1380_v57, %v1392_v5  ;;  %v10680_v22 = vcombine.low %v1716_v58, %v1728_v62  ;;  %v1862_v58 = vrot.slane %v12687_v38, %v11474_v40 }
 0x55f   : > { %v1776_v1 = vld [vmem:[%s11377_s15 + $0x23f8] sm:$0xff] }
 0x560   : > { %9062 = vmatpush1.bf16.msra.mxu1 %v10104_v26  ;;  %v10729_v0 = vcombine.high %v1764_v36, %v1776_v1  ;;  %v1356_v39 = vld [vmem:[%s11377_s15 + $0x16d8] sm:$0xff] }
 0x561   : > { %9103 = vmatpush1.bf16.msra.mxu0 %v10488_v34  ;;  %9063 = vmatprep.subr.bf16.mxu1 %v10081_v6  ;;  %v1368_v49 = vld [vmem:[%s11377_s15 + $0x1738] sm:$0xff]  ;;  %v10344_v34 = vcombine.low %v1380_v57, %v1392_v5  ;;  %v10728_v6 = vcombine.low %v1764_v36, %v1776_v1 }
 0x562   : > { %9104 = vmatprep.subr.bf16.mxu0 %v10465_v53  ;;  %v1740_v26 = vld [vmem:[%s11377_s15 + $0x22d8] sm:$0xff]  ;;  %v10321_v50 = vcombine.high %v1356_v39, %v1368_v49 }
 0x563   : > { %v1752_v45 = vld [vmem:[%s11377_s15 + $0x2338] sm:$0xff] }
 0x564   : > { %9064 = vmatpush1.bf16.msra.mxu1 %v10080_v4  ;;  %v10705_v53 = vcombine.high %v1740_v26, %v1752_v45  ;;  %v10320_v4 = vcombine.low %v1356_v39, %v1368_v49  ;;  %v1308_v7 = vld [vmem:[%s11377_s15 + $0x1558] sm:$0xff] }
 0x565   : > { %9105 = vmatpush1.bf16.msra.mxu0 %v10464_v52  ;;  %9065 = vmatprep.subr.bf16.mxu1 %v10057_v46  ;;  %v10704_v52 = vcombine.low %v1740_v26, %v1752_v45  ;;  %v10297_v46 = vcombine.high %v1332_v32, %v1344_v54  ;;  %v1320_v13 = vld [vmem:[%s11377_s15 + $0x15b8] sm:$0xff] }
 0x566   : > { %9106 = vmatprep.subr.bf16.mxu0 %v10441_v63  ;;  %v10273_v25 = vcombine.high %v1308_v7, %v1320_v13  ;;  %v1284_v24 = vld [vmem:[%s11377_s15 + $0x1498] sm:$0xff] }
 0x567   : > { %v1260_v27 = vld [vmem:[%s11377_s15 + $0x13d8] sm:$0xff] }
 0x568   : > { %9066 = vmatpush1.bf16.msra.mxu1 %v10056_v11  ;;  %v1692_v11 = vld [vmem:[%s11377_s15 + $0x2158] sm:$0xff] }
 0x569   : > { %v10918_v18 = vpop.eup %10917  ;;  %9107 = vmatpush1.bf16.msra.mxu0 %v10440_v12  ;;  %9067 = vmatprep.subr.bf16.mxu1 %v10033_v9  ;;  %v1704_v12 = vld [vmem:[%s11377_s15 + $0x21b8] sm:$0xff] }
 0x56a   : > { %v9227_v20 = vadd.f32 1.0, %v10918_v18  ;;  %9108 = vmatprep.subr.bf16.mxu0 %v10417_v8  ;;  %v10296_v8 = vcombine.low %v1332_v32, %v1344_v54  ;;  %v10657_v3 = vcombine.high %v1692_v11, %v1704_v12  ;;  %v1668_v18 = vld [vmem:[%s11377_s15 + $0x2098] sm:$0xff]  ;;  %v1858_v54 = vrot.slane %v12687_v38, %v11466_v37 }
 0x56b   : > { %v10920_v14 = vpop.eup %10919  ;;  %v1644_v28 = vld [vmem:[%s11377_s15 + $0x1fd8] sm:$0xff] }
 0x56c   : > { %v9228_v29 = vadd.f32 1.0, %v10920_v14  ;;  %9068 = vmatpush1.bf16.msra.mxu1 %v10032_v17  ;;  %10921 = vrcp.f32 %v9227_v20  ;;  %v1296_v17 = vld [vmem:[%s11377_s15 + $0x14f8] sm:$0xff]  ;;  %v10656_v20 = vcombine.low %v1692_v11, %v1704_v12  ;;  %v8805_v62 = vadd.f32 %v12775_v31, %v1858_v54 }
 0x56d   : > { %9109 = vmatpush1.bf16.msra.mxu0 %v10416_v19  ;;  %9069 = vmatprep.subr.bf16.mxu1 %v10009_v61  ;;  %v1680_v19 = vld [vmem:[%s11377_s15 + $0x20f8] sm:$0xff]  ;;  %v10272_v61 = vcombine.low %v1308_v7, %v1320_v13 }
 0x56e   : > { %10923 = vrcp.f32 %v9228_v29  ;;  %9110 = vmatprep.subr.bf16.mxu0 %v10393_v21  ;;  %v10249_v21 = vcombine.high %v1284_v24, %v1296_v17  ;;  %v10633_v23 = vcombine.high %v1668_v18, %v1680_v19  ;;  %v1272_v14 = vld [vmem:[%s11377_s15 + $0x1438] sm:$0xff]  ;;  %v10248_v29 = vcombine.low %v1284_v24, %v1296_v17 }
 0x56f   : > { %v1656_v15 = vld [vmem:[%s11377_s15 + $0x2038] sm:$0xff]  ;;  %v10224_v1 = vcombine.low %v1260_v27, %v1272_v14 }
 0x570   : > { %9070 = vmatpush1.bf16.msra.mxu1 %v10008_v16  ;;  %v10632_v16 = vcombine.low %v1668_v18, %v1680_v19  ;;  %v1248_v57 = vld [vmem:[%s11377_s15 + $0x1378] sm:$0xff] }
 0x571   : > { %9111 = vmatpush1.bf16.msra.mxu0 %v10392_v33  ;;  %9071 = vmatprep.subr.bf16.mxu1 %v9985_v42  ;;  %v10225_v33 = vcombine.high %v1260_v27, %v1272_v14  ;;  %v10609_v42 = vcombine.high %v1644_v28, %v1656_v15  ;;  %v1620_v5 = vld [vmem:[%s11377_s15 + $0x1f18] sm:$0xff]  ;;  %v1870_v27 = vrot.slane %v12687_v38, %v11485_v55 }
 0x572   : > { %9112 = vmatprep.subr.bf16.mxu0 %v10369_v51  ;;  %v1236_v51 = vld [vmem:[%s11377_s15 + $0x1318] sm:$0xff] }
 0x573   : > { %v1632_v36 = vld [vmem:[%s11377_s15 + $0x1f78] sm:$0xff]  ;;  %v10200_v45 = vcombine.low %v1236_v51, %v1248_v57 }
 0x574   : > { %9072 = vmatpush1.bf16.msra.mxu1 %v9984_v44  ;;  %v10608_v44 = vcombine.low %v1644_v28, %v1656_v15  ;;  %v1224_v39 = vld [vmem:[%s11377_s15 + $0x12b8] sm:$0xff] }
 0x575   : > { %9113 = vmatpush1.bf16.msra.mxu0 %v10368_v43  ;;  %9073 = vmatprep.subr.bf16.mxu1 %v10345_v48  ;;  %v10201_v43 = vcombine.high %v1236_v51, %v1248_v57  ;;  %v10585_v48 = vcombine.high %v1620_v5, %v1632_v36  ;;  %v1596_v49 = vld [vmem:[%s11377_s15 + $0x1e58] sm:$0xff] }
 0x576   : > { %9114 = vmatprep.subr.bf16.mxu0 %v10729_v0  ;;  %v1212_v0 = vld [vmem:[%s11377_s15 + $0x1258] sm:$0xff] }
 0x577   : > { %v1608_v26 = vld [vmem:[%s11377_s15 + $0x1eb8] sm:$0xff] }
 0x578   : > { %9074 = vmatpush2.bf16.msra.mxu1 %v10344_v34  ;;  %v10584_v34 = vcombine.low %v1620_v5, %v1632_v36  ;;  %v10560_v32 = vcombine.low %v1596_v49, %v1608_v26 }
 0x579   : > { %9115 = vmatpush2.bf16.msra.mxu0 %v10728_v6  ;;  %9075 = vmatprep.subr.bf16.mxu1 %v10321_v50  ;;  %v12815_v63 = vpop.eup %10921  ;;  %v10177_v6 = vcombine.high %v1212_v0, %v1224_v39  ;;  %v10561_v50 = vcombine.high %v1596_v49, %v1608_v26 }
 0x57a   : > { %9116 = vmatprep.subr.bf16.mxu0 %v10705_v53  ;;  %v10176_v53 = vcombine.low %v1212_v0, %v1224_v39 }
 0x57b   : > { %v12819_v10 = vpop.eup %10923 }
 0x57c   : > { %v9375_v9 = vcombine.low %v12815_v63, %v12819_v10  ;;  %9076 = vmatpush2.bf16.msra.mxu1 %v10320_v4 }
 0x57d   : > { %9117 = vmatpush2.bf16.msra.mxu0 %v10704_v52  ;;  %9077 = vmatprep.subr.bf16.mxu1 %v10297_v46  ;;  %v8807_v52 = vadd.f32 %v12781_v59, %v1862_v58  ;;  %v1874_v58 = vrot.slane %v12687_v38, %v12119_v47 }
 0x57e   : > { %9118 = vmatprep.subr.bf16.mxu0 %v10681_v35 }
 0x580   : > { %9078 = vmatpush2.bf16.msra.mxu1 %v10296_v8 }
 0x581   : > { %9119 = vmatpush2.bf16.msra.mxu0 %v10680_v22  ;;  %9079 = vmatprep.subr.bf16.mxu1 %v10273_v25 }
 0x582   : > { %9120 = vmatprep.subr.bf16.mxu0 %v10657_v3 }
 0x584   : > { %9080 = vmatpush2.bf16.msra.mxu1 %v10272_v61  ;;  %v9383_v61 = vrot.slane %v9375_v9, %v11932_v30 }
 0x585   : > { %9121 = vmatpush2.bf16.msra.mxu0 %v10656_v20  ;;  %9081 = vmatprep.subr.bf16.mxu1 %v10249_v21 }
 0x586   : > { %9122 = vmatprep.subr.bf16.mxu0 %v10633_v23  ;;  %v1866_v23 = vrot.slane %v12687_v38, %v11560_v2 }
 0x588   : > { %9082 = vmatpush2.bf16.msra.mxu1 %v10248_v29 }
 0x589   : > { %9123 = vmatpush2.bf16.msra.mxu0 %v10632_v16  ;;  %9083 = vmatprep.subr.bf16.mxu1 %v10225_v33 }
 0x58a   : > { %9124 = vmatprep.subr.bf16.mxu0 %v10609_v42 }
 0x58c   : > { %9084 = vmatpush2.bf16.msra.mxu1 %v10224_v1 }
 0x58d   : > { %9125 = vmatpush2.bf16.msra.mxu0 %v10608_v44  ;;  %9085 = vmatprep.subr.bf16.mxu1 %v10201_v43 }
 0x58e   : > { %9126 = vmatprep.subr.bf16.mxu0 %v10585_v48 }
 0x590   : > { %9086 = vmatpush2.bf16.msra.mxu1 %v10200_v45 }
 0x591   : > { %9127 = vmatpush2.bf16.msra.mxu0 %v10584_v34  ;;  %9087 = vmatprep.subr.bf16.mxu1 %v10177_v6 }
 0x592   : > { %9128 = vmatprep.subr.bf16.mxu0 %v10561_v50 }
 0x594   : > { %9088 = vmatpush2.bf16.msra.mxu1 %v10176_v53 }
 0x595   : > { %9129 = vmatpush2.bf16.msra.mxu0 %v10560_v32 }
 0x597   : > { %v8845_v4 = vpop.f32.mrf.mxu1  ;;  %9090 = vmatmul.mubr.bf16.vlgmr.msra.gmra.mxu1 %v11489_v60 }
 0x598   : > { %v8846_v46 = vadd.f32 %v8845_v4, %v8805_v62  ;;  %v8886_v35 = vpop.f32.mrf.mxu0  ;;  %9131 = vmatmul.mubr.bf16.vlgmr.msra.gmra.mxu0 %v11581_v41  ;;  %v1878_v62 = vrot.slane %v12687_v38, %v12126_v56 }
 0x599   : > { %v8847_v7 = vpop.f32.mrf.mxu1 }
 0x59a   : > { %v8887_v13 = vadd.f32 %v8886_v35, %v8846_v46  ;;  %v8848_v37 = vadd.f32 %v8847_v7, %v8807_v52  ;;  %v8888_v11 = vpop.f32.mrf.mxu0 }
 0x59b   : > { %v8849_v12 = vpop.f32.mrf.mxu1 }
 0x59c   : > { %v10748_v8 = vmul.f32 -1.442695, %v8887_v13  ;;  %v8889_v40 = vadd.f32 %v8888_v11, %v8848_v37  ;;  %v8890_v22 = vpop.f32.mrf.mxu0 }
 0x59d   : > { %v8850_v25 = vpop.f32.mrf.mxu1 }
 0x59e   : > { %10925 = vpow2.f32 %v10748_v8  ;;  %v10749_v31 = vmul.f32 -1.442695, %v8889_v40  ;;  %v8891_v3 = vpop.f32.mrf.mxu0 }
 0x5a0   : > { %10927 = vpow2.f32 %v10749_v31 }
 0x5ab   : > { %v10926_v60 = vpop.eup %10925 }
 0x5ac   : > { %v9229_v59 = vadd.f32 1.0, %v10926_v60 }
 0x5ad   : > { %v10928_v24 = vpop.eup %10927 }
 0x5ae   : > { %v9230_v17 = vadd.f32 1.0, %v10928_v24  ;;  %10929 = vrcp.f32 %v9229_v59 }
 0x5b0   : > { %10931 = vrcp.f32 %v9230_v17 }
 0x5bb   : > { %v10930_v41 = vpop.eup %10929 }
 0x5bd   : > { %v10932_v18 = vpop.eup %10931 }
 0x5be   : > { %v9376_v19 = vcombine.low %v10930_v41, %v10932_v18 }
 0x5c0   : > { %v9390_v20 = vrot.slane %v9376_v19, %v11932_v30 }
 0x5c2   : > { %v9391_v21 = vcombine.low %v9383_v61, %v9390_v20 }
 0x5c4   : > { %9419 = vst [vmem:[%s11948_s29 + $0x20] sm:$0xff] %v9391_v21 }
 0x5d7   : > { %v8927_v14 = vpop.f32.mrf.mxu1 }
 0x5d8   : > { %v8928_v28 = vadd.f32 %v8927_v14, %v1866_v23  ;;  %v8968_v15 = vpop.f32.mrf.mxu0 }
 0x5d9   : > { %v8929_v29 = vpop.f32.mrf.mxu1 }
 0x5da   : > { %v8969_v16 = vadd.f32 %v8968_v15, %v8928_v28  ;;  %v8930_v33 = vadd.f32 %v8929_v29, %v1870_v27  ;;  %v8970_v42 = vpop.f32.mrf.mxu0 }
 0x5db   : > { %v8931_v51 = vpop.f32.mrf.mxu1 }
 0x5dc   : > { %v8971_v63 = vadd.f32 %v8970_v42, %v8930_v33  ;;  %v8972_v10 = vpop.f32.mrf.mxu0 }
 0x5dd   : > { %v8932_v9 = vpop.f32.mrf.mxu1 }
 0x5de   : > { %v8973_v57 = vpop.f32.mrf.mxu0 }
 0x617   : > { %v9009_v5 = vpop.f32.mrf.mxu1 }
 0x618   : > { %v9010_v36 = vadd.f32 %v9009_v5, %v8969_v16  ;;  %v9050_v1 = vpop.f32.mrf.mxu0 }
 0x619   : > { %v9011_v44 = vpop.f32.mrf.mxu1  ;;  %v9051_v4 = vadd.f32 %v9050_v1, %v1874_v58 }
 0x61a   : > { %v10750_v2 = vmul.f32 -1.442695, %v9010_v36  ;;  %v9012_v43 = vadd.f32 %v9011_v44, %v8971_v63  ;;  %v9052_v48 = vpop.f32.mrf.mxu0 }
 0x61b   : > { %v9013_v55 = vpop.f32.mrf.mxu1  ;;  %v9053_v46 = vadd.f32 %v9052_v48, %v1878_v62 }
 0x61c   : > { %10933 = vpow2.f32 %v10750_v2  ;;  %v10751_v0 = vmul.f32 -1.442695, %v9012_v43  ;;  %v9054_v39 = vpop.f32.mrf.mxu0 }
 0x61d   : > { %v9014_v49 = vpop.f32.mrf.mxu1 }
 0x61e   : > { %10935 = vpow2.f32 %v10751_v0  ;;  %v9055_v26 = vpop.f32.mrf.mxu0 }
 0x629   : > { %v10934_v45 = vpop.eup %10933 }
 0x62a   : > { %v9231_v34 = vadd.f32 1.0, %v10934_v45 }
 0x62b   : > { %v10936_v6 = vpop.eup %10935 }
 0x62c   : > { %v9232_v50 = vadd.f32 1.0, %v10936_v6  ;;  %10937 = vrcp.f32 %v9231_v34 }
 0x62e   : > { %10939 = vrcp.f32 %v9232_v50 }
 0x639   : > { %v10938_v53 = vpop.eup %10937 }
 0x63b   : > { %v10940_v32 = vpop.eup %10939 }
 0x63c   : > { %v9392_v54 = vcombine.low %v10938_v53, %v10940_v32 }
 0x63e   : > { %v9400_v18 = vrot.slane %v9392_v54, %v11932_v30 }
 0x657   : > { %v9091_v52 = vpop.f32.mrf.mxu1 }
 0x658   : > { %v9092_v35 = vadd.f32 %v9091_v52, %v9051_v4  ;;  %v9132_v7 = vpop.f32.mrf.mxu0 }
 0x659   : > { %v9093_v13 = vpop.f32.mrf.mxu1 }
 0x65a   : > { %v9133_v37 = vadd.f32 %v9132_v7, %v9092_v35  ;;  %v9094_v11 = vadd.f32 %v9093_v13, %v9053_v46  ;;  %v9134_v12 = vpop.f32.mrf.mxu0 }
 0x65b   : > { %v9095_v8 = vpop.f32.mrf.mxu1 }
 0x65c   : > { %v10752_v40 = vmul.f32 -1.442695, %v9133_v37  ;;  %v9135_v22 = vadd.f32 %v9134_v12, %v9094_v11  ;;  %v9136_v25 = vpop.f32.mrf.mxu0 }
 0x65d   : > { %v9096_v31 = vpop.f32.mrf.mxu1 }
 0x65e   : > { %10941 = vpow2.f32 %v10752_v40  ;;  %v10753_v47 = vmul.f32 -1.442695, %v9135_v22  ;;  %v9137_v3 = vpop.f32.mrf.mxu0 }
 0x660   : > { %10943 = vpow2.f32 %v10753_v47 }
 0x66b   : > { %v10942_v56 = vpop.eup %10941 }
 0x66c   : > { %v9233_v38 = vadd.f32 1.0, %v10942_v56 }
 0x66d   : > { %v10944_v60 = vpop.eup %10943 }
 0x66e   : > { %v9234_v59 = vadd.f32 1.0, %v10944_v60  ;;  %10945 = vrcp.f32 %v9233_v38 }
 0x670   : > { %10947 = vrcp.f32 %v9234_v59 }
 0x67b   : > { %v10946_v24 = vpop.eup %10945 }
 0x67d   : > { %v10948_v17 = vpop.eup %10947 }
 0x67e   : > { %v9393_v41 = vcombine.low %v10946_v24, %v10948_v17 }
 0x680   : > { %v9407_v19 = vrot.slane %v9393_v41, %v11932_v30 }
 0x682   : > { %v9408_v61 = vcombine.low %v9400_v18, %v9407_v19 }
 0x684   : > { %9420 = vst [vmem:[%s11948_s29 + $0x28] sm:$0xff] %v9408_v61 }
 0x685   : > { %11098 = shalt.err (!%p11095_p0)
}
 0x686   : > { %s11099_s26 = scalar_lea.hbm %s9434_s8, 768  ;;  %s11103_s15 = scalar_lea.hbm %s12906_s5, 3072 }
 0x687   : > { %p11100_p5 = scmp.ne.s32.totalorder %s9434_s8, %s11099_s26  ;;  %p11104_p2 = scmp.lt.s32.totalorder %s9434_s8, %s12906_s5 }
 0x688   : > { %p11105_p13 = scmp.lt.s32.totalorder %s11103_s15, %s11099_s26 }
 0x689   : > { %p11101_p10 = pnand %p11100_p5, %p12930_p1 }
 0x68a   : > { %p11106_p9 = por %p11105_p13, %p11104_p2 }
 0x68b   : > { %p11102_p12 = pneg %p11101_p10 }
 0x68d   : > { %p11107_p3 = pnand %p11106_p9, %p11102_p12 }
 0x68f   : > { %11110 = shalt.err (!%p11107_p3)
}
 0x690   : > { %10781 = dma.vmem_to_hbm [thread:$0]  (%p12930_p1), %s9437_s1, 768, %s9434_s8, %s9422_s11  }
 0x691 PF: > { %p10811_p4 = scmp.ge.s32.totalorder %s11157_s21, 2  ;;  %s9448_s9 = sand.u32 1, %s11145_s18  }
 0x692   : > { %p12931_p6 = scmp.ne.s32.totalorder %s12915_s25, 0  ;;  %s9449_s29 = scalar_lea.sflag [#allocation4], %s9448_s9 }
 0x694   : > { %p10801_p8 = pnand %p10811_p4, %p12931_p6 }
 0x696   : > { %p10802_p11 = pneg %p10801_p8 }
 0x698   : > { %11140 = dma.done.wait (%p10802_p11), %s9449_s29, 768  }
 0x699   : > { %11142 = vsyncadd (%p10802_p11), %s9449_s29, 4294966528  ;;  %p20_p7 = scmp.ge.s32.totalorder %s11254_s30, 6   ;;  %s12932_s18 = smov %s11149_s19 }
 0x69a   : > { %s12933_s19 = smov %s11153_s20  ;;  %s12934_s20 = smov %s11274_s13 }
 0x69b   : > { %s12935_s21 = smov %s11254_s30  ;;  %22 = sbr.rel (!%p20_p7) target bundleno = 9 (0x9), region = 109 }
 0x6a0   :  { %9454 = vsyncpa [#allocation3], 1 }
 0x6a1   :  { %9456 = vsyncpa [#allocation3 + $0x1], 1 }
 0x6a2   :  { %9457 = vsyncpa [#allocation6], 1 }
 0x6a3   :  { %9458 = vsyncpa [#allocation9], 1 }
 0x6a4   :  { %9460 = vsyncpa [#allocation9 + $0x1], 1 }
 0x6a5   :  { %9461 = vsyncpa [#allocation4], 1 }
 0x6a6   :  { %9463 = vsyncpa [#allocation4 + $0x1], 1 }

</bundles_post_ra>
